<compile_context>
chip_gen: v5e
topology: v5e:2x2
jax: 0.10.0
libtpu: 0.0.40
codegen_flags: <defaults>
</compile_context>

<pallas_src>
import numpy as np
import jax
import jax.numpy as jnp
from jax.experimental import pallas as pl
from jax.experimental.pallas import tpu as pltpu

# ----------------------------- problem sizes --------------------------------
BATCH = 2
H, W = 16, 32                 # spatial (scaled down from 64x256)
HW = H * W                    # 512 -> lane-dense minor axis everywhere
C1 = 8                        # per-branch layer-1 channels
C1B = 2 * C1                  # both branches stacked: 16
C2 = 32                       # per-branch layer-2 channels
C2B = 2 * C2                  # 64
C3 = 8                        # branch output channels (== final conv1 out)
C_CAT = 2 * C3
FEAT = C3 * HW                # 4096 flattened features into the FC head
HID1, HID2, NCLS = 128 * 8, 64, 8
TAPS = 25                     # 5x5 conv taps
TN = 256                      # fc1 N tile (HID1 split across grid / TCs)


# ----------------- fused conv kernel (conv5 + conv3 + cat + conv1) ----------
def _conv_fused_kernel(p1_ref, mask_ref, w1_ref, b1_ref, w2_ref, b2_ref,
                       wh_ref, bh_ref, out_ref, col_ref):
    # layer 1, both branches stacked on the channel (sublane) axis.
    a1 = jnp.maximum(
        jnp.dot(w1_ref[...], p1_ref[0],
                preferred_element_type=jnp.float32) + b1_ref[...],
        0.0)                                                   # (16, HW)

    masks = mask_ref[...]                                      # (25, HW)
    # layer-2 im2col: each 5x5 tap is a static lane roll of a1 plus a boundary
    # mask (== zero padding=2); stacked on sublanes -> one big-K matmul.
    for t in range(TAPS):
        r, c = t // 5 - 2, t % 5 - 2
        shift = (-(r * W + c)) % HW
        rolled = pltpu.roll(a1, shift, 1) if shift else a1
        col_ref[t * C1B:(t + 1) * C1B, :] = rolled * masks[t:t + 1, :]

    # layer 2 (block-diagonal 16 -> 64, branches stay independent) + ReLU
    a2 = jnp.maximum(
        jnp.dot(w2_ref[...], col_ref[...],
                preferred_element_type=jnp.float32) + b2_ref[...],
        0.0)                                                   # (64, HW)

    # per-branch 1x1 conv + concat + conv1 1x1: all linear -> one (8,64) matmul
    out_ref[0] = (jnp.dot(wh_ref[...], a2,
                          preferred_element_type=jnp.float32) + bh_ref[...])


def conv_stage(p1, masks, w1cm, b1c, w2cm, b2c, wh, bh):
    return pl.pallas_call(
        _conv_fused_kernel,
        out_shape=jax.ShapeDtypeStruct((BATCH, C3, HW), jnp.float32),
        grid=(BATCH,),
        in_specs=[
            pl.BlockSpec((1, TAPS, HW), lambda b: (b, 0, 0)),
            pl.BlockSpec((TAPS, HW), lambda b: (0, 0)),
            pl.BlockSpec((C1B, TAPS), lambda b: (0, 0)),
            pl.BlockSpec((C1B, 1), lambda b: (0, 0)),
            pl.BlockSpec((C2B, TAPS * C1B), lambda b: (0, 0)),
            pl.BlockSpec((C2B, 1), lambda b: (0, 0)),
            pl.BlockSpec((C3, C2B), lambda b: (0, 0)),
            pl.BlockSpec((C3, 1), lambda b: (0, 0)),
        ],
        out_specs=pl.BlockSpec((1, C3, HW), lambda b: (b, 0, 0)),
        scratch_shapes=[pltpu.VMEM((TAPS * C1B, HW), jnp.float32)],
        compiler_params=pltpu.CompilerParams(
            dimension_semantics=("parallel",)),
    )(p1, masks, w1cm, b1c, w2cm, b2c, wh, bh)


# ---------------- fc1: x @ w1 + b1, ReLU (bf16 streamed weights) ------------
def _fc1_kernel(x_ref, w1_ref, b1_ref, h1_ref):
    h1_ref[...] = jnp.maximum(
        jnp.dot(x_ref[...], w1_ref[...],
                preferred_element_type=jnp.float32) + b1_ref[...],
        0.0)


def fc1_stage(x_bf16, w1_bf16, b1_row):
    cost = pl.CostEstimate(
        flops=2 * BATCH * FEAT * HID1,
        transcendentals=0,
        bytes_accessed=FEAT * HID1 * 2 + BATCH * FEAT * 2
        + BATCH * HID1 * 4 + HID1 * 4)
    return pl.pallas_call(
        _fc1_kernel,
        out_shape=jax.ShapeDtypeStruct((BATCH, HID1), jnp.float32),
        grid=(HID1 // TN,),
        in_specs=[
            pl.BlockSpec((BATCH, FEAT), lambda n: (0, 0)),
            pl.BlockSpec((FEAT, TN), lambda n: (0, n)),
            pl.BlockSpec((1, TN), lambda n: (0, n)),
        ],
        out_specs=pl.BlockSpec((BATCH, TN), lambda n: (0, n)),
        compiler_params=pltpu.CompilerParams(
            dimension_semantics=("parallel",)),
        cost_estimate=cost,
    )(x_bf16, w1_bf16, b1_row)


# ---------------- fc2: Linear -> ReLU -> Linear -> softmax ------------------
def _fc2_kernel(h1_ref, w2_ref, b2_ref, w3_ref, b3_ref, out_ref):
    h2 = jnp.maximum(
        jnp.dot(h1_ref[...], w2_ref[...],
                preferred_element_type=jnp.float32) + b2_ref[...], 0.0)
    logits = jnp.dot(h2, w3_ref[...],
                     preferred_element_type=jnp.float32) + b3_ref[...]
    m = jnp.max(logits, axis=-1, keepdims=True)
    e = jnp.exp(logits - m)
    out_ref[...] = e / jnp.sum(e, axis=-1, keepdims=True)


def fc2_stage(h1, w2, b2_row, w3, b3_row):
    return pl.pallas_call(
        _fc2_kernel,
        out_shape=jax.ShapeDtypeStruct((BATCH, NCLS), jnp.float32),
        grid=(1,),
        in_specs=[
            pl.BlockSpec((BATCH, HID1), lambda i: (0, 0)),
            pl.BlockSpec((HID1, HID2), lambda i: (0, 0)),
            pl.BlockSpec((1, HID2), lambda i: (0, 0)),
            pl.BlockSpec((HID2, NCLS), lambda i: (0, 0)),
            pl.BlockSpec((1, NCLS), lambda i: (0, 0)),
        ],
        out_specs=pl.BlockSpec((BATCH, NCLS), lambda i: (0, 0)),
        compiler_params=pltpu.CompilerParams(
            dimension_semantics=("arbitrary",)),
    )(h1, w2, b2_row, w3, b3_row)


# ------------------------ one-time parameter prep ---------------------------
def _tap_masks():
    hh = np.repeat(np.arange(H), W)            # (HW,)
    ww = np.tile(np.arange(W), H)
    m = np.zeros((TAPS, HW), np.float32)
    for t in range(TAPS):
        r, c = t // 5 - 2, t % 5 - 2
        ok = (hh + r >= 0) & (hh + r < H) & (ww + c >= 0) & (ww + c < W)
        m[t] = ok.astype(np.float32)
    return jnp.asarray(m)


def prepare_params(p):
    """Hoist all weight reshaping / padding / bf16 casts out of the forward."""
    p5, p3, pc, f = p["conv5"], p["conv3"], p["conv1"], p["fcn"]
    # layer 1: both branches stacked on output channels, channel-major
    w1cm = jnp.concatenate(
        [p5["w1"][:, :, 0, :].reshape(TAPS, C1).T,
         p3["w1"][:, :, 0, :].reshape(TAPS, C1).T], axis=0)      # (16, 25)
    b1c = jnp.concatenate([p5["b1"], p3["b1"]]).reshape(C1B, 1)
    # layer 2: block-diagonal so the two branches don't mix
    blk = jnp.zeros((TAPS, C1B, C2B), jnp.float32)
    blk = blk.at[:, :C1, :C2].set(p5["w2"].reshape(TAPS, C1, C2))
    blk = blk.at[:, C1:, C2:].set(p3["w2"].reshape(TAPS, C1, C2))
    w2cm = blk.reshape(TAPS * C1B, C2B).T                        # (64, 400)
    b2c = jnp.concatenate([p5["b2"], p3["b2"]]).reshape(C2B, 1)
    # fold per-branch 1x1 + cat + conv1 1x1 (all linear, no ReLU between)
    wc = pc["w"]                                                 # (16, 8)
    wh = jnp.concatenate([(p5["w3"] @ wc[:C3, :]).T,
                          (p3["w3"] @ wc[C3:, :]).T], axis=1)    # (8, 64)
    bh = (wc[:C3, :].T @ p5["b3"] + wc[C3:, :].T @ p3["b3"]
          + pc["b"]).reshape(C3, 1)
    return dict(
        masks=_tap_masks(), w1cm=w1cm, b1c=b1c, w2cm=w2cm, b2c=b2c,
        wh=wh, bh=bh,
        fw1=f["w1"].astype(jnp.bfloat16),                        # cast once
        fb1=f["b1"].reshape(1, HID1),
        fw2=f["w2"], fb2=f["b2"].reshape(1, HID2),
        fw3=f["w3"], fb3=f["b3"].reshape(1, NCLS))


# ------------------------------ full forward --------------------------------
def cnn_detector_forward(x_nchw, q):
    # x_nchw: (B, 1, H, W) float32 (PyTorch layout)
    # layer-1 im2col in XLA (input is tiny): taps on sublanes, HW on lanes
    xp = jnp.pad(x_nchw[:, 0], ((0, 0), (2, 2), (2, 2)))         # (B, H+4, W+4)
    p1 = jnp.stack([xp[:, dh:dh + H, dw:dw + W].reshape(BATCH, HW)
                    for dh in range(5) for dw in range(5)],
                   axis=1)                                       # (B, 25, HW)
    y_cm = conv_stage(p1, q["masks"], q["w1cm"], q["b1c"],
                      q["w2cm"], q["b2c"], q["wh"], q["bh"])     # (B, 8, HW)
    # channel-major output == PyTorch NCHW .view(-1, C*H*W): no transpose
    yf = y_cm.reshape(BATCH, FEAT).astype(jnp.bfloat16)
    h1 = fc1_stage(yf, q["fw1"], q["fb1"])                       # (B, HID1)
    return fc2_stage(h1, q["fw2"], q["fb2"], q["fw3"], q["fb3"])


# ---------------------- deterministic parameter init ------------------------
def init_params(key):
    ks = jax.random.split(key, 20)

    def wn(k, shape, fan_in):
        return jax.random.normal(k, shape, jnp.float32) / np.sqrt(fan_in)

    def bn(k, shape):
        return 0.01 * jax.random.normal(k, shape, jnp.float32)

    def branch_params(kk):
        return dict(
            w1=wn(kk[0], (5, 5, 1, C1), 25), b1=bn(kk[1], (C1,)),
            w2=wn(kk[2], (5, 5, C1, C2), 25 * C1), b2=bn(kk[3], (C2,)),
            w3=wn(kk[4], (C2, C3), C2), b3=bn(kk[5], (C3,)))

    return dict(
        conv5=branch_params(ks[0:6]),
        conv3=branch_params(ks[6:12]),
        conv1=dict(w=wn(ks[12], (C_CAT, C3), C_CAT), b=bn(ks[13], (C3,))),
        fcn=dict(w1=wn(ks[14], (FEAT, HID1), FEAT), b1=bn(ks[15], (HID1,)),
                 w2=wn(ks[16], (HID1, HID2), HID1), b2=bn(ks[17], (HID2,)),
                 w3=wn(ks[18], (HID2, NCLS), HID2), b3=bn(ks[19], (NCLS,))))


# ------------------------------ pure-JAX reference --------------------------
def reference_forward(x_nchw, p):
    x = jnp.transpose(x_nchw, (0, 2, 3, 1))

    def conv5x5(z, w, b):
        return jax.lax.conv_general_dilated(
            z, w, (1, 1), ((2, 2), (2, 2)),
            dimension_numbers=("NHWC", "HWIO", "NHWC")) + b

    def branch(z, q):
        z = jax.nn.relu(conv5x5(z, q["w1"], q["b1"]))
        z = jax.nn.relu(conv5x5(z, q["w2"], q["b2"]))
        return jnp.einsum("bhwc,cd->bhwd", z, q["w3"]) + q["b3"]

    y1 = branch(x, p["conv5"])
    y2 = branch(x, p["conv3"])
    y = jnp.concatenate([y1, y2], axis=-1)
    y = jnp.einsum("bhwc,cd->bhwd", y, p["conv1"]["w"]) + p["conv1"]["b"]
    yf = jnp.transpose(y, (0, 3, 1, 2)).reshape(x.shape[0], -1)
    f = p["fcn"]
    h = jax.nn.relu(yf @ f["w1"] + f["b1"])
    h = jax.nn.relu(h @ f["w2"] + f["b2"])
    return jax.nn.softmax(h @ f["w3"] + f["b3"], axis=1)


# ----------------------------------- main ------------------------------------
if __name__ == "__main__":
    key = jax.random.PRNGKey(0)
    kx, kp = jax.random.split(key)
    x = jax.random.normal(kx, (BATCH, 1, H, W), jnp.float32)
    params = init_params(kp)
    prep = prepare_params(params)        # one-time: bf16 cast, weight folding

    out = jax.jit(cnn_detector_forward)(x, prep)
    out = jax.block_until_ready(out)

    ref = reference_forward(x, params)
    assert out.shape == (BATCH, NCLS), out.shape
    assert np.allclose(np.asarray(jnp.sum(out, axis=1)), 1.0, atol=1e-4)
    max_err = float(jnp.max(jnp.abs(out - ref)))
    assert np.allclose(np.asarray(out), np.asarray(ref), atol=1e-2), max_err
    print("KERNEL_OK")
</pallas_src>

<mosaic_0001>
module attributes {stable_mosaic.version = 11 : i64} {
  func.func @_conv_fused_kernel(%arg0: i32, %arg1: memref<1x25x512xf32, #tpu.memory_space<vmem>>, %arg2: memref<25x512xf32, #tpu.memory_space<vmem>>, %arg3: memref<16x25xf32, #tpu.memory_space<vmem>>, %arg4: memref<16x1xf32, #tpu.memory_space<vmem>>, %arg5: memref<64x400xf32, #tpu.memory_space<vmem>>, %arg6: memref<64x1xf32, #tpu.memory_space<vmem>>, %arg7: memref<8x64xf32, #tpu.memory_space<vmem>>, %arg8: memref<8x1xf32, #tpu.memory_space<vmem>>, %arg9: memref<1x8x512xf32, #tpu.memory_space<vmem>>, %arg10: memref<400x512xf32, #tpu.memory_space<vmem>>) attributes {dimension_semantics = [#tpu.dimension_semantics<parallel>], iteration_bounds = array<i64: 2>, scalar_prefetch = 0 : i64, scratch_operands = 1 : i64, tpu.core_type = #tpu.core_type<tc>, window_params = [{transform_indices = @transform_0, window_bounds = array<i64: 1, 25, 512>}, {pipeline_mode = #tpu.pipeline_mode<synchronous>, transform_indices = @transform_1, window_bounds = array<i64: 25, 512>}, {pipeline_mode = #tpu.pipeline_mode<synchronous>, transform_indices = @transform_2, window_bounds = array<i64: 16, 25>}, {pipeline_mode = #tpu.pipeline_mode<synchronous>, transform_indices = @transform_3, window_bounds = array<i64: 16, 1>}, {pipeline_mode = #tpu.pipeline_mode<synchronous>, transform_indices = @transform_4, window_bounds = array<i64: 64, 400>}, {pipeline_mode = #tpu.pipeline_mode<synchronous>, transform_indices = @transform_5, window_bounds = array<i64: 64, 1>}, {pipeline_mode = #tpu.pipeline_mode<synchronous>, transform_indices = @transform_6, window_bounds = array<i64: 8, 64>}, {pipeline_mode = #tpu.pipeline_mode<synchronous>, transform_indices = @transform_7, window_bounds = array<i64: 8, 1>}, {transform_indices = @transform_8, window_bounds = array<i64: 1, 8, 512>}]} {
    %c0 = arith.constant 0 : index
    %c0_0 = arith.constant 0 : index
    %0 = vector.load %arg3[%c0, %c0_0] : memref<16x25xf32, #tpu.memory_space<vmem>>, vector<16x25xf32>
    %c0_1 = arith.constant 0 : index
    %c0_2 = arith.constant 0 : index
    %c0_3 = arith.constant 0 : index
    %1 = vector.load %arg1[%c0_1, %c0_2, %c0_3] : memref<1x25x512xf32, #tpu.memory_space<vmem>>, vector<1x25x512xf32>
    %2 = vector.shape_cast %1 : vector<1x25x512xf32> to vector<25x512xf32>
    %cst = arith.constant dense<0.000000e+00> : vector<16x512xf32>
    %3 = tpu.matmul %0, %2, %cst {dimension_numbers = #tpu.dot_dimension_numbers<[1], [0], [0], [1], [0, 0, 1, 1], [], []>} : vector<16x25xf32>, vector<25x512xf32>, vector<16x512xf32> -> vector<16x512xf32>
    %c0_4 = arith.constant 0 : index
    %c0_5 = arith.constant 0 : index
    %4 = vector.load %arg4[%c0_4, %c0_5] : memref<16x1xf32, #tpu.memory_space<vmem>>, vector<16x1xf32>
    %5 = vector.broadcast %4 : vector<16x1xf32> to vector<16x512xf32>
    %6 = arith.addf %3, %5 : vector<16x512xf32>
    %cst_6 = arith.constant 0.000000e+00 : f32
    %7 = vector.broadcast %cst_6 : f32 to vector<16x512xf32>
    %8 = arith.maximumf %6, %7 : vector<16x512xf32>
    %c0_7 = arith.constant 0 : index
    %c0_8 = arith.constant 0 : index
    %9 = vector.load %arg2[%c0_7, %c0_8] : memref<25x512xf32, #tpu.memory_space<vmem>>, vector<25x512xf32>
    %c66_i32 = arith.constant 66 : i32
    %10 = tpu.dynamic_rotate %8 by %c66_i32 dim 1 : vector<16x512xf32>, i32 -> vector<16x512xf32>
    %11 = vector.extract_strided_slice %9 {offsets = [0, 0], sizes = [1, 512], strides = [1, 1]} : vector<25x512xf32> to vector<1x512xf32>
    %12 = vector.broadcast %11 : vector<1x512xf32> to vector<16x512xf32>
    %13 = arith.mulf %10, %12 : vector<16x512xf32>
    %c0_9 = arith.constant 0 : index
    %c0_10 = arith.constant 0 : index
    %14 = vector.load %arg10[%c0_9, %c0_10] : memref<400x512xf32, #tpu.memory_space<vmem>>, vector<16x512xf32>
    tpu.vector_store %arg10[%c0_9, %c0_10], %13 {strides = array<i32>} : memref<400x512xf32, #tpu.memory_space<vmem>>, vector<16x512xf32>,
    %c65_i32 = arith.constant 65 : i32
    %15 = tpu.dynamic_rotate %8 by %c65_i32 dim 1 : vector<16x512xf32>, i32 -> vector<16x512xf32>
    %16 = vector.extract_strided_slice %9 {offsets = [1, 0], sizes = [1, 512], strides = [1, 1]} : vector<25x512xf32> to vector<1x512xf32>
    %17 = vector.broadcast %16 : vector<1x512xf32> to vector<16x512xf32>
    %18 = arith.mulf %15, %17 : vector<16x512xf32>
    %c16 = arith.constant 16 : index
    %c0_11 = arith.constant 0 : index
    %19 = vector.load %arg10[%c16, %c0_11] : memref<400x512xf32, #tpu.memory_space<vmem>>, vector<16x512xf32>
    tpu.vector_store %arg10[%c16, %c0_11], %18 {strides = array<i32>} : memref<400x512xf32, #tpu.memory_space<vmem>>, vector<16x512xf32>,
    %c64_i32 = arith.constant 64 : i32
    %20 = tpu.dynamic_rotate %8 by %c64_i32 dim 1 : vector<16x512xf32>, i32 -> vector<16x512xf32>
    %21 = vector.extract_strided_slice %9 {offsets = [2, 0], sizes = [1, 512], strides = [1, 1]} : vector<25x512xf32> to vector<1x512xf32>
    %22 = vector.broadcast %21 : vector<1x512xf32> to vector<16x512xf32>
    %23 = arith.mulf %20, %22 : vector<16x512xf32>
    %c32 = arith.constant 32 : index
    %c0_12 = arith.constant 0 : index
    %24 = vector.load %arg10[%c32, %c0_12] : memref<400x512xf32, #tpu.memory_space<vmem>>, vector<16x512xf32>
    tpu.vector_store %arg10[%c32, %c0_12], %23 {strides = array<i32>} : memref<400x512xf32, #tpu.memory_space<vmem>>, vector<16x512xf32>,
    %c63_i32 = arith.constant 63 : i32
    %25 = tpu.dynamic_rotate %8 by %c63_i32 dim 1 : vector<16x512xf32>, i32 -> vector<16x512xf32>
    %26 = vector.extract_strided_slice %9 {offsets = [3, 0], sizes = [1, 512], strides = [1, 1]} : vector<25x512xf32> to vector<1x512xf32>
    %27 = vector.broadcast %26 : vector<1x512xf32> to vector<16x512xf32>
    %28 = arith.mulf %25, %27 : vector<16x512xf32>
    %c48 = arith.constant 48 : index
    %c0_13 = arith.constant 0 : index
    %29 = vector.load %arg10[%c48, %c0_13] : memref<400x512xf32, #tpu.memory_space<vmem>>, vector<16x512xf32>
    tpu.vector_store %arg10[%c48, %c0_13], %28 {strides = array<i32>} : memref<400x512xf32, #tpu.memory_space<vmem>>, vector<16x512xf32>,
    %c62_i32 = arith.constant 62 : i32
    %30 = tpu.dynamic_rotate %8 by %c62_i32 dim 1 : vector<16x512xf32>, i32 -> vector<16x512xf32>
    %31 = vector.extract_strided_slice %9 {offsets = [4, 0], sizes = [1, 512], strides = [1, 1]} : vector<25x512xf32> to vector<1x512xf32>
    %32 = vector.broadcast %31 : vector<1x512xf32> to vector<16x512xf32>
    %33 = arith.mulf %30, %32 : vector<16x512xf32>
    %c64 = arith.constant 64 : index
    %c0_14 = arith.constant 0 : index
    %34 = vector.load %arg10[%c64, %c0_14] : memref<400x512xf32, #tpu.memory_space<vmem>>, vector<16x512xf32>
    tpu.vector_store %arg10[%c64, %c0_14], %33 {strides = array<i32>} : memref<400x512xf32, #tpu.memory_space<vmem>>, vector<16x512xf32>,
    %c34_i32 = arith.constant 34 : i32
    %35 = tpu.dynamic_rotate %8 by %c34_i32 dim 1 : vector<16x512xf32>, i32 -> vector<16x512xf32>
    %36 = vector.extract_strided_slice %9 {offsets = [5, 0], sizes = [1, 512], strides = [1, 1]} : vector<25x512xf32> to vector<1x512xf32>
    %37 = vector.broadcast %36 : vector<1x512xf32> to vector<16x512xf32>
    %38 = arith.mulf %35, %37 : vector<16x512xf32>
    %c80 = arith.constant 80 : index
    %c0_15 = arith.constant 0 : index
    %39 = vector.load %arg10[%c80, %c0_15] : memref<400x512xf32, #tpu.memory_space<vmem>>, vector<16x512xf32>
    tpu.vector_store %arg10[%c80, %c0_15], %38 {strides = array<i32>} : memref<400x512xf32, #tpu.memory_space<vmem>>, vector<16x512xf32>,
    %c33_i32 = arith.constant 33 : i32
    %40 = tpu.dynamic_rotate %8 by %c33_i32 dim 1 : vector<16x512xf32>, i32 -> vector<16x512xf32>
    %41 = vector.extract_strided_slice %9 {offsets = [6, 0], sizes = [1, 512], strides = [1, 1]} : vector<25x512xf32> to vector<1x512xf32>
    %42 = vector.broadcast %41 : vector<1x512xf32> to vector<16x512xf32>
    %43 = arith.mulf %40, %42 : vector<16x512xf32>
    %c96 = arith.constant 96 : index
    %c0_16 = arith.constant 0 : index
    %44 = vector.load %arg10[%c96, %c0_16] : memref<400x512xf32, #tpu.memory_space<vmem>>, vector<16x512xf32>
    tpu.vector_store %arg10[%c96, %c0_16], %43 {strides = array<i32>} : memref<400x512xf32, #tpu.memory_space<vmem>>, vector<16x512xf32>,
    %c32_i32 = arith.constant 32 : i32
    %45 = tpu.dynamic_rotate %8 by %c32_i32 dim 1 : vector<16x512xf32>, i32 -> vector<16x512xf32>
    %46 = vector.extract_strided_slice %9 {offsets = [7, 0], sizes = [1, 512], strides = [1, 1]} : vector<25x512xf32> to vector<1x512xf32>
    %47 = vector.broadcast %46 : vector<1x512xf32> to vector<16x512xf32>
    %48 = arith.mulf %45, %47 : vector<16x512xf32>
    %c112 = arith.constant 112 : index
    %c0_17 = arith.constant 0 : index
    %49 = vector.load %arg10[%c112, %c0_17] : memref<400x512xf32, #tpu.memory_space<vmem>>, vector<16x512xf32>
    tpu.vector_store %arg10[%c112, %c0_17], %48 {strides = array<i32>} : memref<400x512xf32, #tpu.memory_space<vmem>>, vector<16x512xf32>,
    %c31_i32 = arith.constant 31 : i32
    %50 = tpu.dynamic_rotate %8 by %c31_i32 dim 1 : vector<16x512xf32>, i32 -> vector<16x512xf32>
    %51 = vector.extract_strided_slice %9 {offsets = [8, 0], sizes = [1, 512], strides = [1, 1]} : vector<25x512xf32> to vector<1x512xf32>
    %52 = vector.broadcast %51 : vector<1x512xf32> to vector<16x512xf32>
    %53 = arith.mulf %50, %52 : vector<16x512xf32>
    %c128 = arith.constant 128 : index
    %c0_18 = arith.constant 0 : index
    %54 = vector.load %arg10[%c128, %c0_18] : memref<400x512xf32, #tpu.memory_space<vmem>>, vector<16x512xf32>
    tpu.vector_store %arg10[%c128, %c0_18], %53 {strides = array<i32>} : memref<400x512xf32, #tpu.memory_space<vmem>>, vector<16x512xf32>,
    %c30_i32 = arith.constant 30 : i32
    %55 = tpu.dynamic_rotate %8 by %c30_i32 dim 1 : vector<16x512xf32>, i32 -> vector<16x512xf32>
    %56 = vector.extract_strided_slice %9 {offsets = [9, 0], sizes = [1, 512], strides = [1, 1]} : vector<25x512xf32> to vector<1x512xf32>
    %57 = vector.broadcast %56 : vector<1x512xf32> to vector<16x512xf32>
    %58 = arith.mulf %55, %57 : vector<16x512xf32>
    %c144 = arith.constant 144 : index
    %c0_19 = arith.constant 0 : index
    %59 = vector.load %arg10[%c144, %c0_19] : memref<400x512xf32, #tpu.memory_space<vmem>>, vector<16x512xf32>
    tpu.vector_store %arg10[%c144, %c0_19], %58 {strides = array<i32>} : memref<400x512xf32, #tpu.memory_space<vmem>>, vector<16x512xf32>,
    %c2_i32 = arith.constant 2 : i32
    %60 = tpu.dynamic_rotate %8 by %c2_i32 dim 1 : vector<16x512xf32>, i32 -> vector<16x512xf32>
    %61 = vector.extract_strided_slice %9 {offsets = [10, 0], sizes = [1, 512], strides = [1, 1]} : vector<25x512xf32> to vector<1x512xf32>
    %62 = vector.broadcast %61 : vector<1x512xf32> to vector<16x512xf32>
    %63 = arith.mulf %60, %62 : vector<16x512xf32>
    %c160 = arith.constant 160 : index
    %c0_20 = arith.constant 0 : index
    %64 = vector.load %arg10[%c160, %c0_20] : memref<400x512xf32, #tpu.memory_space<vmem>>, vector<16x512xf32>
    tpu.vector_store %arg10[%c160, %c0_20], %63 {strides = array<i32>} : memref<400x512xf32, #tpu.memory_space<vmem>>, vector<16x512xf32>,
    %c1_i32 = arith.constant 1 : i32
    %65 = tpu.dynamic_rotate %8 by %c1_i32 dim 1 : vector<16x512xf32>, i32 -> vector<16x512xf32>
    %66 = vector.extract_strided_slice %9 {offsets = [11, 0], sizes = [1, 512], strides = [1, 1]} : vector<25x512xf32> to vector<1x512xf32>
    %67 = vector.broadcast %66 : vector<1x512xf32> to vector<16x512xf32>
    %68 = arith.mulf %65, %67 : vector<16x512xf32>
    %c176 = arith.constant 176 : index
    %c0_21 = arith.constant 0 : index
    %69 = vector.load %arg10[%c176, %c0_21] : memref<400x512xf32, #tpu.memory_space<vmem>>, vector<16x512xf32>
    tpu.vector_store %arg10[%c176, %c0_21], %68 {strides = array<i32>} : memref<400x512xf32, #tpu.memory_space<vmem>>, vector<16x512xf32>,
    %70 = vector.extract_strided_slice %9 {offsets = [12, 0], sizes = [1, 512], strides = [1, 1]} : vector<25x512xf32> to vector<1x512xf32>
    %71 = vector.broadcast %70 : vector<1x512xf32> to vector<16x512xf32>
    %72 = arith.mulf %8, %71 : vector<16x512xf32>
    %c192 = arith.constant 192 : index
    %c0_22 = arith.constant 0 : index
    %73 = vector.load %arg10[%c192, %c0_22] : memref<400x512xf32, #tpu.memory_space<vmem>>, vector<16x512xf32>
    tpu.vector_store %arg10[%c192, %c0_22], %72 {strides = array<i32>} : memref<400x512xf32, #tpu.memory_space<vmem>>, vector<16x512xf32>,
    %c511_i32 = arith.constant 511 : i32
    %74 = tpu.dynamic_rotate %8 by %c511_i32 dim 1 : vector<16x512xf32>, i32 -> vector<16x512xf32>
    %75 = vector.extract_strided_slice %9 {offsets = [13, 0], sizes = [1, 512], strides = [1, 1]} : vector<25x512xf32> to vector<1x512xf32>
    %76 = vector.broadcast %75 : vector<1x512xf32> to vector<16x512xf32>
    %77 = arith.mulf %74, %76 : vector<16x512xf32>
    %c208 = arith.constant 208 : index
    %c0_23 = arith.constant 0 : index
    %78 = vector.load %arg10[%c208, %c0_23] : memref<400x512xf32, #tpu.memory_space<vmem>>, vector<16x512xf32>
    tpu.vector_store %arg10[%c208, %c0_23], %77 {strides = array<i32>} : memref<400x512xf32, #tpu.memory_space<vmem>>, vector<16x512xf32>,
    %c510_i32 = arith.constant 510 : i32
    %79 = tpu.dynamic_rotate %8 by %c510_i32 dim 1 : vector<16x512xf32>, i32 -> vector<16x512xf32>
    %80 = vector.extract_strided_slice %9 {offsets = [14, 0], sizes = [1, 512], strides = [1, 1]} : vector<25x512xf32> to vector<1x512xf32>
    %81 = vector.broadcast %80 : vector<1x512xf32> to vector<16x512xf32>
    %82 = arith.mulf %79, %81 : vector<16x512xf32>
    %c224 = arith.constant 224 : index
    %c0_24 = arith.constant 0 : index
    %83 = vector.load %arg10[%c224, %c0_24] : memref<400x512xf32, #tpu.memory_space<vmem>>, vector<16x512xf32>
    tpu.vector_store %arg10[%c224, %c0_24], %82 {strides = array<i32>} : memref<400x512xf32, #tpu.memory_space<vmem>>, vector<16x512xf32>,
    %c482_i32 = arith.constant 482 : i32
    %84 = tpu.dynamic_rotate %8 by %c482_i32 dim 1 : vector<16x512xf32>, i32 -> vector<16x512xf32>
    %85 = vector.extract_strided_slice %9 {offsets = [15, 0], sizes = [1, 512], strides = [1, 1]} : vector<25x512xf32> to vector<1x512xf32>
    %86 = vector.broadcast %85 : vector<1x512xf32> to vector<16x512xf32>
    %87 = arith.mulf %84, %86 : vector<16x512xf32>
    %c240 = arith.constant 240 : index
    %c0_25 = arith.constant 0 : index
    %88 = vector.load %arg10[%c240, %c0_25] : memref<400x512xf32, #tpu.memory_space<vmem>>, vector<16x512xf32>
    tpu.vector_store %arg10[%c240, %c0_25], %87 {strides = array<i32>} : memref<400x512xf32, #tpu.memory_space<vmem>>, vector<16x512xf32>,
    %c481_i32 = arith.constant 481 : i32
    %89 = tpu.dynamic_rotate %8 by %c481_i32 dim 1 : vector<16x512xf32>, i32 -> vector<16x512xf32>
    %90 = vector.extract_strided_slice %9 {offsets = [16, 0], sizes = [1, 512], strides = [1, 1]} : vector<25x512xf32> to vector<1x512xf32>
    %91 = vector.broadcast %90 : vector<1x512xf32> to vector<16x512xf32>
    %92 = arith.mulf %89, %91 : vector<16x512xf32>
    %c256 = arith.constant 256 : index
    %c0_26 = arith.constant 0 : index
    %93 = vector.load %arg10[%c256, %c0_26] : memref<400x512xf32, #tpu.memory_space<vmem>>, vector<16x512xf32>
    tpu.vector_store %arg10[%c256, %c0_26], %92 {strides = array<i32>} : memref<400x512xf32, #tpu.memory_space<vmem>>, vector<16x512xf32>,
    %c480_i32 = arith.constant 480 : i32
    %94 = tpu.dynamic_rotate %8 by %c480_i32 dim 1 : vector<16x512xf32>, i32 -> vector<16x512xf32>
    %95 = vector.extract_strided_slice %9 {offsets = [17, 0], sizes = [1, 512], strides = [1, 1]} : vector<25x512xf32> to vector<1x512xf32>
    %96 = vector.broadcast %95 : vector<1x512xf32> to vector<16x512xf32>
    %97 = arith.mulf %94, %96 : vector<16x512xf32>
    %c272 = arith.constant 272 : index
    %c0_27 = arith.constant 0 : index
    %98 = vector.load %arg10[%c272, %c0_27] : memref<400x512xf32, #tpu.memory_space<vmem>>, vector<16x512xf32>
    tpu.vector_store %arg10[%c272, %c0_27], %97 {strides = array<i32>} : memref<400x512xf32, #tpu.memory_space<vmem>>, vector<16x512xf32>,
    %c479_i32 = arith.constant 479 : i32
    %99 = tpu.dynamic_rotate %8 by %c479_i32 dim 1 : vector<16x512xf32>, i32 -> vector<16x512xf32>
    %100 = vector.extract_strided_slice %9 {offsets = [18, 0], sizes = [1, 512], strides = [1, 1]} : vector<25x512xf32> to vector<1x512xf32>
    %101 = vector.broadcast %100 : vector<1x512xf32> to vector<16x512xf32>
    %102 = arith.mulf %99, %101 : vector<16x512xf32>
    %c288 = arith.constant 288 : index
    %c0_28 = arith.constant 0 : index
    %103 = vector.load %arg10[%c288, %c0_28] : memref<400x512xf32, #tpu.memory_space<vmem>>, vector<16x512xf32>
    tpu.vector_store %arg10[%c288, %c0_28], %102 {strides = array<i32>} : memref<400x512xf32, #tpu.memory_space<vmem>>, vector<16x512xf32>,
    %c478_i32 = arith.constant 478 : i32
    %104 = tpu.dynamic_rotate %8 by %c478_i32 dim 1 : vector<16x512xf32>, i32 -> vector<16x512xf32>
    %105 = vector.extract_strided_slice %9 {offsets = [19, 0], sizes = [1, 512], strides = [1, 1]} : vector<25x512xf32> to vector<1x512xf32>
    %106 = vector.broadcast %105 : vector<1x512xf32> to vector<16x512xf32>
    %107 = arith.mulf %104, %106 : vector<16x512xf32>
    %c304 = arith.constant 304 : index
    %c0_29 = arith.constant 0 : index
    %108 = vector.load %arg10[%c304, %c0_29] : memref<400x512xf32, #tpu.memory_space<vmem>>, vector<16x512xf32>
    tpu.vector_store %arg10[%c304, %c0_29], %107 {strides = array<i32>} : memref<400x512xf32, #tpu.memory_space<vmem>>, vector<16x512xf32>,
    %c450_i32 = arith.constant 450 : i32
    %109 = tpu.dynamic_rotate %8 by %c450_i32 dim 1 : vector<16x512xf32>, i32 -> vector<16x512xf32>
    %110 = vector.extract_strided_slice %9 {offsets = [20, 0], sizes = [1, 512], strides = [1, 1]} : vector<25x512xf32> to vector<1x512xf32>
    %111 = vector.broadcast %110 : vector<1x512xf32> to vector<16x512xf32>
    %112 = arith.mulf %109, %111 : vector<16x512xf32>
    %c320 = arith.constant 320 : index
    %c0_30 = arith.constant 0 : index
    %113 = vector.load %arg10[%c320, %c0_30] : memref<400x512xf32, #tpu.memory_space<vmem>>, vector<16x512xf32>
    tpu.vector_store %arg10[%c320, %c0_30], %112 {strides = array<i32>} : memref<400x512xf32, #tpu.memory_space<vmem>>, vector<16x512xf32>,
    %c449_i32 = arith.constant 449 : i32
    %114 = tpu.dynamic_rotate %8 by %c449_i32 dim 1 : vector<16x512xf32>, i32 -> vector<16x512xf32>
    %115 = vector.extract_strided_slice %9 {offsets = [21, 0], sizes = [1, 512], strides = [1, 1]} : vector<25x512xf32> to vector<1x512xf32>
    %116 = vector.broadcast %115 : vector<1x512xf32> to vector<16x512xf32>
    %117 = arith.mulf %114, %116 : vector<16x512xf32>
    %c336 = arith.constant 336 : index
    %c0_31 = arith.constant 0 : index
    %118 = vector.load %arg10[%c336, %c0_31] : memref<400x512xf32, #tpu.memory_space<vmem>>, vector<16x512xf32>
    tpu.vector_store %arg10[%c336, %c0_31], %117 {strides = array<i32>} : memref<400x512xf32, #tpu.memory_space<vmem>>, vector<16x512xf32>,
    %c448_i32 = arith.constant 448 : i32
    %119 = tpu.dynamic_rotate %8 by %c448_i32 dim 1 : vector<16x512xf32>, i32 -> vector<16x512xf32>
    %120 = vector.extract_strided_slice %9 {offsets = [22, 0], sizes = [1, 512], strides = [1, 1]} : vector<25x512xf32> to vector<1x512xf32>
    %121 = vector.broadcast %120 : vector<1x512xf32> to vector<16x512xf32>
    %122 = arith.mulf %119, %121 : vector<16x512xf32>
    %c352 = arith.constant 352 : index
    %c0_32 = arith.constant 0 : index
    %123 = vector.load %arg10[%c352, %c0_32] : memref<400x512xf32, #tpu.memory_space<vmem>>, vector<16x512xf32>
    tpu.vector_store %arg10[%c352, %c0_32], %122 {strides = array<i32>} : memref<400x512xf32, #tpu.memory_space<vmem>>, vector<16x512xf32>,
    %c447_i32 = arith.constant 447 : i32
    %124 = tpu.dynamic_rotate %8 by %c447_i32 dim 1 : vector<16x512xf32>, i32 -> vector<16x512xf32>
    %125 = vector.extract_strided_slice %9 {offsets = [23, 0], sizes = [1, 512], strides = [1, 1]} : vector<25x512xf32> to vector<1x512xf32>
    %126 = vector.broadcast %125 : vector<1x512xf32> to vector<16x512xf32>
    %127 = arith.mulf %124, %126 : vector<16x512xf32>
    %c368 = arith.constant 368 : index
    %c0_33 = arith.constant 0 : index
    %128 = vector.load %arg10[%c368, %c0_33] : memref<400x512xf32, #tpu.memory_space<vmem>>, vector<16x512xf32>
    tpu.vector_store %arg10[%c368, %c0_33], %127 {strides = array<i32>} : memref<400x512xf32, #tpu.memory_space<vmem>>, vector<16x512xf32>,
    %c446_i32 = arith.constant 446 : i32
    %129 = tpu.dynamic_rotate %8 by %c446_i32 dim 1 : vector<16x512xf32>, i32 -> vector<16x512xf32>
    %130 = vector.extract_strided_slice %9 {offsets = [24, 0], sizes = [1, 512], strides = [1, 1]} : vector<25x512xf32> to vector<1x512xf32>
    %131 = vector.broadcast %130 : vector<1x512xf32> to vector<16x512xf32>
    %132 = arith.mulf %129, %131 : vector<16x512xf32>
    %c384 = arith.constant 384 : index
    %c0_34 = arith.constant 0 : index
    %133 = vector.load %arg10[%c384, %c0_34] : memref<400x512xf32, #tpu.memory_space<vmem>>, vector<16x512xf32>
    tpu.vector_store %arg10[%c384, %c0_34], %132 {strides = array<i32>} : memref<400x512xf32, #tpu.memory_space<vmem>>, vector<16x512xf32>,
    %c0_35 = arith.constant 0 : index
    %c0_36 = arith.constant 0 : index
    %134 = vector.load %arg5[%c0_35, %c0_36] : memref<64x400xf32, #tpu.memory_space<vmem>>, vector<64x400xf32>
    %c0_37 = arith.constant 0 : index
    %c0_38 = arith.constant 0 : index
    %135 = vector.load %arg10[%c0_37, %c0_38] : memref<400x512xf32, #tpu.memory_space<vmem>>, vector<400x512xf32>
    %cst_39 = arith.constant dense<0.000000e+00> : vector<64x512xf32>
    %136 = tpu.matmul %134, %135, %cst_39 {dimension_numbers = #tpu.dot_dimension_numbers<[1], [0], [0], [1], [0, 0, 1, 1], [], []>} : vector<64x400xf32>, vector<400x512xf32>, vector<64x512xf32> -> vector<64x512xf32>
    %c0_40 = arith.constant 0 : index
    %c0_41 = arith.constant 0 : index
    %137 = vector.load %arg6[%c0_40, %c0_41] : memref<64x1xf32, #tpu.memory_space<vmem>>, vector<64x1xf32>
    %138 = vector.broadcast %137 : vector<64x1xf32> to vector<64x512xf32>
    %139 = arith.addf %136, %138 : vector<64x512xf32>
    %cst_42 = arith.constant 0.000000e+00 : f32
    %140 = vector.broadcast %cst_42 : f32 to vector<64x512xf32>
    %141 = arith.maximumf %139, %140 : vector<64x512xf32>
    %c0_43 = arith.constant 0 : index
    %c0_44 = arith.constant 0 : index
    %142 = vector.load %arg7[%c0_43, %c0_44] : memref<8x64xf32, #tpu.memory_space<vmem>>, vector<8x64xf32>
    %cst_45 = arith.constant dense<0.000000e+00> : vector<8x512xf32>
    %143 = tpu.matmul %142, %141, %cst_45 {dimension_numbers = #tpu.dot_dimension_numbers<[1], [0], [0], [1], [0, 0, 1, 1], [], []>} : vector<8x64xf32>, vector<64x512xf32>, vector<8x512xf32> -> vector<8x512xf32>
    %c0_46 = arith.constant 0 : index
    %c0_47 = arith.constant 0 : index
    %144 = vector.load %arg8[%c0_46, %c0_47] : memref<8x1xf32, #tpu.memory_space<vmem>>, vector<8x1xf32>
    %145 = vector.broadcast %144 : vector<8x1xf32> to vector<8x512xf32>
    %146 = arith.addf %143, %145 : vector<8x512xf32>
    %c0_48 = arith.constant 0 : index
    %c0_49 = arith.constant 0 : index
    %c0_50 = arith.constant 0 : index
    %147 = vector.load %arg9[%c0_48, %c0_49, %c0_50] : memref<1x8x512xf32, #tpu.memory_space<vmem>>, vector<1x8x512xf32>
    %148 = vector.shape_cast %147 : vector<1x8x512xf32> to vector<8x512xf32>
    %149 = vector.shape_cast %146 : vector<8x512xf32> to vector<1x8x512xf32>
    tpu.vector_store %arg9[%c0_48, %c0_49, %c0_50], %149 {strides = array<i32>} : memref<1x8x512xf32, #tpu.memory_space<vmem>>, vector<1x8x512xf32>,
    return
  }
  func.func @transform_0(%arg0: i32) -> (i32, i32, i32) {
    %c0_i32 = arith.constant 0 : i32
    %c0_i32_0 = arith.constant 0 : i32
    %c0_i32_1 = arith.constant 0 : i32
    return %arg0, %c0_i32, %c0_i32_0 : i32, i32, i32
  }
  func.func @transform_1(%arg0: i32) -> (i32, i32) {
    %c0_i32 = arith.constant 0 : i32
    %c0_i32_0 = arith.constant 0 : i32
    %c0_i32_1 = arith.constant 0 : i32
    return %c0_i32, %c0_i32_0 : i32, i32
  }
  func.func @transform_2(%arg0: i32) -> (i32, i32) {
    %c0_i32 = arith.constant 0 : i32
    %c0_i32_0 = arith.constant 0 : i32
    %c0_i32_1 = arith.constant 0 : i32
    return %c0_i32, %c0_i32_0 : i32, i32
  }
  func.func @transform_3(%arg0: i32) -> (i32, i32) {
    %c0_i32 = arith.constant 0 : i32
    %c0_i32_0 = arith.constant 0 : i32
    %c0_i32_1 = arith.constant 0 : i32
    return %c0_i32, %c0_i32_0 : i32, i32
  }
  func.func @transform_4(%arg0: i32) -> (i32, i32) {
    %c0_i32 = arith.constant 0 : i32
    %c0_i32_0 = arith.constant 0 : i32
    %c0_i32_1 = arith.constant 0 : i32
    return %c0_i32, %c0_i32_0 : i32, i32
  }
  func.func @transform_5(%arg0: i32) -> (i32, i32) {
    %c0_i32 = arith.constant 0 : i32
    %c0_i32_0 = arith.constant 0 : i32
    %c0_i32_1 = arith.constant 0 : i32
    return %c0_i32, %c0_i32_0 : i32, i32
  }
  func.func @transform_6(%arg0: i32) -> (i32, i32) {
    %c0_i32 = arith.constant 0 : i32
    %c0_i32_0 = arith.constant 0 : i32
    %c0_i32_1 = arith.constant 0 : i32
    return %c0_i32, %c0_i32_0 : i32, i32
  }
  func.func @transform_7(%arg0: i32) -> (i32, i32) {
    %c0_i32 = arith.constant 0 : i32
    %c0_i32_0 = arith.constant 0 : i32
    %c0_i32_1 = arith.constant 0 : i32
    return %c0_i32, %c0_i32_0 : i32, i32
  }
  func.func @transform_8(%arg0: i32) -> (i32, i32, i32) {
    %c0_i32 = arith.constant 0 : i32
    %c0_i32_0 = arith.constant 0 : i32
    %c0_i32_1 = arith.constant 0 : i32
    return %arg0, %c0_i32, %c0_i32_0 : i32, i32, i32
  }
}

module attributes {stable_mosaic.version = 11 : i64} {
  func.func @_fc1_kernel(%arg0: i32, %arg1: memref<2x4096xbf16, #tpu.memory_space<vmem>>, %arg2: memref<4096x256xbf16, #tpu.memory_space<vmem>>, %arg3: memref<1x256xf32, #tpu.memory_space<vmem>>, %arg4: memref<2x256xf32, #tpu.memory_space<vmem>>) attributes {dimension_semantics = [#tpu.dimension_semantics<parallel>], iteration_bounds = array<i64: 4>, scalar_prefetch = 0 : i64, scratch_operands = 0 : i64, tpu.core_type = #tpu.core_type<tc>, window_params = [{pipeline_mode = #tpu.pipeline_mode<synchronous>, transform_indices = @transform_0, window_bounds = array<i64: 2, 4096>}, {transform_indices = @transform_1, window_bounds = array<i64: 4096, 256>}, {transform_indices = @transform_2, window_bounds = array<i64: 1, 256>}, {transform_indices = @transform_3, window_bounds = array<i64: 2, 256>}]} {
    %c0 = arith.constant 0 : index
    %c0_0 = arith.constant 0 : index
    %0 = vector.load %arg1[%c0, %c0_0] : memref<2x4096xbf16, #tpu.memory_space<vmem>>, vector<2x4096xbf16>
    %c0_1 = arith.constant 0 : index
    %c0_2 = arith.constant 0 : index
    %1 = vector.load %arg2[%c0_1, %c0_2] : memref<4096x256xbf16, #tpu.memory_space<vmem>>, vector<4096x256xbf16>
    %cst = arith.constant dense<0.000000e+00> : vector<2x256xf32>
    %2 = tpu.matmul %0, %1, %cst {dimension_numbers = #tpu.dot_dimension_numbers<[1], [0], [0], [1], [0, 0, 1, 1], [], []>} : vector<2x4096xbf16>, vector<4096x256xbf16>, vector<2x256xf32> -> vector<2x256xf32>
    %c0_3 = arith.constant 0 : index
    %c0_4 = arith.constant 0 : index
    %3 = vector.load %arg3[%c0_3, %c0_4] : memref<1x256xf32, #tpu.memory_space<vmem>>, vector<1x256xf32>
    %4 = vector.broadcast %3 : vector<1x256xf32> to vector<2x256xf32>
    %5 = arith.addf %2, %4 : vector<2x256xf32>
    %cst_5 = arith.constant 0.000000e+00 : f32
    %6 = vector.broadcast %cst_5 : f32 to vector<2x256xf32>
    %7 = arith.maximumf %5, %6 : vector<2x256xf32>
    %c0_6 = arith.constant 0 : index
    %c0_7 = arith.constant 0 : index
    %8 = vector.load %arg4[%c0_6, %c0_7] : memref<2x256xf32, #tpu.memory_space<vmem>>, vector<2x256xf32>
    tpu.vector_store %arg4[%c0_6, %c0_7], %7 {strides = array<i32>} : memref<2x256xf32, #tpu.memory_space<vmem>>, vector<2x256xf32>,
    return
  }
  func.func @transform_0(%arg0: i32) -> (i32, i32) {
    %c0_i32 = arith.constant 0 : i32
    %c0_i32_0 = arith.constant 0 : i32
    %c0_i32_1 = arith.constant 0 : i32
    return %c0_i32, %c0_i32_0 : i32, i32
  }
  func.func @transform_1(%arg0: i32) -> (i32, i32) {
    %c0_i32 = arith.constant 0 : i32
    %c0_i32_0 = arith.constant 0 : i32
    return %c0_i32, %arg0 : i32, i32
  }
  func.func @transform_2(%arg0: i32) -> (i32, i32) {
    %c0_i32 = arith.constant 0 : i32
    %c0_i32_0 = arith.constant 0 : i32
    return %c0_i32, %arg0 : i32, i32
  }
  func.func @transform_3(%arg0: i32) -> (i32, i32) {
    %c0_i32 = arith.constant 0 : i32
    %c0_i32_0 = arith.constant 0 : i32
    return %c0_i32, %arg0 : i32, i32
  }
}

module attributes {stable_mosaic.version = 11 : i64} {
  func.func @_fc2_kernel(%arg0: i32, %arg1: memref<2x1024xf32, #tpu.memory_space<vmem>>, %arg2: memref<1024x64xf32, #tpu.memory_space<vmem>>, %arg3: memref<1x64xf32, #tpu.memory_space<vmem>>, %arg4: memref<64x8xf32, #tpu.memory_space<vmem>>, %arg5: memref<1x8xf32, #tpu.memory_space<vmem>>, %arg6: memref<2x8xf32, #tpu.memory_space<vmem>>) attributes {dimension_semantics = [#tpu.dimension_semantics<arbitrary>], iteration_bounds = array<i64: 1>, scalar_prefetch = 0 : i64, scratch_operands = 0 : i64, tpu.core_type = #tpu.core_type<tc>, window_params = [{pipeline_mode = #tpu.pipeline_mode<synchronous>, transform_indices = @transform_0, window_bounds = array<i64: 2, 1024>}, {pipeline_mode = #tpu.pipeline_mode<synchronous>, transform_indices = @transform_1, window_bounds = array<i64: 1024, 64>}, {pipeline_mode = #tpu.pipeline_mode<synchronous>, transform_indices = @transform_2, window_bounds = array<i64: 1, 64>}, {pipeline_mode = #tpu.pipeline_mode<synchronous>, transform_indices = @transform_3, window_bounds = array<i64: 64, 8>}, {pipeline_mode = #tpu.pipeline_mode<synchronous>, transform_indices = @transform_4, window_bounds = array<i64: 1, 8>}, {pipeline_mode = #tpu.pipeline_mode<synchronous>, transform_indices = @transform_5, window_bounds = array<i64: 2, 8>}]} {
    %c0 = arith.constant 0 : index
    %c0_0 = arith.constant 0 : index
    %0 = vector.load %arg1[%c0, %c0_0] : memref<2x1024xf32, #tpu.memory_space<vmem>>, vector<2x1024xf32>
    %c0_1 = arith.constant 0 : index
    %c0_2 = arith.constant 0 : index
    %1 = vector.load %arg2[%c0_1, %c0_2] : memref<1024x64xf32, #tpu.memory_space<vmem>>, vector<1024x64xf32>
    %cst = arith.constant dense<0.000000e+00> : vector<2x64xf32>
    %2 = tpu.matmul %0, %1, %cst {dimension_numbers = #tpu.dot_dimension_numbers<[1], [0], [0], [1], [0, 0, 1, 1], [], []>} : vector<2x1024xf32>, vector<1024x64xf32>, vector<2x64xf32> -> vector<2x64xf32>
    %c0_3 = arith.constant 0 : index
    %c0_4 = arith.constant 0 : index
    %3 = vector.load %arg3[%c0_3, %c0_4] : memref<1x64xf32, #tpu.memory_space<vmem>>, vector<1x64xf32>
    %4 = vector.broadcast %3 : vector<1x64xf32> to vector<2x64xf32>
    %5 = arith.addf %2, %4 : vector<2x64xf32>
    %cst_5 = arith.constant 0.000000e+00 : f32
    %6 = vector.broadcast %cst_5 : f32 to vector<2x64xf32>
    %7 = arith.maximumf %5, %6 : vector<2x64xf32>
    %c0_6 = arith.constant 0 : index
    %c0_7 = arith.constant 0 : index
    %8 = vector.load %arg4[%c0_6, %c0_7] : memref<64x8xf32, #tpu.memory_space<vmem>>, vector<64x8xf32>
    %cst_8 = arith.constant dense<0.000000e+00> : vector<2x8xf32>
    %9 = tpu.matmul %7, %8, %cst_8 {dimension_numbers = #tpu.dot_dimension_numbers<[1], [0], [0], [1], [0, 0, 1, 1], [], []>} : vector<2x64xf32>, vector<64x8xf32>, vector<2x8xf32> -> vector<2x8xf32>
    %c0_9 = arith.constant 0 : index
    %c0_10 = arith.constant 0 : index
    %10 = vector.load %arg5[%c0_9, %c0_10] : memref<1x8xf32, #tpu.memory_space<vmem>>, vector<1x8xf32>
    %11 = vector.broadcast %10 : vector<1x8xf32> to vector<2x8xf32>
    %12 = arith.addf %9, %11 : vector<2x8xf32>
    %cst_11 = arith.constant dense<0xFF800000> : vector<2xf32>
    %13 = vector.multi_reduction <maximumf>, %12, %cst_11 [1] : vector<2x8xf32> to vector<2xf32>
    %14 = vector.shape_cast %13 : vector<2xf32> to vector<2x1xf32>
    %15 = vector.broadcast %14 : vector<2x1xf32> to vector<2x8xf32>
    %16 = arith.subf %12, %15 : vector<2x8xf32>
    %17 = math.exp %16 : vector<2x8xf32>
    %cst_12 = arith.constant dense<0.000000e+00> : vector<2xf32>
    %18 = vector.multi_reduction <add>, %17, %cst_12 [1] : vector<2x8xf32> to vector<2xf32>
    %19 = vector.shape_cast %18 : vector<2xf32> to vector<2x1xf32>
    %20 = vector.broadcast %19 : vector<2x1xf32> to vector<2x8xf32>
    %21 = arith.divf %17, %20 : vector<2x8xf32>
    %c0_13 = arith.constant 0 : index
    %c0_14 = arith.constant 0 : index
    %22 = vector.load %arg6[%c0_13, %c0_14] : memref<2x8xf32, #tpu.memory_space<vmem>>, vector<2x8xf32>
    tpu.vector_store %arg6[%c0_13, %c0_14], %21 {strides = array<i32>} : memref<2x8xf32, #tpu.memory_space<vmem>>, vector<2x8xf32>,
    return
  }
  func.func @transform_0(%arg0: i32) -> (i32, i32) {
    %c0_i32 = arith.constant 0 : i32
    %c0_i32_0 = arith.constant 0 : i32
    %c0_i32_1 = arith.constant 0 : i32
    return %c0_i32, %c0_i32_0 : i32, i32
  }
  func.func @transform_1(%arg0: i32) -> (i32, i32) {
    %c0_i32 = arith.constant 0 : i32
    %c0_i32_0 = arith.constant 0 : i32
    %c0_i32_1 = arith.constant 0 : i32
    return %c0_i32, %c0_i32_0 : i32, i32
  }
  func.func @transform_2(%arg0: i32) -> (i32, i32) {
    %c0_i32 = arith.constant 0 : i32
    %c0_i32_0 = arith.constant 0 : i32
    %c0_i32_1 = arith.constant 0 : i32
    return %c0_i32, %c0_i32_0 : i32, i32
  }
  func.func @transform_3(%arg0: i32) -> (i32, i32) {
    %c0_i32 = arith.constant 0 : i32
    %c0_i32_0 = arith.constant 0 : i32
    %c0_i32_1 = arith.constant 0 : i32
    return %c0_i32, %c0_i32_0 : i32, i32
  }
  func.func @transform_4(%arg0: i32) -> (i32, i32) {
    %c0_i32 = arith.constant 0 : i32
    %c0_i32_0 = arith.constant 0 : i32
    %c0_i32_1 = arith.constant 0 : i32
    return %c0_i32, %c0_i32_0 : i32, i32
  }
  func.func @transform_5(%arg0: i32) -> (i32, i32) {
    %c0_i32 = arith.constant 0 : i32
    %c0_i32_0 = arith.constant 0 : i32
    %c0_i32_1 = arith.constant 0 : i32
    return %c0_i32, %c0_i32_0 : i32, i32
  }
}

</mosaic_0001>

<bundles_post_ra>
// kernel: cnn_detector_forward.5
= control target key start
LH: loop header
LB: loop body
LE: loop exit
PB: predicated region body
PF: predicated region fallthrough
CT: control target
= control target key end

     0   :  { %s906_s0 = inlined_call_operand.vmem [shape: f32[2,1024], index: 0, kind: input, shape index: {}]   ;;  %s907_s1 = inlined_call_operand.vmem [shape: f32[1024,64], index: 1, kind: input, shape index: {}]   ;;  %s908_s2 = inlined_call_operand.vmem [shape: f32[1,64], index: 2, kind: input, shape index: {}]   ;;  %s909_s3 = inlined_call_operand.vmem [shape: f32[64,8], index: 3, kind: input, shape index: {}]   ;;  %s910_s4 = inlined_call_operand.vmem [shape: f32[1,8], index: 4, kind: input, shape index: {}]   ;;  %s911_s5 = inlined_call_operand.hbm [shape: f32[2,8], index: 5, kind: output, shape index: {}]  }
   0x1   :  { %v70_v0 = vld [vmem:[%s907_s1 + $0x178] sm:$0xff]  ;;  %v69_v2 = vld [vmem:[%s907_s1 + $0x170] sm:$0xff]  ;;  %v68_v6 = vld [vmem:[%s907_s1 + $0x168] sm:$0xff] }
   0x2   :  { %v38_v1 = vld [vmem:[%s907_s1 + $0x78] sm:$0xff]  ;;  %216 = vmatpush.msra.mxu2 %v70_v0  ;;  %v37_v4 = vld [vmem:[%s907_s1 + $0x70] sm:$0xff]  ;;  %v36_v8 = vld [vmem:[%s907_s1 + $0x68] sm:$0xff] }
   0x3   :  { %176 = vmatpush.msra.mxu0 %v38_v1  ;;  %v86_v3 = vld [vmem:[%s907_s1 + $0x1f8] sm:$0xff]  ;;  %v85_v7 = vld [vmem:[%s907_s1 + $0x1f0] sm:$0xff]  ;;  %v84_v10 = vld [vmem:[%s907_s1 + $0x1e8] sm:$0xff] }
   0x4   :  { %v54_v5 = vld [vmem:[%s907_s1 + $0xf8] sm:$0xff]  ;;  %236 = vmatpush.msra.mxu3 %v86_v3  ;;  %217 = vmatpush.msra.mxu2 %v69_v2  ;;  %v53_v9 = vld [vmem:[%s907_s1 + $0xf0] sm:$0xff]  ;;  %v67_v11 = vld [vmem:[%s907_s1 + $0x160] sm:$0xff] }
   0x5   :  { %196 = vmatpush.msra.mxu1 %v54_v5  ;;  %177 = vmatpush.msra.mxu0 %v37_v4  ;;  %v35_v12 = vld [vmem:[%s907_s1 + $0x60] sm:$0xff]  ;;  %v52_v13 = vld [vmem:[%s907_s1 + $0xe8] sm:$0xff]  ;;  %v66_v16 = vld [vmem:[%s907_s1 + $0x158] sm:$0xff] }
   0x6   :  { %237 = vmatpush.msra.mxu3 %v85_v7  ;;  %218 = vmatpush.msra.mxu2 %v68_v6  ;;  %v83_v14 = vld [vmem:[%s907_s1 + $0x1e0] sm:$0xff]  ;;  %v34_v17 = vld [vmem:[%s907_s1 + $0x58] sm:$0xff]  ;;  %v65_v20 = vld [vmem:[%s907_s1 + $0x150] sm:$0xff] }
   0x7   :  { %197 = vmatpush.msra.mxu1 %v53_v9  ;;  %178 = vmatpush.msra.mxu0 %v36_v8  ;;  %v51_v15 = vld [vmem:[%s907_s1 + $0xe0] sm:$0xff]  ;;  %v82_v18 = vld [vmem:[%s907_s1 + $0x1d8] sm:$0xff]  ;;  %v33_v21 = vld [vmem:[%s907_s1 + $0x50] sm:$0xff] }
   0x8   :  { %238 = vmatpush.msra.mxu3 %v84_v10  ;;  %219 = vmatpush.msra.mxu2 %v67_v11  ;;  %v50_v19 = vld [vmem:[%s907_s1 + $0xd8] sm:$0xff]  ;;  %v81_v22 = vld [vmem:[%s907_s1 + $0x1d0] sm:$0xff]  ;;  %v64_v24 = vld [vmem:[%s907_s1 + $0x148] sm:$0xff] }
   0x9   :  { %198 = vmatpush.msra.mxu1 %v52_v13  ;;  %179 = vmatpush.msra.mxu0 %v35_v12  ;;  %v49_v23 = vld [vmem:[%s907_s1 + $0xd0] sm:$0xff]  ;;  %v32_v25 = vld [vmem:[%s907_s1 + $0x48] sm:$0xff]  ;;  %v63_v28 = vld [vmem:[%s907_s1 + $0x140] sm:$0xff] }
   0xa   :  { %239 = vmatpush.msra.mxu3 %v83_v14  ;;  %220 = vmatpush.msra.mxu2 %v66_v16  ;;  %v80_v26 = vld [vmem:[%s907_s1 + $0x1c8] sm:$0xff]  ;;  %v31_v29 = vld [vmem:[%s907_s1 + $0x40] sm:$0xff]  ;;  %v62_v32 = vld [vmem:[%s907_s1 + $0x138] sm:$0xff] }
   0xb   :  { %199 = vmatpush.msra.mxu1 %v51_v15  ;;  %180 = vmatpush.msra.mxu0 %v34_v17  ;;  %v48_v27 = vld [vmem:[%s907_s1 + $0xc8] sm:$0xff]  ;;  %v79_v30 = vld [vmem:[%s907_s1 + $0x1c0] sm:$0xff]  ;;  %v30_v33 = vld [vmem:[%s907_s1 + $0x38] sm:$0xff] }
   0xc   :  { %240 = vmatpush.msra.mxu3 %v82_v18  ;;  %221 = vmatpush.msra.mxu2 %v65_v20  ;;  %v47_v31 = vld [vmem:[%s907_s1 + $0xc0] sm:$0xff]  ;;  %v78_v34 = vld [vmem:[%s907_s1 + $0x1b8] sm:$0xff]  ;;  %v61_v36 = vld [vmem:[%s907_s1 + $0x130] sm:$0xff] }
   0xd   :  { %200 = vmatpush.msra.mxu1 %v50_v19  ;;  %181 = vmatpush.msra.mxu0 %v33_v21  ;;  %v46_v35 = vld [vmem:[%s907_s1 + $0xb8] sm:$0xff]  ;;  %v29_v37 = vld [vmem:[%s907_s1 + $0x30] sm:$0xff]  ;;  %v60_v40 = vld [vmem:[%s907_s1 + $0x128] sm:$0xff] }
   0xe   :  { %241 = vmatpush.msra.mxu3 %v81_v22  ;;  %222 = vmatpush.msra.mxu2 %v64_v24  ;;  %v77_v38 = vld [vmem:[%s907_s1 + $0x1b0] sm:$0xff]  ;;  %v28_v41 = vld [vmem:[%s907_s1 + $0x28] sm:$0xff]  ;;  %v59_v44 = vld [vmem:[%s907_s1 + $0x120] sm:$0xff] }
   0xf   :  { %201 = vmatpush.msra.mxu1 %v49_v23  ;;  %182 = vmatpush.msra.mxu0 %v32_v25  ;;  %v45_v39 = vld [vmem:[%s907_s1 + $0xb0] sm:$0xff]  ;;  %v76_v42 = vld [vmem:[%s907_s1 + $0x1a8] sm:$0xff]  ;;  %v27_v45 = vld [vmem:[%s907_s1 + $0x20] sm:$0xff] }
  0x10   :  { %242 = vmatpush.msra.mxu3 %v80_v26  ;;  %223 = vmatpush.msra.mxu2 %v63_v28  ;;  %v44_v43 = vld [vmem:[%s907_s1 + $0xa8] sm:$0xff]  ;;  %v75_v46 = vld [vmem:[%s907_s1 + $0x1a0] sm:$0xff]  ;;  %v58_v48 = vld [vmem:[%s907_s1 + $0x118] sm:$0xff] }
  0x11   :  { %202 = vmatpush.msra.mxu1 %v48_v27  ;;  %183 = vmatpush.msra.mxu0 %v31_v29  ;;  %v43_v47 = vld [vmem:[%s907_s1 + $0xa0] sm:$0xff]  ;;  %v26_v49 = vld [vmem:[%s907_s1 + $0x18] sm:$0xff]  ;;  %v57_v52 = vld [vmem:[%s907_s1 + $0x110] sm:$0xff] }
  0x12   :  { %243 = vmatpush.msra.mxu3 %v79_v30  ;;  %224 = vmatpush.msra.mxu2 %v62_v32  ;;  %v74_v50 = vld [vmem:[%s907_s1 + $0x198] sm:$0xff]  ;;  %v25_v53 = vld [vmem:[%s907_s1 + $0x10] sm:$0xff]  ;;  %v56_v56 = vld [vmem:[%s907_s1 + $0x108] sm:$0xff] }
  0x13   :  { %203 = vmatpush.msra.mxu1 %v47_v31  ;;  %184 = vmatpush.msra.mxu0 %v30_v33  ;;  %v42_v51 = vld [vmem:[%s907_s1 + $0x98] sm:$0xff]  ;;  %v73_v54 = vld [vmem:[%s907_s1 + $0x190] sm:$0xff]  ;;  %v24_v57 = vld [vmem:[%s907_s1 + $0x8] sm:$0xff] }
  0x14   :  { %244 = vmatpush.msra.mxu3 %v78_v34  ;;  %225 = vmatpush.msra.mxu2 %v61_v36  ;;  %v41_v55 = vld [vmem:[%s907_s1 + $0x90] sm:$0xff]  ;;  %v72_v58 = vld [vmem:[%s907_s1 + $0x188] sm:$0xff]  ;;  %v55_v60 = vld [vmem:[%s907_s1 + $0x100] sm:$0xff] }
  0x15   :  { %204 = vmatpush.msra.mxu1 %v46_v35  ;;  %185 = vmatpush.msra.mxu0 %v29_v37  ;;  %v40_v59 = vld [vmem:[%s907_s1 + $0x88] sm:$0xff]  ;;  %v23_v61 = vld [vmem:[%s907_s1] sm:$0xff]  ;;  %v134_v62 = vld [vmem:[%s907_s1 + $0x378] sm:$0xff] }
  0x16   :  { %245 = vmatpush.msra.mxu3 %v77_v38  ;;  %226 = vmatpush.msra.mxu2 %v60_v40  ;;  %v71_v63 = vld [vmem:[%s907_s1 + $0x180] sm:$0xff]  ;;  %v102_v0 = vld [vmem:[%s907_s1 + $0x278] sm:$0xff]  ;;  %v133_v2 = vld [vmem:[%s907_s1 + $0x370] sm:$0xff] }
  0x17   :  { %205 = vmatpush.msra.mxu1 %v45_v39  ;;  %186 = vmatpush.msra.mxu0 %v28_v41  ;;  %v150_v1 = vld [vmem:[%s907_s1 + $0x3f8] sm:$0xff]  ;;  %v39_v3 = vld [vmem:[%s907_s1 + $0x80] sm:$0xff]  ;;  %v101_v4 = vld [vmem:[%s907_s1 + $0x270] sm:$0xff] }
  0x18   :  { %246 = vmatpush.msra.mxu3 %v76_v42  ;;  %227 = vmatpush.msra.mxu2 %v59_v44  ;;  %v118_v5 = vld [vmem:[%s907_s1 + $0x2f8] sm:$0xff]  ;;  %v132_v6 = vld [vmem:[%s907_s1 + $0x368] sm:$0xff]  ;;  %v149_v7 = vld [vmem:[%s907_s1 + $0x3f0] sm:$0xff] }
  0x19   :  { %206 = vmatpush.msra.mxu1 %v44_v43  ;;  %187 = vmatpush.msra.mxu0 %v27_v45  ;;  %v100_v8 = vld [vmem:[%s907_s1 + $0x268] sm:$0xff]  ;;  %v117_v9 = vld [vmem:[%s907_s1 + $0x2f0] sm:$0xff]  ;;  %v131_v10 = vld [vmem:[%s907_s1 + $0x360] sm:$0xff] }
  0x1a   :  { %247 = vmatpush.msra.mxu3 %v75_v46  ;;  %228 = vmatpush.msra.mxu2 %v58_v48  ;;  %v148_v11 = vld [vmem:[%s907_s1 + $0x3e8] sm:$0xff]  ;;  %v99_v12 = vld [vmem:[%s907_s1 + $0x260] sm:$0xff]  ;;  %v130_v15 = vld [vmem:[%s907_s1 + $0x358] sm:$0xff] }
  0x1b   :  { %207 = vmatpush.msra.mxu1 %v43_v47  ;;  %188 = vmatpush.msra.mxu0 %v26_v49  ;;  %v116_v13 = vld [vmem:[%s907_s1 + $0x2e8] sm:$0xff]  ;;  %v21_v14 = vld [vmem:[%s906_s0] sm:$0xff]  ;;  %v98_v17 = vld [vmem:[%s907_s1 + $0x258] sm:$0xff] }
  0x1c   :  { %248 = vmatpush.msra.mxu3 %v74_v50  ;;  %229 = vmatpush.msra.mxu2 %v57_v52  ;;  %v147_v16 = vld [vmem:[%s907_s1 + $0x3e0] sm:$0xff]  ;;  %157 = vst [vmem:[#allocation1] ss:$4 sm:$0xff] %v21_v14  ;;  %v129_v19 = vld [vmem:[%s907_s1 + $0x350] sm:$0xff]  ;;  %v146_v20 = vld [vmem:[%s907_s1 + $0x3d8] sm:$0xff] }
  0x1d   :  { %208 = vmatpush.msra.mxu1 %v42_v51  ;;  %189 = vmatpush.msra.mxu0 %v25_v53  ;;  %v115_v18 = vld [vmem:[%s907_s1 + $0x2e0] sm:$0xff]  ;;  %v97_v21 = vld [vmem:[%s907_s1 + $0x250] sm:$0xff]  ;;  %v114_v22 = vld [vmem:[%s907_s1 + $0x2d8] sm:$0xff] }
  0x1e   :  { %249 = vmatpush.msra.mxu3 %v73_v54  ;;  %230 = vmatpush.msra.mxu2 %v56_v56  ;;  %v128_v23 = vld [vmem:[%s907_s1 + $0x348] sm:$0xff]  ;;  %v145_v24 = vld [vmem:[%s907_s1 + $0x3d0] sm:$0xff]  ;;  %v127_v28 = vld [vmem:[%s907_s1 + $0x340] sm:$0xff] }
  0x1f   :  { %209 = vmatpush.msra.mxu1 %v41_v55  ;;  %190 = vmatpush.msra.mxu0 %v24_v57  ;;  %v22_v25 = vld [vmem:[%s906_s0 + $0x8] sm:$0xff]  ;;  %v113_v27 = vld [vmem:[%s907_s1 + $0x2d0] sm:$0xff]  ;;  %v95_v30 = vld [vmem:[%s907_s1 + $0x240] sm:$0xff] }
  0x20   :  { %250 = vmatpush.msra.mxu3 %v72_v58  ;;  %231 = vmatpush.msra.mxu2 %v55_v60  ;;  %v96_v26 = vld [vmem:[%s907_s1 + $0x248] sm:$0xff]  ;;  %159 = vst [vmem:[#allocation1 + $0x20] ss:$4 sm:$0xff] %v22_v25  ;;  %v126_v32 = vld [vmem:[%s907_s1 + $0x338] sm:$0xff]  ;;  %v143_v33 = vld [vmem:[%s907_s1 + $0x3c0] sm:$0xff] }
  0x21   :  { %210 = vmatpush.msra.mxu1 %v40_v59  ;;  %191 = vmatpush.msra.mxu0 %v23_v61  ;;  %v144_v29 = vld [vmem:[%s907_s1 + $0x3c8] sm:$0xff]  ;;  %v94_v34 = vld [vmem:[%s907_s1 + $0x238] sm:$0xff]  ;;  %v111_v35 = vld [vmem:[%s907_s1 + $0x2c0] sm:$0xff] }
  0x22   :  { %296 = vmatpush.msrb.mxu2 %v134_v62  ;;  %251 = vmatpush.msra.mxu3 %v71_v63  ;;  %v112_v31 = vld [vmem:[%s907_s1 + $0x2c8] sm:$0xff] }
  0x23   :  { %256 = vmatpush.msrb.mxu0 %v102_v0  ;;  %211 = vmatpush.msra.mxu1 %v39_v3 }
  0x24   :  { %316 = vmatpush.msrb.mxu3 %v150_v1  ;;  %297 = vmatpush.msrb.mxu2 %v133_v2 }
  0x25   :  { %257 = vmatpush.msrb.mxu0 %v101_v4  ;;  %276 = vmatpush.msrb.mxu1 %v118_v5 }
  0x26   :  { %298 = vmatpush.msrb.mxu2 %v132_v6  ;;  %317 = vmatpush.msrb.mxu3 %v149_v7 }
  0x27   :  { %258 = vmatpush.msrb.mxu0 %v100_v8  ;;  %277 = vmatpush.msrb.mxu1 %v117_v9 }
  0x28   :  { %299 = vmatpush.msrb.mxu2 %v131_v10  ;;  %318 = vmatpush.msrb.mxu3 %v148_v11 }
  0x29   :  { %259 = vmatpush.msrb.mxu0 %v99_v12  ;;  %278 = vmatpush.msrb.mxu1 %v116_v13 }
  0x2a   :  { %300 = vmatpush.msrb.mxu2 %v130_v15  ;;  %319 = vmatpush.msrb.mxu3 %v147_v16 }
  0x2b   :  { %260 = vmatpush.msrb.mxu0 %v98_v17  ;;  %279 = vmatpush.msrb.mxu1 %v115_v18 }
  0x2c   :  { %301 = vmatpush.msrb.mxu2 %v129_v19  ;;  %320 = vmatpush.msrb.mxu3 %v146_v20 }
  0x2d   :  { %261 = vmatpush.msrb.mxu0 %v97_v21  ;;  %280 = vmatpush.msrb.mxu1 %v114_v22 }
  0x2e   :  { %302 = vmatpush.msrb.mxu2 %v128_v23  ;;  %321 = vmatpush.msrb.mxu3 %v145_v24 }
  0x2f   :  { %262 = vmatpush.msrb.mxu0 %v96_v26  ;;  %281 = vmatpush.msrb.mxu1 %v113_v27 }
  0x30   :  { %303 = vmatpush.msrb.mxu2 %v127_v28  ;;  %322 = vmatpush.msrb.mxu3 %v144_v29 }
  0x31   :  { %10 = vsyncpa [#allocation3], 0  ;;  %263 = vmatpush.msrb.mxu0 %v95_v30  ;;  %282 = vmatpush.msrb.mxu1 %v112_v31  ;;  %v125_v36 = vld [vmem:[%s907_s1 + $0x330] sm:$0xff]  ;;  %v142_v37 = vld [vmem:[%s907_s1 + $0x3b8] sm:$0xff]  ;;  %vm349_vm0 = vcmask 523264   ;;  %vm373_vm1 = vcmask 58368  }
  0x32   :  { %304 = vmatpush.msrb.mxu2 %v126_v32  ;;  %323 = vmatpush.msrb.mxu3 %v143_v33  ;;  %v93_v38 = vld [vmem:[%s907_s1 + $0x230] sm:$0xff]  ;;  %v110_v39 = vld [vmem:[%s907_s1 + $0x2b8] sm:$0xff]  ;;  %v124_v40 = vld [vmem:[%s907_s1 + $0x328] sm:$0xff]  ;;  %s406_s19 = sshll.u32 %s911_s5, 4  ;;  %s407_s19 = int_to_ptr.hbm [resolvable:$true] %s406_s19 }
  0x33   :  { %264 = vmatpush.msrb.mxu0 %v94_v34  ;;  %283 = vmatpush.msrb.mxu1 %v111_v35  ;;  %v141_v41 = vld [vmem:[%s907_s1 + $0x3b0] sm:$0xff]  ;;  %v92_v42 = vld [vmem:[%s907_s1 + $0x228] sm:$0xff]  ;;  %v123_v44 = vld [vmem:[%s907_s1 + $0x320] sm:$0xff] }
  0x34   :  { %305 = vmatpush.msrb.mxu2 %v125_v36  ;;  %324 = vmatpush.msrb.mxu3 %v142_v37  ;;  %v109_v43 = vld [vmem:[%s907_s1 + $0x2b0] sm:$0xff]  ;;  %v140_v45 = vld [vmem:[%s907_s1 + $0x3a8] sm:$0xff]  ;;  %v91_v47 = vld [vmem:[%s907_s1 + $0x220] sm:$0xff] }
  0x35   :  { %265 = vmatpush.msrb.mxu0 %v93_v38  ;;  %284 = vmatpush.msrb.mxu1 %v110_v39  ;;  %v162_v46 = vld.sshfl [vmem:[#allocation1 + $0x10] sm:$0xff pattern:$0x73625140]  ;;  %v108_v48 = vld [vmem:[%s907_s1 + $0x2a8] sm:$0xff]  ;;  %v122_v49 = vld [vmem:[%s907_s1 + $0x318] sm:$0xff] }
  0x36   :  { %306 = vmatpush.msrb.mxu2 %v124_v40  ;;  %325 = vmatpush.msrb.mxu3 %v141_v41  ;;  %v139_v50 = vld [vmem:[%s907_s1 + $0x3a0] sm:$0xff]  ;;  %v163_v52 = vld.sshfl [vmem:[#allocation1 + $0x18] sm:$0xff pattern:$0x73625140]  ;;  %v121_v55 = vld [vmem:[%s907_s1 + $0x310] sm:$0xff] }
  0x37   :  { %266 = vmatpush.msrb.mxu0 %v92_v42  ;;  %285 = vmatpush.msrb.mxu1 %v109_v43  ;;  %v160_v51 = vld.sshfl [vmem:[#allocation1] sm:$0xff pattern:$0x73625140]  ;;  %v90_v53 = vld [vmem:[%s907_s1 + $0x218] sm:$0xff]  ;;  %v89_v58 = vld [vmem:[%s907_s1 + $0x210] sm:$0xff] }
  0x38   :  { %307 = vmatpush.msrb.mxu2 %v123_v44  ;;  %326 = vmatpush.msrb.mxu3 %v140_v45  ;;  %v107_v54 = vld [vmem:[%s907_s1 + $0x2a0] sm:$0xff]  ;;  %v138_v56 = vld [vmem:[%s907_s1 + $0x398] sm:$0xff]  ;;  %v161_v57 = vld.sshfl [vmem:[#allocation1 + $0x8] sm:$0xff pattern:$0x73625140] }
  0x39   :  { %232 = vmatmul.f32.vlgmr.msra.gmra.mxu2 %v162_v46  ;;  %267 = vmatpush.msrb.mxu0 %v91_v47  ;;  %v106_v59 = vld [vmem:[%s907_s1 + $0x298] sm:$0xff]  ;;  %v120_v60 = vld [vmem:[%s907_s1 + $0x308] sm:$0xff]  ;;  %v137_v61 = vld [vmem:[%s907_s1 + $0x390] sm:$0xff] }
  0x3a   :  { %286 = vmatpush.msrb.mxu1 %v108_v48  ;;  %308 = vmatpush.msrb.mxu2 %v122_v49  ;;  %v88_v62 = vld [vmem:[%s907_s1 + $0x208] sm:$0xff]  ;;  %v105_v63 = vld [vmem:[%s907_s1 + $0x290] sm:$0xff]  ;;  %v119_v0 = vld [vmem:[%s907_s1 + $0x300] sm:$0xff] }
  0x3b   :  { %327 = vmatpush.msrb.mxu3 %v139_v50  ;;  %192 = vmatmul.f32.vlgmr.msra.gmra.mxu0 %v160_v51  ;;  %v136_v1 = vld [vmem:[%s907_s1 + $0x388] sm:$0xff]  ;;  %v166_v2 = vld.sshfl [vmem:[#allocation1 + $0x30] sm:$0xff pattern:$0x73625140]  ;;  %v87_v3 = vld [vmem:[%s907_s1 + $0x200] sm:$0xff] }
  0x3c   :  { %252 = vmatmul.f32.vlgmr.msra.gmra.mxu3 %v163_v52  ;;  %268 = vmatpush.msrb.mxu0 %v90_v53  ;;  %v104_v4 = vld [vmem:[%s907_s1 + $0x288] sm:$0xff]  ;;  %v135_v5 = vld [vmem:[%s907_s1 + $0x380] sm:$0xff]  ;;  %v167_v7 = vld.sshfl [vmem:[#allocation1 + $0x38] sm:$0xff pattern:$0x73625140] }
  0x3d   :  { %287 = vmatpush.msrb.mxu1 %v107_v54  ;;  %309 = vmatpush.msrb.mxu2 %v121_v55  ;;  %v164_v6 = vld.sshfl [vmem:[#allocation1 + $0x20] sm:$0xff pattern:$0x73625140]  ;;  %v165_v9 = vld.sshfl [vmem:[#allocation1 + $0x28] sm:$0xff pattern:$0x73625140] }
  0x3e   :  { %328 = vmatpush.msrb.mxu3 %v138_v56  ;;  %212 = vmatmul.f32.vlgmr.msra.gmra.mxu1 %v161_v57  ;;  %v103_v8 = vld [vmem:[%s907_s1 + $0x280] sm:$0xff]  ;;  %v344_v10 = vld [vmem:[%s909_s3 + $0x38] sm:$0xff]  ;;  %v343_v11 = vld [vmem:[%s909_s3 + $0x30] sm:$0xff] }
  0x3f   :  { %269 = vmatpush.msrb.mxu0 %v89_v58  ;;  %288 = vmatpush.msrb.mxu1 %v106_v59  ;;  %v342_v12 = vld [vmem:[%s909_s3 + $0x28] sm:$0xff]  ;;  %v341_v13 = vld [vmem:[%s909_s3 + $0x20] sm:$0xff]  ;;  %v340_v14 = vld [vmem:[%s909_s3 + $0x18] sm:$0xff] }
  0x40   :  { %310 = vmatpush.msrb.mxu2 %v120_v60  ;;  %329 = vmatpush.msrb.mxu3 %v137_v61  ;;  %v339_v15 = vld [vmem:[%s909_s3 + $0x10] sm:$0xff]  ;;  %v338_v16 = vld [vmem:[%s909_s3 + $0x8] sm:$0xff]  ;;  %v337_v17 = vld [vmem:[%s909_s3] sm:$0xff] }
  0x41   :  { %270 = vmatpush.msrb.mxu0 %v88_v62  ;;  %289 = vmatpush.msrb.mxu1 %v105_v63  ;;  %v417_v18 = vld [vmem:[%s908_s2] ss:$0 sm:$0xff] }
  0x42   :  { %311 = vmatpush.msrb.mxu2 %v119_v0  ;;  %330 = vmatpush.msrb.mxu3 %v136_v1  ;;  %v418_v36 = vld [vmem:[%s910_s4] ss:$0 sm:$0xff]  ;;  %s449_s4 = smov [#allocation2]  }
  0x43   :  { %312 = vmatmul.f32.vlgmr.msrb.gmra.mxu2 %v166_v2  ;;  %271 = vmatpush.msrb.mxu0 %v87_v3  ;;  %s404_s16 = sshll.u32 %s449_s4, 4  ;;  %s405_s16 = int_to_ptr.vmem [resolvable:$true] %s404_s16 }
  0x44   :  { %290 = vmatpush.msrb.mxu1 %v104_v4  ;;  %331 = vmatpush.msrb.mxu3 %v135_v5 }
  0x45   :  { %272 = vmatmul.f32.vlgmr.msrb.gmra.mxu0 %v164_v6  ;;  %332 = vmatmul.f32.vlgmr.msrb.gmra.mxu3 %v167_v7 }
  0x46   :  { %291 = vmatpush.msrb.mxu1 %v103_v8  ;;  %361 = vmatpush.msra.mxu0 %v344_v10 }
  0x47   :  { %292 = vmatmul.f32.vlgmr.msrb.gmra.mxu1 %v165_v9 }
  0x48   :  { %362 = vmatpush.msra.mxu0 %v343_v11 }
  0x4a   :  { %363 = vmatpush.msra.mxu0 %v342_v12 }
  0x4c   :  { %364 = vmatpush.msra.mxu0 %v341_v13 }
  0x4e   :  { %365 = vmatpush.msra.mxu0 %v340_v14 }
  0x50   :  { %366 = vmatpush.msra.mxu0 %v339_v15 }
  0x52   :  { %367 = vmatpush.msra.mxu0 %v338_v16 }
  0x54   :  { %368 = vmatpush.msra.mxu0 %v337_v17 }
  0xb8   :  { %v193_v19 = vpop.f32.mrf.mxu0 }
  0xb9   :  { %v194_v20 = vadd.f32 %v417_v18, %v193_v19 }
  0xbb   :  { %v213_v21 = vpop.f32.mrf.mxu1 }
  0xbc   :  { %v214_v22 = vadd.f32 %v213_v21, %v194_v20  ;;  %v233_v23 = vpop.f32.mrf.mxu2 }
  0xbe   :  { %v234_v24 = vadd.f32 %v233_v23, %v214_v22 }
  0xbf   :  { %v253_v25 = vpop.f32.mrf.mxu3 }
  0xc0   :  { %v254_v26 = vadd.f32 %v253_v25, %v234_v24 }
  0xc2   :  { %v273_v27 = vpop.f32.mrf.mxu0 }
  0xc3   :  { %v274_v28 = vadd.f32 %v273_v27, %v254_v26 }
  0xc4   :  { %v293_v29 = vpop.f32.mrf.mxu1 }
  0xc5   :  { %v294_v30 = vadd.f32 %v293_v29, %v274_v28 }
  0xc6   :  { %v313_v31 = vpop.f32.mrf.mxu2 }
  0xc7   :  { %v314_v32 = vadd.f32 %v313_v31, %v294_v30 }
  0xc8   :  { %v333_v33 = vpop.f32.mrf.mxu3 }
  0xc9   :  { %v334_v34 = vadd.f32 %v333_v33, %v314_v32 }
  0xcb   :  { %v336_v35 = vmax.f32 %v334_v34, 0.0 }
  0xcd   :  { %415 = vmatmul.msk.f32.vlgmr.msra.gmra.mxu0 %vm349_vm0, %v336_v35 }
 0x14a   :  { %v370_v37 = vpop.f32.mrf.mxu0 }
 0x14b   :  { %v371_v38 = vadd.f32 %v418_v36, %v370_v37 }
 0x14d   :  { %v374_v39 = vsel %vm373_vm1, %v371_v38, -inf }
 0x14e   :  { %375 = vmax.xlane.f32.xlu0 %v374_v39 }
 0x1c1   :  { %v376_v40 = vpop.xlane.xlu0 %375 }
 0x1c2   :  { %v377_v41 = vsub.f32 %v371_v38, %v376_v40 }
 0x1c4   :  { %v378_v42 = vmul.f32 1.442695, %v377_v41 }
 0x1c6   :  { %419 = vpow2.f32 %v378_v42 }
 0x1cc   :  { %v420_v43 = vpop.eup %419 }
 0x1cd   :  { %v380_v44 = vsel %vm373_vm1, %v420_v43, 0.0 }
 0x1ce   :  { %381 = vadd.xlane.f32.xlu0 %v380_v44 }
 0x241   :  { %v382_v45 = vpop.xlane.xlu0 %381 }
 0x242   :  { %421 = vrcp.f32 %v382_v45  ;;  %v394_v49 = vand.u32 2147483648, %v382_v45  ;;  %v392_v51 = vand.u32 2147483647, %v382_v45  ;;  %vm388_vm3 = vweird.f32 %v382_v45 }
 0x244   :  { %v395_v53 = vor.u32 1.1754944e-38, %v394_v49  ;;  %vm393_vm5 = vcmp.eq.f32.partialorder %v392_v51, 8.507059e+37 }
 0x248   :  { %v422_v46 = vpop.eup %421 }
 0x249   :  { %v384_v47 = vmul.f32 %v422_v46, %v382_v45  ;;  %vm389_vm2 = vweird.f32 %v422_v46 }
 0x24a   :  { %vm390_vm4 = vmor %vm388_vm3, %vm389_vm2 }
 0x24b   :  { %v385_v48 = vsub.f32 1.0, %v384_v47 }
 0x24d   :  { %v386_v50 = vmul.f32 %v422_v46, %v385_v48 }
 0x24f   :  { %v387_v52 = vadd.f32 %v422_v46, %v386_v50 }
 0x251   :  { %v391_v54 = vsel %vm390_vm4, %v422_v46, %v387_v52 }
 0x252   :  { %v396_v55 = vsel %vm393_vm5, %v395_v53, %v391_v54 }
 0x253   :  { %v397_v56 = vmul.f32 %v420_v43, %v396_v55 }
 0x255   :  { %398 = vst.msk [vmem:[#allocation2] sm:$0x3] %vm373_vm1, %v397_v56 }
 0x256   :  { %409 = dma.vmem_to_hbm [thread:$0]  %s405_s16, 32, %s407_s19, [#allocation3]  }
 0x257   :  { %447 = dma.done.wait [#allocation3], 32  }
 0x258   :  { %448 = vsyncadd [#allocation3], 4294967264 }
 0x259   :  { %414 = vsyncpa [#allocation3], 1 }

// kernel: cnn_detector_forward.3
= control target key start
LH: loop header
LB: loop body
LE: loop exit
PB: predicated region body
PF: predicated region fallthrough
CT: control target
= control target key end

     0   :  { %13 = vsyncpa [#allocation4], 0  ;;  %s5293_s0 = inlined_call_operand.vmem [shape: f32[2,25,512], index: 0, kind: input, shape index: {}]   ;;  %s5294_s1 = inlined_call_operand.hbm [shape: f32[25,512], index: 1, kind: input, shape index: {}]   ;;  %s5295_s2 = inlined_call_operand.hbm [shape: f32[16,25], index: 2, kind: input, shape index: {}]   ;;  %s5296_s3 = inlined_call_operand.vmem [shape: f32[16,1], index: 3, kind: input, shape index: {}]   ;;  %s5297_s4 = inlined_call_operand.hbm [shape: f32[64,400], index: 4, kind: input, shape index: {}]   ;;  %s5298_s5 = inlined_call_operand.vmem [shape: f32[64,1], index: 5, kind: input, shape index: {}]   ;;  %s5299_s6 = inlined_call_operand.hbm [shape: f32[8,64], index: 6, kind: input, shape index: {}]   ;;  %s5300_s7 = inlined_call_operand.vmem [shape: f32[8,1], index: 7, kind: input, shape index: {}]   ;;  %s5301_s8 = inlined_call_operand.vmem [shape: f32[2,8,512], index: 8, kind: output, shape index: {}]  }
   0x1   :  { %14 = vsyncpa [#allocation6], 0 }
   0x2   :  { %15 = vsyncpa [#allocation9], 0  ;;  %s3092_s27 = smov 0  }
   0x3 LB: > { %s250_s30 = sshll.u32 %s5295_s2, 4  ;;  %s3101_s9 = sadd.s32 4294967295, %s3017_s27   ;;  %s3017_s27 = sphi %s3092_s27, %s21_s27   ;;  %s251_s30 = int_to_ptr.hbm [resolvable:$true] %s250_s30 }
   0x4   : > { %p2700_p0 = scmp.ge.s32.totalorder %s3017_s27, 1  ;;  %p225_p1 = scmp.lt.s32.totalorder %s3017_s27, 3 }
   0x5   : > { %p2796_p2 = scmp.eq.s32.totalorder %s3101_s9, 0  ;;  %s3019_s11 = smov [#allocation5]  }
   0x6   : > { %p3106_p3 = pnand %p2700_p0, %p225_p1  ;;  %s252_s12 = sshll.u32 %s3019_s11, 4  ;;  %s253_s12 = int_to_ptr.vmem [resolvable:$true] %s252_s12 }
   0x7   : > { %s236_s15 = sshll.u32 %s5294_s1, 4  ;;  %s3020_s17 = smov [#allocation3]   ;;  %s237_s15 = int_to_ptr.hbm [resolvable:$true] %s236_s15 }
   0x8   : > { %p2783_p4 = pneg %p3106_p3  ;;  %s238_s18 = sshll.u32 %s3020_s17, 4  ;;  %s239_s18 = int_to_ptr.vmem [resolvable:$true] %s238_s18 }
   0x9   : > { %s3021_s19 = smov 128   ;;  %s3022_s20 = smov 8  }
   0xa   : > { %p3117_p5 = pnand %p2796_p2, %p2783_p4  ;;  %s267_s23 = sshll.u32 %s5297_s4, 4  ;;  %s268_s23 = int_to_ptr.hbm [resolvable:$true] %s267_s23 }
   0xb   : > { %s3023_s24 = smov 512   ;;  %s3024_s25 = smov 32  }
   0xc   : > { %2789 = dma.hbm_to_vmem [thread:$0]  (!%p3117_p5), %s251_s30, 256, %s253_s12, [#allocation6], %s3021_s19, %s3021_s19, %s3022_s20  }
   0xd   : > { %2786 = dma.hbm_to_vmem [thread:$0]  (!%p3117_p5), %s237_s15, 2048, %s239_s18, [#allocation4], %s3023_s24, %s3023_s24, %s3024_s25  }
   0xe   : > { %s3025_s26 = smov [#allocation7]   ;;  %s285_s13 = sshll.u32 %s5299_s6, 4  ;;  %s286_s13 = int_to_ptr.hbm [resolvable:$true] %s285_s13 }
   0xf   : > { %s269_s28 = sshll.u32 %s3025_s26, 4  ;;  %s3026_s30 = smov [#allocation8]   ;;  %s270_s28 = int_to_ptr.vmem [resolvable:$true] %s269_s28 }
  0x10   : > { %2792 = dma.hbm_to_vmem [thread:$0]  (!%p3117_p5), %s268_s23, 4096, %s270_s28, [#allocation6], %s3023_s24, %s3023_s24, %s3024_s25  }
  0x11   : > { %s287_s12 = sshll.u32 %s3026_s30, 4  ;;  %311 = sbr.rel (%p3106_p3) target bundleno = 1095 (0x447), region = 52  ;;  %s288_s12 = int_to_ptr.vmem [resolvable:$true] %s287_s12 }
  0x12   : > { %2795 = dma.hbm_to_vmem [thread:$0]  (!%p3117_p5), %s286_s13, 128, %s288_s12, [#allocation9]  }
  0x16   : > { %3004 = dma.done.wait (%p2796_p2), [#allocation4], 2048  }
  0x17   : > { %3006 = vsyncadd (%p2796_p2), [#allocation4], 4294965248 }
  0x18   : > { %3008 = dma.done.wait (%p2796_p2), [#allocation6], 4352  }
  0x19   : > { %3010 = vsyncadd (%p2796_p2), [#allocation6], 4294962944 }
  0x1a   : > { %3012 = dma.done.wait (%p2796_p2), [#allocation9], 128  }
  0x1b   : > { %3014 = vsyncadd (%p2796_p2), [#allocation9], 4294967168  ;;  %p361_p6 = scmp.lt.s32.totalorder %s3101_s9, 1  ;;  %v3027_v0 = vmov 0   ;;  %vm408_vm0 = vcmask 1040384   ;;  %v390_v5 = vld [vmem:[%s5296_s3 + $0x8] sm:$0xff] }
  0x1c   : > { %2840 = vset.pattern.permute.xlu0 %v3027_v0  ;;  %2842 = vset.pattern.permute.xlu2 %v3027_v0  ;;  %v371_v18 = vld [vmem:[#allocation5] sm:$0xff]  ;;  %vm401_vm1 = vcmask 203776   ;;  %v372_v20 = vld [vmem:[#allocation5 + $0x8] sm:$0xff]  ;;  %s3028_s21 = smov 32   ;;  %s3029_s22 = smov 63  }
  0x1d   : > { %s5727_s9 = smov (!%p361_p6, %s3101_s9), 1  ;;  %2841 = vset.pattern.permute.xlu1 %v3027_v0  ;;  %398 = vperm.xlu0 %2840, %v390_v5   ;;  %v389_v19 = vld [vmem:[%s5296_s3] sm:$0xff]  ;;  %s3030_s23 = smov 64  }
  0x1e   : > { %s2765_s10 = sshll.u32 %s5727_s9, 7  ;;  %s3031_s24 = smov 98  }
  0x1f   : > { %s365_s16 = scalar_lea.vmem %s5293_s0, %s2765_s10  ;;  %s3032_s25 = smov 33  }
  0x20   : > { %v385_v1 = vld [vmem:[%s365_s16 + $0x60] sm:$0x1]  ;;  %v386_v2 = vld [vmem:[%s365_s16 + $0x68] sm:$0x1]  ;;  %v387_v3 = vld [vmem:[%s365_s16 + $0x70] sm:$0x1] }
  0x21   : > { %2715 = vmatpush.msk.msra.mxu0 %vm408_vm0, %v385_v1  ;;  %2718 = vmatpush.msk.msra.mxu1 %vm408_vm0, %v386_v2  ;;  %v388_v4 = vld [vmem:[%s365_s16 + $0x78] sm:$0x1]  ;;  %v381_v6 = vld [vmem:[%s365_s16 + $0x40] sm:$0xff]  ;;  %v382_v7 = vld [vmem:[%s365_s16 + $0x48] sm:$0xff]  ;;  %s3033_s26 = smov 65   ;;  %s3034_s28 = smov 126  }
  0x22   : > { %2721 = vmatpush.msk.msra.mxu2 %vm408_vm0, %v387_v3  ;;  %2724 = vmatpush.msk.msra.mxu3 %vm408_vm0, %v388_v4  ;;  %v383_v8 = vld [vmem:[%s365_s16 + $0x50] sm:$0xff]  ;;  %v384_v9 = vld [vmem:[%s365_s16 + $0x58] sm:$0xff]  ;;  %v377_v10 = vld [vmem:[%s365_s16 + $0x20] sm:$0xff]  ;;  %s3035_s29 = smov 34   ;;  %s3036_s11 = smov 66   ;;  %v553_v4 = vlaneseq }
  0x23   : > { %434 = vmatpush.msra.mxu0 %v381_v6  ;;  %v378_v11 = vld [vmem:[%s365_s16 + $0x28] sm:$0xff]  ;;  %v379_v12 = vld [vmem:[%s365_s16 + $0x30] sm:$0xff]  ;;  %457 = vmatpush.msra.mxu1 %v382_v7  ;;  %v380_v13 = vld [vmem:[%s365_s16 + $0x38] sm:$0xff]  ;;  %s3037_s13 = smov 127   ;;  %s3038_s30 = smov 62  }
  0x24   : > { %480 = vmatpush.msra.mxu2 %v383_v8  ;;  %v373_v14 = vld [vmem:[%s365_s16] sm:$0xff]  ;;  %503 = vmatpush.msra.mxu3 %v384_v9  ;;  %v374_v15 = vld [vmem:[%s365_s16 + $0x8] sm:$0xff]  ;;  %v375_v16 = vld [vmem:[%s365_s16 + $0x10] sm:$0xff]  ;;  %s3039_s12 = smov 94   ;;  %s3040_s10 = smov 1   ;;  %v3391_v8 = vand.u32 127, %v553_v4 }
  0x25   : > { %435 = vmatpush.msra.mxu0 %v377_v10  ;;  %458 = vmatpush.msra.mxu1 %v378_v11  ;;  %v376_v17 = vld [vmem:[%s365_s16 + $0x18] sm:$0xff]  ;;  %s3041_s14 = smov 95   ;;  %s3042_s15 = smov 96   ;;  %v3393_v9 = vld [vmem:[#allocation3 + $0x40] sm:$0xff] }
  0x26   : > { %481 = vmatpush.msra.mxu2 %v379_v12  ;;  %504 = vmatpush.msra.mxu3 %v380_v13  ;;  %s3043_s16 = smov 2   ;;  %vm690_vm2 = vcmp.lt.s32.totalorder %v3391_v8, 63  ;;  %s3044_s17 = smov 30   ;;  %v1474_v12 = vperm.slane %v3393_v9, 7  ;;  %vm645_vm3 = vcmp.lt.s32.totalorder %v3391_v8, 64  ;;  %vm1205_vm4 = vcmp.lt.s32.totalorder %v3391_v8, 98 }
  0x27   : > { %436 = vmatpush.msra.mxu0 %v373_v14  ;;  %459 = vmatpush.msra.mxu1 %v374_v15  ;;  %s3045_s18 = smov 97   ;;  %vm600_vm5 = vcmp.lt.s32.totalorder %v3391_v8, 65  ;;  %s3046_s19 = smov 31   ;;  %vm5408_vm6 = vcmp.lt.s32.totalorder %v3391_v8, 126  ;;  %vm555_vm7 = vcmp.lt.s32.totalorder %v3391_v8, 66  ;;  %vm5404_vm8 = vcmp.lt.s32.totalorder %v3391_v8, 127 }
  0x28   : > { %482 = vmatpush.msra.mxu2 %v375_v16  ;;  %505 = vmatpush.msra.mxu3 %v376_v17  ;;  %vm1385_vm9 = vcmp.lt.s32.totalorder %v3391_v8, 94  ;;  %vm5337_vm10 = vcmp.lt.s32.totalorder %v3391_v8, 62  ;;  %vm5403_vm11 = vcmp.lt.s32.totalorder %v3391_v8, 1  ;;  %vm5349_vm12 = vcmp.lt.s32.totalorder %v3391_v8, 95 }
  0x29   : > { %2716 = vmatmul.msk.f32.vlgmr.msra.gmra.mxu0 %vm401_vm1, %v371_v18  ;;  %2719 = vmatmul.msk.f32.vlgmr.msra.gmra.mxu1 %vm401_vm1, %v371_v18  ;;  %vm870_vm13 = vcmp.lt.s32.totalorder %v3391_v8, 32  ;;  %vm825_vm14 = vcmp.lt.s32.totalorder %v3391_v8, 33  ;;  %vm780_vm15 = vcmp.lt.s32.totalorder %v3391_v8, 34  ;;  %vm5400_vm0 = vcmp.lt.s32.totalorder %v3391_v8, 2 }
  0x2a   : > { %2722 = vmatmul.msk.f32.vlgmr.msra.gmra.mxu2 %vm401_vm1, %v371_v18  ;;  %2725 = vmatmul.msk.f32.vlgmr.msra.gmra.mxu3 %vm401_vm1, %v371_v18 }
  0x2b   : > { %393 = vperm.xlu0 %2840, %v389_v19   ;;  %v1454_v19 = vperm.slane %v3393_v9, 6 }
  0x31   : > { %2717 = vmatmul.msk.f32.gmra.mxu0 %vm401_vm1, %v372_v20  ;;  %2720 = vmatmul.msk.f32.gmra.mxu1 %vm401_vm1, %v372_v20 }
  0x32   : > { %2723 = vmatmul.msk.f32.gmra.mxu2 %vm401_vm1, %v372_v20  ;;  %2726 = vmatmul.msk.f32.gmra.mxu3 %vm401_vm1, %v372_v20  ;;  %vm1794_vm1 = vcmask 130048  }
  0x8f   : > { %v3171_v21 = vpop.permute.xlu0 %398 }
  0x9d   : > { %v3173_v22 = vpop.permute.xlu0 %393 }
  0xa6   : > { %v438_v23 = vpop.f32.mrf.mxu0  ;;  %v461_v25 = vpop.f32.mrf.mxu1 }
  0xa7   : > { %v439_v24 = vadd.f32 %v438_v23, %v3173_v22  ;;  %v462_v26 = vadd.f32 %v461_v25, %v3173_v22 }
  0xa9   : > { %v3177_v27 = vmax.f32 %v439_v24, 0.0  ;;  %v3179_v28 = vmax.f32 %v462_v26, 0.0  ;;  %v3449_v26 = vld [vmem:[#allocation3 + $0x20] sm:$0xff] }
  0xab   : > { %854 = vrot.lane.b32.xlu1 %v3177_v27, %s3028_s21  ;;  %674 = vrot.lane.b32.xlu2 %v3177_v27, %s3029_s22 }
  0xac   : > { %633 = vrot.lane.b32.xlu0 %v3179_v28, %s3030_s23 }
  0xad   : > { %v507_v29 = vpop.f32.mrf.mxu3 }
  0xae   : > { %v508_v30 = vadd.f32 %v507_v29, %v3173_v22  ;;  %v441_v32 = vpop.f32.mrf.mxu0  ;;  %v464_v35 = vpop.f32.mrf.mxu1 }
  0xaf   : > { %v442_v33 = vadd.f32 %v441_v32, %v3171_v21  ;;  %v465_v36 = vadd.f32 %v464_v35, %v3171_v21  ;;  %v1214_v32 = vperm.slane %v3449_v26, 7 }
  0xb0   : > { %v3218_v31 = vmax.f32 %v508_v30, 0.0 }
  0xb1   : > { %v3233_v34 = vmax.f32 %v442_v33, 0.0  ;;  %v3242_v37 = vmax.f32 %v465_v36, 0.0 }
  0xb2   : > { %5437 = vst [vmem:[#allocation13_spill] sm:$0xff] %v3218_v31 }
  0xb3   : > { %1193 = vrot.lane.b32.xlu1 %v3179_v28, %s3031_s24  ;;  %678 = vrot.lane.b32.xlu2 %v3179_v28, %s3029_s22 }
  0xb4   : > { %1189 = vrot.lane.b32.xlu0 %v3177_v27, %s3031_s24 }
  0xb5   : > { %v510_v41 = vpop.f32.mrf.mxu3 }
  0xb6   : > { %v511_v42 = vadd.f32 %v510_v41, %v3171_v21 }
  0xb8   : > { %v3293_v46 = vmax.f32 %v511_v42, 0.0 }
  0xba   : > { %5439 = vst [vmem:[#allocation15_spill] sm:$0xff] %v3293_v46 }
  0xbb   : > { %809 = vrot.lane.b32.xlu1 %v3177_v27, %s3032_s25  ;;  %629 = vrot.lane.b32.xlu2 %v3177_v27, %s3030_s23 }
  0xbc   : > { %588 = vrot.lane.b32.xlu0 %v3179_v28, %s3033_s26 }
  0xc3   : > { %1148 = vrot.lane.b32.xlu1 %v3179_v28, %s3034_s28  ;;  %584 = vrot.lane.b32.xlu2 %v3177_v27, %s3033_s26 }
  0xc4   : > { %1144 = vrot.lane.b32.xlu0 %v3177_v27, %s3034_s28 }
  0xcb   : > { %764 = vrot.lane.b32.xlu1 %v3177_v27, %s3035_s29  ;;  %537 = vrot.lane.b32.xlu2 %v3177_v27, %s3036_s11 }
  0xcc   : > { %541 = vrot.lane.b32.xlu0 %v3179_v28, %s3036_s11 }
  0xd3   : > { %1103 = vrot.lane.b32.xlu1 %v3179_v28, %s3037_s13  ;;  %719 = vrot.lane.b32.xlu2 %v3177_v27, %s3038_s30 }
  0xd4   : > { %1099 = vrot.lane.b32.xlu0 %v3177_v27, %s3037_s13 }
  0xdb   : > { %1369 = vrot.lane.b32.xlu1 %v3177_v27, %s3039_s12  ;;  %1373 = vrot.lane.b32.xlu2 %v3179_v28, %s3039_s12 }
  0xdc   : > { %731 = vrot.lane.b32.xlu0 %v3218_v31, %s3038_s30 }
  0xe3   : > { %1034 = vrot.lane.b32.xlu1 %v3177_v27, %s3040_s10  ;;  %866 = vrot.lane.b32.xlu2 %v3218_v31, %s3028_s21 }
  0xe4   : > { %686 = vrot.lane.b32.xlu0 %v3218_v31, %s3029_s22 }
  0xeb   : > { %676 = vrot.lane.b32.xlu1 %v3233_v34, %s3029_s22  ;;  %821 = vrot.lane.b32.xlu2 %v3218_v31, %s3032_s25 }
  0xec   : > { %856 = vrot.lane.b32.xlu0 %v3233_v34, %s3028_s21 }
  0xf3   : > { %680 = vrot.lane.b32.xlu1 %v3242_v37, %s3029_s22  ;;  %776 = vrot.lane.b32.xlu2 %v3218_v31, %s3035_s29 }
  0xf4   : > { %635 = vrot.lane.b32.xlu0 %v3242_v37, %s3030_s23 }
  0xfb   : > { %1195 = vrot.lane.b32.xlu1 %v3242_v37, %s3031_s24  ;;  %1046 = vrot.lane.b32.xlu2 %v3218_v31, %s3040_s10 }
  0xfc   : > { %1191 = vrot.lane.b32.xlu0 %v3233_v34, %s3031_s24 }
 0x103   : > { %811 = vrot.lane.b32.xlu1 %v3233_v34, %s3032_s25  ;;  %631 = vrot.lane.b32.xlu2 %v3233_v34, %s3030_s23 }
 0x104   : > { %590 = vrot.lane.b32.xlu0 %v3242_v37, %s3033_s26 }
 0x105   : > { %v3262_v38 = vpop.permute.xlu2 %674 }
 0x10b   : > { %1150 = vrot.lane.b32.xlu1 %v3242_v37, %s3034_s28  ;;  %586 = vrot.lane.b32.xlu2 %v3233_v34, %s3033_s26 }
 0x10c   : > { %1146 = vrot.lane.b32.xlu0 %v3233_v34, %s3034_s28 }
 0x10d   : > { %v3270_v39 = vpop.permute.xlu2 %678 }
 0x10e   : > { %v3420_v16 = vsel %vm690_vm2, %v3262_v38, %v3270_v39 }
 0x10f   : > { %v1478_v18 = vmul.f32 %v1474_v12, %v3420_v16 }
 0x113   : > { %766 = vrot.lane.b32.xlu1 %v3233_v34, %s3035_s29  ;;  %539 = vrot.lane.b32.xlu2 %v3233_v34, %s3036_s11 }
 0x114   : > { %543 = vrot.lane.b32.xlu0 %v3242_v37, %s3036_s11 }
 0x115   : > { %v3278_v40 = vpop.permute.xlu2 %629 }
 0x11b   : > { %1105 = vrot.lane.b32.xlu1 %v3242_v37, %s3037_s13  ;;  %1375 = vrot.lane.b32.xlu2 %v3242_v37, %s3039_s12 }
 0x11c   : > { %1101 = vrot.lane.b32.xlu0 %v3233_v34, %s3037_s13 }
 0x11d   : > { %v3287_v43 = vpop.permute.xlu1 %854  ;;  %v3289_v44 = vpop.permute.xlu2 %584 }
 0x11e   : > { %v3291_v45 = vpop.permute.xlu0 %633 }
 0x11f   : > { %5438 = vst [vmem:[#allocation14_spill] sm:$0xff] %v3291_v45  ;;  %v3439_v20 = vsel %vm645_vm3, %v3278_v40, %v3291_v45 }
 0x120   : > { %v1458_v30 = vmul.f32 %v1454_v19, %v3439_v20 }
 0x123   : > { %721 = vrot.lane.b32.xlu1 %v3233_v34, %s3038_s30  ;;  %823 = vrot.lane.b32.xlu2 %v3293_v46, %s3032_s25 }
 0x124   : > { %1326 = vrot.lane.b32.xlu0 %v3233_v34, %s3041_s14 }
 0x125   : > { %v3301_v47 = vpop.permute.xlu1 %1193  ;;  %v3303_v48 = vpop.permute.xlu2 %537 }
 0x126   : > { %v3305_v49 = vpop.permute.xlu0 %1189 }
 0x127   : > { %5440 = vst [vmem:[#allocation16_spill] sm:$0xff] %v3305_v49  ;;  %v1210_v35 = vsel %vm1205_vm4, %v3305_v49, %v3301_v47 }
 0x128   : > { %v1218_v41 = vmul.f32 %v1214_v32, %v1210_v35 }
 0x12b   : > { %1371 = vrot.lane.b32.xlu1 %v3233_v34, %s3039_s12  ;;  %778 = vrot.lane.b32.xlu2 %v3293_v46, %s3035_s29 }
 0x12c   : > { %725 = vrot.lane.b32.xlu0 %v3242_v37, %s3038_s30 }
 0x12d   : > { %v3313_v50 = vpop.permute.xlu1 %809  ;;  %v3315_v51 = vpop.permute.xlu2 %719 }
 0x12e   : > { %v3317_v52 = vpop.permute.xlu0 %588 }
 0x12f   : > { %5441 = vst [vmem:[#allocation17_spill] sm:$0xff] %v3317_v52 }
 0x133   : > { %1036 = vrot.lane.b32.xlu1 %v3233_v34, %s3040_s10  ;;  %733 = vrot.lane.b32.xlu2 %v3293_v46, %s3038_s30 }
 0x134   : > { %688 = vrot.lane.b32.xlu0 %v3293_v46, %s3029_s22 }
 0x135   : > { %v3325_v53 = vpop.permute.xlu1 %1148  ;;  %v3327_v54 = vpop.permute.xlu2 %1373 }
 0x136   : > { %5442 = vst [vmem:[#allocation18_spill] sm:$0xff] %v3325_v53  ;;  %v3329_v55 = vpop.permute.xlu0 %1144 }
 0x137   : > { %5443 = vst [vmem:[#allocation19_spill] sm:$0xff] %v3327_v54 }
 0x138   : > { %5444 = vst [vmem:[#allocation20_spill] sm:$0xff] %v3329_v55 }
 0x13b   : > { %1330 = vrot.lane.b32.xlu1 %v3242_v37, %s3041_s14  ;;  %1048 = vrot.lane.b32.xlu2 %v3293_v46, %s3040_s10 }
 0x13c   : > { %1324 = vrot.lane.b32.xlu0 %v3177_v27, %s3041_s14 }
 0x13d   : > { %v3337_v56 = vpop.permute.xlu1 %764  ;;  %v3339_v57 = vpop.permute.xlu2 %866 }
 0x13e   : > { %5445 = vst [vmem:[#allocation21_spill] sm:$0xff] %v3339_v57  ;;  %v3341_v58 = vpop.permute.xlu0 %541 }
 0x13f   : > { %5446 = vst [vmem:[#allocation22_spill] sm:$0xff] %v3341_v58 }
 0x143   : > { %868 = vrot.lane.b32.xlu1 %v3293_v46, %s3028_s21  ;;  %643 = vrot.lane.b32.xlu2 %v3293_v46, %s3030_s23 }
 0x144   : > { %723 = vrot.lane.b32.xlu0 %v3179_v28, %s3038_s30 }
 0x145   : > { %v3349_v59 = vpop.permute.xlu1 %1103  ;;  %v3351_v60 = vpop.permute.xlu2 %821 }
 0x146   : > { %5447 = vst [vmem:[#allocation23_spill] sm:$0xff] %v3349_v59  ;;  %v3353_v61 = vpop.permute.xlu0 %1099 }
 0x147   : > { %5448 = vst [vmem:[#allocation24_spill] sm:$0xff] %v3351_v60 }
 0x148   : > { %5449 = vst [vmem:[#allocation25_spill] sm:$0xff] %v3353_v61 }
 0x14b   : > { %1328 = vrot.lane.b32.xlu1 %v3179_v28, %s3041_s14  ;;  %641 = vrot.lane.b32.xlu2 %v3218_v31, %s3030_s23 }
 0x14c   : > { %1281 = vrot.lane.b32.xlu0 %v3233_v34, %s3042_s15 }
 0x14d   : > { %v3361_v62 = vpop.permute.xlu1 %1369  ;;  %v3363_v63 = vpop.permute.xlu2 %776 }
 0x14e   : > { %5450 = vst [vmem:[#allocation26_spill] sm:$0xff] %v3361_v62  ;;  %v3365_v0 = vpop.permute.xlu0 %731 }
 0x14f   : > { %5451 = vst [vmem:[#allocation27_spill] sm:$0xff] %v3363_v63 }
 0x153   : > { %991 = vrot.lane.b32.xlu1 %v3233_v34, %s3043_s16  ;;  %1003 = vrot.lane.b32.xlu2 %v3293_v46, %s3043_s16 }
 0x154   : > { %989 = vrot.lane.b32.xlu0 %v3177_v27, %s3043_s16 }
 0x155   : > { %v3373_v1 = vpop.permute.xlu1 %1034  ;;  %v3375_v2 = vpop.permute.xlu2 %1046 }
 0x156   : > { %5452 = vst [vmem:[#allocation28_spill] sm:$0xff] %v3373_v1  ;;  %v3377_v3 = vpop.permute.xlu0 %686 }
 0x157   : > { %5453 = vst [vmem:[#allocation29_spill] sm:$0xff] %v3375_v2 }
 0x158   : > { %5454 = vst [vmem:[#allocation30_spill] sm:$0xff] %v3377_v3 }
 0x15b   : > { %1285 = vrot.lane.b32.xlu1 %v3242_v37, %s3042_s15  ;;  %598 = vrot.lane.b32.xlu2 %v3293_v46, %s3033_s26 }
 0x15c   : > { %1283 = vrot.lane.b32.xlu0 %v3179_v28, %s3042_s15 }
 0x15d   : > { %v3385_v5 = vpop.permute.xlu1 %676  ;;  %v3387_v6 = vpop.permute.xlu2 %631 }
 0x15e   : > { %v3389_v7 = vpop.permute.xlu0 %856 }
 0x163   : > { %1001 = vrot.lane.b32.xlu1 %v3218_v31, %s3043_s16  ;;  %1279 = vrot.lane.b32.xlu2 %v3177_v27, %s3042_s15 }
 0x164   : > { %958 = vrot.lane.b32.xlu0 %v3293_v46, %s3044_s17 }
 0x165   : > { %v3402_v10 = vpop.permute.xlu1 %680  ;;  %v3404_v11 = vpop.permute.xlu2 %586 }
 0x166   : > { %v3407_v13 = vpop.permute.xlu0 %635  ;;  %v3413_v14 = vsel %vm690_vm2, %v3385_v5, %v3402_v10 }
 0x167   : > { %v1482_v15 = vmul.f32 %v1474_v12, %v3413_v14  ;;  %v3427_v17 = vsel %vm645_vm3, %v3387_v6, %v3407_v13 }
 0x168   : > { %v1462_v23 = vmul.f32 %v1454_v19, %v3427_v17  ;;  %v3487_v19 = vsel %vm600_vm5, %v3289_v44, %v3317_v52 }
 0x169   : > { %1901 = vmatpush.msrb.mxu2 %v1482_v15  ;;  %v1434_v15 = vperm.slane %v3393_v9, 5  ;;  %5458 = vst [vmem:[#allocation34_spill] sm:$0xff] %v3487_v19 }
 0x16b   : > { %596 = vrot.lane.b32.xlu1 %v3218_v31, %s3033_s26  ;;  %946 = vrot.lane.b32.xlu2 %v3233_v34, %s3044_s17 }
 0x16c   : > { %551 = vrot.lane.b32.xlu0 %v3293_v46, %s3036_s11  ;;  %1902 = vmatpush.msrb.mxu2 %v1478_v18 }
 0x16d   : > { %v3445_v24 = vpop.permute.xlu1 %1195  ;;  %v3447_v25 = vpop.permute.xlu2 %539 }
 0x16e   : > { %v3451_v29 = vpop.permute.xlu0 %1191  ;;  %1903 = vmatpush.msrb.mxu2 %v1462_v23 }
 0x16f   : > { %5455 = vst [vmem:[#allocation31_spill] sm:$0xff] %v3451_v29  ;;  %v1211_v33 = vsel %vm1205_vm4, %v3451_v29, %v3445_v24 }
 0x170   : > { %1904 = vmatpush.msrb.mxu2 %v1458_v30  ;;  %v1222_v36 = vmul.f32 %v1214_v32, %v1211_v33  ;;  %v1438_v30 = vmul.f32 %v1434_v15, %v3487_v19 }
 0x172   : > { %1860 = vmatpush.msrb.mxu1 %v1222_v36  ;;  %v1169_v36 = vperm.slane %v3449_v26, 6 }
 0x173   : > { %1236 = vrot.lane.b32.xlu1 %v3233_v34, %s3045_s18  ;;  %1240 = vrot.lane.b32.xlu2 %v3242_v37, %s3045_s18 }
 0x174   : > { %1234 = vrot.lane.b32.xlu0 %v3177_v27, %s3045_s18  ;;  %1861 = vmatpush.msrb.mxu1 %v1218_v41 }
 0x175   : > { %v3470_v42 = vpop.permute.xlu1 %811  ;;  %v3472_v4 = vpop.permute.xlu2 %1375 }
 0x176   : > { %5456 = vst [vmem:[#allocation32_spill] sm:$0xff] %v3472_v4  ;;  %v3474_v12 = vpop.permute.xlu0 %590 }
 0x177   : > { %5457 = vst [vmem:[#allocation33_spill] sm:$0xff] %v3474_v12  ;;  %v3481_v18 = vsel %vm600_vm5, %v3404_v11, %v3474_v12  ;;  %v1124_v12 = vperm.slane %v3449_v26, 5 }
 0x178   : > { %v1442_v23 = vmul.f32 %v1434_v15, %v3481_v18  ;;  %v1165_v15 = vsel %vm5408_vm6, %v3329_v55, %v3325_v53 }
 0x179   : > { %v1173_v49 = vmul.f32 %v1169_v36, %v1165_v15  ;;  %v3531_v15 = vsel %vm555_vm7, %v3303_v48, %v3341_v58 }
 0x17a   : > { %1905 = vmatpush.msrb.mxu2 %v1442_v23  ;;  %5463 = vst [vmem:[#allocation39_spill] sm:$0xff] %v3531_v15 }
 0x17b   : > { %944 = vrot.lane.b32.xlu1 %v3177_v27, %s3044_s17  ;;  %956 = vrot.lane.b32.xlu2 %v3218_v31, %s3044_s17 }
 0x17c   : > { %901 = vrot.lane.b32.xlu0 %v3233_v34, %s3046_s19  ;;  %1906 = vmatpush.msrb.mxu2 %v1438_v30  ;;  %v484_v30 = vpop.f32.mrf.mxu2 }
 0x17d   : > { %v3498_v32 = vpop.permute.xlu1 %1150  ;;  %v3500_v33 = vpop.permute.xlu2 %823 }
 0x17e   : > { %5459 = vst [vmem:[#allocation35_spill] sm:$0xff] %v3500_v33  ;;  %v3502_v35 = vpop.permute.xlu0 %1146 }
 0x17f   : > { %5460 = vst [vmem:[#allocation36_spill] sm:$0xff] %v3502_v35  ;;  %v1166_v41 = vsel %vm5408_vm6, %v3502_v35, %v3498_v32 }
 0x180   : > { %v1177_v23 = vmul.f32 %v1169_v36, %v1166_v41  ;;  %v1414_v36 = vperm.slane %v3393_v9, 4 }
 0x182   : > { %1862 = vmatpush.msrb.mxu1 %v1177_v23  ;;  %v1418_v55 = vmul.f32 %v1414_v36, %v3531_v15  ;;  %v1120_v15 = vsel %vm5404_vm8, %v3353_v61, %v3349_v59 }
 0x183   : > { %1238 = vrot.lane.b32.xlu1 %v3179_v28, %s3045_s18  ;;  %549 = vrot.lane.b32.xlu2 %v3218_v31, %s3036_s11  ;;  %v1128_v19 = vmul.f32 %v1124_v12, %v1120_v15 }
 0x184   : > { %911 = vrot.lane.b32.xlu0 %v3218_v31, %s3046_s19  ;;  %1863 = vmatpush.msrb.mxu1 %v1173_v49  ;;  %v487_v52 = vpop.f32.mrf.mxu2 }
 0x185   : > { %v3520_v35 = vpop.permute.xlu1 %766  ;;  %v3522_v29 = vpop.permute.xlu2 %778 }
 0x186   : > { %5461 = vst [vmem:[#allocation37_spill] sm:$0xff] %v3522_v29  ;;  %v3524_v41 = vpop.permute.xlu0 %543 }
 0x187   : > { %5462 = vst [vmem:[#allocation38_spill] sm:$0xff] %v3524_v41  ;;  %v3537_v23 = vsel %vm555_vm7, %v3447_v25, %v3524_v41 }
 0x188   : > { %5464 = vst [vmem:[#allocation40_spill] sm:$0xff] %v3537_v23  ;;  %v1422_v49 = vmul.f32 %v1414_v36, %v3537_v23 }
 0x18a   : > { %1907 = vmatpush.msrb.mxu2 %v1422_v49  ;;  %v488_v49 = vadd.f32 %v487_v52, %v3171_v21  ;;  %v1079_v21 = vperm.slane %v3449_v26, 4 }
 0x18b   : > { %913 = vrot.lane.b32.xlu1 %v3293_v46, %s3046_s19  ;;  %899 = vrot.lane.b32.xlu2 %v3177_v27, %s3046_s19 }
 0x18c   : > { %815 = vrot.lane.b32.xlu0 %v3242_v37, %s3032_s25  ;;  %1908 = vmatpush.msrb.mxu2 %v1418_v55  ;;  %v3564_v53 = vmax.f32 %v488_v49, 0.0  ;;  %v1087_v52 = vmul.f32 %v1079_v21, %v3233_v34 }
 0x18d   : > { %v3548_v41 = vpop.permute.xlu1 %1105  ;;  %v3550_v58 = vpop.permute.xlu2 %733 }
 0x18e   : > { %5465 = vst [vmem:[#allocation41_spill] sm:$0xff] %v3548_v41  ;;  %v3553_v36 = vpop.permute.xlu0 %1101 }
 0x18f   : > { %5466 = vst [vmem:[#allocation42_spill] sm:$0xff] %v3553_v36  ;;  %v1121_v55 = vsel %vm5404_vm8, %v3553_v36, %v3548_v41 }
 0x190   : > { %v1132_v23 = vmul.f32 %v1124_v12, %v1121_v55  ;;  %v485_v12 = vadd.f32 %v484_v30, %v3173_v22  ;;  %v2844_v22 = vld [vmem:[#allocation3 + $0x60] ss:$0 sm:$0xff] }
 0x192   : > { %1864 = vmatpush.msrb.mxu1 %v1132_v23  ;;  %v1083_v23 = vmul.f32 %v1079_v21, %v3177_v27  ;;  %v3582_v55 = vmax.f32 %v485_v12, 0.0  ;;  %v1394_v27 = vperm.slane %v3393_v9, 3 }
 0x193   : > { %860 = vrot.lane.b32.xlu1 %v3242_v37, %s3028_s21  ;;  %858 = vrot.lane.b32.xlu2 %v3179_v28, %s3028_s21 }
 0x194   : > { %1199 = vrot.lane.b32.xlu0 %v3564_v53, %s3031_s24  ;;  %1865 = vmatpush.msrb.mxu1 %v1128_v19 }
 0x195   : > { %v3574_v61 = vpop.permute.xlu1 %721  ;;  %v3576_v49 = vpop.permute.xlu2 %1048 }
 0x196   : > { %5467 = vst [vmem:[#allocation43_spill] sm:$0xff] %v3576_v49  ;;  %v3579_v15 = vpop.permute.xlu0 %1326  ;;  %1866 = vmatpush.msrb.mxu1 %v1087_v52  ;;  %v1390_v52 = vsel %vm1385_vm9, %v3361_v62, %v3327_v54  ;;  %v3725_v45 = vsel %vm5337_vm10, %v3550_v58, %v3574_v61 }
 0x197   : > { %5468 = vst [vmem:[#allocation44_spill] sm:$0xff] %v3579_v15  ;;  %v1398_v59 = vmul.f32 %v1394_v27, %v1390_v52  ;;  %v1057_v52 = vsel %vm5403_vm11, %v3375_v2, %v3373_v1 }
 0x198   : > { %1867 = vmatpush.msrb.mxu1 %v1083_v23 }
 0x19b   : > { %813 = vrot.lane.b32.xlu1 %v3179_v28, %s3032_s25  ;;  %770 = vrot.lane.b32.xlu2 %v3242_v37, %s3035_s29 }
 0x19c   : > { %1197 = vrot.lane.b32.xlu0 %v3582_v55, %s3031_s24 }
 0x19d   : > { %v3591_v34 = vpop.permute.xlu1 %1371  ;;  %v3593_v19 = vpop.permute.xlu2 %643 }
 0x19e   : > { %5469 = vst [vmem:[#allocation45_spill] sm:$0xff] %v3591_v34  ;;  %v3597_v30 = vpop.permute.xlu0 %725  ;;  %v1391_v21 = vsel %vm1385_vm9, %v3591_v34, %v3472_v4 }
 0x19f   : > { %5470 = vst [vmem:[#allocation46_spill] sm:$0xff] %v3593_v19  ;;  %v3611_v12 = vsel %vm5337_vm10, %v3574_v61, %v3597_v30  ;;  %v1402_v23 = vmul.f32 %v1394_v27, %v1391_v21 }
 0x1a0   : > { %5471 = vst [vmem:[#allocation47_spill] sm:$0xff] %v3597_v30  ;;  %v1502_v36 = vmul.f32 %v2844_v22, %v3611_v12  ;;  %v1349_v30 = vperm.slane %v3393_v9, 2 }
 0x1a1   : > { %1909 = vmatpush.msrb.mxu2 %v1402_v23  ;;  %v1059_v23 = vperm.slane %v3449_v26, 3 }
 0x1a2   : > { %1956 = vmatpush.msrb.mxu3 %v1502_v36 }
 0x1a3   : > { %684 = vrot.lane.b32.xlu1 %v3564_v53, %s3029_s22  ;;  %768 = vrot.lane.b32.xlu2 %v3179_v28, %s3035_s29 }
 0x1a4   : > { %639 = vrot.lane.b32.xlu0 %v3564_v53, %s3030_s23  ;;  %1910 = vmatpush.msrb.mxu2 %v1398_v59  ;;  %v1063_v59 = vmul.f32 %v1059_v23, %v1057_v52  ;;  %v3654_v52 = vld [vmem:[#allocation3] sm:$0xff] }
 0x1a5   : > { %v3621_v62 = vpop.permute.xlu1 %1036  ;;  %v3623_v21 = vpop.permute.xlu2 %641 }
 0x1a6   : > { %5472 = vst [vmem:[#allocation48_spill] sm:$0xff] %v3621_v62  ;;  %v3626_v36 = vpop.permute.xlu0 %688  ;;  %v1058_v27 = vsel %vm5403_vm11, %v3576_v49, %v3621_v62 }
 0x1a7   : > { %5473 = vst [vmem:[#allocation49_spill] sm:$0xff] %v3623_v21  ;;  %v1067_v34 = vmul.f32 %v1059_v23, %v1058_v27 }
 0x1a8   : > { %5474 = vst [vmem:[#allocation50_spill] sm:$0xff] %v3626_v36 }
 0x1a9   : > { %1868 = vmatpush.msrb.mxu1 %v1067_v34 }
 0x1ab   : > { %682 = vrot.lane.b32.xlu1 %v3582_v55, %s3029_s22  ;;  %1154 = vrot.lane.b32.xlu2 %v3564_v53, %s3034_s28 }
 0x1ac   : > { %1109 = vrot.lane.b32.xlu0 %v3564_v53, %s3037_s13  ;;  %1869 = vmatpush.msrb.mxu1 %v1063_v59 }
 0x1ad   : > { %v3644_v49 = vpop.permute.xlu1 %1330  ;;  %v3646_v2 = vpop.permute.xlu2 %1003 }
 0x1ae   : > { %5475 = vst [vmem:[#allocation51_spill] sm:$0xff] %v3644_v49  ;;  %v3648_v34 = vpop.permute.xlu0 %1324  ;;  %v1346_v23 = vsel %vm5349_vm12, %v3579_v15, %v3644_v49  ;;  %v877_v49 = vsel %vm870_vm13, %v3339_v57, %v3287_v43  ;;  %v834_v57 = vperm.slane %v3654_v52, 6 }
 0x1af   : > { %5476 = vst [vmem:[#allocation52_spill] sm:$0xff] %v3646_v2  ;;  %v1357_v27 = vmul.f32 %v1349_v30, %v1346_v23  ;;  %v879_v23 = vperm.slane %v3654_v52, 7 }
 0x1b0   : > { %5477 = vst [vmem:[#allocation53_spill] sm:$0xff] %v3648_v34 }
 0x1b1   : > { %1911 = vmatpush.msrb.mxu2 %v1357_v27  ;;  %v883_v41 = vmul.f32 %v879_v23, %v877_v49 }
 0x1b3   : > { %1152 = vrot.lane.b32.xlu1 %v3582_v55, %s3034_s28  ;;  %637 = vrot.lane.b32.xlu2 %v3582_v55, %s3030_s23 }
 0x1b4   : > { %592 = vrot.lane.b32.xlu0 %v3582_v55, %s3033_s26 }
 0x1b5   : > { %v3663_v59 = vpop.permute.xlu1 %868  ;;  %v3665_v54 = vpop.permute.xlu2 %598 }
 0x1b6   : > { %5478 = vst [vmem:[#allocation54_spill] sm:$0xff] %v3663_v59  ;;  %v3668_v27 = vpop.permute.xlu0 %723  ;;  %v878_v15 = vsel %vm870_vm13, %v3663_v59, %v3389_v7  ;;  %v833_v59 = vsel %vm825_vm14, %v3500_v33, %v3470_v42 }
 0x1b7   : > { %5479 = vst [vmem:[#allocation55_spill] sm:$0xff] %v3665_v54  ;;  %v3682_v1 = vsel %vm5337_vm10, %v3315_v51, %v3668_v27  ;;  %v887_v4 = vmul.f32 %v879_v23, %v878_v15 }
 0x1b8   : > { %5480 = vst [vmem:[#allocation56_spill] sm:$0xff] %v3668_v27  ;;  %v1498_v62 = vmul.f32 %v2844_v22, %v3682_v1  ;;  %v832_v27 = vsel %vm825_vm14, %v3351_v60, %v3313_v50 }
 0x1b9   : > { %1819 = vmatpush.msrb.mxu0 %v887_v4  ;;  %v788_v4 = vsel %vm780_vm15, %v3522_v29, %v3520_v35  ;;  %v838_v60 = vmul.f32 %v834_v57, %v832_v27  ;;  %v3732_v27 = vsel %vm5337_vm10, %v3365_v0, %v3315_v51  ;;  %v3747_v51 = vsel %vm690_vm2, %v3626_v36, %v3385_v5 }
 0x1ba   : > { %1957 = vmatpush.msrb.mxu3 %v1498_v62  ;;  %v842_v62 = vmul.f32 %v834_v57, %v833_v59  ;;  %v787_v59 = vsel %vm780_vm15, %v3363_v63, %v3337_v56  ;;  %v744_v57 = vperm.slane %v3654_v52, 4  ;;  %5483 = vst [vmem:[#allocation59_spill] sm:$0xff] %v3747_v51  ;;  %v3765_v5 = vsel %vm690_vm2, %v3377_v3, %v3262_v38  ;;  %v3818_v63 = vld [vmem:[#allocation7 + $0x38] sm:$0xff] }
 0x1bb   : > { %594 = vrot.lane.b32.xlu1 %v3564_v53, %s3033_s26  ;;  %1107 = vrot.lane.b32.xlu2 %v3582_v55, %s3037_s13  ;;  %5484 = vst [vmem:[#allocation60_spill] sm:$0xff] %v3765_v5  ;;  %vm5344_vm10 = vcmp.lt.s32.totalorder %v3391_v8, 96 }
 0x1bc   : > { %1040 = vrot.lane.b32.xlu0 %v3242_v37, %s3040_s10  ;;  %1820 = vmatpush.msrb.mxu0 %v883_v41  ;;  %v789_v41 = vperm.slane %v3654_v52, 5  ;;  %v752_v61 = vmul.f32 %v744_v57, %v3725_v45 }
 0x1bd   : > { %v3706_v49 = vpop.permute.xlu1 %1328  ;;  %v3708_v15 = vpop.permute.xlu2 %1279 }
 0x1be   : > { %5481 = vst [vmem:[#allocation57_spill] sm:$0xff] %v3708_v15  ;;  %v3710_v22 = vpop.permute.xlu0 %1281  ;;  %v1345_v23 = vsel %vm5349_vm12, %v3648_v34, %v3706_v49  ;;  %1821 = vmatpush.msrb.mxu0 %v842_v62  ;;  %v797_v33 = vmul.f32 %v789_v41, %v788_v4  ;;  %v793_v62 = vmul.f32 %v789_v41, %v787_v59  ;;  %v699_v41 = vperm.slane %v3654_v52, 3 }
 0x1bf   : > { %5482 = vst [vmem:[#allocation58_spill] sm:$0xff] %v3710_v22  ;;  %v1353_v29 = vmul.f32 %v1349_v30, %v1345_v23  ;;  %v748_v23 = vmul.f32 %v744_v57, %v3732_v27  ;;  %v654_v34 = vperm.slane %v3654_v52, 2  ;;  %v3775_v57 = vld [vmem:[#allocation7 + $0x18] sm:$0xff]  ;;  %vm1250_vm12 = vcmp.lt.s32.totalorder %v3391_v8, 97 }
 0x1c0   : > { %1822 = vmatpush.msrb.mxu0 %v838_v60  ;;  %v1014_v60 = vperm.slane %v3449_v26, 2  ;;  %v703_v38 = vmul.f32 %v699_v41, %v3765_v5  ;;  %2727 = vmatmul.msk.f32.vlgmr.msrb.gmra.mxu3 %vm1794_vm1, %v3775_v57 }
 0x1c1   : > { %1912 = vmatpush.msrb.mxu2 %v1353_v29 }
 0x1c2   : > { %1823 = vmatpush.msrb.mxu0 %v797_v33 }
 0x1c3   : > { %547 = vrot.lane.b32.xlu1 %v3564_v53, %s3036_s11  ;;  %545 = vrot.lane.b32.xlu2 %v3582_v55, %s3036_s11 }
 0x1c4   : > { %995 = vrot.lane.b32.xlu0 %v3242_v37, %s3043_s16  ;;  %1824 = vmatpush.msrb.mxu0 %v793_v62  ;;  %v707_v62 = vmul.f32 %v699_v41, %v3747_v51  ;;  %v609_v41 = vperm.slane %v3654_v52, 1 }
 0x1c5   : > { %v3749_v29 = vpop.permute.xlu1 %991  ;;  %v3751_v33 = vpop.permute.xlu2 %946 }
 0x1c6   : > { %v3753_v30 = vpop.permute.xlu0 %989  ;;  %v1013_v4 = vsel %vm5400_vm0, %v3646_v2, %v3749_v29  ;;  %1825 = vmatpush.msrb.mxu0 %v752_v61  ;;  %v3773_v61 = vsel %vm645_vm3, %v3593_v19, %v3387_v6  ;;  %v1304_v6 = vperm.slane %v3393_v9, 1 }
 0x1c7   : > { %v1022_v59 = vmul.f32 %v1014_v60, %v1013_v4  ;;  %5485 = vst [vmem:[#allocation61_spill] sm:$0xff] %v3773_v61  ;;  %v3784_v4 = vsel %vm645_vm3, %v3623_v21, %v3278_v40  ;;  %v3800_v40 = vsel %vm600_vm5, %v3665_v54, %v3404_v11 }
 0x1c8   : > { %1826 = vmatpush.msrb.mxu0 %v748_v23  ;;  %5486 = vst [vmem:[#allocation62_spill] sm:$0xff] %v3784_v4  ;;  %v662_v23 = vmul.f32 %v654_v34, %v3773_v61  ;;  %v658_v61 = vmul.f32 %v654_v34, %v3784_v4  ;;  %v617_v51 = vmul.f32 %v609_v41, %v3800_v40  ;;  %v3938_v4 = vld [vmem:[#allocation7 + $0x40] sm:$0xff] }
 0x1c9   : > { %1870 = vmatpush.msrb.mxu1 %v1022_v59  ;;  %5487 = vst [vmem:[#allocation63_spill] sm:$0xff] %v3800_v40  ;;  %2728 = vmatmul.msk.f32.gmra.mxu3 %vm1794_vm1, %v3818_v63  ;;  %v3930_v40 = vld [vmem:[#allocation7 + $0xb8] sm:$0xff] }
 0x1ca   : > { %1827 = vmatpush.msrb.mxu0 %v707_v62  ;;  %5504 = vst [vmem:[#allocation80_spill] sm:$0xff] %v3930_v40 }
 0x1cb   : > { %1038 = vrot.lane.b32.xlu1 %v3179_v28, %s3040_s10  ;;  %1379 = vrot.lane.b32.xlu2 %v3564_v53, %s3039_s12 }
 0x1cc   : > { %1334 = vrot.lane.b32.xlu0 %v3564_v53, %s3041_s14  ;;  %1828 = vmatpush.msrb.mxu0 %v703_v38 }
 0x1cd   : > { %v3802_v59 = vpop.permute.xlu1 %1285  ;;  %v3804_v62 = vpop.permute.xlu2 %1240 }
 0x1ce   : > { %5488 = vst [vmem:[#allocation64_spill] sm:$0xff] %v3804_v62  ;;  %v3806_v2 = vpop.permute.xlu0 %1283  ;;  %v1301_v38 = vsel %vm5344_vm10, %v3710_v22, %v3802_v59  ;;  %1829 = vmatpush.msrb.mxu0 %v662_v23  ;;  %v3880_v22 = vld [vmem:[#allocation7 + $0x78] sm:$0xff] }
 0x1cf   : > { %v1300_v11 = vsel %vm5344_vm10, %v3708_v15, %v3806_v2  ;;  %v1312_v5 = vmul.f32 %v1304_v6, %v1301_v38  ;;  %vm5360_vm10 = vcmp.lt.s32.totalorder %v3391_v8, 30  ;;  %v3844_v38 = vld [vmem:[#allocation7 + $0x58] sm:$0xff]  ;;  %5498 = vst [vmem:[#allocation74_spill] sm:$0xff] %v3880_v22 }
 0x1d0   : > { %1830 = vmatpush.msrb.mxu0 %v658_v61  ;;  %v1308_v54 = vmul.f32 %v1304_v6, %v1300_v11  ;;  %v969_v6 = vperm.slane %v3449_v26, 1  ;;  %5492 = vst [vmem:[#allocation68_spill] sm:$0xff] %v3844_v38 }
 0x1d1   : > { %1913 = vmatpush.msrb.mxu2 %v1312_v5  ;;  %2729 = vmatmul.msk.f32.gmra.mxu3 %vm1794_vm1, %v3844_v38 }
 0x1d2   : > { %1831 = vmatpush.msrb.mxu0 %v617_v51 }
 0x1d3   : > { %1377 = vrot.lane.b32.xlu1 %v3582_v55, %s3039_s12  ;;  %993 = vrot.lane.b32.xlu2 %v3179_v28, %s3043_s16 }
 0x1d4   : > { %729 = vrot.lane.b32.xlu0 %v3564_v53, %s3038_s30  ;;  %1914 = vmatpush.msrb.mxu2 %v1308_v54 }
 0x1d5   : > { %v3829_v34 = vpop.permute.xlu1 %1001  ;;  %v3831_v5 = vpop.permute.xlu2 %956 }
 0x1d6   : > { %5489 = vst [vmem:[#allocation65_spill] sm:$0xff] %v3829_v34  ;;  %v3833_v51 = vpop.permute.xlu0 %958  ;;  %v1012_v61 = vsel %vm5400_vm0, %v3829_v34, %v3753_v30 }
 0x1d7   : > { %5490 = vst [vmem:[#allocation66_spill] sm:$0xff] %v3831_v5  ;;  %v968_v54 = vsel %vm5360_vm10, %v3833_v51, %v3751_v33  ;;  %v1018_v23 = vmul.f32 %v1014_v60, %v1012_v61 }
 0x1d8   : > { %5491 = vst [vmem:[#allocation67_spill] sm:$0xff] %v3833_v51  ;;  %v977_v11 = vmul.f32 %v969_v6, %v968_v54 }
 0x1d9   : > { %1871 = vmatpush.msrb.mxu1 %v1018_v23  ;;  %v564_v23 = vperm.slane %v3654_v52, 0  ;;  %2730 = vmatmul.msk.f32.gmra.mxu3 %vm1794_vm1, %v3880_v22  ;;  %v3894_v52 = vld [vmem:[#allocation7] sm:$0xff] }
 0x1db   : > { %950 = vrot.lane.b32.xlu1 %v3242_v37, %s3044_s17  ;;  %1332 = vrot.lane.b32.xlu2 %v3582_v55, %s3041_s14 }
 0x1dc   : > { %727 = vrot.lane.b32.xlu0 %v3582_v55, %s3038_s30  ;;  %1872 = vmatpush.msrb.mxu1 %v977_v11 }
 0x1dd   : > { %v3854_v15 = vpop.permute.xlu1 %596  ;;  %v3856_v60 = vpop.permute.xlu2 %549 }
 0x1de   : > { %5493 = vst [vmem:[#allocation69_spill] sm:$0xff] %v3854_v15  ;;  %v3858_v61 = vpop.permute.xlu0 %551  ;;  %v3864_v54 = vsel %vm600_vm5, %v3854_v15, %v3289_v44  ;;  %v3878_v34 = vsel %vm555_vm7, %v3856_v60, %v3303_v48 }
 0x1df   : > { %5494 = vst [vmem:[#allocation70_spill] sm:$0xff] %v3858_v61  ;;  %v3871_v51 = vsel %vm555_vm7, %v3858_v61, %v3447_v25  ;;  %v613_v11 = vmul.f32 %v609_v41, %v3864_v54  ;;  %v1259_v25 = vperm.slane %v3393_v9, 0  ;;  %v568_v48 = vmul.f32 %v564_v23, %v3878_v34  ;;  %v3952_v61 = vld [vmem:[#allocation7 + $0x10] sm:$0xff] }
 0x1e0   : > { %5495 = vst [vmem:[#allocation71_spill] sm:$0xff] %v3864_v54  ;;  %v572_v44 = vmul.f32 %v564_v23, %v3871_v51  ;;  %v3915_v23 = vld [vmem:[#allocation7 + $0x20] sm:$0xff] }
 0x1e1   : > { %5496 = vst [vmem:[#allocation72_spill] sm:$0xff] %v3871_v51  ;;  %1832 = vmatpush.msrb.mxu0 %v613_v11 }
 0x1e2   : > { %5497 = vst [vmem:[#allocation73_spill] sm:$0xff] %v3878_v34 }
 0x1e3   : > { %948 = vrot.lane.b32.xlu1 %v3179_v28, %s3044_s17  ;;  %1289 = vrot.lane.b32.xlu2 %v3564_v53, %s3042_s15  ;;  %5507 = vst [vmem:[#allocation83_spill] sm:$0xff] %v3952_v61 }
 0x1e4   : > { %903 = vrot.lane.b32.xlu0 %v3179_v28, %s3046_s19  ;;  %1833 = vmatpush.msrb.mxu0 %v572_v44  ;;  %v3907_v44 = vld [vmem:[#allocation7 + $0x98] sm:$0xff] }
 0x1e5   : > { %v3896_v41 = vpop.permute.xlu1 %1236  ;;  %v3898_v11 = vpop.permute.xlu2 %899  ;;  %5501 = vst [vmem:[#allocation77_spill] sm:$0xff] %v3907_v44  ;;  %2731 = vmatmul.msk.f32.gmra.mxu3 %vm1794_vm1, %v3907_v44 }
 0x1e6   : > { %5499 = vst [vmem:[#allocation75_spill] sm:$0xff] %v3896_v41  ;;  %v3900_v51 = vpop.permute.xlu0 %1234  ;;  %v1256_v54 = vsel %vm1250_vm12, %v3896_v41, %v3804_v62  ;;  %1834 = vmatpush.msrb.mxu0 %v568_v48 }
 0x1e7   : > { %5500 = vst [vmem:[#allocation76_spill] sm:$0xff] %v3900_v51  ;;  %v1267_v9 = vmul.f32 %v1259_v25, %v1256_v54  ;;  %1835 = vmatmul.f32.vlgmr.msrb.gmra.mxu0 %v3894_v52 }
 0x1e9   : > { %1915 = vmatpush.msrb.mxu2 %v1267_v9 }
 0x1eb   : > { %905 = vrot.lane.b32.xlu1 %v3242_v37, %s3046_s19  ;;  %1287 = vrot.lane.b32.xlu2 %v3582_v55, %s3042_s15 }
 0x1ec   : > { %864 = vrot.lane.b32.xlu0 %v3564_v53, %s3028_s21 }
 0x1ed   : > { %v3919_v54 = vpop.permute.xlu1 %944  ;;  %v3921_v48 = vpop.permute.xlu2 %858  ;;  %2732 = vmatmul.msk.f32.gmra.mxu3 %vm1794_vm1, %v3930_v40  ;;  %v3960_v40 = vld [vmem:[#allocation7 + $0xd8] sm:$0xff] }
 0x1ee   : > { %5502 = vst [vmem:[#allocation78_spill] sm:$0xff] %v3921_v48  ;;  %v3923_v9 = vpop.permute.xlu0 %901  ;;  %v967_v41 = vsel %vm5360_vm10, %v3831_v5, %v3919_v54  ;;  %vm915_vm10 = vcmp.lt.s32.totalorder %v3391_v8, 31  ;;  %v875_v62 = vsel %vm870_vm13, %v3287_v43, %v3921_v48  ;;  %v4035_v48 = vld [vmem:[#allocation7 + $0x28] sm:$0xff] }
 0x1ef   : > { %5503 = vst [vmem:[#allocation79_spill] sm:$0xff] %v3923_v9  ;;  %v973_v34 = vmul.f32 %v969_v6, %v967_v41  ;;  %1838 = vmatmul.f32.gmra.mxu0 %v3915_v23 }
 0x1f0   : > { %5508 = vst [vmem:[#allocation84_spill] sm:$0xff] %v3960_v40 }
 0x1f1   : > { %1873 = vmatpush.msrb.mxu1 %v973_v34 }
 0x1f3   : > { %1244 = vrot.lane.b32.xlu1 %v3564_v53, %s3045_s18  ;;  %1242 = vrot.lane.b32.xlu2 %v3582_v55, %s3045_s18 }
 0x1f4   : > { %817 = vrot.lane.b32.xlu0 %v3582_v55, %s3032_s25 }
 0x1f5   : > { %v3942_v6 = vpop.permute.xlu1 %1238  ;;  %v3944_v41 = vpop.permute.xlu2 %770  ;;  %2733 = vmatmul.msk.f32.gmra.mxu3 %vm1794_vm1, %v3960_v40  ;;  %v3984_v40 = vld [vmem:[#allocation7 + $0x30] sm:$0xff] }
 0x1f6   : > { %5505 = vst [vmem:[#allocation81_spill] sm:$0xff] %v3942_v6  ;;  %v3946_v34 = vpop.permute.xlu0 %911  ;;  %v1255_v5 = vsel %vm1250_vm12, %v3900_v51, %v3942_v6  ;;  %v924_v51 = vperm.slane %v3449_v26, 0  ;;  %v3987_v26 = vld [vmem:[#allocation7 + $0x8] sm:$0xff] }
 0x1f7   : > { %5506 = vst [vmem:[#allocation82_spill] sm:$0xff] %v3946_v34  ;;  %v1263_v44 = vmul.f32 %v1259_v25, %v1255_v5  ;;  %1841 = vmatmul.f32.gmra.mxu0 %v3938_v4  ;;  %v3965_v5 = vld [vmem:[#allocation7 + $0x60] sm:$0xff]  ;;  %v922_v22 = vsel %vm915_vm10, %v3946_v34, %v3898_v11  ;;  %v3996_v34 = vld [vmem:[#allocation7 + $0xf8] sm:$0xff] }
 0x1f8   : > { %5511 = vst [vmem:[#allocation87_spill] sm:$0xff] %v3984_v40  ;;  %v928_v19 = vmul.f32 %v924_v51, %v922_v22 }
 0x1f9   : > { %1916 = vmatpush.msrb.mxu2 %v1263_v44  ;;  %5512 = vst [vmem:[#allocation88_spill] sm:$0xff] %v3987_v26 }
 0x1fa   : > { %1917 = vmatmul.f32.vlgmr.msrb.gmra.mxu2 %v3952_v61  ;;  %5513 = vst [vmem:[#allocation89_spill] sm:$0xff] %v3996_v34 }
 0x1fb   : > { %862 = vrot.lane.b32.xlu1 %v3582_v55, %s3028_s21  ;;  %819 = vrot.lane.b32.xlu2 %v3564_v53, %s3032_s25 }
 0x1fc   : > { %772 = vrot.lane.b32.xlu0 %v3582_v55, %s3035_s29 }
 0x1fd   : > { %v3969_v25 = vpop.permute.xlu1 %913  ;;  %v3971_v44 = vpop.permute.xlu2 %768  ;;  %2734 = vmatmul.msk.f32.gmra.mxu3 %vm1794_vm1, %v3996_v34 }
 0x1fe   : > { %5509 = vst [vmem:[#allocation85_spill] sm:$0xff] %v3969_v25  ;;  %v3974_v15 = vpop.permute.xlu0 %815  ;;  %v923_v21 = vsel %vm915_vm10, %v3969_v25, %v3923_v9  ;;  %v3994_v25 = vld [vmem:[#allocation3 + $0x28] sm:$0xff] }
 0x1ff   : > { %5510 = vst [vmem:[#allocation86_spill] sm:$0xff] %v3974_v15  ;;  %v932_v61 = vmul.f32 %v924_v51, %v923_v21  ;;  %1844 = vmatmul.f32.gmra.mxu0 %v3965_v5  ;;  %v3998_v21 = vld [vmem:[#allocation3 + $0x8] sm:$0xff]  ;;  %v1215_v22 = vperm.slane %v3994_v25, 7  ;;  %v4003_v51 = vld [vmem:[#allocation7 + $0x80] sm:$0xff] }
 0x200   : > { %v835_v34 = vperm.slane %v3998_v21, 6 }
 0x201   : > { %1874 = vmatpush.msrb.mxu1 %v932_v61  ;;  %v880_v61 = vperm.slane %v3998_v21, 7 }
 0x202   : > { %1920 = vmatmul.f32.gmra.mxu2 %v3984_v40 }
 0x203   : > { %774 = vrot.lane.b32.xlu1 %v3564_v53, %s3035_s29  ;;  %1203 = vrot.lane.b32.xlu2 %v3293_v46, %s3031_s24  ;;  %v884_v43 = vmul.f32 %v880_v61, %v875_v62 }
 0x204   : > { %1156 = vrot.lane.b32.xlu0 %v3218_v31, %s3034_s28  ;;  %1875 = vmatpush.msrb.mxu1 %v928_v19 }
 0x205   : > { %1876 = vmatmul.f32.vlgmr.msrb.gmra.mxu1 %v3987_v26  ;;  %v4007_v40 = vpop.permute.xlu1 %860  ;;  %v4009_v3 = vpop.permute.xlu2 %1154  ;;  %v4027_v26 = vld [vmem:[#allocation7 + $0x50] sm:$0xff] }
 0x206   : > { %5514 = vst [vmem:[#allocation90_spill] sm:$0xff] %v4009_v3  ;;  %v4013_v36 = vpop.permute.xlu0 %1199  ;;  %v876_v19 = vsel %vm870_vm13, %v3389_v7, %v4007_v40  ;;  %v831_v7 = vsel %vm825_vm14, %v3470_v42, %v3974_v15  ;;  %v4067_v15 = vld [vmem:[#allocation7 + $0x70] sm:$0xff] }
 0x207   : > { %v1209_v6 = vsel %vm1205_vm4, %v3445_v24, %v4013_v36  ;;  %v888_v38 = vmul.f32 %v880_v61, %v876_v19  ;;  %5515 = vst [vmem:[#allocation91_spill] sm:$0xff] %v4027_v26  ;;  %1847 = vmatmul.f32.gmra.mxu0 %v4003_v51  ;;  %v843_v24 = vmul.f32 %v835_v34, %v831_v7  ;;  %v745_v7 = vperm.slane %v3998_v21, 4 }
 0x208   : > { %v1223_v9 = vmul.f32 %v1215_v22, %v1209_v6  ;;  %v4044_v6 = vld [vmem:[#allocation7 + $0xa0] sm:$0xff]  ;;  %v786_v19 = vsel %vm780_vm15, %v3520_v35, %v3944_v41  ;;  %5517 = vst [vmem:[#allocation93_spill] sm:$0xff] %v4067_v15  ;;  %v785_v35 = vsel %vm780_vm15, %v3337_v56, %v3971_v44  ;;  %v4088_v56 = vld [vmem:[#allocation3 + $0x48] sm:$0xff] }
 0x209   : > { %1983 = vmatpush.msra.mxu3 %v888_v38  ;;  %v790_v38 = vperm.slane %v3998_v21, 5 }
 0x20a   : > { %2024 = vmatpush.msra.mxu0 %v1223_v9  ;;  %1923 = vmatmul.f32.gmra.mxu2 %v4027_v26 }
 0x20b   : > { %1201 = vrot.lane.b32.xlu1 %v3218_v31, %s3031_s24  ;;  %1158 = vrot.lane.b32.xlu2 %v3293_v46, %s3034_s28 }
 0x20c   : > { %1044 = vrot.lane.b32.xlu0 %v3564_v53, %s3040_s10  ;;  %1984 = vmatpush.msra.mxu3 %v884_v43 }
 0x20d   : > { %1879 = vmatmul.f32.gmra.mxu1 %v4035_v48  ;;  %v4047_v42 = vpop.permute.xlu1 %813  ;;  %v4049_v62 = vpop.permute.xlu2 %637 }
 0x20e   : > { %v4052_v9 = vpop.permute.xlu0 %1197  ;;  %v830_v61 = vsel %vm825_vm14, %v3313_v50, %v4047_v42  ;;  %1985 = vmatpush.msra.mxu3 %v843_v24  ;;  %v1164_v50 = vsel %vm5408_vm6, %v3498_v32, %v4009_v3  ;;  %v794_v32 = vmul.f32 %v790_v38, %v785_v35  ;;  %v749_v35 = vmul.f32 %v745_v7, %v3682_v1 }
 0x20f   : > { %5516 = vst [vmem:[#allocation92_spill] sm:$0xff] %v4052_v9  ;;  %v1208_v43 = vsel %vm1205_vm4, %v3301_v47, %v4052_v9  ;;  %v839_v26 = vmul.f32 %v835_v34, %v830_v61  ;;  %1850 = vmatmul.f32.gmra.mxu0 %v4044_v6  ;;  %v798_v47 = vmul.f32 %v790_v38, %v786_v19  ;;  %v4079_v34 = vld [vmem:[#allocation7 + $0x48] sm:$0xff]  ;;  %v5518_v61 = vperm.slane %v3994_v25, 6 }
 0x210   : > { %v1219_v24 = vmul.f32 %v1215_v22, %v1208_v43  ;;  %v1475_v22 = vperm.slane %v4088_v56, 7  ;;  %v655_v1 = vperm.slane %v3998_v21, 2 }
 0x211   : > { %1986 = vmatpush.msra.mxu3 %v839_v26  ;;  %v1178_v9 = vmul.f32 %v5518_v61, %v1164_v50  ;;  %v4092_v26 = vld [vmem:[#allocation7 + $0xc0] sm:$0xff]  ;;  %v753_v50 = vmul.f32 %v745_v7, %v3611_v12  ;;  %v4115_v61 = vld [vmem:[#allocation7 + $0x68] sm:$0xff] }
 0x212   : > { %2025 = vmatpush.msra.mxu0 %v1219_v24  ;;  %1926 = vmatmul.f32.gmra.mxu2 %v4067_v15  ;;  %5521 = vst [vmem:[#allocation96_spill] sm:$0xff] %v4115_v61 }
 0x213   : > { %1113 = vrot.lane.b32.xlu1 %v3293_v46, %s3037_s13  ;;  %1111 = vrot.lane.b32.xlu2 %v3218_v31, %s3037_s13 }
 0x214   : > { %999 = vrot.lane.b32.xlu0 %v3564_v53, %s3043_s16  ;;  %1987 = vmatpush.msra.mxu3 %v798_v47  ;;  %v700_v47 = vperm.slane %v3998_v21, 3 }
 0x215   : > { %2026 = vmatpush.msra.mxu0 %v1178_v9  ;;  %1882 = vmatmul.f32.gmra.mxu1 %v4079_v34  ;;  %v4096_v19 = vpop.permute.xlu1 %684  ;;  %v4098_v43 = vpop.permute.xlu2 %1107  ;;  %v4109_v9 = vld [vmem:[#allocation7 + $0x90] sm:$0xff] }
 0x216   : > { %v4101_v38 = vpop.permute.xlu0 %639  ;;  %v4107_v24 = vsel %vm690_vm2, %v3402_v10, %v4096_v19  ;;  %1988 = vmatpush.msra.mxu3 %v794_v32  ;;  %5520 = vst [vmem:[#allocation95_spill] sm:$0xff] %v4109_v9  ;;  %v708_v10 = vmul.f32 %v700_v47, %v3413_v14  ;;  %v704_v7 = vmul.f32 %v700_v47, %v3420_v16 }
 0x217   : > { %5519 = vst [vmem:[#allocation94_spill] sm:$0xff] %v4107_v24  ;;  %1853 = vmatmul.f32.gmra.mxu0 %v4092_v26  ;;  %v1483_v12 = vmul.f32 %v1475_v22, %v4107_v24  ;;  %v663_v47 = vmul.f32 %v655_v1, %v3427_v17  ;;  %v4156_v15 = vsel %vm645_vm3, %v3407_v13, %v4101_v38  ;;  %v1455_v24 = vperm.slane %v4088_v56, 6 }
 0x218   : > { %1989 = vmatpush.msra.mxu3 %v753_v50  ;;  %v4132_v50 = vld [vmem:[#allocation7 + $0xe0] sm:$0xff]  ;;  %5524 = vst [vmem:[#allocation99_spill] sm:$0xff] %v4156_v15 }
 0x219   : > { %2065 = vmatpush.msra.mxu1 %v1483_v12 }
 0x21a   : > { %1990 = vmatpush.msra.mxu3 %v749_v35  ;;  %1929 = vmatmul.f32.gmra.mxu2 %v4109_v9  ;;  %v4150_v9 = vld [vmem:[#allocation7 + $0xb0] sm:$0xff] }
 0x21b   : > { %1042 = vrot.lane.b32.xlu1 %v3582_v55, %s3040_s10  ;;  %1383 = vrot.lane.b32.xlu2 %v3293_v46, %s3039_s12  ;;  %5523 = vst [vmem:[#allocation98_spill] sm:$0xff] %v4150_v9 }
 0x21c   : > { %1338 = vrot.lane.b32.xlu0 %v3293_v46, %s3041_s14  ;;  %1991 = vmatpush.msra.mxu3 %v708_v10 }
 0x21d   : > { %1885 = vmatmul.f32.gmra.mxu1 %v4115_v61  ;;  %v4128_v32 = vpop.permute.xlu1 %682  ;;  %v4130_v14 = vpop.permute.xlu2 %545  ;;  %v1125_v61 = vperm.slane %v3994_v25, 5 }
 0x21e   : > { %v4134_v35 = vpop.permute.xlu0 %1109  ;;  %v4140_v12 = vsel %vm690_vm2, %v3270_v39, %v4128_v32  ;;  %v4146_v16 = vsel %vm555_vm7, %v4130_v14, %v3856_v60  ;;  %1992 = vmatpush.msra.mxu3 %v704_v7  ;;  %v659_v39 = vmul.f32 %v655_v1, %v3439_v20  ;;  %v610_v60 = vperm.slane %v3998_v21, 1  ;;  %v4173_v20 = vld [vmem:[#allocation7 + $0x88] sm:$0xff]  ;;  %v5528_v1 = vld [vmem:[#allocation34_spill] sm:$0xff] }
 0x21f   : > { %5522 = vst [vmem:[#allocation97_spill] sm:$0xff] %v4140_v12  ;;  %v1479_v10 = vmul.f32 %v1475_v22, %v4140_v12  ;;  %1856 = vmatmul.f32.gmra.mxu0 %v4132_v50  ;;  %v5525_v22 = vld [vmem:[#allocation14_spill] sm:$0xff]  ;;  %v1463_v7 = vmul.f32 %v1455_v24, %v4156_v15 }
 0x220   : > { %1993 = vmatpush.msra.mxu3 %v663_v47  ;;  %v618_v17 = vmul.f32 %v610_v60, %v3481_v18  ;;  %v4168_v13 = vsel %vm645_vm3, %v5525_v22, %v4049_v62  ;;  %5527 = vst [vmem:[#allocation100_spill] sm:$0xff] %v4173_v20  ;;  %v565_v18 = vperm.slane %v3998_v21, 0  ;;  %v614_v47 = vmul.f32 %v610_v60, %v5528_v1  ;;  %v5529_v15 = vld [vmem:[#allocation18_spill] sm:$0xff]  ;;  %v5530_v21 = vld [vmem:[#allocation40_spill] sm:$0xff]  ;;  %v5533_v1 = vld [vmem:[#allocation41_spill] sm:$0xff] }
 0x221   : > { %2066 = vmatpush.msra.mxu1 %v1479_v10  ;;  %5526 = vst [vmem:[#allocation14_spill] sm:$0xff] %v4168_v13  ;;  %v1459_v22 = vmul.f32 %v1455_v24, %v4168_v13  ;;  %v5531_v60 = vperm.slane %v3994_v25, 6  ;;  %v1119_v24 = vsel %vm5404_vm8, %v5533_v1, %v4134_v35  ;;  %v5534_v13 = vld [vmem:[#allocation39_spill] sm:$0xff] }
 0x222   : > { %1932 = vmatmul.f32.gmra.mxu2 %v4150_v9  ;;  %1994 = vmatpush.msra.mxu3 %v659_v39  ;;  %v573_v3 = vmul.f32 %v565_v18, %v5530_v21  ;;  %v4211_v21 = vld [vmem:[#allocation7 + $0xa8] sm:$0xff] }
 0x223   : > { %1381 = vrot.lane.b32.xlu1 %v3218_v31, %s3039_s12  ;;  %997 = vrot.lane.b32.xlu2 %v3582_v55, %s3043_s16  ;;  %5536 = vst [vmem:[#allocation18_spill] sm:$0xff] %v4211_v21 }
 0x224   : > { %952 = vrot.lane.b32.xlu0 %v3582_v55, %s3044_s17  ;;  %1995 = vmatpush.msra.mxu3 %v618_v17 }
 0x225   : > { %2067 = vmatpush.msra.mxu1 %v1463_v7  ;;  %v4181_v10 = vpop.permute.xlu1 %1152  ;;  %v4183_v39 = vpop.permute.xlu2 %1379  ;;  %v4196_v7 = vld [vmem:[#allocation7 + $0xd0] sm:$0xff] }
 0x226   : > { %1888 = vmatmul.f32.gmra.mxu1 %v4173_v20  ;;  %v4187_v9 = vpop.permute.xlu0 %592  ;;  %v1163_v12 = vsel %vm5408_vm6, %v5529_v15, %v4181_v10  ;;  %1996 = vmatpush.msra.mxu3 %v614_v47  ;;  %5532 = vst [vmem:[#allocation34_spill] sm:$0xff] %v4196_v7  ;;  %v569_v20 = vmul.f32 %v565_v18, %v5534_v13  ;;  %v5535_v15 = vld [vmem:[#allocation23_spill] sm:$0xff]  ;;  %v1435_v13 = vperm.slane %v4088_v56, 5 }
 0x227   : > { %v1174_v17 = vmul.f32 %v5531_v60, %v1163_v12  ;;  %2068 = vmatpush.msra.mxu1 %v1459_v22  ;;  %v1118_v12 = vsel %vm5404_vm8, %v5535_v15, %v4098_v43  ;;  %v1133_v47 = vmul.f32 %v1125_v61, %v1119_v24  ;;  %v1080_v22 = vperm.slane %v3994_v25, 4  ;;  %v4236_v15 = vld [vmem:[#allocation7 + $0xf0] sm:$0xff] }
 0x228   : > { %1997 = vmatpush.msra.mxu3 %v573_v3  ;;  %v1129_v3 = vmul.f32 %v1125_v61, %v1118_v12  ;;  %5539 = vst [vmem:[#allocation41_spill] sm:$0xff] %v4236_v15  ;;  %v5540_v12 = vld [vmem:[#allocation48_spill] sm:$0xff] }
 0x229   : > { %2027 = vmatpush.msra.mxu0 %v1174_v17  ;;  %v1060_v17 = vperm.slane %v3994_v25, 3  ;;  %v1088_v24 = vmul.f32 %v1080_v22, %v3242_v37 }
 0x22a   : > { %1935 = vmatmul.f32.gmra.mxu2 %v4196_v7  ;;  %1998 = vmatpush.msra.mxu3 %v569_v20  ;;  %v5541_v7 = vld [vmem:[#allocation17_spill] sm:$0xff] }
 0x22b   : > { %954 = vrot.lane.b32.xlu1 %v3564_v53, %s3044_s17  ;;  %1999 = vmatmul.f32.vlgmr.msra.gmra.mxu3 %v3894_v52  ;;  %v5538_v52 = vld [vmem:[#allocation33_spill] sm:$0xff] }
 0x22c   : > { %1291 = vrot.lane.b32.xlu0 %v3218_v31, %s3042_s15  ;;  %1336 = vrot.lane.b32.xlu2 %v3218_v31, %s3041_s14 }
 0x22d   : > { %2028 = vmatpush.msra.mxu0 %v1133_v47  ;;  %v4219_v18 = vpop.permute.xlu1 %594  ;;  %v4221_v20 = vpop.permute.xlu2 %993 }
 0x22e   : > { %5537 = vst [vmem:[#allocation40_spill] sm:$0xff] %v4221_v20  ;;  %1891 = vmatmul.f32.gmra.mxu1 %v4211_v21  ;;  %v4225_v60 = vpop.permute.xlu0 %1040  ;;  %v4231_v61 = vsel %vm600_vm5, %v5538_v52, %v4219_v18  ;;  %v4246_v52 = vsel %vm600_vm5, %v5541_v7, %v4187_v9  ;;  %v1084_v21 = vmul.f32 %v1080_v22, %v3179_v28  ;;  %v4256_v7 = vld [vmem:[#allocation7 + $0xc8] sm:$0xff]  ;;  %v5544_v22 = vld [vmem:[#allocation22_spill] sm:$0xff] }
 0x22f   : > { %v1443_v1 = vmul.f32 %v1435_v13, %v4231_v61  ;;  %2029 = vmatpush.msra.mxu0 %v1129_v3  ;;  %v1056_v47 = vsel %vm5403_vm11, %v5540_v12, %v4225_v60  ;;  %v1439_v3 = vmul.f32 %v1435_v13, %v4246_v52  ;;  %5542 = vst [vmem:[#allocation39_spill] sm:$0xff] %v4256_v7 }
 0x230   : > { %v1068_v37 = vmul.f32 %v1060_v17, %v1056_v47  ;;  %v1395_v47 = vperm.slane %v4088_v56, 3 }
 0x231   : > { %2030 = vmatpush.msra.mxu0 %v1088_v24  ;;  %2069 = vmatpush.msra.mxu1 %v1443_v1  ;;  %v1415_v24 = vperm.slane %v4088_v56, 4  ;;  %v5546_v1 = vld [vmem:[#allocation38_spill] sm:$0xff] }
 0x232   : > { %1938 = vmatmul.f32.gmra.mxu2 %v4236_v15  ;;  %v4293_v15 = vld [vmem:[#allocation7 + $0xe8] sm:$0xff] }
 0x233   : > { %2031 = vmatpush.msra.mxu0 %v1084_v21  ;;  %1293 = vrot.lane.b32.xlu1 %v3293_v46, %s3042_s15  ;;  %5548 = vst [vmem:[#allocation48_spill] sm:$0xff] %v4293_v15 }
 0x234   : > { %2002 = vmatmul.f32.gmra.mxu3 %v3915_v23  ;;  %1246 = vrot.lane.b32.xlu0 %v3218_v31, %s3045_s18  ;;  %v4269_v23 = vsel %vm555_vm7, %v5544_v22, %v4130_v14  ;;  %v5547_v31 = vld [vmem:[#allocation32_spill] sm:$0xff]  ;;  %v1751_v22 = vld [vmem:[%s5298_s5 + $0x28] sm:$0xff] }
 0x235   : > { %909 = vrot.lane.b32.xlu2 %v3564_v53, %s3046_s19  ;;  %2032 = vmatpush.msra.mxu0 %v1068_v37  ;;  %v4261_v28 = vpop.permute.xlu1 %547  ;;  %v4263_v21 = vpop.permute.xlu2 %1332  ;;  %v1389_v14 = vsel %vm1385_vm9, %v5547_v31, %v4183_v39 }
 0x236   : > { %5543 = vst [vmem:[#allocation23_spill] sm:$0xff] %v4263_v21  ;;  %2070 = vmatpush.msra.mxu1 %v1439_v3  ;;  %v4271_v13 = vpop.permute.xlu0 %995  ;;  %v4277_v12 = vsel %vm555_vm7, %v5546_v1, %v4261_v28  ;;  %v1419_v3 = vmul.f32 %v1415_v24, %v4269_v23  ;;  %v1403_v1 = vmul.f32 %v1395_v47, %v1389_v14 }
 0x237   : > { %5545 = vst [vmem:[#allocation33_spill] sm:$0xff] %v4271_v13  ;;  %1894 = vmatmul.f32.gmra.mxu1 %v4256_v7  ;;  %v1423_v37 = vmul.f32 %v1415_v24, %v4277_v12 }
 0x239   : > { %2071 = vmatpush.msra.mxu1 %v1423_v37  ;;  %v1011_v37 = vsel %vm5400_vm0, %v3749_v29, %v4271_v13  ;;  %v1753_v29 = vld [vmem:[%s5298_s5 + $0x38] sm:$0xff] }
 0x23b   : > { %907 = vrot.lane.b32.xlu1 %v3582_v55, %s3046_s19  ;;  %2072 = vmatpush.msra.mxu1 %v1419_v3 }
 0x23c   : > { %2005 = vmatmul.f32.gmra.mxu3 %v3938_v4  ;;  %1781 = vperm.xlu0 %2840, %v1751_v22   ;;  %v5551_v4 = vld [vmem:[#allocation28_spill] sm:$0xff]  ;;  %v1015_v22 = vperm.slane %v3994_v25, 2 }
 0x23d   : > { %1248 = vrot.lane.b32.xlu2 %v3293_v46, %s3045_s18  ;;  %v4297_v31 = vpop.permute.xlu1 %1038  ;;  %v4299_v24 = vpop.permute.xlu2 %1289  ;;  %2073 = vmatpush.msra.mxu1 %v1403_v1  ;;  %v1010_v1 = vsel %vm5400_vm0, %v3753_v30, %v4221_v20  ;;  %v2845_v30 = vld [vmem:[#allocation3 + $0x68] ss:$0 sm:$0xff]  ;;  %vm5553_vm0 = vcmp.lt.s32.totalorder %v3391_v8, 95  ;;  %s2766_s18 = sshll.u32 %s5727_s9, 5 }
 0x23e   : > { %5549 = vst [vmem:[#allocation17_spill] sm:$0xff] %v4299_v24  ;;  %v4305_v14 = vpop.permute.xlu0 %1334  ;;  %v1055_v3 = vsel %vm5403_vm11, %v5551_v4, %v4297_v31  ;;  %v1023_v7 = vmul.f32 %v1015_v22, %v1011_v37  ;;  %v1748_v4 = vld [vmem:[%s5298_s5 + $0x10] sm:$0xff]  ;;  %v5552_v37 = vld [vmem:[#allocation51_spill] sm:$0xff]  ;;  %vm5556_vm11 = vcmp.lt.s32.totalorder %v3391_v8, 62  ;;  %vm5557_vm8 = vmmov %vm5553_vm0  ;;  %s5265_s21 = scalar_lea.vmem %s5301_s8, %s2766_s18 }
 0x23f   : > { %5550 = vst [vmem:[#allocation22_spill] sm:$0xff] %v4305_v14  ;;  %1897 = vmatmul.f32.gmra.mxu1 %v4293_v15  ;;  %v1064_v46 = vmul.f32 %v1060_v17, %v1055_v3  ;;  %v1752_v15 = vld [vmem:[%s5298_s5 + $0x30] sm:$0xff]  ;;  %v1019_v17 = vmul.f32 %v1015_v22, %v1010_v1  ;;  %v1344_v20 = vsel %vm5553_vm0, %v5552_v37, %v4305_v14  ;;  %v5554_v22 = vld [vmem:[#allocation19_spill] sm:$0xff]  ;;  %v1750_v37 = vld [vmem:[%s5298_s5 + $0x20] sm:$0xff]  ;;  %v1305_v14 = vperm.slane %v4088_v56, 1 }
 0x240   : > { %v5555_v1 = vld [vmem:[#allocation47_spill] sm:$0xff]  ;;  %vm5560_vm0 = vcmp.lt.s32.totalorder %v3391_v8, 62 }
 0x241   : > { %2033 = vmatpush.msra.mxu0 %v1064_v46  ;;  %vm5564_vm6 = vmmov %vm5560_vm0 }
 0x243   : > { %1791 = vperm.xlu1 %2841, %v1753_v29   ;;  %2034 = vmatpush.msra.mxu0 %v1023_v7 }
 0x244   : > { %2008 = vmatmul.f32.gmra.mxu3 %v3965_v5  ;;  %1766 = vperm.xlu0 %2840, %v1748_v4   ;;  %v1350_v5 = vperm.slane %v4088_v56, 2  ;;  %v1343_v4 = vsel %vm5557_vm8, %v3706_v49, %v4263_v21  ;;  %v1749_v49 = vld [vmem:[%s5298_s5 + $0x18] sm:$0xff] }
 0x245   : > { %1786 = vperm.xlu2 %2842, %v1752_v15   ;;  %v4327_v3 = vpop.permute.xlu1 %1377  ;;  %2035 = vmatpush.msra.mxu0 %v1019_v17  ;;  %v4329_v46 = vpop.permute.xlu2 %1287 }
 0x246   : > { %v730_v13 = vpop.permute.xlu0 %729  ;;  %v1388_v7 = vsel %vm1385_vm9, %v5554_v22, %v4327_v3  ;;  %v1358_v22 = vmul.f32 %v1350_v5, %v1344_v20  ;;  %v970_v20 = vperm.slane %v3994_v25, 1 }
 0x247   : > { %v4343_v15 = vsel %vm5556_vm11, %v5555_v1, %v730_v13  ;;  %v1399_v29 = vmul.f32 %v1395_v47, %v1388_v7  ;;  %v2508_v1 = vld [vmem:[%s5300_s7] sm:$0xff]  ;;  %vm5558_vm11 = vcmp.lt.s32.totalorder %v3391_v8, 96  ;;  %v1354_v7 = vmul.f32 %v1350_v5, %v1343_v4 }
 0x248   : > { %v1503_v17 = vmul.f32 %v2845_v30, %v4343_v15  ;;  %v1299_v47 = vsel %vm5558_vm11, %v3802_v59, %v4299_v24  ;;  %vm5559_vm8 = vmmov %vm5558_vm11  ;;  %v2846_v59 = vld [vmem:[#allocation3 + $0x70] ss:$0 sm:$0xff]  ;;  %v4377_v5 = vsel %vm5560_vm0, %v730_v13, %v3550_v58  ;;  %vm5561_vm11 = vcmp.lt.s32.totalorder %v3391_v8, 30  ;;  %v1747_v13 = vld [vmem:[%s5298_s5 + $0x8] sm:$0xff] }
 0x249   : > { %2074 = vmatpush.msra.mxu1 %v1399_v29  ;;  %v1298_v29 = vsel %vm5559_vm8, %v3806_v2, %v4329_v46  ;;  %v1313_v21 = vmul.f32 %v1305_v14, %v1299_v47  ;;  %vm5563_vm8 = vmmov %vm5560_vm0  ;;  %vm5611_vm0 = vcmp.lt.s32.totalorder %v3391_v8, 1 }
 0x24a   : > { %2120 = vmatpush.msra.mxu2 %v1503_v17 }
 0x24b   : > { %1776 = vperm.xlu1 %2841, %v1750_v37   ;;  %2075 = vmatpush.msra.mxu1 %v1358_v22  ;;  %v5562_v37 = vld [vmem:[#allocation56_spill] sm:$0xff] }
 0x24c   : > { %2011 = vmatmul.f32.gmra.mxu3 %v4003_v51  ;;  %2511 = vperm.xlu0 %2840, %v2508_v1   ;;  %v1309_v51 = vmul.f32 %v1305_v14, %v1298_v29  ;;  %v2843_v14 = vld [vmem:[#allocation3 + $0x78] ss:$0 sm:$0xff] }
 0x24d   : > { %1771 = vperm.xlu2 %2842, %v1749_v49   ;;  %v4370_v17 = vpop.permute.xlu1 %950  ;;  %v4372_v24 = vpop.permute.xlu2 %1242  ;;  %2076 = vmatpush.msra.mxu1 %v1354_v7  ;;  %v1501_v29 = vmul.f32 %v2843_v14, %v3732_v27  ;;  %v925_v27 = vperm.slane %v3994_v25, 0 }
 0x24e   : > { %v728_v4 = vpop.permute.xlu0 %727  ;;  %v966_v2 = vsel %vm5561_vm11, %v3751_v33, %v4370_v17  ;;  %v1504_v33 = vmul.f32 %v2846_v59, %v4377_v5 }
 0x24f   : > { %v4386_v22 = vsel %vm5563_vm8, %v5562_v37, %v728_v4  ;;  %v978_v1 = vmul.f32 %v970_v20, %v966_v2  ;;  %2077 = vmatpush.msra.mxu1 %v1313_v21  ;;  %v4391_v47 = vsel %vm5564_vm6, %v728_v4, %v3365_v0  ;;  %v1746_v21 = vld [vmem:[%s5298_s5] sm:$0xff]  ;;  %v1505_v0 = vmul.f32 %v2843_v14, %v3725_v45  ;;  %vm5565_vm6 = vmmov %vm5561_vm11  ;;  %v5566_v37 = vld [vmem:[#allocation79_spill] sm:$0xff] }
 0x250   : > { %v1499_v58 = vmul.f32 %v2845_v30, %v4386_v22  ;;  %v1500_v49 = vmul.f32 %v2846_v59, %v4391_v47  ;;  %vm5614_vm11 = vmmov %vm5611_vm0 }
 0x251   : > { %2036 = vmatpush.msra.mxu0 %v978_v1  ;;  %2078 = vmatpush.msra.mxu1 %v1309_v51  ;;  %v4438_v1 = vld [vmem:[#allocation3 + $0x30] sm:$0xff] }
 0x252   : > { %2121 = vmatpush.msra.mxu2 %v1499_v58  ;;  %v5409_v58 = vperm.slane %v4438_v1, 7 }
 0x253   : > { %1761 = vperm.xlu1 %2841, %v1747_v13   ;;  %2735 = vmatmul.msk.f32.vlgmr.msra.gmra.mxu2 %vm1794_vm1, %v3775_v57  ;;  %v4417_v57 = vld [vmem:[#allocation3 + $0x10] sm:$0xff] }
 0x254   : > { %2284 = vmatpush.msrb.mxu2 %v1504_v33  ;;  %2014 = vmatmul.f32.gmra.mxu3 %v4044_v6  ;;  %v881_v59 = vperm.slane %v4417_v57, 7 }
 0x255   : > { %1756 = vperm.xlu2 %2842, %v1746_v21   ;;  %v4406_v30 = vpop.permute.xlu1 %948  ;;  %v4408_v7 = vpop.permute.xlu2 %819  ;;  %v5567_v21 = vld [vmem:[#allocation88_spill] sm:$0xff] }
 0x256   : > { %2285 = vmatpush.msrb.mxu2 %v1500_v49  ;;  %v4411_v4 = vpop.permute.xlu0 %903  ;;  %v965_v45 = vsel %vm5565_vm6, %v3919_v54, %v4406_v30  ;;  %v5568_v49 = vld [vmem:[#allocation68_spill] sm:$0xff] }
 0x257   : > { %v974_v6 = vmul.f32 %v970_v20, %v965_v45  ;;  %v920_v54 = vsel %vm915_vm10, %v3898_v11, %v4411_v4  ;;  %v5569_v45 = vld [vmem:[#allocation81_spill] sm:$0xff] }
 0x258   : > { %2448 = vmatpush.msra.mxu2 %v1505_v0  ;;  %v929_v33 = vmul.f32 %v925_v27, %v920_v54  ;;  %v5570_v54 = vld [vmem:[#allocation64_spill] sm:$0xff] }
 0x259   : > { %2037 = vmatpush.msra.mxu0 %v974_v6  ;;  %v1253_v6 = vsel %vm1250_vm12, %v5569_v45, %v4372_v24 }
 0x25a   : > { %2449 = vmatpush.msra.mxu2 %v1501_v29 }
 0x25b   : > { %2736 = vmatmul.msk.f32.gmra.mxu2 %vm1794_vm1, %v3818_v63 }
 0x25c   : > { %2017 = vmatmul.f32.gmra.mxu3 %v4092_v26 }
 0x25d   : > { %v4424_v2 = vpop.permute.xlu1 %905  ;;  %v4426_v51 = vpop.permute.xlu2 %1203 }
 0x25e   : > { %v4432_v20 = vpop.permute.xlu0 %864  ;;  %v921_v63 = vsel %vm915_vm10, %v5566_v37, %v4424_v2  ;;  %v1207_v11 = vsel %vm1205_vm4, %v4013_v36, %v4426_v51  ;;  %v4460_v36 = vld [vmem:[#allocation3 + $0x50] sm:$0xff] }
 0x25f   : > { %v874_v25 = vsel %vm870_vm13, %v4007_v40, %v4432_v20  ;;  %v933_v26 = vmul.f32 %v925_v27, %v921_v63  ;;  %v1224_v14 = vmul.f32 %v5409_v58, %v1207_v11  ;;  %v1260_v40 = vperm.slane %v4088_v56, 0 }
 0x260   : > { %v889_v13 = vmul.f32 %v881_v59, %v874_v25  ;;  %v1476_v37 = vperm.slane %v4460_v36, 7  ;;  %v5571_v25 = vld [vmem:[#allocation50_spill] sm:$0xff] }
 0x261   : > { %2038 = vmatpush.msra.mxu0 %v933_v26  ;;  %v1264_v26 = vmul.f32 %v1260_v40, %v1253_v6 }
 0x262   : > { %2147 = vmatpush.msrb.mxu3 %v889_v13  ;;  %v5572_v13 = vld [vmem:[#allocation30_spill] sm:$0xff] }
 0x263   : > { %2039 = vmatpush.msra.mxu0 %v929_v33  ;;  %2737 = vmatmul.msk.f32.gmra.mxu2 %vm1794_vm1, %v5568_v49  ;;  %v4483_v11 = vsel %vm690_vm2, %v4128_v32, %v5572_v13  ;;  %v1456_v49 = vperm.slane %v4460_v36, 6  ;;  %v836_v32 = vperm.slane %v4417_v57, 6 }
 0x264   : > { %2040 = vmatmul.f32.vlgmr.msra.gmra.mxu0 %v5567_v21  ;;  %2020 = vmatmul.f32.gmra.mxu3 %v4132_v50  ;;  %v4477_v50 = vsel %vm690_vm2, %v4096_v19, %v5571_v25  ;;  %v5574_v19 = vld [vmem:[#allocation83_spill] sm:$0xff]  ;;  %v5578_v25 = vld [vmem:[#allocation78_spill] sm:$0xff]  ;;  %vm5592_vm2 = vcmp.lt.s32.totalorder %v3391_v8, 126 }
 0x265   : > { %2188 = vmatpush.msrb.mxu0 %v1224_v14  ;;  %v4455_v0 = vpop.permute.xlu1 %1244  ;;  %v4457_v29 = vpop.permute.xlu2 %1158  ;;  %v1484_v33 = vmul.f32 %v1476_v37, %v4477_v50  ;;  %v5573_v14 = vld [vmem:[#allocation46_spill] sm:$0xff] }
 0x266   : > { %v4466_v27 = vpop.permute.xlu0 %817  ;;  %v1254_v56 = vsel %vm1250_vm12, %v5570_v54, %v4455_v0  ;;  %v4490_v21 = vsel %vm645_vm3, %v4101_v38, %v5573_v14  ;;  %v5575_v54 = vld [vmem:[#allocation74_spill] sm:$0xff]  ;;  %v5576_v38 = vld [vmem:[#allocation49_spill] sm:$0xff]  ;;  %v5579_v14 = vld [vmem:[#allocation55_spill] sm:$0xff] }
 0x267   : > { %v1268_v63 = vmul.f32 %v1260_v40, %v1254_v56  ;;  %v1480_v40 = vmul.f32 %v1476_v37, %v4483_v11  ;;  %v5577_v56 = vld [vmem:[#allocation86_spill] sm:$0xff]  ;;  %v1464_v13 = vmul.f32 %v1456_v49, %v4490_v21 }
 0x268   : > { %v829_v37 = vsel %vm825_vm14, %v5577_v56, %v4408_v7  ;;  %v1436_v56 = vperm.slane %v4460_v36, 5 }
 0x269   : > { %2079 = vmatpush.msra.mxu1 %v1268_v63 }
 0x26b   : > { %2080 = vmatpush.msra.mxu1 %v1264_v26  ;;  %2738 = vmatmul.msk.f32.gmra.mxu2 %vm1794_vm1, %v5575_v54  ;;  %v4530_v54 = vpop.f32.mrf.mxu0 }
 0x26c   : > { %2043 = vmatmul.f32.gmra.mxu0 %v4035_v48  ;;  %2081 = vmatmul.f32.vlgmr.msra.gmra.mxu1 %v5574_v19  ;;  %v4507_v48 = vsel %vm645_vm3, %v4049_v62, %v5576_v38  ;;  %v4524_v62 = vsel %vm600_vm5, %v4219_v18, %v5579_v14  ;;  %v828_v19 = vsel %vm825_vm14, %v4047_v42, %v4466_v27  ;;  %v5582_v42 = vld [vmem:[#allocation70_spill] sm:$0xff]  ;;  %v4552_v14 = vpop.f32.mrf.mxu3  ;;  %vm5598_vm3 = vmmov %vm5592_vm2 }
 0x26d   : > { %2229 = vmatpush.msrb.mxu1 %v1484_v33  ;;  %v4497_v45 = vpop.permute.xlu1 %862  ;;  %v4499_v6 = vpop.permute.xlu2 %1111  ;;  %5580 = vst [vmem:[#allocation38_spill] sm:$0xff] %v4530_v54  ;;  %v1460_v38 = vmul.f32 %v1456_v49, %v4507_v48  ;;  %v4545_v49 = vsel %vm555_vm7, %v4261_v28, %v5582_v42 }
 0x26e   : > { %v4513_v63 = vpop.permute.xlu0 %772  ;;  %v873_v26 = vsel %vm870_vm13, %v5578_v25, %v4497_v45  ;;  %v844_v25 = vmul.f32 %v836_v32, %v829_v37  ;;  %v5583_v37 = vld [vmem:[#allocation87_spill] sm:$0xff]  ;;  %5584 = vst [vmem:[#allocation32_spill] sm:$0xff] %v4552_v14 }
 0x26f   : > { %v885_v33 = vmul.f32 %v881_v59, %v873_v26  ;;  %2230 = vmatpush.msrb.mxu1 %v1480_v40  ;;  %v5581_v59 = vld [vmem:[#allocation69_spill] sm:$0xff]  ;;  %v1444_v40 = vmul.f32 %v1436_v56, %v4524_v62  ;;  %v840_v26 = vmul.f32 %v836_v32, %v828_v19  ;;  %v783_v28 = vsel %vm780_vm15, %v3971_v44, %v4513_v63  ;;  %v5589_v14 = vld [vmem:[#allocation91_spill] sm:$0xff] }
 0x270   : > { %v4538_v18 = vsel %vm600_vm5, %v4187_v9, %v5581_v59  ;;  %v746_v59 = vperm.slane %v4417_v57, 4  ;;  %vm5605_vm5 = vcmp.lt.s32.totalorder %v3391_v8, 127 }
 0x271   : > { %2231 = vmatpush.msrb.mxu1 %v1464_v13  ;;  %2148 = vmatpush.msrb.mxu3 %v885_v33  ;;  %v1416_v13 = vperm.slane %v4460_v36, 4  ;;  %v1440_v9 = vmul.f32 %v1436_v56, %v4538_v18  ;;  %v791_v33 = vperm.slane %v4417_v57, 5  ;;  %v5586_v56 = vld [vmem:[#allocation77_spill] sm:$0xff]  ;;  %vm5606_vm7 = vmmov %vm5605_vm5 }
 0x272   : > { %v754_v58 = vmul.f32 %v746_v59, %v4343_v15  ;;  %v5591_v15 = vld [vmem:[#allocation90_spill] sm:$0xff] }
 0x273   : > { %2232 = vmatpush.msrb.mxu1 %v1460_v38  ;;  %2149 = vmatpush.msrb.mxu3 %v844_v25  ;;  %v1424_v25 = vmul.f32 %v1416_v13, %v4545_v49  ;;  %v795_v42 = vmul.f32 %v791_v33, %v783_v28 }
 0x274   : > { %2046 = vmatmul.f32.gmra.mxu0 %v4079_v34  ;;  %2084 = vmatmul.f32.gmra.mxu1 %v5583_v37  ;;  %v4578_v37 = vpop.f32.mrf.mxu0 }
 0x275   : > { %2233 = vmatpush.msrb.mxu1 %v1444_v40  ;;  %v4554_v32 = vpop.permute.xlu1 %774  ;;  %2150 = vmatpush.msrb.mxu3 %v840_v26  ;;  %v4566_v38 = vpop.permute.xlu2 %1383  ;;  %v5410_v26 = vperm.slane %v4460_v36, 3  ;;  %5587 = vst [vmem:[#allocation51_spill] sm:$0xff] %v4578_v37 }
 0x276   : > { %v4560_v34 = vpop.permute.xlu0 %1156  ;;  %v784_v19 = vsel %vm780_vm15, %v3944_v41, %v4554_v32  ;;  %5585 = vst [vmem:[#allocation28_spill] sm:$0xff] %v4566_v38  ;;  %2739 = vmatmul.msk.f32.gmra.mxu2 %vm1794_vm1, %v5586_v56  ;;  %v1387_v44 = vsel %vm1385_vm9, %v4183_v39, %v4566_v38  ;;  %v1420_v41 = vmul.f32 %v1416_v13, %v4146_v16  ;;  %v701_v56 = vperm.slane %v4417_v57, 3 }
 0x277   : > { %v799_v40 = vmul.f32 %v791_v33, %v784_v19  ;;  %2234 = vmatpush.msrb.mxu1 %v1440_v9  ;;  %v1404_v19 = vmul.f32 %v5410_v26, %v1387_v44  ;;  %v5588_v9 = vld [vmem:[#allocation96_spill] sm:$0xff]  ;;  %v750_v39 = vmul.f32 %v746_v59, %v4386_v22  ;;  %v1171_v13 = vperm.slane %v4438_v1, 6  ;;  %v5599_v26 = vld [vmem:[#allocation97_spill] sm:$0xff] }
 0x278   : > { %v5593_v44 = vld [vmem:[#allocation92_spill] sm:$0xff] }
 0x279   : > { %2235 = vmatpush.msrb.mxu1 %v1424_v25  ;;  %2151 = vmatpush.msrb.mxu3 %v799_v40  ;;  %v1162_v25 = vsel %vm5592_vm2, %v5591_v15, %v4457_v29  ;;  %v5594_v59 = vld [vmem:[#allocation80_spill] sm:$0xff]  ;;  %v1161_v15 = vsel %vm5598_vm3, %v4181_v10, %v4560_v34  ;;  %v5603_v10 = vld [vmem:[#allocation14_spill] sm:$0xff]  ;;  %vm5637_vm2 = vmmov %vm5565_vm6  ;;  %vm5640_vm3 = vcmp.lt.s32.totalorder %v3391_v8, 96 }
 0x27a   : > { %v1179_v37 = vmul.f32 %v1171_v13, %v1162_v25  ;;  %v1175_v54 = vmul.f32 %v1171_v13, %v1161_v15 }
 0x27b   : > { %2236 = vmatpush.msrb.mxu1 %v1420_v41  ;;  %2152 = vmatpush.msrb.mxu3 %v795_v42  ;;  %v4607_v42 = vpop.f32.mrf.mxu3 }
 0x27c   : > { %2049 = vmatmul.f32.gmra.mxu0 %v5588_v9  ;;  %2087 = vmatmul.f32.gmra.mxu1 %v5589_v14  ;;  %5596 = vst [vmem:[#allocation47_spill] sm:$0xff] %v4607_v42 }
 0x27d   : > { %2237 = vmatpush.msrb.mxu1 %v1404_v19  ;;  %v4588_v33 = vpop.permute.xlu1 %1201  ;;  %2153 = vmatpush.msrb.mxu3 %v754_v58  ;;  %v4590_v28 = vpop.f32.mrf.mxu2  ;;  %v5595_v58 = vld [vmem:[#allocation94_spill] sm:$0xff]  ;;  %v5597_v19 = vperm.slane %v4438_v1, 7 }
 0x27e   : > { %5590 = vst [vmem:[#allocation19_spill] sm:$0xff] %v4590_v28  ;;  %v4596_v40 = vpop.permute.xlu0 %1044  ;;  %v1206_v22 = vsel %vm1205_vm4, %v5593_v44, %v4588_v33  ;;  %v4602_v14 = vpop.permute.xlu2 %997  ;;  %2740 = vmatmul.msk.f32.gmra.mxu2 %vm1794_vm1, %v5594_v59  ;;  %v709_v41 = vmul.f32 %v701_v56, %v5595_v58  ;;  %v656_v44 = vperm.slane %v4417_v57, 2  ;;  %v705_v28 = vmul.f32 %v701_v56, %v5599_v26  ;;  %v5600_v58 = vld [vmem:[#allocation99_spill] sm:$0xff] }
 0x27f   : > { %v1220_v9 = vmul.f32 %v5597_v19, %v1206_v22  ;;  %2154 = vmatpush.msrb.mxu3 %v750_v39  ;;  %v5601_v39 = vld [vmem:[#allocation100_spill] sm:$0xff]  ;;  %v5602_v22 = vld [vmem:[#allocation93_spill] sm:$0xff]  ;;  %v4622_v19 = vpop.f32.mrf.mxu0  ;;  %v611_v26 = vperm.slane %v4417_v57, 1  ;;  %v1126_v56 = vperm.slane %v4438_v1, 5 }
 0x280   : > { %v664_v42 = vmul.f32 %v656_v44, %v5600_v58  ;;  %v660_v38 = vmul.f32 %v656_v44, %v5603_v10  ;;  %v566_v44 = vperm.slane %v4417_v57, 0  ;;  %v4653_v10 = vld [vmem:[#allocation3 + $0x18] sm:$0xff] }
 0x281   : > { %2155 = vmatpush.msrb.mxu3 %v709_v41  ;;  %2189 = vmatpush.msrb.mxu0 %v1220_v9  ;;  %v5607_v9 = vld [vmem:[#allocation84_spill] sm:$0xff]  ;;  %v882_v57 = vperm.slane %v4653_v10, 7 }
 0x282   : > { %v4617_v59 = vpop.f32.mrf.mxu1 }
 0x283   : > { %2156 = vmatpush.msrb.mxu3 %v705_v28  ;;  %2190 = vmatpush.msrb.mxu0 %v1179_v37  ;;  %v1116_v37 = vsel %vm5605_vm5, %v4098_v43, %v4499_v6  ;;  %v615_v43 = vmul.f32 %v611_v26, %v4246_v52  ;;  %v1061_v52 = vperm.slane %v4438_v1, 3  ;;  %vm5642_vm5 = vmmov %vm5640_vm3 }
 0x284   : > { %2052 = vmatmul.f32.gmra.mxu0 %v5601_v39  ;;  %2090 = vmatmul.f32.gmra.mxu1 %v5602_v22  ;;  %v1130_v58 = vmul.f32 %v1126_v56, %v1116_v37  ;;  %v4648_v39 = vpop.f32.mrf.mxu3  ;;  %v570_v37 = vmul.f32 %v566_v44, %v4269_v23 }
 0x285   : > { %v4627_v25 = vpop.permute.xlu1 %1113  ;;  %2157 = vmatpush.msrb.mxu3 %v664_v42  ;;  %2191 = vmatpush.msrb.mxu0 %v1175_v54  ;;  %v4629_v41 = vpop.f32.mrf.mxu2  ;;  %v619_v42 = vmul.f32 %v611_v26, %v4231_v61  ;;  %v574_v61 = vmul.f32 %v566_v44, %v4277_v12  ;;  %v5608_v26 = vld [vmem:[#allocation18_spill] sm:$0xff] }
 0x286   : > { %5604 = vst [vmem:[#allocation56_spill] sm:$0xff] %v4629_v41  ;;  %v4635_v13 = vpop.permute.xlu0 %999  ;;  %v1117_v28 = vsel %vm5606_vm7, %v4134_v35, %v4627_v25  ;;  %2741 = vmatmul.msk.f32.gmra.mxu2 %vm1794_vm1, %v5607_v9  ;;  %v4644_v15 = vpop.permute.xlu2 %1336  ;;  %v1081_v35 = vperm.slane %v4438_v1, 4 }
 0x287   : > { %v1134_v54 = vmul.f32 %v1126_v56, %v1117_v28  ;;  %2158 = vmatpush.msrb.mxu3 %v660_v38  ;;  %v5609_v56 = vld [vmem:[#allocation95_spill] sm:$0xff]  ;;  %v5610_v28 = vld [vmem:[#allocation54_spill] sm:$0xff]  ;;  %v4678_v44 = vpop.f32.mrf.mxu0 }
 0x288   : > { %v1089_v38 = vmul.f32 %v1081_v35, %v3564_v53  ;;  %v872_v9 = vsel %vm870_vm13, %v4432_v20, %v5610_v28  ;;  %v1054_v53 = vsel %vm5611_vm0, %v4225_v60, %v4596_v40  ;;  %v1085_v23 = vmul.f32 %v1081_v35, %v3582_v55  ;;  %v5612_v20 = vld [vmem:[#allocation89_spill] sm:$0xff]  ;;  %v5616_v28 = vld [vmem:[#allocation35_spill] sm:$0xff] }
 0x289   : > { %2159 = vmatpush.msrb.mxu3 %v619_v42  ;;  %2192 = vmatpush.msrb.mxu0 %v1134_v54  ;;  %v5412_v42 = vperm.slane %v4438_v1, 0  ;;  %v837_v55 = vperm.slane %v4653_v10, 6  ;;  %v890_v35 = vmul.f32 %v882_v57, %v872_v9  ;;  %vm5667_vm0 = vcmp.lt.s32.totalorder %v3391_v8, 127 }
 0x28a   : > { %v4651_v22 = vpop.f32.mrf.mxu1 }
 0x28b   : > { %2160 = vmatpush.msrb.mxu3 %v615_v43  ;;  %2193 = vmatpush.msrb.mxu0 %v1130_v58  ;;  %v5613_v58 = vld [vmem:[#allocation21_spill] sm:$0xff] }
 0x28c   : > { %2055 = vmatmul.f32.gmra.mxu0 %v5608_v26  ;;  %2093 = vmatmul.f32.gmra.mxu1 %v5609_v56  ;;  %v871_v60 = vsel %vm870_vm13, %v4497_v45, %v5613_v58  ;;  %v1069_v26 = vmul.f32 %v1061_v52, %v1054_v53  ;;  %v827_v45 = vsel %vm825_vm14, %v4408_v7, %v5616_v28  ;;  %vm5618_vm13 = vcmp.lt.s32.totalorder %v3391_v8, 2  ;;  %v4709_v53 = vld [vmem:[#allocation7] sm:$0xff] }
 0x28d   : > { %v4670_v12 = vpop.permute.xlu1 %1042  ;;  %2161 = vmatpush.msrb.mxu3 %v574_v61  ;;  %2194 = vmatpush.msrb.mxu0 %v1089_v38  ;;  %v4673_v54 = vpop.f32.mrf.mxu2  ;;  %5619 = vst [vmem:[#allocation88_spill] sm:$0xff] %v4709_v53  ;;  %v5620_v7 = vld [vmem:[#allocation24_spill] sm:$0xff]  ;;  %vm5622_vm8 = vmmov %vm5618_vm13 }
 0x28e   : > { %v4675_v43 = vpop.permute.xlu0 %1338  ;;  %2742 = vmatmul.msk.f32.gmra.mxu2 %vm1794_vm1, %v5612_v20  ;;  %v1053_v61 = vsel %vm5614_vm11, %v4297_v31, %v4670_v12  ;;  %v5617_v31 = vld [vmem:[#allocation33_spill] sm:$0xff]  ;;  %v826_v28 = vsel %vm825_vm14, %v4466_v27, %v5620_v7  ;;  %vm5628_vm14 = vcmp.lt.s32.totalorder %v3391_v8, 95  ;;  %v4755_v27 = vld [vmem:[#allocation7 + $0x18] sm:$0xff]  ;;  %vm5671_vm11 = vmmov %vm5667_vm0 }
 0x28f   : > { %v4690_v38 = vpop.permute.xlu2 %909  ;;  %2162 = vmatpush.msrb.mxu3 %v570_v37  ;;  %2195 = vmatpush.msrb.mxu0 %v1085_v23  ;;  %v1009_v37 = vsel %vm5618_vm13, %v5617_v31, %v4635_v13  ;;  %v1016_v23 = vperm.slane %v4438_v1, 2  ;;  %v1065_v20 = vmul.f32 %v1061_v52, %v1053_v61  ;;  %v4719_v31 = vpop.f32.mrf.mxu3  ;;  %v5623_v52 = vld [vmem:[#allocation37_spill] sm:$0xff]  ;;  %5630 = vst [vmem:[#allocation68_spill] sm:$0xff] %v4755_v27  ;;  %vm5677_vm13 = vcmp.lt.s32.totalorder %v3391_v8, 1 }
 0x290   : > { %5615 = vst [vmem:[#allocation79_spill] sm:$0xff] %v4690_v38  ;;  %v919_v56 = vsel %vm915_vm10, %v4424_v2, %v4690_v38  ;;  %2163 = vmatmul.f32.vlgmr.msrb.gmra.mxu3 %v4709_v53  ;;  %v886_v2 = vmul.f32 %v882_v57, %v871_v60  ;;  %v782_v61 = vsel %vm780_vm15, %v4554_v32, %v5623_v52 }
 0x291   : > { %v4707_v9 = vmul.f32 %v5412_v42, %v919_v56  ;;  %2311 = vmatpush.msra.mxu3 %v890_v35  ;;  %2196 = vmatpush.msrb.mxu0 %v1069_v26  ;;  %v845_v56 = vmul.f32 %v837_v55, %v827_v45  ;;  %v5621_v42 = vld [vmem:[#allocation40_spill] sm:$0xff]  ;;  %v1024_v60 = vmul.f32 %v1016_v23, %v1009_v37  ;;  %v5624_v35 = vld [vmem:[#allocation98_spill] sm:$0xff]  ;;  %v5625_v45 = vld [vmem:[#allocation39_spill] sm:$0xff] }
 0x292   : > { %v4713_v58 = vpop.f32.mrf.mxu1  ;;  %v1008_v57 = vsel %vm5622_vm8, %v5621_v42, %v4602_v14  ;;  %v841_v53 = vmul.f32 %v837_v55, %v826_v28  ;;  %v792_v42 = vperm.slane %v4653_v10, 5  ;;  %v5629_v28 = vperm.slane %v4460_v36, 3 }
 0x293   : > { %2312 = vmatpush.msra.mxu3 %v886_v2  ;;  %2197 = vmatpush.msrb.mxu0 %v1065_v20  ;;  %v5626_v2 = vld [vmem:[#allocation27_spill] sm:$0xff]  ;;  %v1020_v52 = vmul.f32 %v1016_v23, %v1008_v57  ;;  %v4765_v57 = vpop.f32.mrf.mxu0 }
 0x294   : > { %2096 = vmatmul.f32.gmra.mxu1 %v5624_v35  ;;  %2058 = vmatmul.f32.gmra.mxu0 %v5625_v45  ;;  %v781_v20 = vsel %vm780_vm15, %v4513_v63, %v5626_v2  ;;  %v5627_v35 = vld [vmem:[#allocation22_spill] sm:$0xff]  ;;  %v1351_v63 = vperm.slane %v4460_v36, 2  ;;  %vm5632_vm15 = vmmov %vm5628_vm14 }
 0x295   : > { %v4730_v26 = vpop.permute.xlu1 %1381  ;;  %v4734_v7 = vpop.f32.mrf.mxu2  ;;  %2313 = vmatpush.msra.mxu3 %v845_v56  ;;  %2198 = vmatpush.msrb.mxu0 %v1024_v60  ;;  %v1342_v55 = vsel %vm5628_vm14, %v5627_v35, %v4675_v43  ;;  %v800_v60 = vmul.f32 %v792_v42, %v782_v61  ;;  %v5633_v35 = vperm.slane %v4460_v36, 0  ;;  %v4775_v61 = vld [vmem:[#allocation7 + $0x20] sm:$0xff] }
 0x296   : > { %v4737_v37 = vpop.permute.xlu0 %952  ;;  %v1386_v32 = vsel %vm1385_vm9, %v4327_v3, %v4730_v26  ;;  %2743 = vmatmul.msk.f32.vlgmr.msrb.gmra.mxu2 %vm1794_vm1, %v4755_v27  ;;  %v747_v3 = vperm.slane %v4653_v10, 4  ;;  %5634 = vst [vmem:[#allocation81_spill] sm:$0xff] %v4775_v61  ;;  %v796_v27 = vmul.f32 %v792_v42, %v781_v20  ;;  %v1359_v38 = vmul.f32 %v1351_v63, %v1342_v55  ;;  %v5636_v42 = vld [vmem:[#allocation48_spill] sm:$0xff] }
 0x297   : > { %v1400_v56 = vmul.f32 %v5629_v28, %v1386_v32  ;;  %v4753_v45 = vpop.permute.xlu2 %1248  ;;  %2314 = vmatpush.msra.mxu3 %v841_v53  ;;  %v5631_v32 = vld [vmem:[#allocation23_spill] sm:$0xff]  ;;  %2199 = vmatpush.msrb.mxu0 %v1020_v52  ;;  %v702_v53 = vperm.slane %v4653_v10, 3  ;;  %v971_v52 = vperm.slane %v4438_v1, 1 }
 0x298   : > { %v1252_v23 = vsel %vm1250_vm12, %v4455_v0, %v4753_v45  ;;  %v1341_v2 = vsel %vm5632_vm15, %v5631_v32, %v4644_v15  ;;  %2166 = vmatmul.f32.gmra.mxu3 %v4775_v61  ;;  %v755_v41 = vmul.f32 %v747_v3, %v4377_v5  ;;  %v751_v20 = vmul.f32 %v747_v3, %v4391_v47  ;;  %vm5688_vm15 = vmmov %vm5628_vm14 }
 0x299   : > { %v4773_v28 = vmul.f32 %v5633_v35, %v1252_v23  ;;  %2315 = vmatpush.msra.mxu3 %v800_v60  ;;  %2238 = vmatpush.msrb.mxu1 %v1400_v56  ;;  %v1355_v32 = vmul.f32 %v1351_v63, %v1341_v2  ;;  %v4782_v23 = vpop.f32.mrf.mxu3  ;;  %v5635_v35 = vld [vmem:[#allocation34_spill] sm:$0xff]  ;;  %v963_v5 = vsel %vm5565_vm6, %v4406_v30, %v4737_v37  ;;  %v4802_v60 = vld [vmem:[#allocation7 + $0x38] sm:$0xff]  ;;  %vm5691_vm6 = vmmov %vm5640_vm3 }
 0x29a   : > { %v4778_v0 = vpop.f32.mrf.mxu1  ;;  %v710_v47 = vmul.f32 %v702_v53, %v4477_v50  ;;  %v975_v30 = vmul.f32 %v971_v52, %v963_v5  ;;  %v706_v3 = vmul.f32 %v702_v53, %v4483_v11  ;;  %v1306_v50 = vperm.slane %v4460_v36, 1 }
 0x29b   : > { %2316 = vmatpush.msra.mxu3 %v796_v27  ;;  %2239 = vmatpush.msrb.mxu1 %v1359_v38  ;;  %v4812_v63 = vpop.f32.mrf.mxu0  ;;  %v612_v11 = vperm.slane %v4653_v10, 1 }
 0x29c   : > { %2099 = vmatmul.f32.gmra.mxu1 %v5635_v35  ;;  %2061 = vmatmul.f32.gmra.mxu0 %v5636_v42 }
 0x29d   : > { %v4786_v61 = vpop.permute.xlu1 %954  ;;  %2317 = vmatpush.msra.mxu3 %v755_v41  ;;  %2240 = vmatpush.msrb.mxu1 %v1355_v32  ;;  %v4800_v55 = vpop.f32.mrf.mxu2  ;;  %v4807_v41 = vld [vmem:[#allocation7 + $0x40] sm:$0xff] }
 0x29e   : > { %v4794_v27 = vpop.permute.xlu0 %1291  ;;  %v964_v38 = vsel %vm5637_vm2, %v4370_v17, %v4786_v61  ;;  %2744 = vmatmul.msk.f32.gmra.mxu2 %vm1794_vm1, %v4802_v60  ;;  %5638 = vst [vmem:[#allocation64_spill] sm:$0xff] %v4807_v41  ;;  %v657_v17 = vperm.slane %v4653_v10, 2  ;;  %vm5693_vm2 = vmmov %vm5622_vm8 }
 0x29f   : > { %v979_v56 = vmul.f32 %v971_v52, %v964_v38  ;;  %2318 = vmatpush.msra.mxu3 %v751_v20  ;;  %v5639_v52 = vld [vmem:[#allocation41_spill] sm:$0xff]  ;;  %v1296_v53 = vsel %vm5640_vm3, %v4329_v46, %v4794_v27  ;;  %vm5695_vm3 = vcmp.lt.s32.totalorder %v3391_v8, 30 }
 0x2a0   : > { %2169 = vmatmul.f32.gmra.mxu3 %v4807_v41  ;;  %v665_v32 = vmul.f32 %v657_v17, %v4490_v21  ;;  %v661_v42 = vmul.f32 %v657_v17, %v4507_v48  ;;  %v5641_v20 = vld [vmem:[#allocation17_spill] sm:$0xff]  ;;  %v620_v48 = vmul.f32 %v612_v11, %v4524_v62  ;;  %v4845_v17 = vld [vmem:[#allocation7 + $0x60] sm:$0xff] }
 0x2a1   : > { %2200 = vmatpush.msrb.mxu0 %v979_v56  ;;  %2319 = vmatpush.msra.mxu3 %v710_v47  ;;  %v4834_v38 = vpop.f32.mrf.mxu3  ;;  %v4836_v56 = vld [vmem:[#allocation7 + $0x58] sm:$0xff]  ;;  %v4843_v47 = vld [vmem:[#allocation3 + $0x58] sm:$0xff]  ;;  %5644 = vst [vmem:[#allocation30_spill] sm:$0xff] %v4845_v17 }
 0x2a2   : > { %5643 = vst [vmem:[#allocation50_spill] sm:$0xff] %v4836_v56 }
 0x2a3   : > { %v4814_v2 = vpop.f32.mrf.mxu1  ;;  %2201 = vmatpush.msrb.mxu0 %v975_v30  ;;  %2320 = vmatpush.msra.mxu3 %v706_v3  ;;  %v1310_v30 = vmul.f32 %v1306_v50, %v1296_v53  ;;  %v567_v3 = vperm.slane %v4653_v10, 0  ;;  %v1854_v10 = vpop.f32.mrf.mxu0 }
 0x2a4   : > { %2102 = vmatmul.f32.gmra.mxu1 %v5639_v52  ;;  %v4850_v52 = vpop.permute.xlu2 %1786 }
 0x2a5   : > { %v4819_v35 = vpop.permute.xlu1 %1293  ;;  %2202 = vmatpush.msrb.mxu0 %v4707_v9  ;;  %2321 = vmatpush.msra.mxu3 %v665_v32  ;;  %v4841_v46 = vpop.f32.mrf.mxu2  ;;  %v616_v32 = vmul.f32 %v612_v11, %v4538_v18  ;;  %5645 = vst [vmem:[#allocation46_spill] sm:$0xff] %v4850_v52  ;;  %v575_v53 = vmul.f32 %v567_v3, %v4545_v49  ;;  %v1457_v18 = vperm.slane %v4843_v47, 6  ;;  %v5648_v49 = vld [vmem:[#allocation31_spill] sm:$0xff] }
 0x2a6   : > { %v4828_v21 = vpop.permute.xlu0 %1246  ;;  %v1297_v5 = vsel %vm5642_vm5, %v5641_v20, %v4819_v35  ;;  %2745 = vmatmul.msk.f32.gmra.mxu2 %vm1794_vm1, %v4836_v56  ;;  %v4860_v20 = vld [vmem:[#allocation3 + $0x38] sm:$0xff] }
 0x2a7   : > { %v1314_v9 = vmul.f32 %v1306_v50, %v1297_v5  ;;  %2322 = vmatpush.msra.mxu3 %v661_v42  ;;  %v1251_v62 = vsel %vm1250_vm12, %v4372_v24, %v4828_v21  ;;  %v1477_v50 = vperm.slane %v4843_v47, 7  ;;  %v1217_v11 = vperm.slane %v4860_v20, 7 }
 0x2a8   : > { %2172 = vmatmul.f32.gmra.mxu3 %v4845_v17  ;;  %v5646_v5 = vperm.slane %v4460_v36, 0  ;;  %v571_v17 = vmul.f32 %v567_v3, %v4146_v16  ;;  %v5651_v16 = vld [vmem:[#allocation60_spill] sm:$0xff] }
 0x2a9   : > { %2241 = vmatpush.msrb.mxu1 %v1314_v9  ;;  %2323 = vmatpush.msra.mxu3 %v620_v48  ;;  %v5647_v48 = vld [vmem:[#allocation59_spill] sm:$0xff]  ;;  %v1481_v3 = vmul.f32 %v1477_v50, %v5651_v16  ;;  %v5656_v16 = vld [vmem:[#allocation36_spill] sm:$0xff] }
 0x2aa   : > { %v1265_v9 = vmul.f32 %v5646_v5, %v1251_v62  ;;  %v5649_v62 = vperm.slane %v4438_v1, 0  ;;  %v1172_v1 = vperm.slane %v4860_v20, 6 }
 0x2ab   : > { %v4856_v42 = vpop.f32.mrf.mxu1  ;;  %2242 = vmatpush.msrb.mxu1 %v1310_v30  ;;  %2324 = vmatpush.msra.mxu3 %v616_v32  ;;  %v1485_v30 = vmul.f32 %v1477_v50, %v5647_v48  ;;  %v1213_v32 = vsel %vm1205_vm4, %v4426_v51, %v5648_v49  ;;  %v5652_v48 = vld [vmem:[#allocation16_spill] sm:$0xff]  ;;  %v5655_v50 = vld [vmem:[#allocation61_spill] sm:$0xff] }
 0x2ac   : > { %v1212_v51 = vsel %vm1205_vm4, %v4588_v33, %v5652_v48  ;;  %v4895_v49 = vld [vmem:[#allocation7 + $0x80] sm:$0xff]  ;;  %vm5657_vm4 = vcmp.lt.s32.totalorder %v3391_v8, 126  ;;  %v1855_v48 = vadd.f32 %v1854_v10, %v4850_v52  ;;  %v5665_v10 = vld [vmem:[#allocation63_spill] sm:$0xff]  ;;  %v5666_v52 = vld [vmem:[#allocation42_spill] sm:$0xff] }
 0x2ad   : > { %v4866_v24 = vpop.permute.xlu1 %907  ;;  %2243 = vmatpush.msrb.mxu1 %v4773_v28  ;;  %2325 = vmatpush.msra.mxu3 %v575_v53  ;;  %v4881_v28 = vld [vmem:[#allocation7 + $0x78] sm:$0xff]  ;;  %5654 = vst [vmem:[#allocation49_spill] sm:$0xff] %v4895_v49  ;;  %v1168_v33 = vsel %vm5657_vm4, %v4457_v29, %v5656_v16  ;;  %vm5662_vm7 = vmmov %vm5657_vm4  ;;  %v4916_v16 = vpop.permute.xlu2 %1771 }
 0x2ae   : > { %v918_v36 = vsel %vm915_vm10, %v4411_v4, %v4866_v24  ;;  %5650 = vst [vmem:[#allocation83_spill] sm:$0xff] %v4881_v28  ;;  %2746 = vmatmul.msk.f32.gmra.mxu2 %vm1794_vm1, %v4881_v28  ;;  %v4890_v53 = vpop.permute.xlu0 %1781  ;;  %v1225_v4 = vmul.f32 %v1217_v11, %v1213_v32  ;;  %v1221_v32 = vmul.f32 %v1217_v11, %v1212_v51  ;;  %v5661_v28 = vld [vmem:[#allocation20_spill] sm:$0xff]  ;;  %vm5699_vm4 = vmmov %vm5695_vm3 }
 0x2af   : > { %v930_v5 = vmul.f32 %v5649_v62, %v918_v36  ;;  %2244 = vmatpush.msrb.mxu1 %v1265_v9  ;;  %5653 = vst [vmem:[#allocation74_spill] sm:$0xff] %v4890_v53  ;;  %2326 = vmatpush.msra.mxu3 %v571_v17  ;;  %v4893_v9 = vpop.f32.mrf.mxu3  ;;  %v1465_v36 = vmul.f32 %v1457_v18, %v5655_v50  ;;  %v1437_v62 = vperm.slane %v4843_v47, 5  ;;  %v4904_v17 = vld [vmem:[#allocation7 + $0x8] sm:$0xff]  ;;  %v5660_v50 = vld [vmem:[#allocation62_spill] sm:$0xff] }
 0x2b0   : > { %2175 = vmatmul.f32.gmra.mxu3 %v4895_v49  ;;  %5658 = vst [vmem:[#allocation86_spill] sm:$0xff] %v4904_v17  ;;  %v1461_v49 = vmul.f32 %v1457_v18, %v5660_v50  ;;  %v1167_v29 = vsel %vm5662_vm7, %v4560_v34, %v5661_v28  ;;  %v1123_v18 = vsel %vm5667_vm0, %v4627_v25, %v5666_v52  ;;  %v1857_v50 = vpop.f32.mrf.mxu0  ;;  %v1082_v34 = vperm.slane %v4860_v20, 4  ;;  %v5670_v25 = vld [vmem:[#allocation25_spill] sm:$0xff] }
 0x2b1   : > { %2393 = vmatpush.msra.mxu1 %v1485_v30  ;;  %2203 = vmatpush.msrb.mxu0 %v930_v5  ;;  %v1936_v30 = vpop.f32.mrf.mxu2  ;;  %v4908_v5 = vld [vmem:[#allocation7 + $0x10] sm:$0xff]  ;;  %5663 = vst [vmem:[#allocation55_spill] sm:$0xff] %v4916_v16  ;;  %v1445_v51 = vmul.f32 %v1437_v62, %v5665_v10  ;;  %v1127_v28 = vperm.slane %v4860_v20, 5  ;;  %v4930_v10 = vld [vmem:[#allocation7 + $0x98] sm:$0xff]  ;;  %v1122_v52 = vsel %vm5671_vm11, %v4499_v6, %v5670_v25  ;;  %v5675_v6 = vld [vmem:[#allocation72_spill] sm:$0xff] }
 0x2b2   : > { %2204 = vmatmul.f32.vlgmr.msrb.gmra.mxu0 %v4904_v17  ;;  %5659 = vst [vmem:[#allocation78_spill] sm:$0xff] %v4908_v5  ;;  %2245 = vmatmul.f32.vlgmr.msrb.gmra.mxu1 %v4908_v5  ;;  %v5669_v5 = vld [vmem:[#allocation71_spill] sm:$0xff] }
 0x2b3   : > { %2394 = vmatpush.msra.mxu1 %v1481_v3  ;;  %2352 = vmatpush.msra.mxu0 %v1225_v4  ;;  %v1180_v3 = vmul.f32 %v1172_v1, %v1168_v33  ;;  %v1417_v4 = vperm.slane %v4843_v47, 4  ;;  %v1852_v33 = vadd.f32 %v4812_v63, %v4890_v53  ;;  %5668 = vst [vmem:[#allocation70_spill] sm:$0xff] %v4930_v10  ;;  %v5672_v63 = vld [vmem:[#allocation45_spill] sm:$0xff]  ;;  %v5676_v53 = vld [vmem:[#allocation43_spill] sm:$0xff] }
 0x2b4   : > { %v1895_v17 = vpop.f32.mrf.mxu1  ;;  %v1441_v56 = vmul.f32 %v1437_v62, %v5669_v5  ;;  %v4948_v5 = vld [vmem:[#allocation7 + $0xa0] sm:$0xff] }
 0x2b5   : > { %2395 = vmatpush.msra.mxu1 %v1465_v36  ;;  %2353 = vmatpush.msra.mxu0 %v1221_v32  ;;  %v4918_v11 = vpop.permute.xlu1 %1791  ;;  %v1176_v36 = vmul.f32 %v1172_v1, %v1167_v29  ;;  %v1896_v32 = vadd.f32 %v1895_v17, %v1855_v48  ;;  %v1846_v1 = vadd.f32 %v4678_v44, %v4916_v16  ;;  %v5673_v17 = vld [vmem:[#allocation28_spill] sm:$0xff]  ;;  %v1062_v29 = vperm.slane %v4860_v20, 3 }
 0x2b6   : > { %5664 = vst [vmem:[#allocation69_spill] sm:$0xff] %v4918_v11  ;;  %2747 = vmatmul.msk.f32.gmra.mxu2 %vm1794_vm1, %v4930_v10  ;;  %v1393_v48 = vsel %vm1385_vm9, %v5673_v17, %v5672_v63  ;;  %v1858_v62 = vadd.f32 %v1857_v50, %v4918_v11  ;;  %v1425_v25 = vmul.f32 %v1417_v4, %v5675_v6  ;;  %v4958_v63 = vld [vmem:[#allocation7 + $0x28] sm:$0xff]  ;;  %v4963_v6 = vld [vmem:[#allocation7 + $0x30] sm:$0xff] }
 0x2b7   : > { %2396 = vmatpush.msra.mxu1 %v1461_v49  ;;  %2354 = vmatpush.msra.mxu0 %v1180_v3  ;;  %v1397_v49 = vperm.slane %v4843_v47, 3  ;;  %v1135_v3 = vmul.f32 %v1127_v28, %v1123_v18  ;;  %5674 = vst [vmem:[#allocation87_spill] sm:$0xff] %v4948_v5  ;;  %v1052_v44 = vsel %vm5677_vm13, %v4596_v40, %v5676_v53  ;;  %v5679_v18 = vld [vmem:[#allocation13_spill] sm:$0xff]  ;;  %v1980_v16 = vpop.f32.mrf.mxu3 }
 0x2b8   : > { %2178 = vmatmul.f32.gmra.mxu3 %v4948_v5  ;;  %5678 = vst [vmem:[#allocation77_spill] sm:$0xff] %v4958_v63  ;;  %v1086_v50 = vmul.f32 %v1082_v34, %v5679_v18  ;;  %v1131_v17 = vmul.f32 %v1127_v28, %v1122_v52  ;;  %v1937_v11 = vadd.f32 %v1936_v30, %v1896_v32  ;;  %v5680_v40 = vld [vmem:[#allocation73_spill] sm:$0xff]  ;;  %v5682_v52 = vld [vmem:[#allocation26_spill] sm:$0xff]  ;;  %v5683_v32 = vld [vmem:[#allocation52_spill] sm:$0xff] }
 0x2b9   : > { %2397 = vmatpush.msra.mxu1 %v1445_v51  ;;  %2355 = vmatpush.msra.mxu0 %v1176_v36  ;;  %v4956_v51 = vpop.permute.xlu0 %1766  ;;  %v1893_v36 = vadd.f32 %v4856_v42, %v1852_v33  ;;  %v1421_v53 = vmul.f32 %v1417_v4, %v5680_v40  ;;  %v1405_v5 = vmul.f32 %v1397_v49, %v1393_v48  ;;  %v5685_v48 = vld [vmem:[#allocation29_spill] sm:$0xff] }
 0x2ba   : > { %2207 = vmatmul.f32.gmra.mxu0 %v4958_v63  ;;  %2248 = vmatmul.f32.gmra.mxu1 %v4963_v6  ;;  %v1887_v10 = vadd.f32 %v4778_v0, %v1846_v1  ;;  %v1939_v63 = vpop.f32.mrf.mxu2  ;;  %v1070_v28 = vmul.f32 %v1062_v29, %v1052_v44  ;;  %v1392_v42 = vsel %vm1385_vm9, %v4730_v26, %v5682_v52  ;;  %v5684_v1 = vld [vmem:[#allocation44_spill] sm:$0xff]  ;;  %vm5686_vm9 = vmmov %vm5677_vm13 }
 0x2bb   : > { %2398 = vmatpush.msra.mxu1 %v1441_v56  ;;  %2356 = vmatpush.msra.mxu0 %v1135_v3  ;;  %v5681_v56 = vld [vmem:[#allocation15_spill] sm:$0xff]  ;;  %v1843_v30 = vadd.f32 %v4622_v19, %v4956_v51  ;;  %v1007_v0 = vsel %vm5622_vm8, %v4635_v13, %v5683_v32  ;;  %v1051_v26 = vsel %vm5686_vm9, %v4670_v12, %v5685_v48  ;;  %v4989_v19 = vpop.permute.xlu2 %1756  ;;  %v1352_v3 = vperm.slane %v4843_v47, 2  ;;  %v5687_v12 = vld [vmem:[#allocation53_spill] sm:$0xff] }
 0x2bc   : > { %v1898_v41 = vpop.f32.mrf.mxu1  ;;  %v1090_v18 = vmul.f32 %v1082_v34, %v5681_v56  ;;  %v1348_v34 = vsel %vm5628_vm14, %v4675_v43, %v5684_v1  ;;  %v1978_v13 = vadd.f32 %v4893_v9, %v1937_v11  ;;  %v4996_v43 = vld [vmem:[#allocation7 + $0xb8] sm:$0xff]  ;;  %v1347_v44 = vsel %vm5688_vm15, %v4644_v15, %v5687_v12  ;;  %v5022_v56 = vld [vmem:[#allocation7 + $0x50] sm:$0xff] }
 0x2bd   : > { %2399 = vmatpush.msra.mxu1 %v1425_v25  ;;  %v1899_v33 = vadd.f32 %v1898_v41, %v1858_v62  ;;  %2357 = vmatpush.msra.mxu0 %v1131_v17  ;;  %v4975_v4 = vpop.permute.xlu1 %1776  ;;  %v1934_v25 = vadd.f32 %v4841_v46, %v1893_v36  ;;  %v1928_v9 = vadd.f32 %v4734_v7, %v1887_v10  ;;  %v1017_v11 = vperm.slane %v4860_v20, 2  ;;  %v5689_v46 = vld [vmem:[#allocation38_spill] sm:$0xff] }
 0x2be   : > { %v1849_v41 = vadd.f32 %v4765_v57, %v4975_v4  ;;  %2748 = vmatmul.msk.f32.gmra.mxu2 %vm1794_vm1, %v4996_v43  ;;  %v1401_v57 = vmul.f32 %v1397_v49, %v1392_v42  ;;  %v1884_v36 = vadd.f32 %v4713_v58, %v1843_v30  ;;  %v1360_v15 = vmul.f32 %v1352_v3, %v1348_v34  ;;  %v5690_v10 = vld [vmem:[#allocation58_spill] sm:$0xff]  ;;  %v5696_v34 = vld [vmem:[#allocation51_spill] sm:$0xff] }
 0x2bf   : > { %2400 = vmatpush.msra.mxu1 %v1421_v53  ;;  %v1940_v62 = vadd.f32 %v1939_v63, %v1899_v33  ;;  %2358 = vmatpush.msra.mxu0 %v1090_v18  ;;  %v1837_v63 = vadd.f32 %v5689_v46, %v4989_v19  ;;  %v5010_v53 = vld [vmem:[#allocation7 + $0xc0] sm:$0xff]  ;;  %v1066_v49 = vmul.f32 %v1062_v29, %v1051_v26  ;;  %v2499_v29 = vmax.f32 %v1978_v13, 0.0  ;;  %v5692_v18 = vld [vmem:[#allocation65_spill] sm:$0xff] }
 0x2c0   : > { %v1890_v17 = vadd.f32 %v4814_v2, %v1849_v41  ;;  %2181 = vmatmul.f32.gmra.mxu3 %v5010_v53  ;;  %v1307_v2 = vperm.slane %v4843_v47, 1  ;;  %v1303_v58 = vsel %vm5691_vm6, %v4819_v35, %v5690_v10  ;;  %v1006_v52 = vsel %vm5693_vm2, %v4602_v14, %v5692_v18  ;;  %v5031_v35 = vpop.f32.mrf.mxu3  ;;  %v5694_v14 = vld [vmem:[#allocation67_spill] sm:$0xff]  ;;  %v5697_v26 = vld [vmem:[#allocation57_spill] sm:$0xff]  ;;  %v5702_v46 = vld [vmem:[#allocation56_spill] sm:$0xff] }
 0x2c1   : > { %2401 = vmatpush.msra.mxu1 %v1405_v5  ;;  %v1981_v40 = vadd.f32 %v1980_v16, %v1940_v62  ;;  %2359 = vmatpush.msra.mxu0 %v1086_v50  ;;  %v5014_v5 = vld [vmem:[#allocation7 + $0x48] sm:$0xff]  ;;  %v1975_v50 = vadd.f32 %v4834_v38, %v1934_v25  ;;  %v1356_v42 = vmul.f32 %v1352_v3, %v1347_v44  ;;  %v972_v1 = vperm.slane %v4860_v20, 1  ;;  %v5698_v3 = vld [vmem:[#allocation66_spill] sm:$0xff]  ;;  %v5700_v62 = vld [vmem:[#allocation75_spill] sm:$0xff] }
 0x2c2   : > { %2210 = vmatmul.f32.gmra.mxu0 %v5014_v5  ;;  %v1931_v7 = vadd.f32 %v4800_v55, %v1890_v17  ;;  %2251 = vmatmul.f32.gmra.mxu1 %v5022_v56  ;;  %v1025_v55 = vmul.f32 %v1017_v11, %v1007_v0  ;;  %v1969_v38 = vadd.f32 %v4719_v31, %v1928_v9  ;;  %v1262_v13 = vperm.slane %v4843_v47, 0  ;;  %v5701_v47 = vld [vmem:[#allocation19_spill] sm:$0xff]  ;;  %v5708_v18 = vld [vmem:[#allocation32_spill] sm:$0xff] }
 0x2c3   : > { %2402 = vmatpush.msra.mxu1 %v1401_v57  ;;  %v2503_v16 = vmax.f32 %v1981_v40, 0.0  ;;  %2360 = vmatpush.msra.mxu0 %v1070_v28  ;;  %v1878_v28 = vadd.f32 %v4617_v59, %v1837_v63  ;;  %v1925_v32 = vadd.f32 %v4673_v54, %v1884_v36  ;;  %v962_v0 = vsel %vm5695_vm3, %v4786_v61, %v5694_v14  ;;  %v5703_v36 = vld [vmem:[#allocation85_spill] sm:$0xff]  ;;  %v5704_v40 = vld [vmem:[#allocation79_spill] sm:$0xff] }
 0x2c4   : > { %v1972_v30 = vadd.f32 %v4782_v23, %v1931_v7  ;;  %v1315_v23 = vmul.f32 %v1307_v2, %v1303_v58  ;;  %v1021_v59 = vmul.f32 %v1017_v11, %v1006_v52  ;;  %v1302_v31 = vsel %vm5642_vm5, %v4794_v27, %v5697_v26  ;;  %v5059_v27 = vld [vmem:[#allocation7 + $0xd8] sm:$0xff]  ;;  %v5707_v58 = vld [vmem:[#allocation82_spill] sm:$0xff] }
 0x2c5   : > { %2403 = vmatpush.msra.mxu1 %v1360_v15  ;;  %2526 = vmatpush.msrb.mxu3 %v2503_v16  ;;  %v5034_v33 = vpop.permute.xlu1 %1761  ;;  %v2495_v54 = vmax.f32 %v1975_v50, 0.0  ;;  %v961_v61 = vsel %vm5699_vm4, %v4737_v37, %v5698_v3  ;;  %v1258_v25 = vsel %vm1250_vm12, %v4753_v45, %v5700_v62  ;;  %v980_v44 = vmul.f32 %v972_v1, %v962_v0  ;;  %v5066_v45 = vld [vmem:[#allocation7 + $0xe0] sm:$0xff]  ;;  %v5706_v7 = vld [vmem:[#allocation47_spill] sm:$0xff]  ;;  %v5125_v3 = vld [vmem:[#allocation7 + $0xc8] sm:$0xff] }
 0x2c6   : > { %2361 = vmatpush.msra.mxu0 %v1066_v49  ;;  %v1840_v48 = vadd.f32 %v5696_v34, %v5034_v33  ;;  %v2491_v41 = vmax.f32 %v1972_v30, 0.0  ;;  %2749 = vmatmul.msk.f32.gmra.mxu2 %vm1794_vm1, %v5059_v27  ;;  %v2487_v57 = vmax.f32 %v1969_v38, 0.0  ;;  %v1966_v37 = vadd.f32 %v4648_v39, %v1925_v32  ;;  %v5705_v15 = vld [vmem:[#allocation76_spill] sm:$0xff]  ;;  %v5097_v32 = vld [vmem:[#allocation7 + $0x88] sm:$0xff] }
 0x2c7   : > { %2404 = vmatpush.msra.mxu1 %v1356_v42  ;;  %2527 = vmatpush.msrb.mxu3 %v2499_v29  ;;  %v1919_v17 = vadd.f32 %v5701_v47, %v1878_v28  ;;  %v927_v9 = vperm.slane %v4860_v20, 0  ;;  %v1311_v11 = vmul.f32 %v1307_v2, %v1302_v31  ;;  %v917_v39 = vsel %vm915_vm10, %v5704_v40, %v5703_v36  ;;  %v5086_v29 = vld [vmem:[#allocation7 + $0x70] sm:$0xff]  ;;  %v5709_v38 = vld [vmem:[#allocation88_spill] sm:$0xff]  ;;  %v5711_v34 = vld [vmem:[#allocation81_spill] sm:$0xff] }
 0x2c8   : > { %2362 = vmatpush.msra.mxu0 %v1025_v55  ;;  %v1881_v12 = vadd.f32 %v4651_v22, %v1840_v48  ;;  %2184 = vmatmul.f32.gmra.mxu3 %v5066_v45  ;;  %v5069_v22 = vld [vmem:[#allocation7 + $0x68] sm:$0xff]  ;;  %v1257_v20 = vsel %vm1250_vm12, %v4828_v21, %v5705_v15  ;;  %v976_v49 = vmul.f32 %v972_v1, %v961_v61  ;;  %v2483_v50 = vmax.f32 %v1966_v37, 0.0  ;;  %v5090_v30 = vpop.f32.mrf.mxu3  ;;  %v5100_v1 = vld [vmem:[#allocation7 + $0x90] sm:$0xff] }
 0x2c9   : > { %2405 = vmatpush.msra.mxu1 %v1315_v23  ;;  %2528 = vmatpush.msrb.mxu3 %v2495_v54  ;;  %v1270_v2 = vmul.f32 %v1262_v13, %v1258_v25  ;;  %v916_v16 = vsel %vm915_vm10, %v4866_v24, %v5707_v58  ;;  %v1960_v21 = vadd.f32 %v5708_v18, %v1919_v17  ;;  %v5092_v24 = vld [vmem:[#allocation7 + $0xf8] sm:$0xff]  ;;  %v5710_v23 = vld [vmem:[#allocation68_spill] sm:$0xff]  ;;  %v5110_v48 = vld [vmem:[#allocation7 + $0xa8] sm:$0xff]  ;;  %vm2514_vm10 = vcmask 523264  }
 0x2ca   : > { %2363 = vmatpush.msra.mxu0 %v1021_v59  ;;  %v1922_v63 = vadd.f32 %v5702_v46, %v1881_v12  ;;  %2254 = vmatmul.f32.gmra.mxu1 %v5086_v29  ;;  %v935_v52 = vmul.f32 %v927_v9, %v917_v39  ;;  %v1266_v55 = vmul.f32 %v1262_v13, %v1257_v20  ;;  %v5113_v59 = vld [vmem:[#allocation7 + $0xb0] sm:$0xff]  ;;  %v5712_v54 = vld [vmem:[#allocation64_spill] sm:$0xff]  ;;  %v5716_v46 = vld [vmem:[#allocation49_spill] sm:$0xff] }
 0x2cb   : > { %2213 = vmatmul.f32.gmra.mxu0 %v5069_v22  ;;  %2529 = vmatpush.msrb.mxu3 %v2491_v41  ;;  %v931_v28 = vmul.f32 %v927_v9, %v916_v16  ;;  %v2475_v8 = vmax.f32 %v1960_v21, 0.0  ;;  %v5128_v61 = vld [vmem:[#allocation7 + $0xd0] sm:$0xff] }
 0x2cc   : > { %2364 = vmatpush.msra.mxu0 %v980_v44  ;;  %2406 = vmatpush.msra.mxu1 %v1311_v11  ;;  %v1963_v10 = vadd.f32 %v5706_v7, %v1922_v63  ;;  %v5713_v12 = vld [vmem:[#allocation50_spill] sm:$0xff]  ;;  %v5140_v44 = vld [vmem:[#allocation7 + $0xe8] sm:$0xff]  ;;  %v5715_v11 = vld [vmem:[#allocation83_spill] sm:$0xff] }
 0x2cd   : > { %2530 = vmatpush.msrb.mxu3 %v2487_v57  ;;  %v5143_v37 = vld [vmem:[#allocation7 + $0xf0] sm:$0xff]  ;;  %v5721_v7 = vld [vmem:[#allocation77_spill] sm:$0xff] }
 0x2ce   : > { %2365 = vmatpush.msra.mxu0 %v976_v49  ;;  %2407 = vmatpush.msra.mxu1 %v1270_v2  ;;  %v2479_v42 = vmax.f32 %v1963_v10, 0.0  ;;  %v5717_v63 = vld [vmem:[#allocation86_spill] sm:$0xff]  ;;  %v5720_v49 = vld [vmem:[#allocation87_spill] sm:$0xff] }
 0x2cf   : > { %2531 = vmatpush.msrb.mxu3 %v2483_v50  ;;  %2750 = vmatmul.msk.f32.gmra.mxu2 %vm1794_vm1, %v5092_v24  ;;  %v5718_v36 = vld [vmem:[#allocation78_spill] sm:$0xff] }
 0x2d0   : > { %2366 = vmatpush.msra.mxu0 %v935_v52  ;;  %2408 = vmatpush.msra.mxu1 %v1266_v55  ;;  %v5105_v0 = vpop.f32.mrf.mxu3  ;;  %v5719_v20 = vld [vmem:[#allocation70_spill] sm:$0xff]  ;;  %v5723_v55 = vld [vmem:[#allocation69_spill] sm:$0xff] }
 0x2d1   : > { %2532 = vmatpush.msrb.mxu3 %v2479_v42 }
 0x2d2   : > { %2327 = vmatmul.f32.vlgmr.msra.gmra.mxu3 %v5709_v38  ;;  %2367 = vmatpush.msra.mxu0 %v931_v28 }
 0x2d3   : > { %2216 = vmatmul.f32.gmra.mxu0 %v5097_v32  ;;  %2533 = vmatpush.msrb.mxu3 %v2475_v8 }
 0x2d4   : > { %2257 = vmatmul.f32.gmra.mxu1 %v5100_v1 }
 0x2d6   : > { %v5103_v14 = vpop.f32.mrf.mxu2 }
 0x2d7   : > { %2751 = vmatmul.msk.f32.vlgmr.msra.gmra.mxu2 %vm1794_vm1, %v5710_v23 }
 0x2d8   : > { %v5123_v41 = vpop.f32.mrf.mxu3 }
 0x2da   : > { %2330 = vmatmul.f32.gmra.mxu3 %v5711_v34  ;;  %v5724_v34 = vld [vmem:[#allocation55_spill] sm:$0xff] }
 0x2db   : > { %2219 = vmatmul.f32.gmra.mxu0 %v5110_v48 }
 0x2dc   : > { %2260 = vmatmul.f32.gmra.mxu1 %v5113_v59 }
 0x2de   : > { %v5116_v26 = vpop.f32.mrf.mxu2 }
 0x2df   : > { %2752 = vmatmul.msk.f32.gmra.mxu2 %vm1794_vm1, %v4802_v60  ;;  %v5714_v60 = vld [vmem:[#allocation30_spill] sm:$0xff] }
 0x2e0   : > { %v2012_v57 = vpop.f32.mrf.mxu3 }
 0x2e1   : > { %v5118_v31 = vpop.f32.mrf.mxu0  ;;  %v2013_v38 = vadd.f32 %v2012_v57, %v4975_v4 }
 0x2e2   : > { %2333 = vmatmul.f32.gmra.mxu3 %v5712_v54  ;;  %v5725_v54 = vld [vmem:[#allocation74_spill] sm:$0xff] }
 0x2e3   : > { %2222 = vmatmul.f32.gmra.mxu0 %v5125_v3 }
 0x2e4   : > { %2263 = vmatmul.f32.gmra.mxu1 %v5128_v61 }
 0x2e6   : > { %v5131_v13 = vpop.f32.mrf.mxu2 }
 0x2e7   : > { %2753 = vmatmul.msk.f32.gmra.mxu2 %vm1794_vm1, %v5713_v12 }
 0x2e8   : > { %v2015_v40 = vpop.f32.mrf.mxu3 }
 0x2e9   : > { %v5133_v62 = vpop.f32.mrf.mxu0  ;;  %v5135_v25 = vpop.f32.mrf.mxu1  ;;  %v2016_v12 = vadd.f32 %v2015_v40, %v5725_v54  ;;  %v2007_v40 = vadd.f32 %v5105_v0, %v4956_v51 }
 0x2ea   : > { %2336 = vmatmul.f32.gmra.mxu3 %v5714_v60 }
 0x2eb   : > { %2225 = vmatmul.f32.gmra.mxu0 %v5140_v44 }
 0x2ec   : > { %2266 = vmatmul.f32.gmra.mxu1 %v5143_v37 }
 0x2ee   : > { %v5146_v47 = vpop.f32.mrf.mxu2 }
 0x2ef   : > { %2754 = vmatmul.msk.f32.gmra.mxu2 %vm1794_vm1, %v5715_v11 }
 0x2f0   : > { %v2018_v10 = vpop.f32.mrf.mxu3 }
 0x2f1   : > { %v5148_v17 = vpop.f32.mrf.mxu0  ;;  %v5150_v9 = vpop.f32.mrf.mxu1 }
 0x2f2   : > { %2339 = vmatmul.f32.gmra.mxu3 %v5716_v46 }
 0x2f3   : > { %2368 = vmatmul.f32.vlgmr.msra.gmra.mxu0 %v5717_v63 }
 0x2f4   : > { %2409 = vmatmul.f32.vlgmr.msra.gmra.mxu1 %v5718_v36 }
 0x2f7   : > { %2755 = vmatmul.msk.f32.gmra.mxu2 %vm1794_vm1, %v5719_v20 }
 0x2f8   : > { %v2021_v21 = vpop.f32.mrf.mxu3 }
 0x2f9   : > { %v2050_v39 = vpop.f32.mrf.mxu0  ;;  %v5157_v15 = vpop.f32.mrf.mxu1  ;;  %v2022_v42 = vadd.f32 %v2021_v21, %v5723_v55 }
 0x2fa   : > { %2342 = vmatmul.f32.gmra.mxu3 %v5720_v49  ;;  %v5162_v2 = vpop.f32.mrf.mxu2 }
 0x2fb   : > { %2371 = vmatmul.f32.gmra.mxu0 %v5721_v7 }
 0x2fc   : > { %2412 = vmatmul.f32.gmra.mxu1 %v4963_v6 }
 0x2ff   : > { %2756 = vmatmul.msk.f32.gmra.mxu2 %vm1794_vm1, %v4996_v43  ;;  %v5176_v43 = vld [vmem:[#allocation8] sm:$0xff] }
 0x301   : > { %v2053_v58 = vpop.f32.mrf.mxu0  ;;  %v2091_v16 = vpop.f32.mrf.mxu1 }
 0x302   : > { %2345 = vmatmul.f32.gmra.mxu3 %v5010_v53  ;;  %v2138_v50 = vpop.f32.mrf.mxu2  ;;  %v2054_v60 = vadd.f32 %v2053_v58, %v2013_v38 }
 0x303   : > { %2374 = vmatmul.f32.gmra.mxu0 %v5014_v5 }
 0x304   : > { %2415 = vmatmul.f32.gmra.mxu1 %v5022_v56 }
 0x307   : > { %2757 = vmatmul.msk.f32.gmra.mxu2 %vm1794_vm1, %v5059_v27 }
 0x309   : > { %v2094_v18 = vpop.f32.mrf.mxu1  ;;  %v2056_v6 = vpop.f32.mrf.mxu0 }
 0x30a   : > { %2348 = vmatmul.f32.gmra.mxu3 %v5066_v45  ;;  %v2141_v52 = vpop.f32.mrf.mxu2  ;;  %v5722_v45 = vld [vmem:[#allocation46_spill] sm:$0xff]  ;;  %v2057_v11 = vadd.f32 %v2056_v6, %v2016_v12 }
 0x30b   : > { %2377 = vmatmul.f32.gmra.mxu0 %v5069_v22  ;;  %v2019_v22 = vadd.f32 %v2018_v10, %v5722_v45  ;;  %v2095_v10 = vadd.f32 %v2094_v18, %v2054_v60 }
 0x30c   : > { %2418 = vmatmul.f32.gmra.mxu1 %v5086_v29 }
 0x30f   : > { %2758 = vmatmul.msk.f32.gmra.mxu2 %vm1794_vm1, %v5092_v24 }
 0x311   : > { %v2097_v53 = vpop.f32.mrf.mxu1  ;;  %v2059_v5 = vpop.f32.mrf.mxu0 }
 0x312   : > { %2759 = vmatmul.msk.f32.vlgmr.msrb.gmra.mxu3 %vm2514_vm10, %v5176_v43  ;;  %v2144_v56 = vpop.f32.mrf.mxu2  ;;  %v2098_v20 = vadd.f32 %v2097_v53, %v2057_v11 }
 0x313   : > { %2380 = vmatmul.f32.gmra.mxu0 %v5097_v32  ;;  %v2164_v27 = vpop.f32.mrf.mxu3  ;;  %v2060_v32 = vadd.f32 %v2059_v5, %v2019_v22  ;;  %v2136_v5 = vadd.f32 %v5162_v2, %v2095_v10 }
 0x314   : > { %2421 = vmatmul.f32.gmra.mxu1 %v5100_v1  ;;  %v2010_v1 = vadd.f32 %v5123_v41, %v5724_v34  ;;  %v2001_v41 = vadd.f32 %v5031_v35, %v4989_v19  ;;  %v2139_v6 = vadd.f32 %v2138_v50, %v2098_v20 }
 0x315   : > { %v2492_v2 = vmax.f32 %v2136_v5, 0.0 }
 0x316   : > { %v2051_v57 = vadd.f32 %v2050_v39, %v2010_v1  ;;  %v2042_v53 = vadd.f32 %v5118_v31, %v2001_v41 }
 0x318   : > { %v2092_v39 = vadd.f32 %v2091_v16, %v2051_v57  ;;  %v2083_v31 = vadd.f32 %v5135_v25, %v2042_v53 }
 0x319   : > { %v2100_v29 = vpop.f32.mrf.mxu1  ;;  %v2062_v24 = vpop.f32.mrf.mxu0 }
 0x31a   : > { %v5187_v28 = vpop.f32.mrf.mxu2  ;;  %v2063_v23 = vadd.f32 %v2062_v24, %v2022_v42  ;;  %v2101_v46 = vadd.f32 %v2100_v29, %v2060_v32  ;;  %v2124_v22 = vadd.f32 %v5103_v14, %v2083_v31 }
 0x31b   : > { %2383 = vmatmul.f32.gmra.mxu0 %v5110_v48  ;;  %v5189_v8 = vpop.f32.mrf.mxu3 }
 0x31c   : > { %2424 = vmatmul.f32.gmra.mxu1 %v5113_v59  ;;  %v2004_v59 = vadd.f32 %v5090_v30, %v5034_v33  ;;  %v2048_v30 = vadd.f32 %v5148_v17, %v2007_v40  ;;  %v2165_v17 = vadd.f32 %v2164_v27, %v4989_v19  ;;  %v2476_v24 = vmax.f32 %v2124_v22, 0.0 }
 0x31e   : > { %v2045_v21 = vadd.f32 %v5133_v62, %v2004_v59  ;;  %v2133_v62 = vadd.f32 %v5146_v47, %v2092_v39 }
 0x320   : > { %v2086_v18 = vadd.f32 %v5150_v9, %v2045_v21 }
 0x321   : > { %v2103_v48 = vpop.f32.mrf.mxu1 }
 0x322   : > { %v2104_v63 = vadd.f32 %v2103_v48, %v2063_v23  ;;  %v5197_v36 = vpop.f32.mrf.mxu2  ;;  %v2127_v50 = vadd.f32 %v5116_v26, %v2086_v18 }
 0x323   : > { %2386 = vmatmul.f32.gmra.mxu0 %v5125_v3  ;;  %v5201_v49 = vpop.f32.mrf.mxu3  ;;  %v2142_v3 = vadd.f32 %v2141_v52, %v2101_v46  ;;  %v2496_v52 = vmax.f32 %v2139_v6, 0.0 }
 0x324   : > { %v2145_v7 = vadd.f32 %v2144_v56, %v2104_v63  ;;  %2427 = vmatmul.f32.gmra.mxu1 %v5128_v61  ;;  %v2089_v61 = vadd.f32 %v5157_v15, %v2048_v30  ;;  %v2488_v56 = vmax.f32 %v2133_v62, 0.0  ;;  %v2171_v31 = vadd.f32 %v5201_v49, %v4956_v51 }
 0x325   : > { %v2500_v35 = vmax.f32 %v2142_v3, 0.0 }
 0x326   : > { %v2504_v58 = vmax.f32 %v2145_v7, 0.0  ;;  %v2130_v15 = vadd.f32 %v5131_v13, %v2089_v61 }
 0x328   : > { %2546 = vmatpush.msrb.mxu0 %v2504_v58  ;;  %v2484_v27 = vmax.f32 %v2130_v15, 0.0 }
 0x32a   : > { %v5214_v0 = vpop.f32.mrf.mxu2  ;;  %2547 = vmatpush.msrb.mxu0 %v2500_v35 }
 0x32b   : > { %2389 = vmatmul.f32.gmra.mxu0 %v5140_v44  ;;  %v2173_v16 = vpop.f32.mrf.mxu3 }
 0x32c   : > { %2430 = vmatmul.f32.gmra.mxu1 %v5143_v37  ;;  %2548 = vmatpush.msrb.mxu0 %v2496_v52  ;;  %v2480_v37 = vmax.f32 %v2127_v50, 0.0  ;;  %v2174_v5 = vadd.f32 %v2173_v16, %v5724_v34 }
 0x32e   : > { %2549 = vmatpush.msrb.mxu0 %v2492_v2  ;;  %v2168_v2 = vadd.f32 %v5189_v8, %v5034_v33 }
 0x32f   : > { %v2205_v44 = vpop.f32.mrf.mxu0  ;;  %v2246_v47 = vpop.f32.mrf.mxu1 }
 0x330   : > { %v2206_v9 = vadd.f32 %v2205_v44, %v2165_v17  ;;  %2550 = vmatpush.msrb.mxu0 %v2488_v56 }
 0x332   : > { %v2247_v29 = vadd.f32 %v2246_v47, %v2206_v9  ;;  %v5224_v42 = vpop.f32.mrf.mxu2  ;;  %2551 = vmatpush.msrb.mxu0 %v2484_v27 }
 0x333   : > { %v2176_v25 = vpop.f32.mrf.mxu3 }
 0x334   : > { %v5227_v13 = vadd.f32 %v5187_v28, %v2247_v29  ;;  %2552 = vmatpush.msrb.mxu0 %v2480_v37  ;;  %v2177_v30 = vadd.f32 %v2176_v25, %v4975_v4 }
 0x336   : > { %2553 = vmatpush.msrb.mxu0 %v2476_v24 }
 0x337   : > { %v2208_v26 = vpop.f32.mrf.mxu0  ;;  %v2249_v38 = vpop.f32.mrf.mxu1  ;;  %2760 = vmatmul.msk.f32.vlgmr.msrb.gmra.mxu0 %vm2514_vm10, %v5176_v43 }
 0x338   : > { %v2209_v25 = vadd.f32 %v2208_v26, %v2168_v2 }
 0x33a   : > { %v2299_v32 = vpop.f32.mrf.mxu2 }
 0x33b   : > { %v2179_v14 = vpop.f32.mrf.mxu3 }
 0x33c   : > { %v2180_v39 = vadd.f32 %v2179_v14, %v5725_v54 }
 0x33f   : > { %v2211_v23 = vpop.f32.mrf.mxu0  ;;  %v2252_v1 = vpop.f32.mrf.mxu1 }
 0x340   : > { %v2212_v9 = vadd.f32 %v2211_v23, %v2171_v31 }
 0x342   : > { %v2302_v60 = vpop.f32.mrf.mxu2 }
 0x343   : > { %v2182_v12 = vpop.f32.mrf.mxu3 }
 0x344   : > { %v2183_v3 = vadd.f32 %v2182_v12, %v5722_v45 }
 0x347   : > { %v2255_v46 = vpop.f32.mrf.mxu1 }
 0x348   : > { %v2214_v11 = vpop.f32.mrf.mxu0 }
 0x349   : > { %v2215_v44 = vadd.f32 %v2214_v11, %v2174_v5 }
 0x34a   : > { %v2305_v28 = vpop.f32.mrf.mxu2 }
 0x34b   : > { %v2185_v48 = vpop.f32.mrf.mxu3  ;;  %v2256_v24 = vadd.f32 %v2255_v46, %v2215_v44 }
 0x34c   : > { %v2186_v6 = vadd.f32 %v2185_v48, %v5723_v55  ;;  %v2253_v48 = vadd.f32 %v2252_v1, %v2212_v9 }
 0x350   : > { %v2217_v63 = vpop.f32.mrf.mxu0 }
 0x351   : > { %v2258_v59 = vpop.f32.mrf.mxu1  ;;  %v2218_v62 = vadd.f32 %v2217_v63, %v2177_v30 }
 0x352   : > { %v2308_v41 = vpop.f32.mrf.mxu2 }
 0x353   : > { %v2259_v47 = vadd.f32 %v2258_v59, %v2218_v62  ;;  %v2250_v59 = vadd.f32 %v2249_v38, %v2209_v25  ;;  %v5260_v62 = vpop.permute.xlu0 %2511 }
 0x355   : > { %v2328_v57 = vpop.f32.mrf.mxu3  ;;  %v2300_v8 = vadd.f32 %v2299_v32, %v2259_v47  ;;  %v2291_v1 = vadd.f32 %v5197_v36, %v2250_v59 }
 0x356   : > { %v2329_v22 = vadd.f32 %v2328_v57, %v4989_v19  ;;  %v2297_v19 = vadd.f32 %v5224_v42, %v2256_v24 }
 0x358   : > { %v2220_v20 = vpop.f32.mrf.mxu0  ;;  %v2489_v32 = vmax.f32 %v2297_v19, 0.0 }
 0x359   : > { %v2261_v7 = vpop.f32.mrf.mxu1  ;;  %v2221_v35 = vadd.f32 %v2220_v20, %v2180_v39  ;;  %v2294_v20 = vadd.f32 %v5214_v0, %v2253_v48  ;;  %v2477_v0 = vmax.f32 %v5227_v13, 0.0 }
 0x35a   : > { %v2451_v21 = vpop.f32.mrf.mxu2 }
 0x35b   : > { %v2262_v50 = vadd.f32 %v2261_v7, %v2221_v35  ;;  %v2493_v7 = vmax.f32 %v2300_v8, 0.0  ;;  %v2485_v38 = vmax.f32 %v2294_v20, 0.0 }
 0x35d   : > { %v5231_v40 = vpop.f32.mrf.mxu3  ;;  %v2303_v49 = vadd.f32 %v2302_v60, %v2262_v50 }
 0x35e   : > { %v2332_v48 = vadd.f32 %v5231_v40, %v5034_v33 }
 0x360   : > { %v2223_v10 = vpop.f32.mrf.mxu0 }
 0x361   : > { %v2264_v58 = vpop.f32.mrf.mxu1  ;;  %v2224_v53 = vadd.f32 %v2223_v10, %v2183_v3  ;;  %v2481_v10 = vmax.f32 %v2291_v1, 0.0 }
 0x362   : > { %v5247_v37 = vpop.f32.mrf.mxu2 }
 0x363   : > { %v2265_v52 = vadd.f32 %v2264_v58, %v2224_v53 }
 0x365   : > { %v5237_v61 = vpop.f32.mrf.mxu3  ;;  %v2306_v16 = vadd.f32 %v2305_v28, %v2265_v52  ;;  %v2497_v28 = vmax.f32 %v2303_v49, 0.0 }
 0x367   : > { %v2501_v11 = vmax.f32 %v2306_v16, 0.0 }
 0x368   : > { %v2226_v18 = vpop.f32.mrf.mxu0 }
 0x369   : > { %v2227_v17 = vadd.f32 %v2226_v18, %v2186_v6  ;;  %v2267_v15 = vpop.f32.mrf.mxu1 }
 0x36b   : > { %v2268_v56 = vadd.f32 %v2267_v15, %v2227_v17 }
 0x36d   : > { %v2309_v27 = vadd.f32 %v2308_v41, %v2268_v56  ;;  %v5245_v29 = vpop.f32.mrf.mxu3  ;;  %v5254_v41 = vpop.f32.mrf.mxu2 }
 0x36e   : > { %v2338_v16 = vadd.f32 %v5245_v29, %v5724_v34 }
 0x36f   : > { %v2505_v14 = vmax.f32 %v2309_v27, 0.0 }
 0x370   : > { %v2369_v12 = vpop.f32.mrf.mxu0 }
 0x371   : > { %v2370_v63 = vadd.f32 %v2369_v12, %v2329_v22  ;;  %2566 = vmatpush.msrb.mxu1 %v2505_v14  ;;  %v2410_v23 = vpop.f32.mrf.mxu1 }
 0x373   : > { %v2411_v57 = vadd.f32 %v2410_v23, %v2370_v63  ;;  %2567 = vmatpush.msrb.mxu1 %v2501_v11 }
 0x375   : > { %v2340_v26 = vpop.f32.mrf.mxu3  ;;  %v5251_v46 = vadd.f32 %v2451_v21, %v2411_v57  ;;  %2568 = vmatpush.msrb.mxu1 %v2497_v28  ;;  %v2460_v21 = vpop.f32.mrf.mxu2 }
 0x376   : > { %v2341_v9 = vadd.f32 %v2340_v26, %v4975_v4  ;;  %v2335_v4 = vadd.f32 %v5237_v61, %v4956_v51 }
 0x377   : > { %2569 = vmatpush.msrb.mxu1 %v2493_v7 }
 0x378   : > { %v2372_v60 = vpop.f32.mrf.mxu0 }
 0x379   : > { %2570 = vmatpush.msrb.mxu1 %v2489_v32  ;;  %v2413_v42 = vpop.f32.mrf.mxu1  ;;  %v2373_v59 = vadd.f32 %v2372_v60, %v2332_v48 }
 0x37b   : > { %2571 = vmatpush.msrb.mxu1 %v2485_v38  ;;  %v2414_v40 = vadd.f32 %v2413_v42, %v2373_v59 }
 0x37d   : > { %v2343_v3 = vpop.f32.mrf.mxu3  ;;  %2572 = vmatpush.msrb.mxu1 %v2481_v10  ;;  %v2463_v53 = vpop.f32.mrf.mxu2  ;;  %v2455_v60 = vadd.f32 %v5247_v37, %v2414_v40 }
 0x37e   : > { %v2344_v47 = vadd.f32 %v2343_v3, %v5725_v54  ;;  %v2478_v3 = vmax.f32 %v5251_v46, 0.0 }
 0x37f   : > { %2573 = vmatpush.msrb.mxu1 %v2477_v0  ;;  %v2482_v42 = vmax.f32 %v2455_v60, 0.0 }
 0x380   : > { %v2375_v58 = vpop.f32.mrf.mxu0  ;;  %2761 = vmatmul.msk.f32.vlgmr.msrb.gmra.mxu1 %vm2514_vm10, %v5176_v43 }
 0x381   : > { %v2416_v36 = vpop.f32.mrf.mxu1  ;;  %v2376_v23 = vadd.f32 %v2375_v58, %v2335_v4 }
 0x383   : > { %v2417_v20 = vadd.f32 %v2416_v36, %v2376_v23 }
 0x385   : > { %v2346_v30 = vpop.f32.mrf.mxu3  ;;  %v2466_v17 = vpop.f32.mrf.mxu2  ;;  %v2458_v51 = vadd.f32 %v5254_v41, %v2417_v20 }
 0x386   : > { %v2347_v50 = vadd.f32 %v2346_v30, %v5722_v45 }
 0x387   : > { %v2486_v0 = vmax.f32 %v2458_v51, 0.0 }
 0x388   : > { %v2378_v39 = vpop.f32.mrf.mxu0 }
 0x389   : > { %v2419_v6 = vpop.f32.mrf.mxu1  ;;  %v2379_v54 = vadd.f32 %v2378_v39, %v2338_v16 }
 0x38b   : > { %v2420_v19 = vadd.f32 %v2419_v6, %v2379_v54 }
 0x38d   : > { %v2349_v5 = vpop.f32.mrf.mxu3  ;;  %v2469_v44 = vpop.f32.mrf.mxu2  ;;  %v2461_v26 = vadd.f32 %v2460_v21, %v2420_v19 }
 0x38e   : > { %v2350_v27 = vadd.f32 %v2349_v5, %v5723_v55 }
 0x38f   : > { %v2490_v38 = vmax.f32 %v2461_v26, 0.0 }
 0x390   : > { %v2381_v35 = vpop.f32.mrf.mxu0 }
 0x391   : > { %v2422_v18 = vpop.f32.mrf.mxu1  ;;  %v2382_v49 = vadd.f32 %v2381_v35, %v2341_v9 }
 0x393   : > { %v2423_v34 = vadd.f32 %v2422_v18, %v2382_v49 }
 0x395   : > { %v2535_v13 = vpop.f32.mrf.mxu3  ;;  %v2472_v8 = vpop.f32.mrf.mxu2  ;;  %v2464_v7 = vadd.f32 %v2463_v53, %v2423_v34 }
 0x396   : > { %v2536_v52 = vadd.f32 %v2535_v13, %v5260_v62 }
 0x397   : > { %v2494_v61 = vmax.f32 %v2464_v7, 0.0 }
 0x398   : > { %2598 = vst [vmem:[%s5265_s21] sm:$0xff] %v2536_v52  ;;  %v2384_v31 = vpop.f32.mrf.mxu0 }
 0x399   : > { %v2425_v15 = vpop.f32.mrf.mxu1  ;;  %v2385_v25 = vadd.f32 %v2384_v31, %v2344_v47 }
 0x39b   : > { %v2426_v11 = vadd.f32 %v2425_v15, %v2385_v25 }
 0x39d   : > { %v2467_v28 = vadd.f32 %v2466_v17, %v2426_v11 }
 0x39f   : > { %v2498_v1 = vmax.f32 %v2467_v28, 0.0 }
 0x3a0   : > { %v2387_v2 = vpop.f32.mrf.mxu0 }
 0x3a1   : > { %v2428_v56 = vpop.f32.mrf.mxu1  ;;  %v2388_v22 = vadd.f32 %v2387_v2, %v2347_v50 }
 0x3a3   : > { %v2429_v14 = vadd.f32 %v2428_v56, %v2388_v22 }
 0x3a5   : > { %v2470_v29 = vadd.f32 %v2469_v44, %v2429_v14 }
 0x3a7   : > { %v2502_v33 = vmax.f32 %v2470_v29, 0.0 }
 0x3a8   : > { %v2390_v24 = vpop.f32.mrf.mxu0 }
 0x3a9   : > { %v2391_v12 = vadd.f32 %v2390_v24, %v2350_v27  ;;  %v2431_v45 = vpop.f32.mrf.mxu1 }
 0x3ab   : > { %v2432_v63 = vadd.f32 %v2431_v45, %v2391_v12 }
 0x3ad   : > { %v2473_v55 = vadd.f32 %v2472_v8, %v2432_v63 }
 0x3af   : > { %v2506_v57 = vmax.f32 %v2473_v55, 0.0 }
 0x3b1   : > { %2586 = vmatpush.msrb.mxu2 %v2506_v57 }
 0x3b3   : > { %2587 = vmatpush.msrb.mxu2 %v2502_v33 }
 0x3b4   : > { %v2555_v32 = vpop.f32.mrf.mxu0 }
 0x3b5   : > { %2588 = vmatpush.msrb.mxu2 %v2498_v1  ;;  %v2556_v10 = vadd.f32 %v2555_v32, %v5260_v62 }
 0x3b7   : > { %2589 = vmatpush.msrb.mxu2 %v2494_v61  ;;  %2599 = vst [vmem:[%s5265_s21 + $0x8] sm:$0xff] %v2556_v10 }
 0x3b9   : > { %2590 = vmatpush.msrb.mxu2 %v2490_v38 }
 0x3bb   : > { %2591 = vmatpush.msrb.mxu2 %v2486_v0 }
 0x3bd   : > { %2592 = vmatpush.msrb.mxu2 %v2482_v42 }
 0x3bf   : > { %2593 = vmatpush.msrb.mxu2 %v2478_v3 }
 0x3c0   : > { %2762 = vmatmul.msk.f32.vlgmr.msrb.gmra.mxu2 %vm2514_vm10, %v5176_v43 }
 0x3fd   : > { %v2575_v41 = vpop.f32.mrf.mxu1 }
 0x3fe   : > { %v2576_v37 = vadd.f32 %v2575_v41, %v5260_v62 }
 0x400   : > { %2600 = vst [vmem:[%s5265_s21 + $0x10] sm:$0xff] %v2576_v37 }
 0x443   : > { %v2595_v58 = vpop.f32.mrf.mxu2 }
 0x444   : > { %v2596_v36 = vadd.f32 %v2595_v58, %v5260_v62 }
 0x446   : > { %2601 = vst [vmem:[%s5265_s21 + $0x18] sm:$0xff] %v2596_v36 }
 0x447 PF: > { %s21_s27 = sadd.s32 1, %s3017_s27  }
 0x448   : > { %p18_p7 = scmp.ge.s32.totalorder %s21_s27, 4  }
 0x44a   :  { %20 = sbr.rel (!%p18_p7) target bundleno = 3 (0x3), region = 99 }
 0x44f   :  { %2623 = vsyncpa [#allocation4], 1 }
 0x450   :  { %2625 = vsyncpa [#allocation4 + $0x1], 1 }
 0x451   :  { %2626 = vsyncpa [#allocation6], 1 }
 0x452   :  { %2627 = vsyncpa [#allocation9], 1 }

// kernel: cnn_detector_forward.4
= control target key start
LH: loop header
LB: loop body
LE: loop exit
PB: predicated region body
PF: predicated region fallthrough
CT: control target
= control target key end

     0   :  { %8 = vsyncpa [#allocation3], 0  ;;  %s8364_s0 = inlined_call_operand.vmem [shape: bf16[2,4096], index: 0, kind: input, shape index: {}]   ;;  %s8365_s1 = inlined_call_operand.hbm [shape: bf16[4096,1024], index: 1, kind: input, shape index: {}]   ;;  %s8366_s2 = inlined_call_operand.hbm [shape: f32[1,1024], index: 2, kind: input, shape index: {}]   ;;  %s8367_s3 = inlined_call_operand.vmem [shape: f32[2,1024], index: 3, kind: output, shape index: {}]  }
   0x1   :  { %10 = vsyncpa [#allocation3 + $0x1], 0 }
   0x2   :  { %11 = vsyncpa [#allocation5], 0 }
   0x3   :  { %13 = vsyncpa [#allocation5 + $0x1], 0  ;;  %s7076_s12 = smov 0   ;;  %s7078_s13 = smov 0  }
   0x4   :  { %s7080_s14 = smov 0   ;;  %s7082_s15 = smov 0  }
   0x5 LB: > { %s4320_s16 = sadd.s32 4294967295, %s7051_s15   ;;  %s7096_s17 = sadd.s32 1, %s7051_s15   ;;  %s7051_s15 = sphi %s7082_s15, %s8375_s15   ;;  %s7047_s14 = sphi %s7080_s14, %s8374_s14   ;;  %s7043_s13 = sphi %s7078_s13, %s8373_s13   ;;  %s7039_s12 = sphi %s7076_s12, %s8372_s12  }
   0x6   : > { %s44_s18 = ssub.s32 %s7051_s15, %s7096_s17  ;;  %s47_s19 = sadd.s32 1, %s7047_s14 }
   0x7   : > { %p45_p0 = scmp.eq.s32.totalorder %s44_s18, 0  ;;  %p54_p1 = scmp.ne.s32.totalorder %s7047_s14, %s7043_s13 }
   0x8   : > { %p55_p2 = scmp.eq.s32.totalorder %s7051_s15, 0  ;;  %p60_p3 = scmp.ne.s32.totalorder %s7043_s13, %s7039_s12 }
   0x9   : > { %s7106_s20 = scalar_select %p45_p0, %s7047_s14, %s47_s19  }
   0xa   : > { %p7108_p4 = por %p55_p2, %p54_p1  ;;  %p61_p5 = scmp.eq.s32.totalorder %s4320_s16, 0 }
   0xb   : > { %p6908_p6 = scmp.lt.s32.totalorder %s7051_s15, 4  ;;  %s7120_s23 = sand.u32 1, %s7047_s14  }
   0xc   : > { %p7115_p7 = por %p61_p5, %p60_p3  ;;  %s4324_s24 = sshll.u32 %s7120_s23, 12 }
   0xd   : > { %s6384_s25 = sshll.u32 %s7051_s15, 3  ;;  %s143_s29 = scalar_lea.vmem [#allocation2], %s4324_s24 }
   0xe   : > { %s148_s28 = scalar_lea.hbm %s8365_s1, %s6384_s25  ;;  %s151_s30 = sshll.u32 %s143_s29, 4  ;;  %s152_s30 = int_to_ptr.vmem [resolvable:$true] %s151_s30 }
   0xf   : > { %s149_s4 = sshll.u32 %s148_s28, 4  ;;  %p7129_p8 = pnand %p6908_p6, %p7108_p4  ;;  %s150_s4 = int_to_ptr.hbm [resolvable:$true] %s149_s4 }
  0x10   : > { %s140_s6 = scalar_lea.sflag [#allocation3], %s7120_s23  ;;  %s6953_s7 = sshra.s32 %s150_s4, 4  ;;  %s6954_s7 = int_to_ptr.hbm [resolvable:$true] %s6953_s7 }
  0x11   : > { %s6955_s8 = scalar_lea.hbm %s6954_s7, 4096  ;;  %p6957_p10 = pneg %p7129_p8 }
  0x12   : > { %p6956_p9 = scmp.ne.s32.totalorder %s6954_s7, %s6955_s8  ;;  %s6960_s11 = scalar_lea.hbm %s8365_s1, 16384 }
  0x13   : > { %p6961_p13 = scmp.lt.s32.totalorder %s6954_s7, %s8365_s1  ;;  %p6962_p0 = scmp.lt.s32.totalorder %s6960_s11, %s6955_s8 }
  0x14   : > { %p6958_p11 = pnand %p6957_p10, %p6956_p9 }
  0x15   : > { %p6963_p1 = por %p6962_p0, %p6961_p13 }
  0x16   : > { %p6959_p12 = pneg %p6958_p11 }
  0x18   : > { %p6964_p2 = pnand %p6963_p1, %p6959_p12 }
  0x1a   : > { %6967 = shalt.err (!%p6964_p2)
}
  0x1b   : > { %s7053_s19 = smov 512   ;;  %s7054_s21 = smov 128  }
  0x1c   : > { %s7055_s24 = smov 8   ;;  %p4329_p3 = scmp.ge.s32.totalorder %s7051_s15, 1 }
  0x1d   : > { %6904 = dma.hbm_to_vmem [thread:$0]  (!%p7129_p8), %s150_s4, 65536, %s152_s30, %s140_s6, %s7053_s19, %s7054_s21, %s7055_s24  }
  0x1e   : > { %p178_p4 = scmp.lt.s32.totalorder %s7051_s15, 5  ;;  %s4327_s25 = sshll.u32 %s7120_s23, 1 }
  0x1f   : > { %s4328_s27 = sshll.u32 %s7051_s15, 1  ;;  %s165_s28 = scalar_lea.vmem [#allocation4], %s4327_s25 }
  0x20   : > { %p7150_p5 = pnand %p4329_p3, %p178_p4  ;;  %s173_s29 = sshll.u32 %s165_s28, 4  ;;  %s174_s29 = int_to_ptr.vmem [resolvable:$true] %s173_s29 }
  0x21   : > { %s169_s9 = scalar_lea.hbm %s8366_s2, %s4328_s27  ;;  %s162_s11 = scalar_lea.sflag [#allocation5], %s7120_s23 }
  0x22   : > { %s171_s10 = sshll.u32 %s169_s9, 4  ;;  %s6990_s18 = scalar_lea.hbm %s8366_s2, 8  ;;  %s172_s10 = int_to_ptr.hbm [resolvable:$true] %s171_s10 }
  0x23   : > { %s6983_s30 = sshra.s32 %s172_s10, 4  ;;  %s6984_s30 = int_to_ptr.hbm [resolvable:$true] %s6983_s30 }
  0x24   : > { %s6985_s4 = scalar_lea.hbm %s6984_s30, 2  ;;  %p6991_p12 = scmp.lt.s32.totalorder %s6984_s30, %s8366_s2 }
  0x25   : > { %p6986_p6 = scmp.ne.s32.totalorder %s6984_s30, %s6985_s4  ;;  %p6992_p13 = scmp.lt.s32.totalorder %s6990_s18, %s6985_s4 }
  0x27   : > { %p6988_p9 = pnand %p6986_p6, %p6957_p10  ;;  %p6993_p0 = por %p6992_p13, %p6991_p12 }
  0x29   : > { %p6989_p11 = pneg %p6988_p9 }
  0x2b   : > { %p6994_p1 = pnand %p6993_p0, %p6989_p11 }
  0x2d   : > { %6997 = shalt.err (!%p6994_p1)
}
  0x2e   : > { %6907 = dma.hbm_to_vmem [thread:$0]  (!%p7129_p8), %s172_s10, 32, %s174_s29, %s162_s11  }
  0x2f   : > { %182 = sbr.rel (%p7150_p5) target bundleno = 714 (0x2ca), region = 32  ;;  %s184_s23 = sand.u32 (!%p7150_p5), 1, %s7043_s13  }
  0x30   : > { %s4330_s24 = sshll.u32 (!%p7150_p5), %s184_s23, 12  ;;  %s185_s25 = scalar_lea.sflag (!%p7150_p5), [#allocation3], %s184_s23 }
  0x31   : > { %s7173_s27 = scalar_lea.vmem (!%p7150_p5), [#allocation2], %s4330_s24 }
  0x34   : > { %7030 = dma.done.wait (%p7115_p7), %s185_s25, 65536  }
  0x35   : > { %7032 = vsyncadd (%p7115_p7), %s185_s25, 4294901760  ;;  %s4331_s28 = sshll.u32 %s184_s23, 1  ;;  %s195_s7 = scalar_lea.sflag [#allocation5], %s184_s23 }
  0x36   : > { %s7179_s5 = scalar_lea.vmem [#allocation4], %s4331_s28 }
  0x37   : > { %7034 = dma.done.wait (%p7115_p7), %s195_s7, 32  }
  0x38   : > { %7036 = vsyncadd (%p7115_p7), %s195_s7, 4294967264  ;;  %v4392_v0 = vld [vmem:[%s7173_s27 + $0x70] sm:$0xf]  ;;  %v6400_v1 = vld [vmem:[%s7173_s27 + $0x74] sm:$0xf0]  ;;  %s4332_s4 = sshll.u32 %s4320_s16, 1 }
  0x39   : > { %v4456_v2 = vld [vmem:[%s7173_s27 + $0xf0] sm:$0xf]  ;;  %v4393_v3 = vor.u32 %v6400_v1, %v4392_v0  ;;  %v6416_v4 = vld [vmem:[%s7173_s27 + $0xf4] sm:$0xf0]  ;;  %v4384_v11 = vld [vmem:[%s7173_s27 + $0x60] sm:$0xf] }
  0x3a   : > { %v4520_v5 = vld [vmem:[%s7173_s27 + $0x170] sm:$0xf]  ;;  %v6432_v6 = vld [vmem:[%s7173_s27 + $0x174] sm:$0xf0]  ;;  %v4457_v7 = vor.u32 %v6416_v4, %v4456_v2  ;;  %v6398_v13 = vld [vmem:[%s7173_s27 + $0x64] sm:$0xf0] }
  0x3b   : > { %v4521_v8 = vor.u32 %v6432_v6, %v4520_v5  ;;  %v4584_v9 = vld [vmem:[%s7173_s27 + $0x1f0] sm:$0xf]  ;;  %v6448_v10 = vld [vmem:[%s7173_s27 + $0x1f4] sm:$0xf0]  ;;  %3389 = vmatpush.bf16.msra.mxu0 %v4393_v3  ;;  %v4448_v14 = vld [vmem:[%s7173_s27 + $0xe0] sm:$0xf]  ;;  %v4385_v16 = vor.u32 %v6398_v13, %v4384_v11 }
  0x3c   : > { %v4585_v12 = vor.u32 %v6448_v10, %v4584_v9  ;;  %v6414_v15 = vld [vmem:[%s7173_s27 + $0xe4] sm:$0xf0]  ;;  %3402 = vmatpush.bf16.msra.mxu1 %v4457_v7  ;;  %v4512_v18 = vld [vmem:[%s7173_s27 + $0x160] sm:$0xf]  ;;  %v4376_v23 = vld [vmem:[%s7173_s27 + $0x50] sm:$0xf] }
  0x3d   : > { %3415 = vmatpush.bf16.msra.mxu2 %v4521_v8  ;;  %v4449_v17 = vor.u32 %v6414_v15, %v4448_v14  ;;  %v6430_v19 = vld [vmem:[%s7173_s27 + $0x164] sm:$0xf0]  ;;  %v4576_v20 = vld [vmem:[%s7173_s27 + $0x1e0] sm:$0xf]  ;;  %v6396_v24 = vld [vmem:[%s7173_s27 + $0x54] sm:$0xf0] }
  0x3e   : > { %3428 = vmatpush.bf16.msra.mxu3 %v4585_v12  ;;  %v4513_v21 = vor.u32 %v6430_v19, %v4512_v18  ;;  %v6446_v22 = vld [vmem:[%s7173_s27 + $0x1e4] sm:$0xf0]  ;;  %v4440_v26 = vld [vmem:[%s7173_s27 + $0xd0] sm:$0xf]  ;;  %v6412_v27 = vld [vmem:[%s7173_s27 + $0xd4] sm:$0xf0]  ;;  %v4377_v29 = vor.u32 %v6396_v24, %v4376_v23 }
  0x3f   : > { %v4577_v25 = vor.u32 %v6446_v22, %v4576_v20  ;;  %v4504_v28 = vld [vmem:[%s7173_s27 + $0x150] sm:$0xf]  ;;  %3390 = vmatpush.bf16.msra.mxu0 %v4385_v16  ;;  %v6428_v30 = vld [vmem:[%s7173_s27 + $0x154] sm:$0xf0]  ;;  %v4441_v33 = vor.u32 %v6412_v27, %v4440_v26  ;;  %v4368_v35 = vld [vmem:[%s7173_s27 + $0x40] sm:$0xf] }
  0x40   : > { %v4568_v31 = vld [vmem:[%s7173_s27 + $0x1d0] sm:$0xf]  ;;  %v6444_v32 = vld [vmem:[%s7173_s27 + $0x1d4] sm:$0xf0]  ;;  %3403 = vmatpush.bf16.msra.mxu1 %v4449_v17  ;;  %v4505_v34 = vor.u32 %v6428_v30, %v4504_v28  ;;  %v6394_v36 = vld [vmem:[%s7173_s27 + $0x44] sm:$0xf0] }
  0x41   : > { %3416 = vmatpush.bf16.msra.mxu2 %v4513_v21  ;;  %v4432_v37 = vld [vmem:[%s7173_s27 + $0xc0] sm:$0xf]  ;;  %v4569_v38 = vor.u32 %v6444_v32, %v4568_v31  ;;  %v6410_v39 = vld [vmem:[%s7173_s27 + $0xc4] sm:$0xf0]  ;;  %v4369_v44 = vor.u32 %v6394_v36, %v4368_v35  ;;  %v4360_v47 = vld [vmem:[%s7173_s27 + $0x30] sm:$0xf] }
  0x42   : > { %3429 = vmatpush.bf16.msra.mxu3 %v4577_v25  ;;  %v4496_v40 = vld [vmem:[%s7173_s27 + $0x140] sm:$0xf]  ;;  %v6426_v41 = vld [vmem:[%s7173_s27 + $0x144] sm:$0xf0]  ;;  %v4433_v45 = vor.u32 %v6410_v39, %v4432_v37  ;;  %v6392_v48 = vld [vmem:[%s7173_s27 + $0x34] sm:$0xf0] }
  0x43   : > { %v4560_v42 = vld [vmem:[%s7173_s27 + $0x1c0] sm:$0xf]  ;;  %v6442_v43 = vld [vmem:[%s7173_s27 + $0x1c4] sm:$0xf0]  ;;  %3391 = vmatpush.bf16.msra.mxu0 %v4377_v29  ;;  %v4497_v46 = vor.u32 %v6426_v41, %v4496_v40  ;;  %v4424_v49 = vld [vmem:[%s7173_s27 + $0xb0] sm:$0xf]  ;;  %v4361_v56 = vor.u32 %v6392_v48, %v4360_v47 }
  0x44   : > { %3404 = vmatpush.bf16.msra.mxu1 %v4441_v33  ;;  %v4561_v50 = vor.u32 %v6442_v43, %v4560_v42  ;;  %v6408_v51 = vld [vmem:[%s7173_s27 + $0xb4] sm:$0xf0]  ;;  %v4488_v52 = vld [vmem:[%s7173_s27 + $0x130] sm:$0xf]  ;;  %v4352_v59 = vld [vmem:[%s7173_s27 + $0x20] sm:$0xf] }
  0x45   : > { %3417 = vmatpush.bf16.msra.mxu2 %v4505_v34  ;;  %v6424_v53 = vld [vmem:[%s7173_s27 + $0x134] sm:$0xf0]  ;;  %v4552_v54 = vld [vmem:[%s7173_s27 + $0x1b0] sm:$0xf]  ;;  %v4425_v57 = vor.u32 %v6408_v51, %v4424_v49  ;;  %v6390_v60 = vld [vmem:[%s7173_s27 + $0x24] sm:$0xf0] }
  0x46   : > { %3430 = vmatpush.bf16.msra.mxu3 %v4569_v38  ;;  %v6440_v55 = vld [vmem:[%s7173_s27 + $0x1b4] sm:$0xf0]  ;;  %v4489_v58 = vor.u32 %v6424_v53, %v4488_v52  ;;  %v4416_v61 = vld [vmem:[%s7173_s27 + $0xa0] sm:$0xf]  ;;  %v6406_v63 = vld [vmem:[%s7173_s27 + $0xa4] sm:$0xf0]  ;;  %v4353_v4 = vor.u32 %v6390_v60, %v4352_v59 }
  0x47   : > { %3392 = vmatpush.bf16.msra.mxu0 %v4369_v44  ;;  %v4553_v62 = vor.u32 %v6440_v55, %v4552_v54  ;;  %v4480_v0 = vld [vmem:[%s7173_s27 + $0x120] sm:$0xf]  ;;  %v6422_v1 = vld [vmem:[%s7173_s27 + $0x124] sm:$0xf0]  ;;  %v4417_v5 = vor.u32 %v6406_v63, %v4416_v61  ;;  %v4344_v7 = vld [vmem:[%s7173_s27 + $0x10] sm:$0xf] }
  0x48   : > { %3405 = vmatpush.bf16.msra.mxu1 %v4433_v45  ;;  %v4544_v2 = vld [vmem:[%s7173_s27 + $0x1a0] sm:$0xf]  ;;  %v6438_v3 = vld [vmem:[%s7173_s27 + $0x1a4] sm:$0xf0]  ;;  %v4481_v6 = vor.u32 %v6422_v1, %v4480_v0  ;;  %v6388_v8 = vld [vmem:[%s7173_s27 + $0x14] sm:$0xf0] }
  0x49   : > { %3418 = vmatpush.bf16.msra.mxu2 %v4497_v46  ;;  %v4408_v9 = vld [vmem:[%s7173_s27 + $0x90] sm:$0xf]  ;;  %v4545_v10 = vor.u32 %v6438_v3, %v4544_v2  ;;  %v6404_v11 = vld [vmem:[%s7173_s27 + $0x94] sm:$0xf0]  ;;  %v4345_v16 = vor.u32 %v6388_v8, %v4344_v7  ;;  %v4336_v17 = vld [vmem:[%s7173_s27] sm:$0xf] }
  0x4a   : > { %3431 = vmatpush.bf16.msra.mxu3 %v4561_v50  ;;  %v4472_v12 = vld [vmem:[%s7173_s27 + $0x110] sm:$0xf]  ;;  %v6420_v13 = vld [vmem:[%s7173_s27 + $0x114] sm:$0xf0]  ;;  %v6386_v18 = vld [vmem:[%s7173_s27 + $0x4] sm:$0xf0]  ;;  %v4409_v19 = vor.u32 %v6404_v11, %v4408_v9 }
  0x4b   : > { %3393 = vmatpush.bf16.msra.mxu0 %v4361_v56  ;;  %v4536_v14 = vld [vmem:[%s7173_s27 + $0x190] sm:$0xf]  ;;  %v6436_v15 = vld [vmem:[%s7173_s27 + $0x194] sm:$0xf0]  ;;  %v4473_v20 = vor.u32 %v6420_v13, %v4472_v12  ;;  %v4400_v21 = vld [vmem:[%s7173_s27 + $0x80] sm:$0xf]  ;;  %v4337_v31 = vor.u32 %v6386_v18, %v4336_v17 }
  0x4c   : > { %3406 = vmatpush.bf16.msra.mxu1 %v4425_v57  ;;  %v6402_v22 = vld [vmem:[%s7173_s27 + $0x84] sm:$0xf0]  ;;  %v4464_v23 = vld [vmem:[%s7173_s27 + $0x100] sm:$0xf]  ;;  %v4537_v24 = vor.u32 %v6436_v15, %v4536_v14  ;;  %v4648_v28 = vld [vmem:[%s7173_s27 + $0x270] sm:$0xf] }
  0x4d   : > { %3419 = vmatpush.bf16.msra.mxu2 %v4489_v58  ;;  %v6418_v25 = vld [vmem:[%s7173_s27 + $0x104] sm:$0xf0]  ;;  %v4528_v26 = vld [vmem:[%s7173_s27 + $0x180] sm:$0xf]  ;;  %v6464_v29 = vld [vmem:[%s7173_s27 + $0x274] sm:$0xf0]  ;;  %v4401_v35 = vor.u32 %v6402_v22, %v4400_v21 }
  0x4e   : > { %3432 = vmatpush.bf16.msra.mxu3 %v4553_v62  ;;  %v6434_v27 = vld [vmem:[%s7173_s27 + $0x184] sm:$0xf0]  ;;  %v4712_v30 = vld [vmem:[%s7173_s27 + $0x2f0] sm:$0xf]  ;;  %v6480_v32 = vld [vmem:[%s7173_s27 + $0x2f4] sm:$0xf0]  ;;  %v4465_v36 = vor.u32 %v6418_v25, %v4464_v23  ;;  %v4649_v40 = vor.u32 %v6464_v29, %v4648_v28 }
  0x4f   : > { %3394 = vmatpush.bf16.msra.mxu0 %v4353_v4  ;;  %v4776_v33 = vld [vmem:[%s7173_s27 + $0x370] sm:$0xf]  ;;  %v6496_v34 = vld [vmem:[%s7173_s27 + $0x374] sm:$0xf0]  ;;  %v4529_v39 = vor.u32 %v6434_v27, %v4528_v26  ;;  %v4713_v41 = vor.u32 %v6480_v32, %v4712_v30  ;;  %v4640_v43 = vld [vmem:[%s7173_s27 + $0x260] sm:$0xf] }
  0x50   : > { %3407 = vmatpush.bf16.msra.mxu1 %v4417_v5  ;;  %v4840_v37 = vld [vmem:[%s7173_s27 + $0x3f0] sm:$0xf]  ;;  %v6512_v38 = vld [vmem:[%s7173_s27 + $0x3f4] sm:$0xf0]  ;;  %v4777_v42 = vor.u32 %v6496_v34, %v4776_v33  ;;  %v6462_v44 = vld [vmem:[%s7173_s27 + $0x264] sm:$0xf0] }
  0x51   : > { %3420 = vmatpush.bf16.msra.mxu2 %v4481_v6  ;;  %v4704_v45 = vld [vmem:[%s7173_s27 + $0x2e0] sm:$0xf]  ;;  %v4841_v46 = vor.u32 %v6512_v38, %v4840_v37  ;;  %v6478_v47 = vld [vmem:[%s7173_s27 + $0x2e4] sm:$0xf0]  ;;  %v4641_v52 = vor.u32 %v6462_v44, %v4640_v43  ;;  %v4632_v55 = vld [vmem:[%s7173_s27 + $0x250] sm:$0xf] }
  0x52   : > { %3433 = vmatpush.bf16.msra.mxu3 %v4545_v10  ;;  %v4768_v48 = vld [vmem:[%s7173_s27 + $0x360] sm:$0xf]  ;;  %v6494_v49 = vld [vmem:[%s7173_s27 + $0x364] sm:$0xf0]  ;;  %v4705_v53 = vor.u32 %v6478_v47, %v4704_v45  ;;  %v6460_v56 = vld [vmem:[%s7173_s27 + $0x254] sm:$0xf0] }
  0x53   : > { %3395 = vmatpush.bf16.msra.mxu0 %v4345_v16  ;;  %v4832_v50 = vld [vmem:[%s7173_s27 + $0x3e0] sm:$0xf]  ;;  %v6510_v51 = vld [vmem:[%s7173_s27 + $0x3e4] sm:$0xf0]  ;;  %v4769_v54 = vor.u32 %v6494_v49, %v4768_v48  ;;  %v4696_v57 = vld [vmem:[%s7173_s27 + $0x2d0] sm:$0xf]  ;;  %v4633_v0 = vor.u32 %v6460_v56, %v4632_v55 }
  0x54   : > { %3408 = vmatpush.bf16.msra.mxu1 %v4409_v19  ;;  %v4833_v58 = vor.u32 %v6510_v51, %v4832_v50  ;;  %v6476_v59 = vld [vmem:[%s7173_s27 + $0x2d4] sm:$0xf0]  ;;  %v4760_v60 = vld [vmem:[%s7173_s27 + $0x350] sm:$0xf]  ;;  %v4624_v1 = vld [vmem:[%s7173_s27 + $0x240] sm:$0xf] }
  0x55   : > { %3421 = vmatpush.bf16.msra.mxu2 %v4473_v20  ;;  %v6492_v61 = vld [vmem:[%s7173_s27 + $0x354] sm:$0xf0]  ;;  %v4824_v62 = vld [vmem:[%s7173_s27 + $0x3d0] sm:$0xf]  ;;  %v4697_v3 = vor.u32 %v6476_v59, %v4696_v57  ;;  %v6458_v5 = vld [vmem:[%s7173_s27 + $0x244] sm:$0xf0] }
  0x56   : > { %3434 = vmatpush.bf16.msra.mxu3 %v4537_v24  ;;  %v6508_v63 = vld [vmem:[%s7173_s27 + $0x3d4] sm:$0xf0]  ;;  %v4761_v4 = vor.u32 %v6492_v61, %v4760_v60  ;;  %v4688_v6 = vld [vmem:[%s7173_s27 + $0x2c0] sm:$0xf]  ;;  %v6474_v8 = vld [vmem:[%s7173_s27 + $0x2c4] sm:$0xf0]  ;;  %v4625_v13 = vor.u32 %v6458_v5, %v4624_v1 }
  0x57   : > { %3396 = vmatpush.bf16.msra.mxu0 %v4337_v31  ;;  %v235_v2 = vld [vmem:[%s8364_s0] sm:$0xff]  ;;  %v4825_v7 = vor.u32 %v6508_v63, %v4824_v62  ;;  %v4752_v9 = vld [vmem:[%s7173_s27 + $0x340] sm:$0xf]  ;;  %v6490_v10 = vld [vmem:[%s7173_s27 + $0x344] sm:$0xf0]  ;;  %v4689_v14 = vor.u32 %v6474_v8, %v4688_v6  ;;  %p230_p7 = scmp.lt.s32.totalorder %s4332_s4, 7 }
  0x58   : > { %3409 = vmatpush.bf16.msra.mxu1 %v4401_v35  ;;  %758 = vst [vmem:[#allocation1] ss:$9 sm:$0xff] %v235_v2  ;;  %v4816_v11 = vld [vmem:[%s7173_s27 + $0x3c0] sm:$0xf]  ;;  %v6506_v12 = vld [vmem:[%s7173_s27 + $0x3c4] sm:$0xf0]  ;;  %v4753_v15 = vor.u32 %v6490_v10, %v4752_v9 }
  0x59   : > { %3422 = vmatpush.bf16.msra.mxu2 %v4465_v36  ;;  %v4616_v16 = vld [vmem:[%s7173_s27 + $0x230] sm:$0xf]  ;;  %v6456_v17 = vld [vmem:[%s7173_s27 + $0x234] sm:$0xf0]  ;;  %v4817_v19 = vor.u32 %v6506_v12, %v4816_v11  ;;  %v4608_v25 = vld [vmem:[%s7173_s27 + $0x220] sm:$0xf] }
  0x5a   : > { %3435 = vmatpush.bf16.msra.mxu3 %v4529_v39  ;;  %v4680_v18 = vld [vmem:[%s7173_s27 + $0x2b0] sm:$0xf]  ;;  %v6472_v20 = vld [vmem:[%s7173_s27 + $0x2b4] sm:$0xf0]  ;;  %v4617_v26 = vor.u32 %v6456_v17, %v4616_v16  ;;  %v6454_v32 = vld [vmem:[%s7173_s27 + $0x224] sm:$0xf0] }
  0x5b   : > { %3441 = vmatpush.bf16.msrb.mxu0 %v4649_v40  ;;  %v4744_v21 = vld [vmem:[%s7173_s27 + $0x330] sm:$0xf]  ;;  %v6488_v22 = vld [vmem:[%s7173_s27 + $0x334] sm:$0xf0]  ;;  %v4681_v30 = vor.u32 %v6472_v20, %v4680_v18  ;;  %v4672_v33 = vld [vmem:[%s7173_s27 + $0x2a0] sm:$0xf] }
  0x5c   : > { %3454 = vmatpush.bf16.msrb.mxu1 %v4713_v41  ;;  %v4808_v23 = vld [vmem:[%s7173_s27 + $0x3b0] sm:$0xf]  ;;  %v6504_v24 = vld [vmem:[%s7173_s27 + $0x3b4] sm:$0xf0]  ;;  %v4745_v31 = vor.u32 %v6488_v22, %v4744_v21  ;;  %v6470_v36 = vld [vmem:[%s7173_s27 + $0x2a4] sm:$0xf0]  ;;  %v4609_v41 = vor.u32 %v6454_v32, %v4608_v25 }
  0x5d   : > { %3467 = vmatpush.bf16.msrb.mxu2 %v4777_v42  ;;  %v4809_v35 = vor.u32 %v6504_v24, %v4808_v23  ;;  %v4736_v37 = vld [vmem:[%s7173_s27 + $0x320] sm:$0xf]  ;;  %v6486_v38 = vld [vmem:[%s7173_s27 + $0x324] sm:$0xf0]  ;;  %v4673_v42 = vor.u32 %v6470_v36, %v4672_v33  ;;  %v4600_v44 = vld [vmem:[%s7173_s27 + $0x210] sm:$0xf] }
  0x5e   : > { %3480 = vmatpush.bf16.msrb.mxu3 %v4841_v46  ;;  %v4800_v39 = vld [vmem:[%s7173_s27 + $0x3a0] sm:$0xf]  ;;  %v6502_v40 = vld [vmem:[%s7173_s27 + $0x3a4] sm:$0xf0]  ;;  %v4737_v43 = vor.u32 %v6486_v38, %v4736_v37  ;;  %v6452_v45 = vld [vmem:[%s7173_s27 + $0x214] sm:$0xf0] }
  0x5f   : > { %3442 = vmatpush.bf16.msrb.mxu0 %v4641_v52  ;;  %v7293_v27 = vld [vmem:[#allocation1 + $0x12] sm:$0xff]  ;;  %v7295_v28 = vld [vmem:[#allocation1] sm:$0xff]  ;;  %v7301_v34 = vld [vmem:[#allocation1 + $0x9] sm:$0xff]  ;;  %v4801_v47 = vor.u32 %v6502_v40, %v4800_v39  ;;  %s8377_s4 = smov (!%p230_p7, %s4332_s4), 7  ;;  %vm4226_vm0 = vcmask 1041408  }
  0x60   : > { %3455 = vmatpush.bf16.msrb.mxu1 %v4705_v53  ;;  %v7297_v29 = vld [vmem:[#allocation1 + $0x1b] sm:$0xff]  ;;  %3423 = vmatmul.bf16.vlgmr.msra.gmra.mxu2 %v7293_v27  ;;  %v4601_v53 = vor.u32 %v6452_v45, %v4600_v44  ;;  %v6450_v55 = vld [vmem:[%s7173_s27 + $0x204] sm:$0xf0]  ;;  %v4720_v60 = vld [vmem:[%s7173_s27 + $0x300] sm:$0xf]  ;;  %s4333_s6 = sshll.u32 %s8377_s4, 1 }
  0x61   : > { %3468 = vmatpush.bf16.msrb.mxu2 %v4769_v54  ;;  %3397 = vmatmul.bf16.vlgmr.msra.gmra.mxu0 %v7295_v28  ;;  %v4664_v46 = vld [vmem:[%s7173_s27 + $0x290] sm:$0xf]  ;;  %v6468_v48 = vld [vmem:[%s7173_s27 + $0x294] sm:$0xf0]  ;;  %v4592_v54 = vld [vmem:[%s7173_s27 + $0x200] sm:$0xf]  ;;  %s233_s15 = scalar_lea.vmem %s8367_s3, %s4333_s6 }
  0x62   : > { %3481 = vmatpush.bf16.msrb.mxu3 %v4833_v58  ;;  %3410 = vmatmul.bf16.vlgmr.msra.gmra.mxu1 %v7301_v34  ;;  %v4728_v49 = vld [vmem:[%s7173_s27 + $0x310] sm:$0xf]  ;;  %v6484_v50 = vld [vmem:[%s7173_s27 + $0x314] sm:$0xf0]  ;;  %v4665_v56 = vor.u32 %v6468_v48, %v4664_v46  ;;  %v4656_v58 = vld [vmem:[%s7173_s27 + $0x280] sm:$0xf] }
  0x63   : > { %3443 = vmatpush.bf16.msrb.mxu0 %v4633_v0  ;;  %3436 = vmatmul.bf16.vlgmr.msra.gmra.mxu3 %v7297_v29  ;;  %v4792_v51 = vld [vmem:[%s7173_s27 + $0x390] sm:$0xf]  ;;  %v6500_v52 = vld [vmem:[%s7173_s27 + $0x394] sm:$0xf0]  ;;  %v4729_v57 = vor.u32 %v6484_v50, %v4728_v49  ;;  %v6466_v59 = vld [vmem:[%s7173_s27 + $0x284] sm:$0xf0] }
  0x64   : > { %3456 = vmatpush.bf16.msrb.mxu1 %v4697_v3  ;;  %v4793_v61 = vor.u32 %v6500_v52, %v4792_v51  ;;  %v6482_v62 = vld [vmem:[%s7173_s27 + $0x304] sm:$0xf0]  ;;  %v4784_v63 = vld [vmem:[%s7173_s27 + $0x380] sm:$0xf]  ;;  %v4904_v1 = vld [vmem:[%s7173_s27 + $0x470] sm:$0xf]  ;;  %v4657_v8 = vor.u32 %v6466_v59, %v4656_v58 }
  0x65   : > { %3469 = vmatpush.bf16.msrb.mxu2 %v4761_v4  ;;  %v6498_v0 = vld [vmem:[%s7173_s27 + $0x384] sm:$0xf0]  ;;  %v6528_v2 = vld [vmem:[%s7173_s27 + $0x474] sm:$0xf0]  ;;  %v4968_v3 = vld [vmem:[%s7173_s27 + $0x4f0] sm:$0xf]  ;;  %v4593_v4 = vor.u32 %v6450_v55, %v4592_v54  ;;  %v4721_v9 = vor.u32 %v6482_v62, %v4720_v60 }
  0x66   : > { %3482 = vmatpush.bf16.msrb.mxu3 %v4825_v7  ;;  %v6544_v5 = vld [vmem:[%s7173_s27 + $0x4f4] sm:$0xf0]  ;;  %v5032_v6 = vld [vmem:[%s7173_s27 + $0x570] sm:$0xf]  ;;  %v4785_v12 = vor.u32 %v6498_v0, %v4784_v63  ;;  %v4896_v16 = vld [vmem:[%s7173_s27 + $0x460] sm:$0xf] }
  0x67   : > { %3444 = vmatpush.bf16.msrb.mxu0 %v4625_v13  ;;  %v6560_v7 = vld [vmem:[%s7173_s27 + $0x574] sm:$0xf0]  ;;  %v5096_v10 = vld [vmem:[%s7173_s27 + $0x5f0] sm:$0xf]  ;;  %v4905_v13 = vor.u32 %v6528_v2, %v4904_v1  ;;  %v6526_v17 = vld [vmem:[%s7173_s27 + $0x464] sm:$0xf0] }
  0x68   : > { %3457 = vmatpush.bf16.msrb.mxu1 %v4689_v14  ;;  %v6576_v11 = vld [vmem:[%s7173_s27 + $0x5f4] sm:$0xf0]  ;;  %v4969_v14 = vor.u32 %v6544_v5, %v4968_v3  ;;  %v4960_v18 = vld [vmem:[%s7173_s27 + $0x4e0] sm:$0xf]  ;;  %v6542_v20 = vld [vmem:[%s7173_s27 + $0x4e4] sm:$0xf0] }
  0x69   : > { %3470 = vmatpush.bf16.msrb.mxu2 %v4753_v15  ;;  %v5033_v15 = vor.u32 %v6560_v7, %v5032_v6  ;;  %v5024_v21 = vld [vmem:[%s7173_s27 + $0x560] sm:$0xf]  ;;  %v6558_v22 = vld [vmem:[%s7173_s27 + $0x564] sm:$0xf0]  ;;  %v7344_v25 = vld [vmem:[#allocation1 + $0x36] sm:$0xff]  ;;  %v4961_v33 = vor.u32 %v6542_v20, %v4960_v18 }
  0x6a   : > { %3483 = vmatpush.bf16.msrb.mxu3 %v4817_v19  ;;  %v5097_v19 = vor.u32 %v6576_v11, %v5096_v10  ;;  %v5088_v23 = vld [vmem:[%s7173_s27 + $0x5e0] sm:$0xf]  ;;  %v6574_v24 = vld [vmem:[%s7173_s27 + $0x5e4] sm:$0xf0]  ;;  %v7349_v32 = vld [vmem:[#allocation1 + $0x3f] sm:$0xff] }
  0x6b   : > { %3445 = vmatpush.bf16.msrb.mxu0 %v4617_v26  ;;  %v4897_v26 = vor.u32 %v6526_v17, %v4896_v16  ;;  %v6524_v36 = vld [vmem:[%s7173_s27 + $0x454] sm:$0xf0]  ;;  %v4952_v37 = vld [vmem:[%s7173_s27 + $0x4d0] sm:$0xf]  ;;  %v7353_v38 = vld [vmem:[#allocation1 + $0x2d] sm:$0xff]  ;;  %v5089_v39 = vor.u32 %v6574_v24, %v5088_v23 }
  0x6c   : > { %3458 = vmatpush.bf16.msrb.mxu1 %v4681_v30  ;;  %v4888_v30 = vld [vmem:[%s7173_s27 + $0x450] sm:$0xf]  ;;  %v6540_v40 = vld [vmem:[%s7173_s27 + $0x4d4] sm:$0xf0]  ;;  %v4880_v48 = vld [vmem:[%s7173_s27 + $0x440] sm:$0xf] }
  0x6d   : > { %3471 = vmatpush.bf16.msrb.mxu2 %v4745_v31  ;;  %v7347_v31 = vld [vmem:[#allocation1 + $0x24] sm:$0xff]  ;;  %v6572_v44 = vld [vmem:[%s7173_s27 + $0x5d4] sm:$0xf0]  ;;  %v4889_v45 = vor.u32 %v6524_v36, %v4888_v30  ;;  %v4953_v46 = vor.u32 %v6540_v40, %v4952_v37  ;;  %v6522_v49 = vld [vmem:[%s7173_s27 + $0x444] sm:$0xf0] }
  0x6e   : > { %3484 = vmatpush.bf16.msrb.mxu3 %v4809_v35  ;;  %v5025_v35 = vor.u32 %v6558_v22, %v5024_v21  ;;  %v4944_v50 = vld [vmem:[%s7173_s27 + $0x4c0] sm:$0xf]  ;;  %v6538_v52 = vld [vmem:[%s7173_s27 + $0x4c4] sm:$0xf0]  ;;  %v4881_v58 = vor.u32 %v6522_v49, %v4880_v48  ;;  %v6520_v62 = vld [vmem:[%s7173_s27 + $0x434] sm:$0xf0] }
  0x6f   : > { %3446 = vmatpush.bf16.msrb.mxu0 %v4609_v41  ;;  %v5016_v41 = vld [vmem:[%s7173_s27 + $0x550] sm:$0xf]  ;;  %v6554_v54 = vld [vmem:[%s7173_s27 + $0x544] sm:$0xf0]  ;;  %v5072_v55 = vld [vmem:[%s7173_s27 + $0x5c0] sm:$0xf]  ;;  %v4945_v59 = vor.u32 %v6538_v52, %v4944_v50 }
  0x70   : > { %3459 = vmatpush.bf16.msrb.mxu1 %v4673_v42  ;;  %v6556_v42 = vld [vmem:[%s7173_s27 + $0x554] sm:$0xf0]  ;;  %v4936_v63 = vld [vmem:[%s7173_s27 + $0x4b0] sm:$0xf]  ;;  %v6518_v10 = vld [vmem:[%s7173_s27 + $0x424] sm:$0xf0] }
  0x71   : > { %3472 = vmatpush.bf16.msrb.mxu2 %v4737_v43  ;;  %v5080_v43 = vld [vmem:[%s7173_s27 + $0x5d0] sm:$0xf]  ;;  %v6536_v1 = vld [vmem:[%s7173_s27 + $0x4b4] sm:$0xf0]  ;;  %v4928_v11 = vld [vmem:[%s7173_s27 + $0x4a0] sm:$0xf] }
  0x72   : > { %3485 = vmatpush.bf16.msrb.mxu3 %v4801_v47  ;;  %v5017_v47 = vor.u32 %v6556_v42, %v5016_v41  ;;  %v5081_v51 = vor.u32 %v6572_v44, %v5080_v43  ;;  %v5000_v2 = vld [vmem:[%s7173_s27 + $0x530] sm:$0xf]  ;;  %v6552_v3 = vld [vmem:[%s7173_s27 + $0x534] sm:$0xf0]  ;;  %v4937_v7 = vor.u32 %v6536_v1, %v4936_v63  ;;  %v5056_v16 = vld [vmem:[%s7173_s27 + $0x5a0] sm:$0xf] }
  0x73   : > { %3447 = vmatpush.bf16.msrb.mxu0 %v4601_v53  ;;  %v5008_v53 = vld [vmem:[%s7173_s27 + $0x540] sm:$0xf]  ;;  %v6568_v5 = vld [vmem:[%s7173_s27 + $0x5b4] sm:$0xf0]  ;;  %v6566_v17 = vld [vmem:[%s7173_s27 + $0x5a4] sm:$0xf0] }
  0x74   : > { %3460 = vmatpush.bf16.msrb.mxu1 %v4665_v56  ;;  %v6570_v56 = vld [vmem:[%s7173_s27 + $0x5c4] sm:$0xf0]  ;;  %v5009_v60 = vor.u32 %v6554_v54, %v5008_v53  ;;  %v4856_v21 = vld [vmem:[%s7173_s27 + $0x410] sm:$0xf]  ;;  %v6516_v22 = vld [vmem:[%s7173_s27 + $0x414] sm:$0xf0]  ;;  %v5057_v24 = vor.u32 %v6566_v17, %v5056_v16 }
  0x75   : > { %3473 = vmatpush.bf16.msrb.mxu2 %v4729_v57  ;;  %v236_v57 = vld [vmem:[%s8364_s0 + $0x8] sm:$0xff]  ;;  %v5073_v0 = vor.u32 %v6570_v56, %v5072_v55  ;;  %v4920_v23 = vld [vmem:[%s7173_s27 + $0x490] sm:$0xf]  ;;  %v6564_v36 = vld [vmem:[%s7173_s27 + $0x594] sm:$0xf0]  ;;  %v4857_v37 = vor.u32 %v6516_v22, %v4856_v21 }
  0x76   : > { %3486 = vmatpush.bf16.msrb.mxu3 %v4793_v61  ;;  %768 = vst [vmem:[#allocation1] ss:$9 sm:$0xff] %v236_v57  ;;  %v4872_v61 = vld [vmem:[%s7173_s27 + $0x430] sm:$0xf]  ;;  %v6514_v40 = vld [vmem:[%s7173_s27 + $0x404] sm:$0xf0] }
  0x77   : > { %3448 = vmatpush.bf16.msrb.mxu0 %v4593_v4  ;;  %v5064_v4 = vld [vmem:[%s7173_s27 + $0x5b0] sm:$0xf]  ;;  %v4873_v6 = vor.u32 %v6520_v62, %v4872_v61  ;;  %v4912_v43 = vld [vmem:[%s7173_s27 + $0x480] sm:$0xf]  ;;  %v6530_v44 = vld [vmem:[%s7173_s27 + $0x484] sm:$0xf0] }
  0x78   : > { %3461 = vmatpush.bf16.msrb.mxu1 %v4657_v8  ;;  %v5001_v8 = vor.u32 %v6552_v3, %v5000_v2  ;;  %v4984_v30 = vld [vmem:[%s7173_s27 + $0x510] sm:$0xf]  ;;  %v5040_v48 = vld [vmem:[%s7173_s27 + $0x580] sm:$0xf]  ;;  %v6562_v49 = vld [vmem:[%s7173_s27 + $0x584] sm:$0xf0]  ;;  %v4913_v57 = vor.u32 %v6530_v44, %v4912_v43 }
  0x79   : > { %3474 = vmatpush.bf16.msrb.mxu2 %v4721_v9  ;;  %v4864_v9 = vld [vmem:[%s7173_s27 + $0x420] sm:$0xf]  ;;  %v5160_v50 = vld [vmem:[%s7173_s27 + $0x670] sm:$0xf]  ;;  %v6608_v54 = vld [vmem:[%s7173_s27 + $0x6f4] sm:$0xf0]  ;;  %v5041_v61 = vor.u32 %v6562_v49, %v5040_v48 }
  0x7a   : > { %3487 = vmatpush.bf16.msrb.mxu3 %v4785_v12  ;;  %3449 = vmatmul.bf16.vlgmr.msrb.gmra.mxu0 %v7347_v31  ;;  %v5065_v12 = vor.u32 %v6568_v5, %v5064_v4  ;;  %v4865_v18 = vor.u32 %v6518_v10, %v4864_v9  ;;  %v5224_v52 = vld [vmem:[%s7173_s27 + $0x6f0] sm:$0xf]  ;;  %v6624_v56 = vld [vmem:[%s7173_s27 + $0x774] sm:$0xf0]  ;;  %v5152_v1 = vld [vmem:[%s7173_s27 + $0x660] sm:$0xf] }
  0x7b   : > { %3493 = vmatpush.bf16.msra.mxu0 %v4905_v13  ;;  %3462 = vmatmul.bf16.vlgmr.msrb.gmra.mxu1 %v7353_v38  ;;  %v6534_v13 = vld [vmem:[%s7173_s27 + $0x4a4] sm:$0xf0]  ;;  %v5288_v55 = vld [vmem:[%s7173_s27 + $0x770] sm:$0xf]  ;;  %v5225_v63 = vor.u32 %v6608_v54, %v5224_v52  ;;  %v5216_v3 = vld [vmem:[%s7173_s27 + $0x6e0] sm:$0xf] }
  0x7c   : > { %3506 = vmatpush.bf16.msra.mxu1 %v4969_v14  ;;  %3475 = vmatmul.bf16.vlgmr.msrb.gmra.mxu2 %v7344_v25  ;;  %v4992_v14 = vld [vmem:[%s7173_s27 + $0x520] sm:$0xf]  ;;  %v6590_v2 = vld [vmem:[%s7173_s27 + $0x664] sm:$0xf0]  ;;  %v6604_v21 = vld [vmem:[%s7173_s27 + $0x6d4] sm:$0xf0] }
  0x7d   : > { %3519 = vmatpush.bf16.msra.mxu2 %v5033_v15  ;;  %3488 = vmatmul.bf16.vlgmr.msrb.gmra.mxu3 %v7349_v32  ;;  %v6550_v15 = vld [vmem:[%s7173_s27 + $0x524] sm:$0xf0]  ;;  %v5344_v9 = vld [vmem:[%s7173_s27 + $0x7e0] sm:$0xf]  ;;  %v5272_v22 = vld [vmem:[%s7173_s27 + $0x750] sm:$0xf] }
  0x7e   : > { %3532 = vmatpush.bf16.msra.mxu3 %v5097_v19  ;;  %v4929_v19 = vor.u32 %v6534_v13, %v4928_v11  ;;  %v4993_v20 = vor.u32 %v6550_v15, %v4992_v14  ;;  %v6606_v5 = vld [vmem:[%s7173_s27 + $0x6e4] sm:$0xf0]  ;;  %v5153_v13 = vor.u32 %v6590_v2, %v5152_v1  ;;  %v5144_v14 = vld [vmem:[%s7173_s27 + $0x650] sm:$0xf]  ;;  %v5328_v44 = vld [vmem:[%s7173_s27 + $0x7c0] sm:$0xf] }
  0x7f   : > { %3494 = vmatpush.bf16.msra.mxu0 %v4897_v26  ;;  %v6532_v26 = vld [vmem:[%s7173_s27 + $0x494] sm:$0xf0]  ;;  %v6638_v10 = vld [vmem:[%s7173_s27 + $0x7e4] sm:$0xf0]  ;;  %v5217_v16 = vor.u32 %v6606_v5, %v5216_v3  ;;  %v5128_v49 = vld [vmem:[%s7173_s27 + $0x630] sm:$0xf] }
  0x80   : > { %3507 = vmatpush.bf16.msra.mxu1 %v4961_v33  ;;  %v6548_v33 = vld [vmem:[%s7173_s27 + $0x514] sm:$0xf0]  ;;  %v4921_v41 = vor.u32 %v6532_v26, %v4920_v23  ;;  %v7425_v11 = vld [vmem:[#allocation1 + $0x12] sm:$0xff]  ;;  %v5248_v2 = vld [vmem:[%s7173_s27 + $0x720] sm:$0xf] }
  0x81   : > { %3520 = vmatpush.bf16.msra.mxu2 %v5025_v35  ;;  %v5048_v35 = vld [vmem:[%s7173_s27 + $0x590] sm:$0xf]  ;;  %v4985_v42 = vor.u32 %v6548_v33, %v4984_v30  ;;  %v6620_v23 = vld [vmem:[%s7173_s27 + $0x754] sm:$0xf0]  ;;  %v6618_v43 = vld [vmem:[%s7173_s27 + $0x744] sm:$0xf0] }
  0x82   : > { %3533 = vmatpush.bf16.msra.mxu3 %v5089_v39  ;;  %v4848_v39 = vld [vmem:[%s7173_s27 + $0x400] sm:$0xf]  ;;  %v7430_v15 = vld [vmem:[#allocation1 + $0x1b] sm:$0xff]  ;;  %v6598_v1 = vld [vmem:[%s7173_s27 + $0x6a4] sm:$0xf0] }
  0x83   : > { %3495 = vmatpush.bf16.msra.mxu0 %v4889_v45  ;;  %v4976_v45 = vld [vmem:[%s7173_s27 + $0x500] sm:$0xf]  ;;  %v4849_v53 = vor.u32 %v6514_v40, %v4848_v39  ;;  %v6636_v26 = vld [vmem:[%s7173_s27 + $0x7d4] sm:$0xf0]  ;;  %v5256_v54 = vld [vmem:[%s7173_s27 + $0x730] sm:$0xf] }
  0x84   : > { %3508 = vmatpush.bf16.msra.mxu1 %v4953_v46  ;;  %v5049_v46 = vor.u32 %v6564_v36, %v5048_v35  ;;  %v5273_v35 = vor.u32 %v6620_v23, %v5272_v22  ;;  %v5136_v36 = vld [vmem:[%s7173_s27 + $0x640] sm:$0xf]  ;;  %v6614_v3 = vld [vmem:[%s7173_s27 + $0x724] sm:$0xf0] }
  0x85   : > { %3521 = vmatpush.bf16.msra.mxu2 %v5017_v47  ;;  %v6546_v47 = vld [vmem:[%s7173_s27 + $0x504] sm:$0xf0]  ;;  %v5200_v39 = vld [vmem:[%s7173_s27 + $0x6c0] sm:$0xf] }
  0x86   : > { %3534 = vmatpush.bf16.msra.mxu3 %v5081_v51  ;;  %v6592_v51 = vld [vmem:[%s7173_s27 + $0x674] sm:$0xf0]  ;;  %v6630_v5 = vld [vmem:[%s7173_s27 + $0x7a4] sm:$0xf0]  ;;  %v5104_v22 = vld [vmem:[%s7173_s27 + $0x600] sm:$0xf] }
  0x87   : > { %3496 = vmatpush.bf16.msra.mxu0 %v4881_v58  ;;  %v4977_v58 = vor.u32 %v6546_v47, %v4976_v45  ;;  %v5161_v62 = vor.u32 %v6592_v51, %v5160_v50  ;;  %v6634_v45 = vld [vmem:[%s7173_s27 + $0x7c4] sm:$0xf0]  ;;  %v6584_v50 = vld [vmem:[%s7173_s27 + $0x634] sm:$0xf0]  ;;  %v5192_v51 = vld [vmem:[%s7173_s27 + $0x6b0] sm:$0xf] }
  0x88   : > { %3509 = vmatpush.bf16.msra.mxu1 %v4945_v59  ;;  %v5352_v59 = vld [vmem:[%s7173_s27 + $0x7f0] sm:$0xf]  ;;  %v5329_v52 = vor.u32 %v6634_v45, %v5328_v44  ;;  %v6578_v23 = vld [vmem:[%s7173_s27 + $0x604] sm:$0xf0]  ;;  %v6672_v45 = vld [vmem:[%s7173_s27 + $0x8f4] sm:$0xf0] }
  0x89   : > { %3522 = vmatpush.bf16.msra.mxu2 %v5009_v60  ;;  %v6640_v60 = vld [vmem:[%s7173_s27 + $0x7f4] sm:$0xf0]  ;;  %v5480_v44 = vld [vmem:[%s7173_s27 + $0x8f0] sm:$0xf] }
  0x8a   : > { %3535 = vmatpush.bf16.msra.mxu3 %v5073_v0  ;;  %v5289_v0 = vor.u32 %v6624_v56, %v5288_v55  ;;  %v5353_v4 = vor.u32 %v6640_v60, %v5352_v59  ;;  %v6616_v55 = vld [vmem:[%s7173_s27 + $0x734] sm:$0xf0]  ;;  %v5320_v56 = vld [vmem:[%s7173_s27 + $0x7b0] sm:$0xf] }
  0x8b   : > { %3497 = vmatpush.bf16.msra.mxu0 %v4873_v6  ;;  %v5280_v6 = vld [vmem:[%s7173_s27 + $0x760] sm:$0xf]  ;;  %v5257_v60 = vor.u32 %v6616_v55, %v5256_v54 }
  0x8c   : > { %3510 = vmatpush.bf16.msra.mxu1 %v4937_v7  ;;  %v6622_v7 = vld [vmem:[%s7173_s27 + $0x764] sm:$0xf0] }
  0x8d   : > { %3523 = vmatpush.bf16.msra.mxu2 %v5001_v8  ;;  %v7421_v8 = vld [vmem:[#allocation1] sm:$0xff]  ;;  %v5281_v17 = vor.u32 %v6622_v7, %v5280_v6  ;;  %v5112_v7 = vld [vmem:[%s7173_s27 + $0x610] sm:$0xf] }
  0x8e   : > { %3536 = vmatpush.bf16.msra.mxu3 %v5065_v12  ;;  %v7427_v12 = vld [vmem:[#allocation1 + $0x9] sm:$0xff] }
  0x8f   : > { %3498 = vmatpush.bf16.msra.mxu0 %v4865_v18  ;;  %v6588_v18 = vld [vmem:[%s7173_s27 + $0x654] sm:$0xf0] }
  0x90   : > { %3511 = vmatpush.bf16.msra.mxu1 %v4929_v19  ;;  %v5208_v19 = vld [vmem:[%s7173_s27 + $0x6d0] sm:$0xf]  ;;  %v5145_v30 = vor.u32 %v6588_v18, %v5144_v14 }
  0x91   : > { %3524 = vmatpush.bf16.msra.mxu2 %v4993_v20  ;;  %v5345_v20 = vor.u32 %v6638_v10, %v5344_v9  ;;  %v5209_v33 = vor.u32 %v6604_v21, %v5208_v19  ;;  %v5249_v10 = vor.u32 %v6614_v3, %v5248_v2  ;;  %v5176_v14 = vld [vmem:[%s7173_s27 + $0x690] sm:$0xf]  ;;  %v6612_v19 = vld [vmem:[%s7173_s27 + $0x714] sm:$0xf0]  ;;  %v6670_v2 = vld [vmem:[%s7173_s27 + $0x8e4] sm:$0xf0] }
  0x92   : > { %3537 = vmatpush.bf16.msra.mxu3 %v5057_v24  ;;  %v5336_v24 = vld [vmem:[%s7173_s27 + $0x7d0] sm:$0xf]  ;;  %v6628_v21 = vld [vmem:[%s7173_s27 + $0x794] sm:$0xf0]  ;;  %v5536_v3 = vld [vmem:[%s7173_s27 + $0x960] sm:$0xf] }
  0x93   : > { %3499 = vmatpush.bf16.msra.mxu0 %v4857_v37  ;;  %v6586_v37 = vld [vmem:[%s7173_s27 + $0x644] sm:$0xf0]  ;;  %v5337_v40 = vor.u32 %v6636_v26, %v5336_v24  ;;  %v5240_v18 = vld [vmem:[%s7173_s27 + $0x710] sm:$0xf]  ;;  %v5168_v26 = vld [vmem:[%s7173_s27 + $0x680] sm:$0xf] }
  0x94   : > { %3512 = vmatpush.bf16.msra.mxu1 %v4921_v41  ;;  %v6602_v41 = vld [vmem:[%s7173_s27 + $0x6c4] sm:$0xf0] }
  0x95   : > { %3525 = vmatpush.bf16.msra.mxu2 %v4985_v42  ;;  %v5264_v42 = vld [vmem:[%s7173_s27 + $0x740] sm:$0xf]  ;;  %v5201_v47 = vor.u32 %v6602_v41, %v5200_v39  ;;  %v5416_v41 = vld [vmem:[%s7173_s27 + $0x870] sm:$0xf] }
  0x96   : > { %3538 = vmatpush.bf16.msra.mxu3 %v5049_v46  ;;  %v5137_v46 = vor.u32 %v6586_v37, %v5136_v36  ;;  %v5265_v48 = vor.u32 %v6618_v43, %v5264_v42  ;;  %v5241_v37 = vor.u32 %v6612_v19, %v5240_v18  ;;  %v5296_v39 = vld [vmem:[%s7173_s27 + $0x780] sm:$0xf]  ;;  %v6656_v42 = vld [vmem:[%s7173_s27 + $0x874] sm:$0xf0]  ;;  %v5528_v19 = vld [vmem:[%s7173_s27 + $0x950] sm:$0xf] }
  0x97   : > { %3500 = vmatpush.bf16.msra.mxu0 %v4849_v53  ;;  %v6600_v53 = vld [vmem:[%s7173_s27 + $0x6b4] sm:$0xf0] }
  0x98   : > { %3513 = vmatpush.bf16.msra.mxu1 %v4913_v57  ;;  %v6632_v57 = vld [vmem:[%s7173_s27 + $0x7b4] sm:$0xf0]  ;;  %v5193_v59 = vor.u32 %v6600_v53, %v5192_v51  ;;  %v5105_v51 = vor.u32 %v6578_v23, %v5104_v22 }
  0x99   : > { %3526 = vmatpush.bf16.msra.mxu2 %v4977_v58  ;;  %v5129_v58 = vor.u32 %v6584_v50, %v5128_v49  ;;  %v7493_v49 = vld [vmem:[#allocation1 + $0x3f] sm:$0xff]  ;;  %v237_v50 = vld [vmem:[%s8364_s0 + $0x10] sm:$0xff] }
  0x9a   : > { %3539 = vmatpush.bf16.msra.mxu3 %v5041_v61  ;;  %3501 = vmatmul.bf16.vlgmr.msra.gmra.mxu0 %v7421_v8  ;;  %v5120_v61 = vld [vmem:[%s7173_s27 + $0x620] sm:$0xf]  ;;  %v6688_v53 = vld [vmem:[%s7173_s27 + $0x974] sm:$0xf0] }
  0x9b   : > { %3545 = vmatpush.bf16.msrb.mxu0 %v5161_v62  ;;  %3514 = vmatmul.bf16.vlgmr.msra.gmra.mxu1 %v7427_v12  ;;  %v6582_v62 = vld [vmem:[%s7173_s27 + $0x624] sm:$0xf0]  ;;  %v6668_v18 = vld [vmem:[%s7173_s27 + $0x8d4] sm:$0xf0] }
  0x9c   : > { %3558 = vmatpush.bf16.msrb.mxu1 %v5225_v63  ;;  %3527 = vmatmul.bf16.vlgmr.msra.gmra.mxu2 %v7425_v11  ;;  %v5184_v63 = vld [vmem:[%s7173_s27 + $0x6a0] sm:$0xf]  ;;  %v5121_v6 = vor.u32 %v6582_v62, %v5120_v61  ;;  %v6700_v22 = vld [vmem:[%s7173_s27 + $0x9d4] sm:$0xf0] }
  0x9d   : > { %3571 = vmatpush.bf16.msrb.mxu2 %v5289_v0  ;;  %3540 = vmatmul.bf16.vlgmr.msra.gmra.mxu3 %v7430_v15  ;;  %v5321_v0 = vor.u32 %v6632_v57, %v5320_v56  ;;  %v5185_v9 = vor.u32 %v6598_v1, %v5184_v63  ;;  %v5608_v56 = vld [vmem:[%s7173_s27 + $0x9f0] sm:$0xf]  ;;  %v6704_v57 = vld [vmem:[%s7173_s27 + $0x9f4] sm:$0xf0]  ;;  %v5408_v62 = vld [vmem:[%s7173_s27 + $0x860] sm:$0xf] }
  0x9e   : > { %3584 = vmatpush.bf16.msrb.mxu3 %v5353_v4  ;;  %v5312_v4 = vld [vmem:[%s7173_s27 + $0x7a0] sm:$0xf]  ;;  %v6654_v63 = vld [vmem:[%s7173_s27 + $0x864] sm:$0xf0]  ;;  %v5609_v1 = vor.u32 %v6704_v57, %v5608_v56  ;;  %v6680_v56 = vld [vmem:[%s7173_s27 + $0x934] sm:$0xf0] }
  0x9f   : > { %3546 = vmatpush.bf16.msrb.mxu0 %v5153_v13  ;;  %v6580_v13 = vld [vmem:[%s7173_s27 + $0x614] sm:$0xf0]  ;;  %v5576_v57 = vld [vmem:[%s7173_s27 + $0x9b0] sm:$0xf] }
  0xa0   : > { %3559 = vmatpush.bf16.msrb.mxu1 %v5217_v16  ;;  %v6596_v16 = vld [vmem:[%s7173_s27 + $0x694] sm:$0xf0]  ;;  %v5113_v24 = vor.u32 %v6580_v13, %v5112_v7  ;;  %v5409_v7 = vor.u32 %v6654_v63, %v5408_v62  ;;  %v5400_v13 = vld [vmem:[%s7173_s27 + $0x850] sm:$0xf]  ;;  %v5376_v62 = vld [vmem:[%s7173_s27 + $0x820] sm:$0xf] }
  0xa1   : > { %3572 = vmatpush.bf16.msrb.mxu2 %v5281_v17  ;;  %v5313_v17 = vor.u32 %v6630_v5, %v5312_v4  ;;  %v5177_v36 = vor.u32 %v6596_v16, %v5176_v14  ;;  %v6686_v4 = vld [vmem:[%s7173_s27 + $0x964] sm:$0xf0]  ;;  %v5600_v5 = vld [vmem:[%s7173_s27 + $0x9e0] sm:$0xf]  ;;  %v6652_v14 = vld [vmem:[%s7173_s27 + $0x854] sm:$0xf0] }
  0xa2   : > { %3585 = vmatpush.bf16.msrb.mxu3 %v5345_v20  ;;  %v5304_v20 = vld [vmem:[%s7173_s27 + $0x790] sm:$0xf]  ;;  %v5401_v23 = vor.u32 %v6652_v14, %v5400_v13  ;;  %v6646_v63 = vld [vmem:[%s7173_s27 + $0x824] sm:$0xf0]  ;;  %v6644_v14 = vld [vmem:[%s7173_s27 + $0x814] sm:$0xf0] }
  0xa3   : > { %3547 = vmatpush.bf16.msrb.mxu0 %v5145_v30  ;;  %v6594_v30 = vld [vmem:[%s7173_s27 + $0x684] sm:$0xf0]  ;;  %v5305_v43 = vor.u32 %v6628_v21, %v5304_v20  ;;  %v5464_v16 = vld [vmem:[%s7173_s27 + $0x8d0] sm:$0xf]  ;;  %v6684_v20 = vld [vmem:[%s7173_s27 + $0x954] sm:$0xf0] }
  0xa4   : > { %3560 = vmatpush.bf16.msrb.mxu1 %v5209_v33  ;;  %v5232_v33 = vld [vmem:[%s7173_s27 + $0x700] sm:$0xf]  ;;  %v5169_v54 = vor.u32 %v6594_v30, %v5168_v26  ;;  %v5592_v21 = vld [vmem:[%s7173_s27 + $0x9d0] sm:$0xf]  ;;  %v5529_v26 = vor.u32 %v6684_v20, %v5528_v19  ;;  %v6676_v20 = vld [vmem:[%s7173_s27 + $0x914] sm:$0xf0] }
  0xa5   : > { %3573 = vmatpush.bf16.msrb.mxu2 %v5273_v35  ;;  %v6610_v35 = vld [vmem:[%s7173_s27 + $0x704] sm:$0xf0]  ;;  %v5392_v30 = vld [vmem:[%s7173_s27 + $0x840] sm:$0xf]  ;;  %v5368_v13 = vld [vmem:[%s7173_s27 + $0x810] sm:$0xf] }
  0xa6   : > { %3586 = vmatpush.bf16.msrb.mxu3 %v5337_v40  ;;  %v6626_v40 = vld [vmem:[%s7173_s27 + $0x784] sm:$0xf0]  ;;  %v5233_v55 = vor.u32 %v6610_v35, %v5232_v33  ;;  %v5456_v35 = vld [vmem:[%s7173_s27 + $0x8c0] sm:$0xf]  ;;  %v5496_v19 = vld [vmem:[%s7173_s27 + $0x910] sm:$0xf] }
  0xa7   : > { %3548 = vmatpush.bf16.msrb.mxu0 %v5137_v46  ;;  %v7487_v46 = vld [vmem:[#allocation1 + $0x24] sm:$0xff]  ;;  %v6650_v33 = vld [vmem:[%s7173_s27 + $0x844] sm:$0xf0] }
  0xa8   : > { %3561 = vmatpush.bf16.msrb.mxu1 %v5201_v47  ;;  %v7489_v47 = vld [vmem:[#allocation1 + $0x36] sm:$0xff] }
  0xa9   : > { %3574 = vmatpush.bf16.msrb.mxu2 %v5265_v48  ;;  %v7491_v48 = vld [vmem:[#allocation1 + $0x2d] sm:$0xff] }
  0xaa   : > { %3587 = vmatpush.bf16.msrb.mxu3 %v5329_v52  ;;  %v5544_v52 = vld [vmem:[%s7173_s27 + $0x970] sm:$0xf]  ;;  %778 = vst [vmem:[#allocation1] ss:$9 sm:$0xff] %v237_v50 }
  0xab   : > { %3549 = vmatpush.bf16.msrb.mxu0 %v5129_v58  ;;  %v5297_v58 = vor.u32 %v6626_v40, %v5296_v39  ;;  %v5545_v61 = vor.u32 %v6688_v53, %v5544_v52  ;;  %v5520_v39 = vld [vmem:[%s7173_s27 + $0x940] sm:$0xf]  ;;  %v6682_v40 = vld [vmem:[%s7173_s27 + $0x944] sm:$0xf0]  ;;  %v5384_v50 = vld [vmem:[%s7173_s27 + $0x830] sm:$0xf] }
  0xac   : > { %3562 = vmatpush.bf16.msrb.mxu1 %v5193_v59  ;;  %v5417_v59 = vor.u32 %v6656_v42, %v5416_v41  ;;  %v5584_v41 = vld [vmem:[%s7173_s27 + $0x9c0] sm:$0xf]  ;;  %v6698_v42 = vld [vmem:[%s7173_s27 + $0x9c4] sm:$0xf0]  ;;  %v5448_v52 = vld [vmem:[%s7173_s27 + $0x8b0] sm:$0xf] }
  0xad   : > { %3575 = vmatpush.bf16.msrb.mxu2 %v5257_v60  ;;  %v5481_v60 = vor.u32 %v6672_v45, %v5480_v44  ;;  %v5521_v45 = vor.u32 %v6682_v40, %v5520_v39  ;;  %v5585_v53 = vor.u32 %v6698_v42, %v5584_v41  ;;  %v6674_v40 = vld [vmem:[%s7173_s27 + $0x904] sm:$0xf0]  ;;  %v5552_v41 = vld [vmem:[%s7173_s27 + $0x980] sm:$0xf] }
  0xae   : > { %3588 = vmatpush.bf16.msrb.mxu3 %v5321_v0  ;;  %v5472_v0 = vld [vmem:[%s7173_s27 + $0x8e0] sm:$0xf]  ;;  %v6690_v42 = vld [vmem:[%s7173_s27 + $0x984] sm:$0xf0] }
  0xaf   : > { %3550 = vmatpush.bf16.msrb.mxu0 %v5121_v6  ;;  %v6702_v6 = vld [vmem:[%s7173_s27 + $0x9e4] sm:$0xf0] }
  0xb0   : > { %3563 = vmatpush.bf16.msrb.mxu1 %v5185_v9  ;;  %v5473_v9 = vor.u32 %v6670_v2, %v5472_v0  ;;  %v5440_v0 = vld [vmem:[%s7173_s27 + $0x8a0] sm:$0xf]  ;;  %v6662_v2 = vld [vmem:[%s7173_s27 + $0x8a4] sm:$0xf0] }
  0xb1   : > { %3576 = vmatpush.bf16.msrb.mxu2 %v5249_v10  ;;  %v5537_v10 = vor.u32 %v6686_v4, %v5536_v3  ;;  %v5504_v3 = vld [vmem:[%s7173_s27 + $0x920] sm:$0xf]  ;;  %v6678_v4 = vld [vmem:[%s7173_s27 + $0x924] sm:$0xf0] }
  0xb2   : > { %3589 = vmatpush.bf16.msrb.mxu3 %v5313_v17  ;;  %v5601_v17 = vor.u32 %v6702_v6, %v5600_v5  ;;  %v5568_v5 = vld [vmem:[%s7173_s27 + $0x9a0] sm:$0xf]  ;;  %v6694_v6 = vld [vmem:[%s7173_s27 + $0x9a4] sm:$0xf0] }
  0xb3   : > { %3551 = vmatpush.bf16.msrb.mxu0 %v5113_v24  ;;  %v5465_v24 = vor.u32 %v6668_v18, %v5464_v16  ;;  %v5432_v16 = vld [vmem:[%s7173_s27 + $0x890] sm:$0xf]  ;;  %v6660_v18 = vld [vmem:[%s7173_s27 + $0x894] sm:$0xf0] }
  0xb4   : > { %3564 = vmatpush.bf16.msrb.mxu1 %v5177_v36  ;;  %v5593_v36 = vor.u32 %v6700_v22, %v5592_v21  ;;  %v5560_v21 = vld [vmem:[%s7173_s27 + $0x990] sm:$0xf]  ;;  %v6692_v22 = vld [vmem:[%s7173_s27 + $0x994] sm:$0xf0] }
  0xb5   : > { %3577 = vmatpush.bf16.msrb.mxu2 %v5241_v37  ;;  %v6666_v37 = vld [vmem:[%s7173_s27 + $0x8c4] sm:$0xf0]  ;;  %v5561_v39 = vor.u32 %v6692_v22, %v5560_v21  ;;  %v6732_v22 = vld [vmem:[%s7173_s27 + $0xad4] sm:$0xf0] }
  0xb6   : > { %3590 = vmatpush.bf16.msrb.mxu3 %v5305_v43  ;;  %v5393_v43 = vor.u32 %v6650_v33, %v5392_v30  ;;  %v5457_v44 = vor.u32 %v6666_v37, %v5456_v35  ;;  %v5433_v30 = vor.u32 %v6660_v18, %v5432_v16  ;;  %v5497_v33 = vor.u32 %v6676_v20, %v5496_v19  ;;  %v5424_v35 = vld [vmem:[%s7173_s27 + $0x880] sm:$0xf]  ;;  %v5656_v18 = vld [vmem:[%s7173_s27 + $0xa50] sm:$0xf]  ;;  %v6716_v19 = vld [vmem:[%s7173_s27 + $0xa54] sm:$0xf0] }
  0xb7   : > { %3552 = vmatpush.bf16.msrb.mxu0 %v5105_v51  ;;  %v6648_v51 = vld [vmem:[%s7173_s27 + $0x834] sm:$0xf0]  ;;  %v5488_v37 = vld [vmem:[%s7173_s27 + $0x900] sm:$0xf]  ;;  %v5720_v20 = vld [vmem:[%s7173_s27 + $0xad0] sm:$0xf] }
  0xb8   : > { %3565 = vmatpush.bf16.msrb.mxu1 %v5169_v54  ;;  %v6664_v54 = vld [vmem:[%s7173_s27 + $0x8b4] sm:$0xf0] }
  0xb9   : > { %3578 = vmatpush.bf16.msrb.mxu2 %v5233_v55  ;;  %v5512_v55 = vld [vmem:[%s7173_s27 + $0x930] sm:$0xf] }
  0xba   : > { %3591 = vmatpush.bf16.msrb.mxu3 %v5297_v58  ;;  %3553 = vmatmul.bf16.vlgmr.msrb.gmra.mxu0 %v7487_v46  ;;  %v6696_v58 = vld [vmem:[%s7173_s27 + $0x9b4] sm:$0xf0] }
  0xbb   : > { %3597 = vmatpush.bf16.msra.mxu0 %v5417_v59  ;;  %3566 = vmatmul.bf16.vlgmr.msrb.gmra.mxu1 %v7491_v48  ;;  %v5385_v59 = vor.u32 %v6648_v51, %v5384_v50  ;;  %v6736_v51 = vld [vmem:[%s7173_s27 + $0xaf4] sm:$0xf0] }
  0xbc   : > { %3610 = vmatpush.bf16.msra.mxu1 %v5481_v60  ;;  %3579 = vmatmul.bf16.vlgmr.msrb.gmra.mxu2 %v7489_v47  ;;  %v5449_v60 = vor.u32 %v6664_v54, %v5448_v52  ;;  %v5800_v52 = vld [vmem:[%s7173_s27 + $0xb70] sm:$0xf] }
  0xbd   : > { %3623 = vmatpush.bf16.msra.mxu2 %v5545_v61  ;;  %3592 = vmatmul.bf16.vlgmr.msrb.gmra.mxu3 %v7493_v49  ;;  %v5513_v61 = vor.u32 %v6680_v56, %v5512_v55  ;;  %v5489_v55 = vor.u32 %v6674_v40, %v5488_v37  ;;  %v5864_v56 = vld [vmem:[%s7173_s27 + $0xbf0] sm:$0xf]  ;;  %v5648_v37 = vld [vmem:[%s7173_s27 + $0xa40] sm:$0xf] }
  0xbe   : > { %3636 = vmatpush.bf16.msra.mxu3 %v5609_v1  ;;  %v5577_v1 = vor.u32 %v6696_v58, %v5576_v57  ;;  %v6768_v57 = vld [vmem:[%s7173_s27 + $0xbf4] sm:$0xf0]  ;;  %v5553_v58 = vor.u32 %v6690_v42, %v5552_v41  ;;  %v5712_v40 = vld [vmem:[%s7173_s27 + $0xac0] sm:$0xf]  ;;  %v6730_v42 = vld [vmem:[%s7173_s27 + $0xac4] sm:$0xf0] }
  0xbf   : > { %3598 = vmatpush.bf16.msra.mxu0 %v5409_v7  ;;  %v5377_v7 = vor.u32 %v6646_v63, %v5376_v62  ;;  %v5664_v62 = vld [vmem:[%s7173_s27 + $0xa60] sm:$0xf]  ;;  %v6718_v63 = vld [vmem:[%s7173_s27 + $0xa64] sm:$0xf0] }
  0xc0   : > { %3611 = vmatpush.bf16.msra.mxu1 %v5473_v9  ;;  %v5441_v9 = vor.u32 %v6662_v2, %v5440_v0  ;;  %v5728_v0 = vld [vmem:[%s7173_s27 + $0xae0] sm:$0xf]  ;;  %v6734_v2 = vld [vmem:[%s7173_s27 + $0xae4] sm:$0xf0] }
  0xc1   : > { %3624 = vmatpush.bf16.msra.mxu2 %v5537_v10  ;;  %v5505_v10 = vor.u32 %v6678_v4, %v5504_v3  ;;  %v5792_v3 = vld [vmem:[%s7173_s27 + $0xb60] sm:$0xf]  ;;  %v6750_v4 = vld [vmem:[%s7173_s27 + $0xb64] sm:$0xf0]  ;;  %v5729_v16 = vor.u32 %v6734_v2, %v5728_v0 }
  0xc2   : > { %3637 = vmatpush.bf16.msra.mxu3 %v5601_v17  ;;  %v5569_v17 = vor.u32 %v6694_v6, %v5568_v5  ;;  %v7576_v5 = vld [vmem:[#allocation1] sm:$0xff]  ;;  %v5856_v6 = vld [vmem:[%s7173_s27 + $0xbe0] sm:$0xf] }
  0xc3   : > { %3599 = vmatpush.bf16.msra.mxu0 %v5401_v23  ;;  %v5369_v23 = vor.u32 %v6644_v14, %v5368_v13  ;;  %v7584_v13 = vld [vmem:[#allocation1 + $0x1b] sm:$0xff]  ;;  %v5665_v14 = vor.u32 %v6718_v63, %v5664_v62  ;;  %v5632_v0 = vld [vmem:[%s7173_s27 + $0xa20] sm:$0xf] }
  0xc4   : > { %3612 = vmatpush.bf16.msra.mxu1 %v5465_v24  ;;  %v5360_v24 = vld [vmem:[%s7173_s27 + $0x800] sm:$0xf]  ;;  %v6760_v62 = vld [vmem:[%s7173_s27 + $0xbb4] sm:$0xf0] }
  0xc5   : > { %3625 = vmatpush.bf16.msra.mxu2 %v5529_v26  ;;  %v6642_v26 = vld [vmem:[%s7173_s27 + $0x804] sm:$0xf0] }
  0xc6   : > { %3638 = vmatpush.bf16.msra.mxu3 %v5593_v36  ;;  %v6658_v36 = vld [vmem:[%s7173_s27 + $0x884] sm:$0xf0]  ;;  %v5361_v50 = vor.u32 %v6642_v26, %v5360_v24  ;;  %v6748_v24 = vld [vmem:[%s7173_s27 + $0xb54] sm:$0xf0]  ;;  %v5848_v26 = vld [vmem:[%s7173_s27 + $0xbd0] sm:$0xf] }
  0xc7   : > { %3600 = vmatpush.bf16.msra.mxu0 %v5393_v43  ;;  %v5672_v43 = vld [vmem:[%s7173_s27 + $0xa70] sm:$0xf]  ;;  %v5425_v54 = vor.u32 %v6658_v36, %v5424_v35  ;;  %v5721_v35 = vor.u32 %v6732_v22, %v5720_v20  ;;  %v6708_v22 = vld [vmem:[%s7173_s27 + $0xa14] sm:$0xf0] }
  0xc8   : > { %3613 = vmatpush.bf16.msra.mxu1 %v5457_v44  ;;  %v6720_v44 = vld [vmem:[%s7173_s27 + $0xa74] sm:$0xf0] }
  0xc9   : > { %3626 = vmatpush.bf16.msra.mxu2 %v5521_v45  ;;  %v5736_v45 = vld [vmem:[%s7173_s27 + $0xaf0] sm:$0xf] }
  0xca   : > { %3639 = vmatpush.bf16.msra.mxu3 %v5585_v53  ;;  %v6752_v53 = vld [vmem:[%s7173_s27 + $0xb74] sm:$0xf0] }
  0xcb   : > { %3601 = vmatpush.bf16.msra.mxu0 %v5385_v59  ;;  %v5673_v59 = vor.u32 %v6720_v44, %v5672_v43  ;;  %v5776_v43 = vld [vmem:[%s7173_s27 + $0xb40] sm:$0xf]  ;;  %v6746_v44 = vld [vmem:[%s7173_s27 + $0xb44] sm:$0xf0] }
  0xcc   : > { %3614 = vmatpush.bf16.msra.mxu1 %v5449_v60  ;;  %v5737_v60 = vor.u32 %v6736_v51, %v5736_v45  ;;  %v5840_v45 = vld [vmem:[%s7173_s27 + $0xbc0] sm:$0xf] }
  0xcd   : > { %3627 = vmatpush.bf16.msra.mxu2 %v5513_v61  ;;  %v5801_v61 = vor.u32 %v6752_v53, %v5800_v52  ;;  %v5713_v52 = vor.u32 %v6730_v42, %v5712_v40  ;;  %v5777_v53 = vor.u32 %v6746_v44, %v5776_v43  ;;  %v6756_v40 = vld [vmem:[%s7173_s27 + $0xb94] sm:$0xf0]  ;;  %v6706_v42 = vld [vmem:[%s7173_s27 + $0xa04] sm:$0xf0]  ;;  %v5680_v44 = vld [vmem:[%s7173_s27 + $0xa80] sm:$0xf] }
  0xce   : > { %3640 = vmatpush.bf16.msra.mxu3 %v5577_v1  ;;  %v5865_v1 = vor.u32 %v6768_v57, %v5864_v56  ;;  %v5704_v56 = vld [vmem:[%s7173_s27 + $0xab0] sm:$0xf] }
  0xcf   : > { %3602 = vmatpush.bf16.msra.mxu0 %v5377_v7  ;;  %v6766_v7 = vld [vmem:[%s7173_s27 + $0xbe4] sm:$0xf0] }
  0xd0   : > { %3615 = vmatpush.bf16.msra.mxu1 %v5441_v9  ;;  %v7580_v9 = vld [vmem:[#allocation1 + $0x12] sm:$0xff]  ;;  %v5857_v21 = vor.u32 %v6766_v7, %v5856_v6 }
  0xd1   : > { %3628 = vmatpush.bf16.msra.mxu2 %v5505_v10  ;;  %v7582_v10 = vld [vmem:[#allocation1 + $0x9] sm:$0xff] }
  0xd2   : > { %3641 = vmatpush.bf16.msra.mxu3 %v5569_v17  ;;  %v5793_v17 = vor.u32 %v6750_v4, %v5792_v3  ;;  %v6710_v3 = vld [vmem:[%s7173_s27 + $0xa24] sm:$0xf0]  ;;  %v5696_v4 = vld [vmem:[%s7173_s27 + $0xaa0] sm:$0xf] }
  0xd3   : > { %3603 = vmatpush.bf16.msra.mxu0 %v5369_v23  ;;  %v5784_v23 = vld [vmem:[%s7173_s27 + $0xb50] sm:$0xf]  ;;  %v6726_v6 = vld [vmem:[%s7173_s27 + $0xaa4] sm:$0xf0]  ;;  %v5633_v20 = vor.u32 %v6710_v3, %v5632_v0  ;;  %v7643_v0 = vld [vmem:[#allocation1 + $0x24] sm:$0xff] }
  0xd4   : > { %3616 = vmatpush.bf16.msra.mxu1 %v5433_v30  ;;  %v6764_v30 = vld [vmem:[%s7173_s27 + $0xbd4] sm:$0xf0]  ;;  %v5785_v36 = vor.u32 %v6748_v24, %v5784_v23  ;;  %v5697_v23 = vor.u32 %v6726_v6, %v5696_v4  ;;  %v238_v6 = vld [vmem:[%s8364_s0 + $0x18] sm:$0xff] }
  0xd5   : > { %3629 = vmatpush.bf16.msra.mxu2 %v5497_v33  ;;  %v5657_v33 = vor.u32 %v6716_v19, %v5656_v18  ;;  %v5849_v41 = vor.u32 %v6764_v30, %v5848_v26  ;;  %v5824_v18 = vld [vmem:[%s7173_s27 + $0xba0] sm:$0xf]  ;;  %v6758_v19 = vld [vmem:[%s7173_s27 + $0xba4] sm:$0xf0]  ;;  %v5688_v26 = vld [vmem:[%s7173_s27 + $0xa90] sm:$0xf] }
  0xd6   : > { %3642 = vmatpush.bf16.msra.mxu3 %v5561_v39  ;;  %v6714_v39 = vld [vmem:[%s7173_s27 + $0xa44] sm:$0xf0]  ;;  %v6724_v30 = vld [vmem:[%s7173_s27 + $0xa94] sm:$0xf0] }
  0xd7   : > { %3604 = vmatpush.bf16.msra.mxu0 %v5361_v50  ;;  %v6762_v50 = vld [vmem:[%s7173_s27 + $0xbc4] sm:$0xf0]  ;;  %v5649_v51 = vor.u32 %v6714_v39, %v5648_v37  ;;  %v6740_v37 = vld [vmem:[%s7173_s27 + $0xb14] sm:$0xf0]  ;;  %v5816_v39 = vld [vmem:[%s7173_s27 + $0xb90] sm:$0xf] }
  0xd8   : > { %3617 = vmatpush.bf16.msra.mxu1 %v5425_v54  ;;  %v5640_v54 = vld [vmem:[%s7173_s27 + $0xa30] sm:$0xf]  ;;  %v5841_v57 = vor.u32 %v6762_v50, %v5840_v45  ;;  %v6722_v45 = vld [vmem:[%s7173_s27 + $0xa84] sm:$0xf0]  ;;  %v5744_v50 = vld [vmem:[%s7173_s27 + $0xb00] sm:$0xf] }
  0xd9   : > { %3630 = vmatpush.bf16.msra.mxu2 %v5489_v55  ;;  %v6712_v55 = vld [vmem:[%s7173_s27 + $0xa34] sm:$0xf0] }
  0xda   : > { %3643 = vmatpush.bf16.msra.mxu3 %v5553_v58  ;;  %3605 = vmatmul.bf16.vlgmr.msra.gmra.mxu0 %v7576_v5  ;;  %v6728_v58 = vld [vmem:[%s7173_s27 + $0xab4] sm:$0xf0]  ;;  %v5641_v63 = vor.u32 %v6712_v55, %v5640_v54  ;;  %v5808_v55 = vld [vmem:[%s7173_s27 + $0xb80] sm:$0xf] }
  0xdb   : > { %3649 = vmatpush.bf16.msrb.mxu0 %v5673_v59  ;;  %3618 = vmatmul.bf16.vlgmr.msra.gmra.mxu1 %v7582_v10  ;;  %v5768_v59 = vld [vmem:[%s7173_s27 + $0xb30] sm:$0xf]  ;;  %v7649_v3 = vld [vmem:[#allocation1 + $0x3f] sm:$0xff] }
  0xdc   : > { %3662 = vmatpush.bf16.msrb.mxu1 %v5737_v60  ;;  %3631 = vmatmul.bf16.vlgmr.msra.gmra.mxu2 %v7580_v9  ;;  %v6744_v60 = vld [vmem:[%s7173_s27 + $0xb34] sm:$0xf0] }
  0xdd   : > { %3675 = vmatpush.bf16.msrb.mxu2 %v5801_v61  ;;  %3644 = vmatmul.bf16.vlgmr.msra.gmra.mxu3 %v7584_v13  ;;  %v5832_v61 = vld [vmem:[%s7173_s27 + $0xbb0] sm:$0xf]  ;;  %v5769_v2 = vor.u32 %v6744_v60, %v5768_v59 }
  0xde   : > { %3688 = vmatpush.bf16.msrb.mxu3 %v5865_v1  ;;  %v5705_v1 = vor.u32 %v6728_v58, %v5704_v56  ;;  %v5833_v7 = vor.u32 %v6760_v62, %v5832_v61  ;;  %v6754_v56 = vld [vmem:[%s7173_s27 + $0xb84] sm:$0xf0]  ;;  %v6784_v58 = vld [vmem:[%s7173_s27 + $0xc74] sm:$0xf0]  ;;  %v5817_v61 = vor.u32 %v6756_v40, %v5816_v39  ;;  %v5992_v62 = vld [vmem:[%s7173_s27 + $0xcf0] sm:$0xf] }
  0xdf   : > { %3650 = vmatpush.bf16.msrb.mxu0 %v5665_v14  ;;  %v5760_v14 = vld [vmem:[%s7173_s27 + $0xb20] sm:$0xf]  ;;  %v3411_v60 = vpop.f32.mrf.mxu1  ;;  %v6798_v40 = vld [vmem:[%s7173_s27 + $0xce4] sm:$0xf0] }
  0xe0   : > { %3663 = vmatpush.bf16.msrb.mxu1 %v5729_v16  ;;  %v6742_v16 = vld [vmem:[%s7173_s27 + $0xb24] sm:$0xf0] }
  0xe1   : > { %3676 = vmatpush.bf16.msrb.mxu2 %v5793_v17  ;;  %v751_v17 = vld [vmem:[%s7179_s5] sm:$0x3]  ;;  %v5761_v24 = vor.u32 %v6742_v16, %v5760_v14  ;;  %v6056_v14 = vld [vmem:[%s7173_s27 + $0xd70] sm:$0xf]  ;;  %v6816_v16 = vld [vmem:[%s7173_s27 + $0xd74] sm:$0xf0] }
  0xe2   : > { %3689 = vmatpush.bf16.msrb.mxu3 %v5857_v21  ;;  %v5624_v21 = vld [vmem:[%s7173_s27 + $0xa10] sm:$0xf] }
  0xe3   : > { %3651 = vmatpush.bf16.msrb.mxu0 %v5657_v33  ;;  %v753_v33 = vperm.slane %v751_v17, 0  ;;  %v5625_v43 = vor.u32 %v6708_v22, %v5624_v21  ;;  %v5681_v17 = vor.u32 %v6722_v45, %v5680_v44  ;;  %v3424_v21 = vpop.f32.mrf.mxu2  ;;  %v5809_v22 = vor.u32 %v6754_v56, %v5808_v55  ;;  %v6112_v45 = vld [vmem:[%s7173_s27 + $0xde0] sm:$0xf]  ;;  %v5912_v55 = vld [vmem:[%s7173_s27 + $0xc50] sm:$0xf] }
  0xe4   : > { %3664 = vmatpush.bf16.msrb.mxu1 %v5721_v35  ;;  %v5825_v35 = vor.u32 %v6758_v19, %v5824_v18  ;;  %v6120_v19 = vld [vmem:[%s7173_s27 + $0xdf0] sm:$0xf]  ;;  %v6780_v56 = vld [vmem:[%s7173_s27 + $0xc54] sm:$0xf0] }
  0xe5   : > { %3677 = vmatpush.bf16.msrb.mxu2 %v5785_v36  ;;  %v5752_v36 = vld [vmem:[%s7173_s27 + $0xb10] sm:$0xf] }
  0xe6   : > { %3690 = vmatpush.bf16.msrb.mxu3 %v5849_v41  ;;  %v5616_v41 = vld [vmem:[%s7173_s27 + $0xa00] sm:$0xf]  ;;  %v5753_v54 = vor.u32 %v6740_v37, %v5752_v36  ;;  %v6782_v36 = vld [vmem:[%s7173_s27 + $0xc64] sm:$0xf0] }
  0xe7   : > { %3652 = vmatpush.bf16.msrb.mxu0 %v5649_v51  ;;  %v6738_v51 = vld [vmem:[%s7173_s27 + $0xb04] sm:$0xf0]  ;;  %v5984_v37 = vld [vmem:[%s7173_s27 + $0xce0] sm:$0xf] }
  0xe8   : > { %3665 = vmatpush.bf16.msrb.mxu1 %v5713_v52  ;;  %v3398_v52 = vpop.f32.mrf.mxu0  ;;  %v5745_v18 = vor.u32 %v6738_v51, %v5744_v50  ;;  %v6830_v50 = vld [vmem:[%s7173_s27 + $0xde4] sm:$0xf0]  ;;  %v3413_v51 = vpop.f32.mrf.mxu1 }
  0xe9   : > { %3678 = vmatpush.bf16.msrb.mxu2 %v5777_v53  ;;  %v5689_v53 = vor.u32 %v6724_v30, %v5688_v26  ;;  %v3399_v59 = vadd.f32 %v3398_v52, %v753_v33  ;;  %v3437_v26 = vpop.f32.mrf.mxu3  ;;  %v6057_v33 = vor.u32 %v6816_v16, %v6056_v14  ;;  %v6808_v51 = vld [vmem:[%s7173_s27 + $0xd34] sm:$0xf0] }
  0xea   : > { %3691 = vmatpush.bf16.msrb.mxu3 %v5841_v57  ;;  %v5928_v57 = vld [vmem:[%s7173_s27 + $0xc70] sm:$0xf] }
  0xeb   : > { %3653 = vmatpush.bf16.msrb.mxu0 %v5641_v63  ;;  %v6800_v63 = vld [vmem:[%s7173_s27 + $0xcf4] sm:$0xf0]  ;;  %v3412_v4 = vadd.f32 %v3411_v60, %v3399_v59  ;;  %v6040_v60 = vld [vmem:[%s7173_s27 + $0xd50] sm:$0xf] }
  0xec   : > { %3666 = vmatpush.bf16.msrb.mxu1 %v5705_v1  ;;  %v7645_v1 = vld [vmem:[#allocation1 + $0x36] sm:$0xff]  ;;  %v5993_v30 = vor.u32 %v6800_v63, %v5992_v62  ;;  %v6796_v59 = vld [vmem:[%s7173_s27 + $0xcd4] sm:$0xf0] }
  0xed   : > { %3679 = vmatpush.bf16.msrb.mxu2 %v5769_v2  ;;  %v7647_v2 = vld [vmem:[#allocation1 + $0x2d] sm:$0xff]  ;;  %v6104_v62 = vld [vmem:[%s7173_s27 + $0xdd0] sm:$0xf]  ;;  %v6828_v63 = vld [vmem:[%s7173_s27 + $0xdd4] sm:$0xf0] }
  0xee   : > { %3692 = vmatpush.bf16.msrb.mxu3 %v5833_v7  ;;  %v5617_v7 = vor.u32 %v6706_v42, %v5616_v41  ;;  %788 = vst [vmem:[#allocation1] ss:$9 sm:$0xff] %v238_v6  ;;  %v6048_v41 = vld [vmem:[%s7173_s27 + $0xd60] sm:$0xf]  ;;  %v6814_v42 = vld [vmem:[%s7173_s27 + $0xd64] sm:$0xf0]  ;;  %v5913_v6 = vor.u32 %v6780_v56, %v5912_v55 }
  0xef   : > { %3654 = vmatpush.bf16.msrb.mxu0 %v5633_v20  ;;  %v6832_v20 = vld [vmem:[%s7173_s27 + $0xdf4] sm:$0xf0] }
  0xf0   : > { %3667 = vmatpush.bf16.msrb.mxu1 %v5697_v23  ;;  %v5929_v23 = vor.u32 %v6784_v58, %v5928_v57  ;;  %v6121_v39 = vor.u32 %v6832_v20, %v6120_v19  ;;  %v3400_v44 = vpop.f32.mrf.mxu0  ;;  %v5976_v57 = vld [vmem:[%s7173_s27 + $0xcd0] sm:$0xf]  ;;  %v6113_v58 = vor.u32 %v6830_v50, %v6112_v45  ;;  %v5968_v19 = vld [vmem:[%s7173_s27 + $0xcc0] sm:$0xf]  ;;  %v6105_v20 = vor.u32 %v6828_v63, %v6104_v62  ;;  %v6792_v45 = vld [vmem:[%s7173_s27 + $0xcb4] sm:$0xf0] }
  0xf1   : > { %3680 = vmatpush.bf16.msrb.mxu2 %v5761_v24  ;;  %v3425_v24 = vadd.f32 %v3424_v21, %v3412_v4  ;;  %v3426_v4 = vpop.f32.mrf.mxu2  ;;  %v5977_v14 = vor.u32 %v6796_v59, %v5976_v57  ;;  %v6794_v21 = vld [vmem:[%s7173_s27 + $0xcc4] sm:$0xf0]  ;;  %v6024_v50 = vld [vmem:[%s7173_s27 + $0xd30] sm:$0xf]  ;;  %v5888_v57 = vld [vmem:[%s7173_s27 + $0xc20] sm:$0xf] }
  0xf2   : > { %3693 = vmatpush.bf16.msrb.mxu3 %v5825_v35  ;;  %v5920_v35 = vld [vmem:[%s7173_s27 + $0xc60] sm:$0xf]  ;;  %v6025_v56 = vor.u32 %v6808_v51, %v6024_v50  ;;  %v6790_v62 = vld [vmem:[%s7173_s27 + $0xca4] sm:$0xf0] }
  0xf3   : > { %3655 = vmatpush.bf16.msrb.mxu0 %v5625_v43  ;;  %v3438_v43 = vadd.f32 %v3437_v26, %v3425_v24  ;;  %v5921_v52 = vor.u32 %v6782_v36, %v5920_v35  ;;  %v6096_v24 = vld [vmem:[%s7173_s27 + $0xdc0] sm:$0xf]  ;;  %v6826_v26 = vld [vmem:[%s7173_s27 + $0xdc4] sm:$0xf0]  ;;  %v5969_v35 = vor.u32 %v6794_v21, %v5968_v19 }
  0xf4   : > { %3668 = vmatpush.bf16.msrb.mxu1 %v5689_v53  ;;  %v5985_v53 = vor.u32 %v6798_v40, %v5984_v37  ;;  %v5896_v37 = vld [vmem:[%s7173_s27 + $0xc30] sm:$0xf]  ;;  %v6097_v44 = vor.u32 %v6826_v26, %v6096_v24  ;;  %v5952_v59 = vld [vmem:[%s7173_s27 + $0xca0] sm:$0xf]  ;;  %v6806_v4 = vld [vmem:[%s7173_s27 + $0xd24] sm:$0xf0] }
  0xf5   : > { %3681 = vmatpush.bf16.msrb.mxu2 %v5753_v54  ;;  %v6049_v54 = vor.u32 %v6814_v42, %v6048_v41  ;;  %v5960_v40 = vld [vmem:[%s7173_s27 + $0xcb0] sm:$0xf]  ;;  %v6016_v63 = vld [vmem:[%s7173_s27 + $0xd20] sm:$0xf]  ;;  %v6786_v51 = vld [vmem:[%s7173_s27 + $0xc84] sm:$0xf0] }
  0xf6   : > { %3694 = vmatpush.bf16.msrb.mxu3 %v5817_v61  ;;  %v6812_v61 = vld [vmem:[%s7173_s27 + $0xd54] sm:$0xf0]  ;;  %v6017_v21 = vor.u32 %v6806_v4, %v6016_v63  ;;  %v5944_v24 = vld [vmem:[%s7173_s27 + $0xc90] sm:$0xf]  ;;  %v5936_v50 = vld [vmem:[%s7173_s27 + $0xc80] sm:$0xf] }
  0xf7   : > { %3656 = vmatpush.bf16.msrb.mxu0 %v5617_v7  ;;  %v3439_v7 = vpop.f32.mrf.mxu3  ;;  %v6041_v16 = vor.u32 %v6812_v61, %v6040_v60  ;;  %v6312_v63 = vld [vmem:[%s7173_s27 + $0xf70] sm:$0xf]  ;;  %v6880_v4 = vld [vmem:[%s7173_s27 + $0xf74] sm:$0xf0] }
  0xf8   : > { %3669 = vmatpush.bf16.msrb.mxu1 %v5681_v17  ;;  %v5904_v17 = vld [vmem:[%s7173_s27 + $0xc40] sm:$0xf]  ;;  %v3463_v42 = vpop.f32.mrf.mxu1 }
  0xf9   : > { %3682 = vmatpush.bf16.msrb.mxu2 %v5745_v18  ;;  %v6778_v18 = vld [vmem:[%s7173_s27 + $0xc44] sm:$0xf0] }
  0xfa   : > { %3695 = vmatpush.bf16.msrb.mxu3 %v5809_v22  ;;  %3657 = vmatmul.bf16.vlgmr.msrb.gmra.mxu0 %v7643_v0  ;;  %v6032_v22 = vld [vmem:[%s7173_s27 + $0xd40] sm:$0xf] }
  0xfb   : > { %3701 = vmatpush.bf16.msra.mxu0 %v5929_v23  ;;  %3670 = vmatmul.bf16.vlgmr.msrb.gmra.mxu1 %v7647_v2  ;;  %v6810_v23 = vld [vmem:[%s7173_s27 + $0xd44] sm:$0xf0] }
  0xfc   : > { %3714 = vmatpush.bf16.msra.mxu1 %v5993_v30  ;;  %3683 = vmatmul.bf16.vlgmr.msrb.gmra.mxu2 %v7645_v1  ;;  %v5905_v30 = vor.u32 %v6778_v18, %v5904_v17  ;;  %v6033_v36 = vor.u32 %v6810_v23, %v6032_v22  ;;  %v5880_v22 = vld [vmem:[%s7173_s27 + $0xc10] sm:$0xf]  ;;  %v6772_v23 = vld [vmem:[%s7173_s27 + $0xc14] sm:$0xf0] }
  0xfd   : > { %3727 = vmatpush.bf16.msra.mxu2 %v6057_v33  ;;  %3696 = vmatmul.bf16.vlgmr.msrb.gmra.mxu3 %v7649_v3  ;;  %v3450_v33 = vpop.f32.mrf.mxu0 }
  0xfe   : > { %3740 = vmatpush.bf16.msra.mxu3 %v6121_v39  ;;  %v6776_v39 = vld [vmem:[%s7173_s27 + $0xc34] sm:$0xf0]  ;;  %v3451_v41 = vadd.f32 %v3450_v33, %v3438_v43  ;;  %v5961_v43 = vor.u32 %v6792_v45, %v5960_v40  ;;  %v5881_v40 = vor.u32 %v6772_v23, %v5880_v22  ;;  %v6176_v22 = vld [vmem:[%s7173_s27 + $0xe60] sm:$0xf]  ;;  %v6846_v23 = vld [vmem:[%s7173_s27 + $0xe64] sm:$0xf0] }
  0xff   : > { %3702 = vmatpush.bf16.msra.mxu0 %v5921_v52  ;;  %v6088_v52 = vld [vmem:[%s7173_s27 + $0xdb0] sm:$0xf]  ;;  %v5897_v55 = vor.u32 %v6776_v39, %v5896_v37  ;;  %v3476_v60 = vpop.f32.mrf.mxu2  ;;  %v6788_v33 = vld [vmem:[%s7173_s27 + $0xc94] sm:$0xf0] }
 0x100   : > { %3715 = vmatpush.bf16.msra.mxu1 %v5985_v53  ;;  %v6824_v53 = vld [vmem:[%s7173_s27 + $0xdb4] sm:$0xf0]  ;;  %v3489_v7 = vpop.f32.mrf.mxu3  ;;  %v3465_v26 = vpop.f32.mrf.mxu1  ;;  %v6072_v37 = vld [vmem:[%s7173_s27 + $0xd90] sm:$0xf] }
 0x101   : > { %3728 = vmatpush.bf16.msra.mxu2 %v6049_v54  ;;  %v3464_v54 = vadd.f32 %v3463_v42, %v3451_v41  ;;  %v6089_v61 = vor.u32 %v6824_v53, %v6088_v52  ;;  %v6820_v39 = vld [vmem:[%s7173_s27 + $0xd94] sm:$0xf0]  ;;  %v5872_v41 = vld [vmem:[%s7173_s27 + $0xc00] sm:$0xf]  ;;  %v6770_v42 = vld [vmem:[%s7173_s27 + $0xc04] sm:$0xf0] }
 0x102   : > { %3741 = vmatpush.bf16.msra.mxu3 %v6113_v58  ;;  %v6774_v58 = vld [vmem:[%s7173_s27 + $0xc24] sm:$0xf0]  ;;  %v6000_v52 = vld [vmem:[%s7173_s27 + $0xd00] sm:$0xf] }
 0x103   : > { %3703 = vmatpush.bf16.msra.mxu0 %v5913_v6  ;;  %v3477_v6 = vadd.f32 %v3476_v60, %v3464_v54  ;;  %v5889_v17 = vor.u32 %v6774_v58, %v5888_v57  ;;  %v6073_v54 = vor.u32 %v6820_v39, %v6072_v37  ;;  %v6184_v58 = vld [vmem:[%s7173_s27 + $0xe70] sm:$0xf]  ;;  %v6368_v37 = vld [vmem:[%s7173_s27 + $0xfe0] sm:$0xf]  ;;  %v6894_v39 = vld [vmem:[%s7173_s27 + $0xfe4] sm:$0xf0] }
 0x104   : > { %3716 = vmatpush.bf16.msra.mxu1 %v5977_v14  ;;  %v6080_v14 = vld [vmem:[%s7173_s27 + $0xda0] sm:$0xf]  ;;  %v6248_v60 = vld [vmem:[%s7173_s27 + $0xef0] sm:$0xf] }
 0x105   : > { %3729 = vmatpush.bf16.msra.mxu2 %v6041_v16  ;;  %v6822_v16 = vld [vmem:[%s7173_s27 + $0xda4] sm:$0xf0]  ;;  %v7702_v18 = vadd.f32 %v3489_v7, %v3477_v6  ;;  %v3452_v19 = vpop.f32.mrf.mxu0  ;;  %v5937_v6 = vor.u32 %v6786_v51, %v5936_v50  ;;  %v6168_v51 = vld [vmem:[%s7173_s27 + $0xe50] sm:$0xf] }
 0x106   : > { %3742 = vmatpush.bf16.msra.mxu3 %v6105_v20  ;;  %v5953_v20 = vor.u32 %v6790_v62, %v5952_v59  ;;  %v6848_v59 = vld [vmem:[%s7173_s27 + $0xe74] sm:$0xf0] }
 0x107   : > { %3704 = vmatpush.bf16.msra.mxu0 %v5905_v30  ;;  %v6081_v30 = vor.u32 %v6822_v16, %v6080_v14  ;;  %v3478_v53 = vpop.f32.mrf.mxu2  ;;  %v6864_v62 = vld [vmem:[%s7173_s27 + $0xef4] sm:$0xf0]  ;;  %v6376_v14 = vld [vmem:[%s7173_s27 + $0xff0] sm:$0xf]  ;;  %v6185_v19 = vor.u32 %v6848_v59, %v6184_v58 }
 0x108   : > { %3717 = vmatpush.bf16.msra.mxu1 %v5969_v35  ;;  %v6008_v35 = vld [vmem:[%s7173_s27 + $0xd10] sm:$0xf]  ;;  %v3491_v57 = vpop.f32.mrf.mxu3  ;;  %v6896_v16 = vld [vmem:[%s7173_s27 + $0xff4] sm:$0xf0] }
 0x109   : > { %3730 = vmatpush.bf16.msra.mxu2 %v6033_v36  ;;  %v6804_v36 = vld [vmem:[%s7173_s27 + $0xd14] sm:$0xf0]  ;;  %v6377_v26 = vor.u32 %v6896_v16, %v6376_v14  ;;  %v6232_v53 = vld [vmem:[%s7173_s27 + $0xed0] sm:$0xf]  ;;  %v6288_v14 = vld [vmem:[%s7173_s27 + $0xf40] sm:$0xf] }
 0x10a   : > { %3743 = vmatpush.bf16.msra.mxu3 %v6097_v44  ;;  %v5945_v44 = vor.u32 %v6788_v33, %v5944_v24  ;;  %v6009_v45 = vor.u32 %v6804_v36, %v6008_v35  ;;  %v6240_v24 = vld [vmem:[%s7173_s27 + $0xee0] sm:$0xf]  ;;  %v6878_v35 = vld [vmem:[%s7173_s27 + $0xf64] sm:$0xf0]  ;;  %v789_v36 = vld [vmem:[#allocation1] sm:$0xff] }
 0x10b   : > { %3705 = vmatpush.bf16.msra.mxu0 %v5897_v55  ;;  %v6802_v55 = vld [vmem:[%s7173_s27 + $0xd04] sm:$0xf0]  ;;  %v6304_v33 = vld [vmem:[%s7173_s27 + $0xf60] sm:$0xf]  ;;  %v6360_v57 = vld [vmem:[%s7173_s27 + $0xfd0] sm:$0xf] }
 0x10c   : > { %3718 = vmatpush.bf16.msra.mxu1 %v5961_v43  ;;  %v6064_v43 = vld [vmem:[%s7173_s27 + $0xd80] sm:$0xf]  ;;  %v6001_v7 = vor.u32 %v6802_v55, %v6000_v52  ;;  %v6305_v50 = vor.u32 %v6878_v35, %v6304_v33  ;;  %v6844_v52 = vld [vmem:[%s7173_s27 + $0xe54] sm:$0xf0]  ;;  %v6874_v16 = vld [vmem:[%s7173_s27 + $0xf44] sm:$0xf0] }
 0x10d   : > { %3731 = vmatpush.bf16.msra.mxu2 %v6025_v56  ;;  %v6818_v56 = vld [vmem:[%s7173_s27 + $0xd84] sm:$0xf0]  ;;  %v6860_v55 = vld [vmem:[%s7173_s27 + $0xed4] sm:$0xf0]  ;;  %v6169_v59 = vor.u32 %v6844_v52, %v6168_v51  ;;  %v6216_v35 = vld [vmem:[%s7173_s27 + $0xeb0] sm:$0xf] }
 0x10e   : > { %3744 = vmatpush.bf16.msra.mxu3 %v6089_v61  ;;  %v5873_v61 = vor.u32 %v6770_v42, %v5872_v41  ;;  %v790_v41 = vld [vmem:[#allocation1 + $0x9] sm:$0xff]  ;;  %v792_v42 = vld [vmem:[#allocation1 + $0x1b] sm:$0xff] }
 0x10f   : > { %3706 = vmatpush.bf16.msra.mxu0 %v5889_v17  ;;  %v6065_v17 = vor.u32 %v6818_v56, %v6064_v43  ;;  %v6296_v43 = vld [vmem:[%s7173_s27 + $0xf50] sm:$0xf]  ;;  %v6876_v56 = vld [vmem:[%s7173_s27 + $0xf54] sm:$0xf0]  ;;  %v6144_v51 = vld [vmem:[%s7173_s27 + $0xe20] sm:$0xf] }
 0x110   : > { %3719 = vmatpush.bf16.msra.mxu1 %v5953_v20  ;;  %v6249_v20 = vor.u32 %v6864_v62, %v6248_v60  ;;  %v6892_v58 = vld [vmem:[%s7173_s27 + $0xfd4] sm:$0xf0]  ;;  %v6233_v60 = vor.u32 %v6860_v55, %v6232_v53  ;;  %v6160_v62 = vld [vmem:[%s7173_s27 + $0xe40] sm:$0xf]  ;;  %v6838_v52 = vld [vmem:[%s7173_s27 + $0xe24] sm:$0xf0] }
 0x111   : > { %3732 = vmatpush.bf16.msra.mxu2 %v6017_v21  ;;  %v6313_v21 = vor.u32 %v6880_v4, %v6312_v63  ;;  %v6842_v63 = vld [vmem:[%s7173_s27 + $0xe44] sm:$0xf0]  ;;  %v6224_v4 = vld [vmem:[%s7173_s27 + $0xec0] sm:$0xf]  ;;  %v6840_v33 = vld [vmem:[%s7173_s27 + $0xe34] sm:$0xf0] }
 0x112   : > { %3745 = vmatpush.bf16.msra.mxu3 %v6081_v30  ;;  %v6862_v30 = vld [vmem:[%s7173_s27 + $0xee4] sm:$0xf0]  ;;  %v6208_v53 = vld [vmem:[%s7173_s27 + $0xea0] sm:$0xf] }
 0x113   : > { %3707 = vmatpush.bf16.msra.mxu0 %v5881_v40  ;;  %v791_v40 = vld [vmem:[#allocation1 + $0x12] sm:$0xff] }
 0x114   : > { %3720 = vmatpush.bf16.msra.mxu1 %v5945_v44  ;;  %v6177_v44 = vor.u32 %v6846_v23, %v6176_v22  ;;  %v6161_v22 = vor.u32 %v6842_v63, %v6160_v62  ;;  %v6145_v63 = vor.u32 %v6838_v52, %v6144_v51  ;;  %v6399_v51 = vld [vmem:[%s7173_s27 + $0x74] sm:$0xf]  ;;  %v4394_v52 = vld [vmem:[%s7173_s27 + $0x78] sm:$0xf0] }
 0x115   : > { %3733 = vmatpush.bf16.msra.mxu2 %v6009_v45  ;;  %v6241_v45 = vor.u32 %v6862_v30, %v6240_v24  ;;  %v6152_v30 = vld [vmem:[%s7173_s27 + $0xe30] sm:$0xf] }
 0x116   : > { %3746 = vmatpush.bf16.msra.mxu3 %v6073_v54  ;;  %v6369_v54 = vor.u32 %v6894_v39, %v6368_v37  ;;  %v6856_v39 = vld [vmem:[%s7173_s27 + $0xeb4] sm:$0xf0] }
 0x117   : > { %3708 = vmatpush.bf16.msra.mxu0 %v5873_v61  ;;  %v6297_v61 = vor.u32 %v6876_v56, %v6296_v43  ;;  %v6854_v43 = vld [vmem:[%s7173_s27 + $0xea4] sm:$0xf0]  ;;  %v6272_v56 = vld [vmem:[%s7173_s27 + $0xf20] sm:$0xf] }
 0x118   : > { %3721 = vmatpush.bf16.msra.mxu1 %v5937_v6  ;;  %v6361_v6 = vor.u32 %v6892_v58, %v6360_v57  ;;  %v3515_v23 = vpop.f32.mrf.mxu1  ;;  %v6870_v57 = vld [vmem:[%s7173_s27 + $0xf24] sm:$0xf0] }
 0x119   : > { %3734 = vmatpush.bf16.msra.mxu2 %v6001_v7  ;;  %v6858_v7 = vld [vmem:[%s7173_s27 + $0xec4] sm:$0xf0] }
 0x11a   : > { %3747 = vmatpush.bf16.msra.mxu3 %v6065_v17  ;;  %3709 = vmatmul.bf16.vlgmr.msra.gmra.mxu0 %v789_v36  ;;  %v3502_v17 = vpop.f32.mrf.mxu0  ;;  %v6225_v24 = vor.u32 %v6858_v7, %v6224_v4  ;;  %v6209_v7 = vor.u32 %v6854_v43, %v6208_v53  ;;  %v6415_v53 = vld [vmem:[%s7173_s27 + $0xf4] sm:$0xf]  ;;  %v4458_v43 = vld [vmem:[%s7173_s27 + $0xf8] sm:$0xf0] }
 0x11b   : > { %3753 = vmatpush.bf16.msrb.mxu0 %v6185_v19  ;;  %3722 = vmatmul.bf16.vlgmr.msra.gmra.mxu1 %v790_v41  ;;  %v6352_v19 = vld [vmem:[%s7173_s27 + $0xfc0] sm:$0xf]  ;;  %v6344_v41 = vld [vmem:[%s7173_s27 + $0xfb0] sm:$0xf] }
 0x11c   : > { %3766 = vmatpush.bf16.msrb.mxu1 %v6249_v20  ;;  %3735 = vmatmul.bf16.vlgmr.msra.gmra.mxu2 %v791_v40  ;;  %v6890_v20 = vld [vmem:[%s7173_s27 + $0xfc4] sm:$0xf0]  ;;  %v6280_v40 = vld [vmem:[%s7173_s27 + $0xf30] sm:$0xf] }
 0x11d   : > { %3779 = vmatpush.bf16.msrb.mxu2 %v6313_v21  ;;  %3748 = vmatmul.bf16.vlgmr.msra.gmra.mxu3 %v792_v42  ;;  %v3503_v21 = vadd.f32 %v3502_v17, %v7702_v18  ;;  %v6353_v36 = vor.u32 %v6890_v20, %v6352_v19  ;;  %v6872_v18 = vld [vmem:[%s7173_s27 + $0xf34] sm:$0xf0]  ;;  %v6200_v19 = vld [vmem:[%s7173_s27 + $0xe90] sm:$0xf] }
 0x11e   : > { %3792 = vmatpush.bf16.msrb.mxu3 %v6377_v26  ;;  %v6289_v26 = vor.u32 %v6874_v16, %v6288_v14  ;;  %v6888_v42 = vld [vmem:[%s7173_s27 + $0xfb4] sm:$0xf0]  ;;  %v6273_v14 = vor.u32 %v6870_v57, %v6272_v56  ;;  %v6136_v16 = vld [vmem:[%s7173_s27 + $0xe10] sm:$0xf]  ;;  %v6431_v56 = vld [vmem:[%s7173_s27 + $0x174] sm:$0xf] }
 0x11f   : > { %3754 = vmatpush.bf16.msrb.mxu0 %v6177_v44  ;;  %v3516_v37 = vadd.f32 %v3515_v23, %v3503_v21  ;;  %v6153_v44 = vor.u32 %v6840_v33, %v6152_v30  ;;  %v3528_v55 = vpop.f32.mrf.mxu2  ;;  %v6836_v17 = vld [vmem:[%s7173_s27 + $0xe14] sm:$0xf0]  ;;  %v6128_v33 = vld [vmem:[%s7173_s27 + $0xe00] sm:$0xf]  ;;  %v4522_v57 = vld [vmem:[%s7173_s27 + $0x178] sm:$0xf0] }
 0x120   : > { %3767 = vmatpush.bf16.msrb.mxu1 %v6241_v45  ;;  %v6217_v45 = vor.u32 %v6856_v39, %v6216_v35  ;;  %v3517_v4 = vpop.f32.mrf.mxu1  ;;  %v6852_v21 = vld [vmem:[%s7173_s27 + $0xe94] sm:$0xf0]  ;;  %v6137_v30 = vor.u32 %v6836_v17, %v6136_v16  ;;  %v6834_v35 = vld [vmem:[%s7173_s27 + $0xe04] sm:$0xf0]  ;;  %v6192_v39 = vld [vmem:[%s7173_s27 + $0xe80] sm:$0xf] }
 0x121   : > { %3780 = vmatpush.bf16.msrb.mxu2 %v6305_v50  ;;  %v6281_v50 = vor.u32 %v6872_v18, %v6280_v40  ;;  %v3529_v58 = vadd.f32 %v3528_v55, %v3516_v37  ;;  %v6868_v23 = vld [vmem:[%s7173_s27 + $0xf14] sm:$0xf0]  ;;  %v6850_v40 = vld [vmem:[%s7173_s27 + $0xe84] sm:$0xf0]  ;;  %v6256_v18 = vld [vmem:[%s7173_s27 + $0xf00] sm:$0xf]  ;;  %v6129_v55 = vor.u32 %v6834_v35, %v6128_v33  ;;  %v4461_v4 = vor.u32 %v6415_v53, %v4458_v43 }
 0x122   : > { %3793 = vmatpush.bf16.msrb.mxu3 %v6369_v54  ;;  %v6345_v54 = vor.u32 %v6888_v42, %v6344_v41  ;;  %v3504_v62 = vpop.f32.mrf.mxu0  ;;  %v6866_v42 = vld [vmem:[%s7173_s27 + $0xf04] sm:$0xf0]  ;;  %v4386_v16 = vld [vmem:[%s7173_s27 + $0x68] sm:$0xf0]  ;;  %v6413_v17 = vld [vmem:[%s7173_s27 + $0xe4] sm:$0xf] }
 0x123   : > { %3755 = vmatpush.bf16.msrb.mxu0 %v6169_v59  ;;  %v3541_v59 = vpop.f32.mrf.mxu3  ;;  %v794_v33 = vld [vmem:[#allocation1 + $0x2d] sm:$0xff]  ;;  %v796_v35 = vld [vmem:[#allocation1 + $0x3f] sm:$0xff] }
 0x124   : > { %3768 = vmatpush.bf16.msrb.mxu1 %v6233_v60  ;;  %v6336_v60 = vld [vmem:[%s7173_s27 + $0xfa0] sm:$0xf]  ;;  %v6393_v43 = vld [vmem:[%s7173_s27 + $0x44] sm:$0xf] }
 0x125   : > { %3781 = vmatpush.bf16.msrb.mxu2 %v6297_v61  ;;  %v6886_v61 = vld [vmem:[%s7173_s27 + $0xfa4] sm:$0xf0] }
 0x126   : > { %3794 = vmatpush.bf16.msrb.mxu3 %v6361_v6  ;;  %v7769_v6 = vadd.f32 %v3541_v59, %v3529_v58  ;;  %v6337_v20 = vor.u32 %v6886_v61, %v6336_v60  ;;  %v6193_v58 = vor.u32 %v6850_v40, %v6192_v39  ;;  %v6257_v59 = vor.u32 %v6866_v42, %v6256_v18  ;;  %v6447_v60 = vld [vmem:[%s7173_s27 + $0x1f4] sm:$0xf]  ;;  %v4586_v61 = vld [vmem:[%s7173_s27 + $0x1f8] sm:$0xf0] }
 0x127   : > { %3756 = vmatpush.bf16.msrb.mxu0 %v6161_v22  ;;  %v6264_v22 = vld [vmem:[%s7173_s27 + $0xf10] sm:$0xf]  ;;  %v6395_v40 = vld [vmem:[%s7173_s27 + $0x54] sm:$0xf]  ;;  %v4378_v18 = vld [vmem:[%s7173_s27 + $0x58] sm:$0xf0] }
 0x128   : > { %3769 = vmatpush.bf16.msrb.mxu1 %v6225_v24  ;;  %v6328_v24 = vld [vmem:[%s7173_s27 + $0xf90] sm:$0xf]  ;;  %v6265_v37 = vor.u32 %v6868_v23, %v6264_v22  ;;  %v4514_v22 = vld [vmem:[%s7173_s27 + $0x168] sm:$0xf0]  ;;  %v793_v23 = vld [vmem:[#allocation1 + $0x24] sm:$0xff]  ;;  %v4381_v53 = vor.u32 %v6395_v40, %v4378_v18 }
 0x129   : > { %3782 = vmatpush.bf16.msrb.mxu2 %v6289_v26  ;;  %v6884_v26 = vld [vmem:[%s7173_s27 + $0xf94] sm:$0xf0]  ;;  %v6389_v40 = vld [vmem:[%s7173_s27 + $0x24] sm:$0xf]  ;;  %v4354_v18 = vld [vmem:[%s7173_s27 + $0x28] sm:$0xf0] }
 0x12a   : > { %3795 = vmatpush.bf16.msrb.mxu3 %v6353_v36  ;;  %v6201_v36 = vor.u32 %v6852_v21, %v6200_v19  ;;  %v6329_v41 = vor.u32 %v6884_v26, %v6328_v24  ;;  %v4589_v19 = vor.u32 %v6447_v60, %v4586_v61  ;;  %v6429_v21 = vld [vmem:[%s7173_s27 + $0x164] sm:$0xf]  ;;  %v4578_v26 = vld [vmem:[%s7173_s27 + $0x1e8] sm:$0xf0] }
 0x12b   : > { %3757 = vmatpush.bf16.msrb.mxu0 %v6153_v44  ;;  %v6320_v44 = vld [vmem:[%s7173_s27 + $0xf80] sm:$0xf]  ;;  %v6445_v24 = vld [vmem:[%s7173_s27 + $0x1e4] sm:$0xf]  ;;  %v4517_v39 = vor.u32 %v6429_v21, %v4514_v22  ;;  %v4498_v61 = vld [vmem:[%s7173_s27 + $0x148] sm:$0xf0] }
 0x12c   : > { %3770 = vmatpush.bf16.msrb.mxu1 %v6217_v45  ;;  %v6882_v45 = vld [vmem:[%s7173_s27 + $0xf84] sm:$0xf0]  ;;  %v4581_v42 = vor.u32 %v6445_v24, %v4578_v26  ;;  %v6425_v60 = vld [vmem:[%s7173_s27 + $0x144] sm:$0xf]  ;;  %v4362_v21 = vld [vmem:[%s7173_s27 + $0x38] sm:$0xf0] }
 0x12d   : > { %3783 = vmatpush.bf16.msrb.mxu2 %v6281_v50  ;;  %v3530_v50 = vpop.f32.mrf.mxu2  ;;  %v6321_v62 = vor.u32 %v6882_v45, %v6320_v44  ;;  %v4442_v44 = vld [vmem:[%s7173_s27 + $0xd8] sm:$0xf0]  ;;  %v6427_v45 = vld [vmem:[%s7173_s27 + $0x154] sm:$0xf] }
 0x12e   : > { %3796 = vmatpush.bf16.msrb.mxu3 %v6345_v54  ;;  %v3543_v54 = vpop.f32.mrf.mxu3  ;;  %v4506_v50 = vld [vmem:[%s7173_s27 + $0x158] sm:$0xf0]  ;;  %v6407_v22 = vld [vmem:[%s7173_s27 + $0xb4] sm:$0xf] }
 0x12f   : > { %3758 = vmatpush.bf16.msrb.mxu0 %v6145_v63  ;;  %v4397_v63 = vor.u32 %v6399_v51, %v4394_v52  ;;  %v6443_v51 = vld [vmem:[%s7173_s27 + $0x1d4] sm:$0xf]  ;;  %v4570_v52 = vld [vmem:[%s7173_s27 + $0x1d8] sm:$0xf0] }
 0x130   : > { %3771 = vmatpush.bf16.msrb.mxu1 %v6209_v7  ;;  %v4525_v7 = vor.u32 %v6431_v56, %v4522_v57  ;;  %v4370_v56 = vld [vmem:[%s7173_s27 + $0x48] sm:$0xf0]  ;;  %v6409_v57 = vld [vmem:[%s7173_s27 + $0xc4] sm:$0xf]  ;;  %v4426_v26 = vld [vmem:[%s7173_s27 + $0xb8] sm:$0xf0] }
 0x131   : > { %3784 = vmatpush.bf16.msrb.mxu2 %v6273_v14  ;;  %v6397_v14 = vld [vmem:[%s7173_s27 + $0x64] sm:$0xf] }
 0x132   : > { %3797 = vmatpush.bf16.msrb.mxu3 %v6337_v20  ;;  %v4450_v20 = vld [vmem:[%s7173_s27 + $0xe8] sm:$0xf0] }
 0x133   : > { %3759 = vmatpush.bf16.msrb.mxu0 %v6137_v30  ;;  %v795_v30 = vld [vmem:[#allocation1 + $0x36] sm:$0xff] }
 0x134   : > { %3772 = vmatpush.bf16.msrb.mxu1 %v6201_v36  ;;  %v4389_v36 = vor.u32 %v6397_v14, %v4386_v16  ;;  %v4373_v14 = vor.u32 %v6393_v43, %v4370_v56  ;;  %v4357_v56 = vor.u32 %v6389_v40, %v4354_v18  ;;  %v6463_v40 = vld [vmem:[%s7173_s27 + $0x274] sm:$0xf]  ;;  %v4650_v18 = vld [vmem:[%s7173_s27 + $0x278] sm:$0xf0] }
 0x135   : > { %3785 = vmatpush.bf16.msrb.mxu2 %v6265_v37  ;;  %v4453_v37 = vor.u32 %v6413_v17, %v4450_v20  ;;  %v6391_v20 = vld [vmem:[%s7173_s27 + $0x34] sm:$0xf] }
 0x136   : > { %3798 = vmatpush.bf16.msrb.mxu3 %v6329_v41  ;;  %v6411_v41 = vld [vmem:[%s7173_s27 + $0xd4] sm:$0xf] }
 0x137   : > { %3760 = vmatpush.bf16.msrb.mxu0 %v6129_v55  ;;  %v4445_v54 = vor.u32 %v6411_v41, %v4442_v44  ;;  %v4509_v55 = vor.u32 %v6427_v45, %v4506_v50  ;;  %v6405_v41 = vld [vmem:[%s7173_s27 + $0xa4] sm:$0xf]  ;;  %v4418_v45 = vld [vmem:[%s7173_s27 + $0xa8] sm:$0xf0] }
 0x138   : > { %3773 = vmatpush.bf16.msrb.mxu1 %v6193_v58  ;;  %v4573_v58 = vor.u32 %v6443_v51, %v4570_v52  ;;  %v3567_v16 = vpop.f32.mrf.mxu1  ;;  %v6421_v50 = vld [vmem:[%s7173_s27 + $0x124] sm:$0xf]  ;;  %v4482_v51 = vld [vmem:[%s7173_s27 + $0x128] sm:$0xf0] }
 0x139   : > { %3786 = vmatpush.bf16.msrb.mxu2 %v6257_v59  ;;  %v4434_v59 = vld [vmem:[%s7173_s27 + $0xc8] sm:$0xf0] }
 0x13a   : > { %3799 = vmatpush.bf16.msrb.mxu3 %v6321_v62  ;;  %3761 = vmatmul.bf16.vlgmr.msrb.gmra.mxu0 %v793_v23  ;;  %v3554_v62 = vpop.f32.mrf.mxu0  ;;  %v4437_v17 = vor.u32 %v6409_v57, %v4434_v59  ;;  %v4421_v59 = vor.u32 %v6405_v41, %v4418_v45  ;;  %v6479_v41 = vld [vmem:[%s7173_s27 + $0x2f4] sm:$0xf]  ;;  %v4714_v45 = vld [vmem:[%s7173_s27 + $0x2f8] sm:$0xf0] }
 0x13b   : > { %3805 = vmatpush.bf16.msra.mxu0 %v4397_v63  ;;  %3774 = vmatmul.bf16.vlgmr.msrb.gmra.mxu1 %v794_v33  ;;  %v6441_v63 = vld [vmem:[%s7173_s27 + $0x1c4] sm:$0xf]  ;;  %v6439_v33 = vld [vmem:[%s7173_s27 + $0x1b4] sm:$0xf] }
 0x13c   : > { %3818 = vmatpush.bf16.msra.mxu1 %v4461_v4  ;;  %3787 = vmatmul.bf16.vlgmr.msrb.gmra.mxu2 %v795_v30  ;;  %v4562_v4 = vld [vmem:[%s7173_s27 + $0x1c8] sm:$0xf0]  ;;  %v6423_v30 = vld [vmem:[%s7173_s27 + $0x134] sm:$0xf] }
 0x13d   : > { %3831 = vmatpush.bf16.msra.mxu2 %v4525_v7  ;;  %3800 = vmatmul.bf16.vlgmr.msrb.gmra.mxu3 %v796_v35  ;;  %v3555_v7 = vadd.f32 %v3554_v62, %v7769_v6  ;;  %v4565_v23 = vor.u32 %v6441_v63, %v4562_v4  ;;  %v4490_v6 = vld [vmem:[%s7173_s27 + $0x138] sm:$0xf0]  ;;  %v6403_v63 = vld [vmem:[%s7173_s27 + $0x94] sm:$0xf] }
 0x13e   : > { %3844 = vmatpush.bf16.msra.mxu3 %v4589_v19  ;;  %v4501_v19 = vor.u32 %v6425_v60, %v4498_v61  ;;  %v4554_v35 = vld [vmem:[%s7173_s27 + $0x1b8] sm:$0xf0]  ;;  %v4485_v60 = vor.u32 %v6421_v50, %v4482_v51  ;;  %v6387_v61 = vld [vmem:[%s7173_s27 + $0x14] sm:$0xf] }
 0x13f   : > { %3806 = vmatpush.bf16.msra.mxu0 %v4389_v36  ;;  %v3568_v24 = vadd.f32 %v3567_v16, %v3555_v7  ;;  %v4365_v36 = vor.u32 %v6391_v20, %v4362_v21  ;;  %v3580_v44 = vpop.f32.mrf.mxu2  ;;  %v4346_v62 = vld [vmem:[%s7173_s27 + $0x18] sm:$0xf0]  ;;  %v6385_v21 = vld [vmem:[%s7173_s27 + $0x4] sm:$0xf]  ;;  %v6495_v50 = vld [vmem:[%s7173_s27 + $0x374] sm:$0xf] }
 0x140   : > { %3819 = vmatpush.bf16.msra.mxu1 %v4453_v37  ;;  %v4429_v37 = vor.u32 %v6407_v22, %v4426_v26  ;;  %v3569_v57 = vpop.f32.mrf.mxu1  ;;  %v4410_v7 = vld [vmem:[%s7173_s27 + $0x98] sm:$0xf0]  ;;  %v4349_v20 = vor.u32 %v6387_v61, %v4346_v62  ;;  %v4338_v22 = vld [vmem:[%s7173_s27 + $0x8] sm:$0xf0]  ;;  %v6401_v26 = vld [vmem:[%s7173_s27 + $0x84] sm:$0xf] }
 0x141   : > { %3832 = vmatpush.bf16.msra.mxu2 %v4517_v39  ;;  %v4493_v39 = vor.u32 %v6423_v30, %v4490_v6  ;;  %v3581_v52 = vadd.f32 %v3580_v44, %v3568_v24  ;;  %v4474_v16 = vld [vmem:[%s7173_s27 + $0x118] sm:$0xf0]  ;;  %v4402_v30 = vld [vmem:[%s7173_s27 + $0x88] sm:$0xf0]  ;;  %v6417_v6 = vld [vmem:[%s7173_s27 + $0x104] sm:$0xf]  ;;  %v4341_v44 = vor.u32 %v6385_v21, %v4338_v22  ;;  %v4717_v57 = vor.u32 %v6479_v41, %v4714_v45 }
 0x142   : > { %3845 = vmatpush.bf16.msra.mxu3 %v4581_v42  ;;  %v4557_v42 = vor.u32 %v6439_v33, %v4554_v35  ;;  %v3556_v43 = vpop.f32.mrf.mxu0  ;;  %v4466_v35 = vld [vmem:[%s7173_s27 + $0x108] sm:$0xf0]  ;;  %v4778_v51 = vld [vmem:[%s7173_s27 + $0x378] sm:$0xf0]  ;;  %v6477_v62 = vld [vmem:[%s7173_s27 + $0x2e4] sm:$0xf] }
 0x143   : > { %3807 = vmatpush.bf16.msra.mxu0 %v4381_v53  ;;  %v3593_v53 = vpop.f32.mrf.mxu3  ;;  %v4642_v61 = vld [vmem:[%s7173_s27 + $0x268] sm:$0xf0]  ;;  %v6459_v22 = vld [vmem:[%s7173_s27 + $0x254] sm:$0xf]  ;;  %v6473_v41 = vld [vmem:[%s7173_s27 + $0x2c4] sm:$0xf] }
 0x144   : > { %3820 = vmatpush.bf16.msra.mxu1 %v4445_v54  ;;  %v6437_v54 = vld [vmem:[%s7173_s27 + $0x1a4] sm:$0xf] }
 0x145   : > { %3833 = vmatpush.bf16.msra.mxu2 %v4509_v55  ;;  %v4546_v55 = vld [vmem:[%s7173_s27 + $0x1a8] sm:$0xf0] }
 0x146   : > { %3846 = vmatpush.bf16.msra.mxu3 %v4573_v58  ;;  %v7836_v58 = vadd.f32 %v3593_v53, %v3581_v52  ;;  %v4549_v4 = vor.u32 %v6437_v54, %v4546_v55  ;;  %v4405_v52 = vor.u32 %v6401_v26, %v4402_v30  ;;  %v4469_v53 = vor.u32 %v6417_v6, %v4466_v35  ;;  %v6511_v54 = vld [vmem:[%s7173_s27 + $0x3f4] sm:$0xf]  ;;  %v4842_v55 = vld [vmem:[%s7173_s27 + $0x3f8] sm:$0xf0] }
 0x147   : > { %3808 = vmatpush.bf16.msra.mxu0 %v4373_v14  ;;  %v6419_v14 = vld [vmem:[%s7173_s27 + $0x114] sm:$0xf]  ;;  %v4698_v30 = vld [vmem:[%s7173_s27 + $0x2d8] sm:$0xf0] }
 0x148   : > { %3821 = vmatpush.bf16.msra.mxu1 %v4437_v17  ;;  %v6435_v17 = vld [vmem:[%s7173_s27 + $0x194] sm:$0xf]  ;;  %v4477_v24 = vor.u32 %v6419_v14, %v4474_v16  ;;  %v4770_v14 = vld [vmem:[%s7173_s27 + $0x368] sm:$0xf0]  ;;  %v6509_v16 = vld [vmem:[%s7173_s27 + $0x3e4] sm:$0xf] }
 0x149   : > { %3834 = vmatpush.bf16.msra.mxu2 %v4501_v19  ;;  %v4538_v19 = vld [vmem:[%s7173_s27 + $0x198] sm:$0xf0]  ;;  %v6491_v6 = vld [vmem:[%s7173_s27 + $0x354] sm:$0xf] }
 0x14a   : > { %3847 = vmatpush.bf16.msra.mxu3 %v4565_v23  ;;  %v4413_v23 = vor.u32 %v6403_v63, %v4410_v7  ;;  %v4541_v33 = vor.u32 %v6435_v17, %v4538_v19  ;;  %v4845_v63 = vor.u32 %v6511_v54, %v4842_v55  ;;  %v6493_v7 = vld [vmem:[%s7173_s27 + $0x364] sm:$0xf]  ;;  %v4834_v17 = vld [vmem:[%s7173_s27 + $0x3e8] sm:$0xf0]  ;;  %v6507_v35 = vld [vmem:[%s7173_s27 + $0x3d4] sm:$0xf] }
 0x14b   : > { %3809 = vmatpush.bf16.msra.mxu0 %v4365_v36  ;;  %v6433_v36 = vld [vmem:[%s7173_s27 + $0x184] sm:$0xf]  ;;  %v4773_v21 = vor.u32 %v6493_v7, %v4770_v14  ;;  %v4837_v26 = vor.u32 %v6509_v16, %v4834_v17 }
 0x14c   : > { %3822 = vmatpush.bf16.msra.mxu1 %v4429_v37  ;;  %v4530_v37 = vld [vmem:[%s7173_s27 + $0x188] sm:$0xf0]  ;;  %v6453_v17 = vld [vmem:[%s7173_s27 + $0x224] sm:$0xf] }
 0x14d   : > { %3835 = vmatpush.bf16.msra.mxu2 %v4493_v39  ;;  %v3582_v39 = vpop.f32.mrf.mxu2  ;;  %v4533_v43 = vor.u32 %v6433_v36, %v4530_v37  ;;  %v4826_v36 = vld [vmem:[%s7173_s27 + $0x3d8] sm:$0xf0] }
 0x14e   : > { %3848 = vmatpush.bf16.msra.mxu3 %v4557_v42  ;;  %v3595_v42 = vpop.f32.mrf.mxu3 }
 0x14f   : > { %3810 = vmatpush.bf16.msra.mxu0 %v4357_v56  ;;  %v4653_v56 = vor.u32 %v6463_v40, %v4650_v18  ;;  %v4626_v18 = vld [vmem:[%s7173_s27 + $0x248] sm:$0xf0]  ;;  %v4829_v42 = vor.u32 %v6507_v35, %v4826_v36 }
 0x150   : > { %3823 = vmatpush.bf16.msra.mxu1 %v4421_v59  ;;  %v4781_v59 = vor.u32 %v6495_v50, %v4778_v51  ;;  %v6505_v50 = vld [vmem:[%s7173_s27 + $0x3c4] sm:$0xf]  ;;  %v4818_v51 = vld [vmem:[%s7173_s27 + $0x3c8] sm:$0xf0] }
 0x151   : > { %3836 = vmatpush.bf16.msra.mxu2 %v4485_v60  ;;  %v6461_v60 = vld [vmem:[%s7173_s27 + $0x264] sm:$0xf]  ;;  %v4802_v35 = vld [vmem:[%s7173_s27 + $0x3a8] sm:$0xf0] }
 0x152   : > { %3849 = vmatpush.bf16.msra.mxu3 %v4549_v4  ;;  %v4706_v4 = vld [vmem:[%s7173_s27 + $0x2e8] sm:$0xf0]  ;;  %v4645_v19 = vor.u32 %v6461_v60, %v4642_v61  ;;  %v4682_v61 = vld [vmem:[%s7173_s27 + $0x2b8] sm:$0xf0] }
 0x153   : > { %3811 = vmatpush.bf16.msra.mxu0 %v4349_v20  ;;  %v4709_v20 = vor.u32 %v6477_v62, %v4706_v4  ;;  %v6487_v62 = vld [vmem:[%s7173_s27 + $0x334] sm:$0xf]  ;;  %v4810_v4 = vld [vmem:[%s7173_s27 + $0x3b8] sm:$0xf0] }
 0x154   : > { %3824 = vmatpush.bf16.msra.mxu1 %v4413_v23  ;;  %v4634_v23 = vld [vmem:[%s7173_s27 + $0x258] sm:$0xf0] }
 0x155   : > { %3837 = vmatpush.bf16.msra.mxu2 %v4477_v24  ;;  %v6475_v24 = vld [vmem:[%s7173_s27 + $0x2d4] sm:$0xf]  ;;  %v4637_v37 = vor.u32 %v6459_v22, %v4634_v23  ;;  %v4674_v23 = vld [vmem:[%s7173_s27 + $0x2a8] sm:$0xf0] }
 0x156   : > { %3850 = vmatpush.bf16.msra.mxu3 %v4541_v33  ;;  %v4762_v33 = vld [vmem:[%s7173_s27 + $0x358] sm:$0xf0]  ;;  %v4701_v39 = vor.u32 %v6475_v24, %v4698_v30  ;;  %v6485_v24 = vld [vmem:[%s7173_s27 + $0x324] sm:$0xf] }
 0x157   : > { %3812 = vmatpush.bf16.msra.mxu0 %v4341_v44  ;;  %v4765_v40 = vor.u32 %v6491_v6, %v4762_v33  ;;  %v4754_v44 = vld [vmem:[%s7173_s27 + $0x348] sm:$0xf0]  ;;  %v3606_v45 = vpop.f32.mrf.mxu0  ;;  %v6501_v33 = vld [vmem:[%s7173_s27 + $0x3a4] sm:$0xf] }
 0x158   : > { %3825 = vmatpush.bf16.msra.mxu1 %v4405_v52 }
 0x159   : > { %3838 = vmatpush.bf16.msra.mxu2 %v4469_v53  ;;  %v3619_v53 = vpop.f32.mrf.mxu1 }
 0x15a   : > { %3851 = vmatpush.bf16.msra.mxu3 %v4533_v43  ;;  %3813 = vmatmul.bf16.vlgmr.msra.gmra.mxu0 %v7295_v28  ;;  %v4690_v28 = vld [vmem:[%s7173_s27 + $0x2c8] sm:$0xf0]  ;;  %v6455_v43 = vld [vmem:[%s7173_s27 + $0x234] sm:$0xf] }
 0x15b   : > { %3857 = vmatpush.bf16.msrb.mxu0 %v4653_v56  ;;  %3826 = vmatmul.bf16.vlgmr.msra.gmra.mxu1 %v7301_v34  ;;  %v3607_v34 = vadd.f32 %v3606_v45, %v7836_v58  ;;  %v4693_v54 = vor.u32 %v6473_v41, %v4690_v28  ;;  %v4618_v56 = vld [vmem:[%s7173_s27 + $0x238] sm:$0xf0]  ;;  %v6451_v41 = vld [vmem:[%s7173_s27 + $0x214] sm:$0xf] }
 0x15c   : > { %3870 = vmatpush.bf16.msrb.mxu1 %v4717_v57  ;;  %3839 = vmatmul.bf16.vlgmr.msra.gmra.mxu2 %v7293_v27  ;;  %v6457_v27 = vld [vmem:[%s7173_s27 + $0x244] sm:$0xf]  ;;  %v6471_v57 = vld [vmem:[%s7173_s27 + $0x2b4] sm:$0xf]  ;;  %v4746_v58 = vld [vmem:[%s7173_s27 + $0x338] sm:$0xf0]  ;;  %v4621_v7 = vor.u32 %v6455_v43, %v4618_v56 }
 0x15d   : > { %3883 = vmatpush.bf16.msrb.mxu2 %v4781_v59  ;;  %3852 = vmatmul.bf16.vlgmr.msra.gmra.mxu3 %v7297_v29  ;;  %v6489_v29 = vld [vmem:[%s7173_s27 + $0x344] sm:$0xf]  ;;  %v4629_v52 = vor.u32 %v6457_v27, %v4626_v18  ;;  %v4821_v59 = vor.u32 %v6505_v50, %v4818_v51  ;;  %v3620_v60 = vadd.f32 %v3619_v53, %v3607_v34  ;;  %v6467_v28 = vld [vmem:[%s7173_s27 + $0x294] sm:$0xf]  ;;  %v4730_v50 = vld [vmem:[%s7173_s27 + $0x318] sm:$0xf0] }
 0x15e   : > { %3896 = vmatpush.bf16.msrb.mxu3 %v4845_v63  ;;  %v4757_v55 = vor.u32 %v6489_v29, %v4754_v44  ;;  %v6503_v63 = vld [vmem:[%s7173_s27 + $0x3b4] sm:$0xf]  ;;  %v4685_v14 = vor.u32 %v6471_v57, %v4682_v61  ;;  %v4749_v16 = vor.u32 %v6487_v62, %v4746_v58  ;;  %v4805_v29 = vor.u32 %v6501_v33, %v4802_v35  ;;  %v4666_v44 = vld [vmem:[%s7173_s27 + $0x298] sm:$0xf0]  ;;  %v6449_v53 = vld [vmem:[%s7173_s27 + $0x204] sm:$0xf] }
 0x15f   : > { %3858 = vmatpush.bf16.msrb.mxu0 %v4645_v19  ;;  %v4610_v19 = vld [vmem:[%s7173_s27 + $0x228] sm:$0xf0]  ;;  %v3632_v22 = vpop.f32.mrf.mxu2  ;;  %v3608_v36 = vpop.f32.mrf.mxu0  ;;  %v6483_v45 = vld [vmem:[%s7173_s27 + $0x314] sm:$0xf]  ;;  %v4794_v34 = vld [vmem:[%s7173_s27 + $0x398] sm:$0xf0] }
 0x160   : > { %3871 = vmatpush.bf16.msrb.mxu1 %v4709_v20  ;;  %v6469_v20 = vld [vmem:[%s7173_s27 + $0x2a4] sm:$0xf]  ;;  %v3633_v30 = vadd.f32 %v3632_v22, %v3620_v60  ;;  %v3645_v6 = vpop.f32.mrf.mxu3  ;;  %v6499_v51 = vld [vmem:[%s7173_s27 + $0x394] sm:$0xf]  ;;  %v4733_v43 = vor.u32 %v6483_v45, %v4730_v50  ;;  %v4658_v57 = vld [vmem:[%s7173_s27 + $0x288] sm:$0xf0] }
 0x161   : > { %3884 = vmatpush.bf16.msrb.mxu2 %v4773_v21  ;;  %v4813_v21 = vor.u32 %v6503_v63, %v4810_v4  ;;  %v4677_v27 = vor.u32 %v6469_v20, %v4674_v23  ;;  %v6465_v56 = vld [vmem:[%s7173_s27 + $0x284] sm:$0xf]  ;;  %v4797_v60 = vor.u32 %v6499_v51, %v4794_v34  ;;  %v4722_v61 = vld [vmem:[%s7173_s27 + $0x308] sm:$0xf0]  ;;  %v6527_v4 = vld [vmem:[%s7173_s27 + $0x474] sm:$0xf] }
 0x162   : > { %3897 = vmatpush.bf16.msrb.mxu3 %v4837_v26  ;;  %v4738_v26 = vld [vmem:[%s7173_s27 + $0x328] sm:$0xf0]  ;;  %v6497_v62 = vld [vmem:[%s7173_s27 + $0x384] sm:$0xf]  ;;  %v6559_v20 = vld [vmem:[%s7173_s27 + $0x574] sm:$0xf]  ;;  %v4661_v22 = vor.u32 %v6465_v56, %v4658_v57 }
 0x163   : > { %3859 = vmatpush.bf16.msrb.mxu0 %v4637_v37  ;;  %v4613_v37 = vor.u32 %v6453_v17, %v4610_v19  ;;  %v4741_v18 = vor.u32 %v6485_v24, %v4738_v26  ;;  %v4786_v58 = vld [vmem:[%s7173_s27 + $0x388] sm:$0xf0]  ;;  %v4970_v19 = vld [vmem:[%s7173_s27 + $0x4f8] sm:$0xf0]  ;;  %v6575_v24 = vld [vmem:[%s7173_s27 + $0x5f4] sm:$0xf] }
 0x164   : > { %3872 = vmatpush.bf16.msrb.mxu1 %v4701_v39  ;;  %v3621_v39 = vpop.f32.mrf.mxu1  ;;  %v5098_v26 = vld [vmem:[%s7173_s27 + $0x5f8] sm:$0xf0]  ;;  %v6525_v36 = vld [vmem:[%s7173_s27 + $0x464] sm:$0xf]  ;;  %v6523_v51 = vld [vmem:[%s7173_s27 + $0x454] sm:$0xf] }
 0x165   : > { %3885 = vmatpush.bf16.msrb.mxu2 %v4765_v40  ;;  %v7907_v40 = vadd.f32 %v3645_v6, %v3633_v30  ;;  %v4789_v30 = vor.u32 %v6497_v62, %v4786_v58  ;;  %v6541_v39 = vld [vmem:[%s7173_s27 + $0x4e4] sm:$0xf]  ;;  %v4890_v34 = vld [vmem:[%s7173_s27 + $0x458] sm:$0xf0]  ;;  %v6571_v56 = vld [vmem:[%s7173_s27 + $0x5d4] sm:$0xf] }
 0x166   : > { %3898 = vmatpush.bf16.msrb.mxu3 %v4829_v42  ;;  %v4602_v42 = vld [vmem:[%s7173_s27 + $0x218] sm:$0xf0]  ;;  %v4882_v62 = vld [vmem:[%s7173_s27 + $0x448] sm:$0xf0]  ;;  %v6537_v58 = vld [vmem:[%s7173_s27 + $0x4c4] sm:$0xf] }
 0x167   : > { %3860 = vmatpush.bf16.msrb.mxu0 %v4629_v52  ;;  %v4605_v52 = vor.u32 %v6451_v41, %v4602_v42  ;;  %v3634_v63 = vpop.f32.mrf.mxu2  ;;  %v6557_v41 = vld [vmem:[%s7173_s27 + $0x564] sm:$0xf]  ;;  %v5026_v42 = vld [vmem:[%s7173_s27 + $0x568] sm:$0xf0]  ;;  %v5082_v57 = vld [vmem:[%s7173_s27 + $0x5d8] sm:$0xf0] }
 0x168   : > { %3873 = vmatpush.bf16.msrb.mxu1 %v4693_v54  ;;  %v4594_v54 = vld [vmem:[%s7173_s27 + $0x208] sm:$0xf0]  ;;  %v5029_v50 = vor.u32 %v6557_v41, %v5026_v42  ;;  %v5085_v63 = vor.u32 %v6571_v56, %v5082_v57  ;;  %v6533_v42 = vld [vmem:[%s7173_s27 + $0x4a4] sm:$0xf] }
 0x169   : > { %3886 = vmatpush.bf16.msrb.mxu2 %v4757_v55  ;;  %v4669_v55 = vor.u32 %v6467_v28, %v4666_v44  ;;  %v4597_v17 = vor.u32 %v6449_v53, %v4594_v54  ;;  %v6573_v28 = vld [vmem:[%s7173_s27 + $0x5e4] sm:$0xf]  ;;  %v4954_v54 = vld [vmem:[%s7173_s27 + $0x4d8] sm:$0xf0]  ;;  %v4866_v41 = vld [vmem:[%s7173_s27 + $0x428] sm:$0xf0] }
 0x16a   : > { %3899 = vmatpush.bf16.msrb.mxu3 %v4821_v59  ;;  %v6481_v59 = vld [vmem:[%s7173_s27 + $0x304] sm:$0xf] }
 0x16b   : > { %3861 = vmatpush.bf16.msrb.mxu0 %v4621_v7  ;;  %v4906_v7 = vld [vmem:[%s7173_s27 + $0x478] sm:$0xf0]  ;;  %v4725_v23 = vor.u32 %v6481_v59, %v4722_v61  ;;  %v4893_v59 = vor.u32 %v6523_v51, %v4890_v34  ;;  %v6521_v61 = vld [vmem:[%s7173_s27 + $0x444] sm:$0xf] }
 0x16c   : > { %3874 = vmatpush.bf16.msrb.mxu1 %v4685_v14  ;;  %v6543_v14 = vld [vmem:[%s7173_s27 + $0x4f4] sm:$0xf]  ;;  %v4909_v6 = vor.u32 %v6527_v4, %v4906_v7  ;;  %v5010_v4 = vld [vmem:[%s7173_s27 + $0x548] sm:$0xf0] }
 0x16d   : > { %3887 = vmatpush.bf16.msrb.mxu2 %v4749_v16  ;;  %v3647_v16 = vpop.f32.mrf.mxu3  ;;  %v4973_v33 = vor.u32 %v6543_v14, %v4970_v19  ;;  %v6569_v14 = vld [vmem:[%s7173_s27 + $0x5c4] sm:$0xf] }
 0x16e   : > { %3900 = vmatpush.bf16.msrb.mxu3 %v4813_v21  ;;  %v5034_v21 = vld [vmem:[%s7173_s27 + $0x578] sm:$0xf0]  ;;  %v5074_v16 = vld [vmem:[%s7173_s27 + $0x5c8] sm:$0xf0] }
 0x16f   : > { %3862 = vmatpush.bf16.msrb.mxu0 %v4613_v37  ;;  %v5037_v35 = vor.u32 %v6559_v20, %v5034_v21  ;;  %v4898_v37 = vld [vmem:[%s7173_s27 + $0x468] sm:$0xf0] }
 0x170   : > { %3875 = vmatpush.bf16.msrb.mxu1 %v4677_v27  ;;  %v5101_v27 = vor.u32 %v6575_v24, %v5098_v26  ;;  %v4901_v44 = vor.u32 %v6525_v36, %v4898_v37  ;;  %v6535_v24 = vld [vmem:[%s7173_s27 + $0x4b4] sm:$0xf]  ;;  %v5077_v26 = vor.u32 %v6569_v14, %v5074_v16  ;;  %v5066_v36 = vld [vmem:[%s7173_s27 + $0x5b8] sm:$0xf0]  ;;  %v6513_v14 = vld [vmem:[%s7173_s27 + $0x404] sm:$0xf] }
 0x171   : > { %3888 = vmatpush.bf16.msrb.mxu2 %v4741_v18  ;;  %v4962_v18 = vld [vmem:[%s7173_s27 + $0x4e8] sm:$0xf0] }
 0x172   : > { %3901 = vmatpush.bf16.msrb.mxu3 %v4805_v29  ;;  %v5090_v29 = vld [vmem:[%s7173_s27 + $0x5e8] sm:$0xf0]  ;;  %v4965_v45 = vor.u32 %v6541_v39, %v4962_v18  ;;  %v6517_v18 = vld [vmem:[%s7173_s27 + $0x424] sm:$0xf] }
 0x173   : > { %3863 = vmatpush.bf16.msrb.mxu0 %v4605_v52  ;;  %v6539_v52 = vld [vmem:[%s7173_s27 + $0x4d4] sm:$0xf]  ;;  %v5093_v53 = vor.u32 %v6573_v28, %v5090_v29  ;;  %v4850_v16 = vld [vmem:[%s7173_s27 + $0x408] sm:$0xf0] }
 0x174   : > { %3876 = vmatpush.bf16.msrb.mxu1 %v4669_v55  ;;  %v6555_v55 = vld [vmem:[%s7173_s27 + $0x554] sm:$0xf] }
 0x175   : > { %3889 = vmatpush.bf16.msrb.mxu2 %v4733_v43  ;;  %v5018_v43 = vld [vmem:[%s7173_s27 + $0x558] sm:$0xf0] }
 0x176   : > { %3902 = vmatpush.bf16.msrb.mxu3 %v4797_v60  ;;  %v5021_v60 = vor.u32 %v6555_v55, %v5018_v43  ;;  %v4869_v55 = vor.u32 %v6517_v18, %v4866_v41 }
 0x177   : > { %3864 = vmatpush.bf16.msrb.mxu0 %v4597_v17  ;;  %v3658_v7 = vpop.f32.mrf.mxu0  ;;  %v4885_v17 = vor.u32 %v6521_v61, %v4882_v62  ;;  %v6531_v61 = vld [vmem:[%s7173_s27 + $0x494] sm:$0xf] }
 0x178   : > { %3877 = vmatpush.bf16.msrb.mxu1 %v4661_v22  ;;  %v3671_v19 = vpop.f32.mrf.mxu1  ;;  %v6519_v22 = vld [vmem:[%s7173_s27 + $0x434] sm:$0xf] }
 0x179   : > { %3890 = vmatpush.bf16.msrb.mxu2 %v4725_v23  ;;  %v4874_v23 = vld [vmem:[%s7173_s27 + $0x438] sm:$0xf0] }
 0x17a   : > { %3903 = vmatpush.bf16.msrb.mxu3 %v4789_v30  ;;  %3865 = vmatmul.bf16.vlgmr.msrb.gmra.mxu0 %v7347_v31  ;;  %v4946_v31 = vld [vmem:[%s7173_s27 + $0x4c8] sm:$0xf0]  ;;  %v4877_v37 = vor.u32 %v6519_v22, %v4874_v23 }
 0x17b   : > { %3909 = vmatpush.bf16.msra.mxu0 %v4909_v6  ;;  %3878 = vmatmul.bf16.vlgmr.msrb.gmra.mxu1 %v7353_v38  ;;  %v3659_v38 = vadd.f32 %v3658_v7, %v7907_v40  ;;  %v4949_v20 = vor.u32 %v6537_v58, %v4946_v31  ;;  %v4938_v6 = vld [vmem:[%s7173_s27 + $0x4b8] sm:$0xf0]  ;;  %v4978_v23 = vld [vmem:[%s7173_s27 + $0x508] sm:$0xf0] }
 0x17c   : > { %3922 = vmatpush.bf16.msra.mxu1 %v4973_v33  ;;  %3891 = vmatmul.bf16.vlgmr.msrb.gmra.mxu2 %v7344_v25  ;;  %v4957_v25 = vor.u32 %v6539_v52, %v4954_v54  ;;  %v6551_v33 = vld [vmem:[%s7173_s27 + $0x534] sm:$0xf]  ;;  %v5002_v40 = vld [vmem:[%s7173_s27 + $0x538] sm:$0xf0]  ;;  %v4941_v39 = vor.u32 %v6535_v24, %v4938_v6  ;;  %v6565_v52 = vld [vmem:[%s7173_s27 + $0x5a4] sm:$0xf] }
 0x17d   : > { %3935 = vmatpush.bf16.msra.mxu2 %v5037_v35  ;;  %3904 = vmatmul.bf16.vlgmr.msrb.gmra.mxu3 %v7349_v32  ;;  %v6553_v32 = vld [vmem:[%s7173_s27 + $0x544] sm:$0xf]  ;;  %v3672_v30 = vadd.f32 %v3671_v19, %v3659_v38  ;;  %v6567_v35 = vld [vmem:[%s7173_s27 + $0x5b4] sm:$0xf]  ;;  %v4922_v58 = vld [vmem:[%s7173_s27 + $0x498] sm:$0xf0] }
 0x17e   : > { %3948 = vmatpush.bf16.msra.mxu3 %v5101_v27  ;;  %v5013_v21 = vor.u32 %v6553_v32, %v5010_v4  ;;  %v5005_v27 = vor.u32 %v6551_v33, %v5002_v40  ;;  %v5069_v28 = vor.u32 %v6567_v35, %v5066_v36  ;;  %v4986_v31 = vld [vmem:[%s7173_s27 + $0x518] sm:$0xf0]  ;;  %v6563_v32 = vld [vmem:[%s7173_s27 + $0x594] sm:$0xf]  ;;  %v4925_v38 = vor.u32 %v6531_v61, %v4922_v58  ;;  %v6529_v19 = vld [vmem:[%s7173_s27 + $0x484] sm:$0xf] }
 0x17f   : > { %3910 = vmatpush.bf16.msra.mxu0 %v4901_v44  ;;  %v3684_v29 = vpop.f32.mrf.mxu2  ;;  %v4930_v44 = vld [vmem:[%s7173_s27 + $0x4a8] sm:$0xf0]  ;;  %v3660_v54 = vpop.f32.mrf.mxu0  ;;  %v5050_v4 = vld [vmem:[%s7173_s27 + $0x598] sm:$0xf0]  ;;  %v6561_v24 = vld [vmem:[%s7173_s27 + $0x584] sm:$0xf]  ;;  %v4853_v36 = vor.u32 %v6513_v14, %v4850_v16 }
 0x180   : > { %3923 = vmatpush.bf16.msra.mxu1 %v4965_v45  ;;  %v6549_v45 = vld [vmem:[%s7173_s27 + $0x524] sm:$0xf]  ;;  %v3685_v51 = vadd.f32 %v3684_v29, %v3672_v30  ;;  %v3697_v34 = vpop.f32.mrf.mxu3  ;;  %v3673_v43 = vpop.f32.mrf.mxu1  ;;  %v4933_v57 = vor.u32 %v6533_v42, %v4930_v44  ;;  %v5053_v22 = vor.u32 %v6563_v32, %v5050_v4  ;;  %v6591_v6 = vld [vmem:[%s7173_s27 + $0x674] sm:$0xf]  ;;  %v5162_v33 = vld [vmem:[%s7173_s27 + $0x678] sm:$0xf0] }
 0x181   : > { %3936 = vmatpush.bf16.msra.mxu2 %v5029_v50  ;;  %v4994_v50 = vld [vmem:[%s7173_s27 + $0x528] sm:$0xf0]  ;;  %v6607_v40 = vld [vmem:[%s7173_s27 + $0x6f4] sm:$0xf]  ;;  %v5165_v44 = vor.u32 %v6591_v6, %v5162_v33  ;;  %v5146_v58 = vld [vmem:[%s7173_s27 + $0x658] sm:$0xf0] }
 0x182   : > { %3949 = vmatpush.bf16.msra.mxu3 %v5093_v53  ;;  %v5058_v53 = vld [vmem:[%s7173_s27 + $0x5a8] sm:$0xf0]  ;;  %v7978_v56 = vadd.f32 %v3697_v34, %v3685_v51  ;;  %v6639_v42 = vld [vmem:[%s7173_s27 + $0x7f4] sm:$0xf]  ;;  %v6589_v51 = vld [vmem:[%s7173_s27 + $0x664] sm:$0xf] }
 0x183   : > { %3911 = vmatpush.bf16.msra.mxu0 %v4893_v59  ;;  %v4997_v59 = vor.u32 %v6549_v45, %v4994_v50  ;;  %v5061_v62 = vor.u32 %v6565_v52, %v5058_v53  ;;  %v5154_v34 = vld [vmem:[%s7173_s27 + $0x668] sm:$0xf0]  ;;  %v6605_v52 = vld [vmem:[%s7173_s27 + $0x6e4] sm:$0xf]  ;;  %v5210_v32 = vld [vmem:[%s7173_s27 + $0x6d8] sm:$0xf0] }
 0x184   : > { %3924 = vmatpush.bf16.msra.mxu1 %v4957_v25  ;;  %v6515_v25 = vld [vmem:[%s7173_s27 + $0x414] sm:$0xf]  ;;  %v5218_v54 = vld [vmem:[%s7173_s27 + $0x6e8] sm:$0xf0]  ;;  %v5338_v16 = vld [vmem:[%s7173_s27 + $0x7d8] sm:$0xf0] }
 0x185   : > { %3937 = vmatpush.bf16.msra.mxu2 %v5021_v60  ;;  %v4858_v60 = vld [vmem:[%s7173_s27 + $0x418] sm:$0xf0]  ;;  %v5282_v43 = vld [vmem:[%s7173_s27 + $0x768] sm:$0xf0]  ;;  %v6619_v4 = vld [vmem:[%s7173_s27 + $0x754] sm:$0xf] }
 0x186   : > { %3950 = vmatpush.bf16.msra.mxu3 %v5085_v63  ;;  %v6547_v63 = vld [vmem:[%s7173_s27 + $0x514] sm:$0xf]  ;;  %v4861_v7 = vor.u32 %v6515_v25, %v4858_v60  ;;  %v5157_v25 = vor.u32 %v6589_v51, %v5154_v34  ;;  %v5221_v60 = vor.u32 %v6605_v52, %v5218_v54  ;;  %v6581_v51 = vld [vmem:[%s7173_s27 + $0x624] sm:$0xf]  ;;  %v5122_v34 = vld [vmem:[%s7173_s27 + $0x628] sm:$0xf0] }
 0x187   : > { %3912 = vmatpush.bf16.msra.mxu0 %v4885_v17  ;;  %v4989_v17 = vor.u32 %v6547_v63, %v4986_v31  ;;  %v3686_v30 = vpop.f32.mrf.mxu2  ;;  %v6603_v63 = vld [vmem:[%s7173_s27 + $0x6d4] sm:$0xf]  ;;  %v6597_v52 = vld [vmem:[%s7173_s27 + $0x6a4] sm:$0xf] }
 0x188   : > { %3925 = vmatpush.bf16.msra.mxu1 %v4949_v20  ;;  %v4914_v20 = vld [vmem:[%s7173_s27 + $0x488] sm:$0xf0]  ;;  %v3699_v35 = vpop.f32.mrf.mxu3  ;;  %v6635_v14 = vld [vmem:[%s7173_s27 + $0x7d4] sm:$0xf] }
 0x189   : > { %3938 = vmatpush.bf16.msra.mxu2 %v5013_v21  ;;  %v6545_v21 = vld [vmem:[%s7173_s27 + $0x504] sm:$0xf]  ;;  %v4917_v18 = vor.u32 %v6529_v19, %v4914_v20  ;;  %v5138_v20 = vld [vmem:[%s7173_s27 + $0x648] sm:$0xf0] }
 0x18a   : > { %3951 = vmatpush.bf16.msra.mxu3 %v5077_v26  ;;  %v5042_v26 = vld [vmem:[%s7173_s27 + $0x588] sm:$0xf0]  ;;  %v4981_v41 = vor.u32 %v6545_v21, %v4978_v23  ;;  %v6585_v19 = vld [vmem:[%s7173_s27 + $0x644] sm:$0xf] }
 0x18b   : > { %3913 = vmatpush.bf16.msra.mxu0 %v4877_v37  ;;  %v5226_v37 = vld [vmem:[%s7173_s27 + $0x6f8] sm:$0xf0]  ;;  %v5045_v29 = vor.u32 %v6561_v24, %v5042_v26  ;;  %v5202_v21 = vld [vmem:[%s7173_s27 + $0x6c8] sm:$0xf0]  ;;  %v6633_v24 = vld [vmem:[%s7173_s27 + $0x7c4] sm:$0xf]  ;;  %v5141_v6 = vor.u32 %v6585_v19, %v5138_v20 }
 0x18c   : > { %3926 = vmatpush.bf16.msra.mxu1 %v4941_v39  ;;  %v6623_v39 = vld [vmem:[%s7173_s27 + $0x774] sm:$0xf]  ;;  %v5229_v45 = vor.u32 %v6607_v40, %v5226_v37  ;;  %v5266_v23 = vld [vmem:[%s7173_s27 + $0x748] sm:$0xf0]  ;;  %v5130_v37 = vld [vmem:[%s7173_s27 + $0x638] sm:$0xf0] }
 0x18d   : > { %3939 = vmatpush.bf16.msra.mxu2 %v5005_v27  ;;  %v5290_v27 = vld [vmem:[%s7173_s27 + $0x778] sm:$0xf0]  ;;  %v5330_v26 = vld [vmem:[%s7173_s27 + $0x7c8] sm:$0xf0]  ;;  %v6627_v20 = vld [vmem:[%s7173_s27 + $0x794] sm:$0xf] }
 0x18e   : > { %3952 = vmatpush.bf16.msra.mxu3 %v5069_v28  ;;  %v5354_v28 = vld [vmem:[%s7173_s27 + $0x7f8] sm:$0xf0]  ;;  %v5293_v50 = vor.u32 %v6623_v39, %v5290_v27  ;;  %v6599_v39 = vld [vmem:[%s7173_s27 + $0x6b4] sm:$0xf]  ;;  %v5333_v27 = vor.u32 %v6633_v24, %v5330_v26  ;;  %v6593_v24 = vld [vmem:[%s7173_s27 + $0x684] sm:$0xf] }
 0x18f   : > { %3914 = vmatpush.bf16.msra.mxu0 %v4869_v55  ;;  %v5357_v53 = vor.u32 %v6639_v42, %v5354_v28  ;;  %v6621_v55 = vld [vmem:[%s7173_s27 + $0x764] sm:$0xf]  ;;  %v6615_v42 = vld [vmem:[%s7173_s27 + $0x734] sm:$0xf]  ;;  %v5242_v19 = vld [vmem:[%s7173_s27 + $0x718] sm:$0xf0] }
 0x190   : > { %3927 = vmatpush.bf16.msra.mxu1 %v4933_v57  ;;  %v6637_v57 = vld [vmem:[%s7173_s27 + $0x7e4] sm:$0xf]  ;;  %v5285_v61 = vor.u32 %v6621_v55, %v5282_v43  ;;  %v6631_v28 = vld [vmem:[%s7173_s27 + $0x7b4] sm:$0xf]  ;;  %v5186_v55 = vld [vmem:[%s7173_s27 + $0x6a8] sm:$0xf0] }
 0x191   : > { %3940 = vmatpush.bf16.msra.mxu2 %v4997_v59  ;;  %v5346_v59 = vld [vmem:[%s7173_s27 + $0x7e8] sm:$0xf0]  ;;  %v6613_v43 = vld [vmem:[%s7173_s27 + $0x724] sm:$0xf] }
 0x192   : > { %3953 = vmatpush.bf16.msra.mxu3 %v5061_v62  ;;  %v6587_v62 = vld [vmem:[%s7173_s27 + $0x654] sm:$0xf]  ;;  %v5349_v31 = vor.u32 %v6637_v57, %v5346_v59  ;;  %v5250_v57 = vld [vmem:[%s7173_s27 + $0x728] sm:$0xf0] }
 0x193   : > { %3915 = vmatpush.bf16.msra.mxu0 %v4861_v7  ;;  %v5274_v7 = vld [vmem:[%s7173_s27 + $0x758] sm:$0xf0]  ;;  %v5170_v26 = vld [vmem:[%s7173_s27 + $0x688] sm:$0xf0] }
 0x194   : > { %3928 = vmatpush.bf16.msra.mxu1 %v4925_v38  ;;  %v5213_v38 = vor.u32 %v6603_v63, %v5210_v32  ;;  %v5189_v32 = vor.u32 %v6597_v52, %v5186_v55  ;;  %v5410_v55 = vld [vmem:[%s7173_s27 + $0x868] sm:$0xf0] }
 0x195   : > { %3941 = vmatpush.bf16.msra.mxu2 %v4989_v17  ;;  %v5277_v17 = vor.u32 %v6619_v4, %v5274_v7  ;;  %v5253_v4 = vor.u32 %v6613_v43, %v5250_v57  ;;  %v6579_v7 = vld [vmem:[%s7173_s27 + $0x614] sm:$0xf]  ;;  %v6669_v43 = vld [vmem:[%s7173_s27 + $0x8e4] sm:$0xf] }
 0x196   : > { %3954 = vmatpush.bf16.msra.mxu3 %v5053_v22  ;;  %v6617_v22 = vld [vmem:[%s7173_s27 + $0x744] sm:$0xf] }
 0x197   : > { %3916 = vmatpush.bf16.msra.mxu0 %v4853_v36  ;;  %v5269_v35 = vor.u32 %v6617_v22, %v5266_v23  ;;  %v6583_v36 = vld [vmem:[%s7173_s27 + $0x634] sm:$0xf]  ;;  %v5106_v22 = vld [vmem:[%s7173_s27 + $0x608] sm:$0xf0] }
 0x198   : > { %3929 = vmatpush.bf16.msra.mxu1 %v4917_v18  ;;  %v3723_v33 = vpop.f32.mrf.mxu1 }
 0x199   : > { %3942 = vmatpush.bf16.msra.mxu2 %v4981_v41  ;;  %v5194_v41 = vld [vmem:[%s7173_s27 + $0x6b8] sm:$0xf0] }
 0x19a   : > { %3955 = vmatpush.bf16.msra.mxu3 %v5045_v29  ;;  %3917 = vmatmul.bf16.vlgmr.msra.gmra.mxu0 %v7421_v8  ;;  %v5149_v8 = vor.u32 %v6587_v62, %v5146_v58  ;;  %v5322_v29 = vld [vmem:[%s7173_s27 + $0x7b8] sm:$0xf0]  ;;  %v5125_v58 = vor.u32 %v6581_v51, %v5122_v34 }
 0x19b   : > { %3961 = vmatpush.bf16.msrb.mxu0 %v5165_v44  ;;  %3930 = vmatmul.bf16.vlgmr.msra.gmra.mxu1 %v7427_v12  ;;  %v5341_v12 = vor.u32 %v6635_v14, %v5338_v16  ;;  %v5133_v44 = vor.u32 %v6583_v36, %v5130_v37  ;;  %v5114_v14 = vld [vmem:[%s7173_s27 + $0x618] sm:$0xf0]  ;;  %v6595_v16 = vld [vmem:[%s7173_s27 + $0x694] sm:$0xf] }
 0x19c   : > { %3974 = vmatpush.bf16.msrb.mxu1 %v5229_v45  ;;  %3943 = vmatmul.bf16.vlgmr.msra.gmra.mxu2 %v7425_v11  ;;  %v6601_v11 = vld [vmem:[%s7173_s27 + $0x6c4] sm:$0xf]  ;;  %v5197_v45 = vor.u32 %v6599_v39, %v5194_v41  ;;  %v6655_v37 = vld [vmem:[%s7173_s27 + $0x874] sm:$0xf]  ;;  %v5418_v39 = vld [vmem:[%s7173_s27 + $0x878] sm:$0xf0] }
 0x19d   : > { %3987 = vmatpush.bf16.msrb.mxu2 %v5293_v50  ;;  %3956 = vmatmul.bf16.vlgmr.msra.gmra.mxu3 %v7430_v15  ;;  %v3710_v15 = vpop.f32.mrf.mxu0  ;;  %v5205_v40 = vor.u32 %v6601_v11, %v5202_v21  ;;  %v5306_v11 = vld [vmem:[%s7173_s27 + $0x798] sm:$0xf0]  ;;  %v6577_v21 = vld [vmem:[%s7173_s27 + $0x604] sm:$0xf]  ;;  %v5421_v34 = vor.u32 %v6655_v37, %v5418_v39  ;;  %v6647_v37 = vld [vmem:[%s7173_s27 + $0x834] sm:$0xf] }
 0x19e   : > { %4000 = vmatpush.bf16.msrb.mxu3 %v5357_v53  ;;  %v3711_v30 = vadd.f32 %v3710_v15, %v7978_v56  ;;  %v5258_v56 = vld [vmem:[%s7173_s27 + $0x738] sm:$0xf0]  ;;  %v5325_v53 = vor.u32 %v6631_v28, %v5322_v29  ;;  %v5109_v41 = vor.u32 %v6577_v21, %v5106_v22  ;;  %v5173_v29 = vor.u32 %v6593_v24, %v5170_v26  ;;  %v6649_v21 = vld [vmem:[%s7173_s27 + $0x844] sm:$0xf]  ;;  %v5394_v22 = vld [vmem:[%s7173_s27 + $0x848] sm:$0xf0] }
 0x19f   : > { %3962 = vmatpush.bf16.msrb.mxu0 %v5157_v25  ;;  %v5261_v50 = vor.u32 %v6615_v42, %v5258_v56  ;;  %v3736_v54 = vpop.f32.mrf.mxu2  ;;  %v5482_v42 = vld [vmem:[%s7173_s27 + $0x8f8] sm:$0xf0]  ;;  %v6687_v56 = vld [vmem:[%s7173_s27 + $0x974] sm:$0xf]  ;;  %v5522_v24 = vld [vmem:[%s7173_s27 + $0x948] sm:$0xf0] }
 0x1a0   : > { %3975 = vmatpush.bf16.msrb.mxu1 %v5221_v60  ;;  %v3724_v18 = vadd.f32 %v3723_v33, %v3711_v30  ;;  %v3749_v25 = vpop.f32.mrf.mxu3  ;;  %v6629_v60 = vld [vmem:[%s7173_s27 + $0x7a4] sm:$0xf]  ;;  %v3725_v63 = vpop.f32.mrf.mxu1  ;;  %v5234_v33 = vld [vmem:[%s7173_s27 + $0x708] sm:$0xf0]  ;;  %v5546_v28 = vld [vmem:[%s7173_s27 + $0x978] sm:$0xf0] }
 0x1a1   : > { %3988 = vmatpush.bf16.msrb.mxu2 %v5285_v61  ;;  %v5314_v61 = vld [vmem:[%s7173_s27 + $0x7a8] sm:$0xf0]  ;;  %v6609_v30 = vld [vmem:[%s7173_s27 + $0x704] sm:$0xf]  ;;  %v5386_v39 = vld [vmem:[%s7173_s27 + $0x838] sm:$0xf0] }
 0x1a2   : > { %4001 = vmatpush.bf16.msrb.mxu3 %v5349_v31  ;;  %v3737_v59 = vadd.f32 %v3736_v54, %v3724_v18  ;;  %v6653_v54 = vld [vmem:[%s7173_s27 + $0x864] sm:$0xf] }
 0x1a3   : > { %3963 = vmatpush.bf16.msrb.mxu0 %v5149_v8  ;;  %v5317_v8 = vor.u32 %v6629_v60, %v5314_v61  ;;  %v5538_v60 = vld [vmem:[%s7173_s27 + $0x968] sm:$0xf0]  ;;  %v6701_v61 = vld [vmem:[%s7173_s27 + $0x9e4] sm:$0xf] }
 0x1a4   : > { %3976 = vmatpush.bf16.msrb.mxu1 %v5213_v38  ;;  %v8049_v31 = vadd.f32 %v3749_v25, %v3737_v59  ;;  %v5178_v38 = vld [vmem:[%s7173_s27 + $0x698] sm:$0xf0]  ;;  %v5474_v59 = vld [vmem:[%s7173_s27 + $0x8e8] sm:$0xf0]  ;;  %v6685_v25 = vld [vmem:[%s7173_s27 + $0x964] sm:$0xf] }
 0x1a5   : > { %3989 = vmatpush.bf16.msrb.mxu2 %v5277_v17  ;;  %v3712_v62 = vpop.f32.mrf.mxu0  ;;  %v6611_v17 = vld [vmem:[%s7173_s27 + $0x714] sm:$0xf]  ;;  %v5181_v23 = vor.u32 %v6595_v16, %v5178_v38  ;;  %v5477_v63 = vor.u32 %v6669_v43, %v5474_v59  ;;  %v6697_v26 = vld [vmem:[%s7173_s27 + $0x9c4] sm:$0xf] }
 0x1a6   : > { %4002 = vmatpush.bf16.msrb.mxu3 %v5341_v12  ;;  %v5117_v12 = vor.u32 %v6579_v7, %v5114_v14  ;;  %v5245_v15 = vor.u32 %v6611_v17, %v5242_v19  ;;  %v5602_v62 = vld [vmem:[%s7173_s27 + $0x9e8] sm:$0xf0]  ;;  %v5402_v7 = vld [vmem:[%s7173_s27 + $0x858] sm:$0xf0]  ;;  %v6667_v14 = vld [vmem:[%s7173_s27 + $0x8d4] sm:$0xf] }
 0x1a7   : > { %3964 = vmatpush.bf16.msrb.mxu0 %v5141_v6  ;;  %v5309_v6 = vor.u32 %v6627_v20, %v5306_v11  ;;  %v3738_v36 = vpop.f32.mrf.mxu2  ;;  %v5605_v16 = vor.u32 %v6701_v61, %v5602_v62  ;;  %v6683_v38 = vld [vmem:[%s7173_s27 + $0x954] sm:$0xf]  ;;  %v5530_v17 = vld [vmem:[%s7173_s27 + $0x958] sm:$0xf0]  ;;  %v6677_v43 = vld [vmem:[%s7173_s27 + $0x924] sm:$0xf] }
 0x1a8   : > { %3977 = vmatpush.bf16.msrb.mxu1 %v5205_v40  ;;  %v6625_v40 = vld [vmem:[%s7173_s27 + $0x784] sm:$0xf]  ;;  %v3751_v18 = vpop.f32.mrf.mxu3  ;;  %v6699_v19 = vld [vmem:[%s7173_s27 + $0x9d4] sm:$0xf]  ;;  %v5594_v20 = vld [vmem:[%s7173_s27 + $0x9d8] sm:$0xf0] }
 0x1a9   : > { %3990 = vmatpush.bf16.msrb.mxu2 %v5269_v35  ;;  %v5298_v35 = vld [vmem:[%s7173_s27 + $0x788] sm:$0xf0] }
 0x1aa   : > { %4003 = vmatpush.bf16.msrb.mxu3 %v5333_v27  ;;  %v6671_v27 = vld [vmem:[%s7173_s27 + $0x8f4] sm:$0xf]  ;;  %v5301_v51 = vor.u32 %v6625_v40, %v5298_v35  ;;  %v5570_v61 = vld [vmem:[%s7173_s27 + $0x9a8] sm:$0xf0] }
 0x1ab   : > { %3965 = vmatpush.bf16.msrb.mxu0 %v5133_v44  ;;  %v5237_v44 = vor.u32 %v6609_v30, %v5234_v33  ;;  %v5485_v52 = vor.u32 %v6671_v27, %v5482_v42  ;;  %v5586_v30 = vld [vmem:[%s7173_s27 + $0x9c8] sm:$0xf0]  ;;  %v5397_v33 = vor.u32 %v6649_v21, %v5394_v22  ;;  %v6663_v27 = vld [vmem:[%s7173_s27 + $0x8b4] sm:$0xf]  ;;  %v5450_v42 = vld [vmem:[%s7173_s27 + $0x8b8] sm:$0xf0] }
 0x1ac   : > { %3978 = vmatpush.bf16.msrb.mxu1 %v5197_v45  ;;  %v6703_v45 = vld [vmem:[%s7173_s27 + $0x9f4] sm:$0xf]  ;;  %v5589_v18 = vor.u32 %v6697_v26, %v5586_v30  ;;  %v6641_v21 = vld [vmem:[%s7173_s27 + $0x804] sm:$0xf]  ;;  %v5362_v22 = vld [vmem:[%s7173_s27 + $0x808] sm:$0xf0] }
 0x1ad   : > { %3991 = vmatpush.bf16.msrb.mxu2 %v5261_v50  ;;  %v5610_v50 = vld [vmem:[%s7173_s27 + $0x9f8] sm:$0xf0]  ;;  %v5490_v26 = vld [vmem:[%s7173_s27 + $0x908] sm:$0xf0]  ;;  %v6689_v30 = vld [vmem:[%s7173_s27 + $0x984] sm:$0xf] }
 0x1ae   : > { %4004 = vmatpush.bf16.msrb.mxu3 %v5325_v53  ;;  %v5549_v53 = vor.u32 %v6687_v56, %v5546_v28  ;;  %v5613_v57 = vor.u32 %v6703_v45, %v5610_v50  ;;  %v6679_v56 = vld [vmem:[%s7173_s27 + $0x934] sm:$0xf]  ;;  %v5453_v45 = vor.u32 %v6663_v27, %v5450_v42  ;;  %v5738_v27 = vld [vmem:[%s7173_s27 + $0xaf8] sm:$0xf0] }
 0x1af   : > { %3966 = vmatpush.bf16.msrb.mxu0 %v5125_v58  ;;  %v5413_v58 = vor.u32 %v6653_v54, %v5410_v55  ;;  %v6695_v28 = vld [vmem:[%s7173_s27 + $0x9b4] sm:$0xf]  ;;  %v5442_v55 = vld [vmem:[%s7173_s27 + $0x8a8] sm:$0xf0] }
 0x1b0   : > { %3979 = vmatpush.bf16.msrb.mxu1 %v5189_v32  ;;  %v5541_v32 = vor.u32 %v6685_v25, %v5538_v60  ;;  %v6693_v60 = vld [vmem:[%s7173_s27 + $0x9a4] sm:$0xf] }
 0x1b1   : > { %3992 = vmatpush.bf16.msrb.mxu2 %v5253_v4  ;;  %v6651_v4 = vld [vmem:[%s7173_s27 + $0x854] sm:$0xf] }
 0x1b2   : > { %4005 = vmatpush.bf16.msrb.mxu3 %v5317_v8  ;;  %v5466_v8 = vld [vmem:[%s7173_s27 + $0x8d8] sm:$0xf0] }
 0x1b3   : > { %3967 = vmatpush.bf16.msrb.mxu0 %v5117_v12  ;;  %v5469_v11 = vor.u32 %v6667_v14, %v5466_v8  ;;  %v5533_v12 = vor.u32 %v6683_v38, %v5530_v17  ;;  %v6643_v14 = vld [vmem:[%s7173_s27 + $0x814] sm:$0xf]  ;;  %v5573_v38 = vor.u32 %v6693_v60, %v5570_v61  ;;  %v5434_v17 = vld [vmem:[%s7173_s27 + $0x898] sm:$0xf0] }
 0x1b4   : > { %3980 = vmatpush.bf16.msrb.mxu1 %v5181_v23  ;;  %v5458_v23 = vld [vmem:[%s7173_s27 + $0x8c8] sm:$0xf0]  ;;  %v6659_v8 = vld [vmem:[%s7173_s27 + $0x894] sm:$0xf] }
 0x1b5   : > { %3993 = vmatpush.bf16.msrb.mxu2 %v5245_v15  ;;  %v6681_v15 = vld [vmem:[%s7173_s27 + $0x944] sm:$0xf] }
 0x1b6   : > { %4006 = vmatpush.bf16.msrb.mxu3 %v5309_v6  ;;  %v5525_v36 = vor.u32 %v6681_v15, %v5522_v24  ;;  %v5426_v15 = vld [vmem:[%s7173_s27 + $0x888] sm:$0xf0]  ;;  %v6673_v24 = vld [vmem:[%s7173_s27 + $0x904] sm:$0xf] }
 0x1b7   : > { %3968 = vmatpush.bf16.msrb.mxu0 %v5109_v41 }
 0x1b8   : > { %3981 = vmatpush.bf16.msrb.mxu1 %v5173_v29  ;;  %v3775_v40 = vpop.f32.mrf.mxu1  ;;  %v5578_v29 = vld [vmem:[%s7173_s27 + $0x9b8] sm:$0xf0] }
 0x1b9   : > { %3994 = vmatpush.bf16.msrb.mxu2 %v5237_v44  ;;  %v5389_v44 = vor.u32 %v6647_v37, %v5386_v39  ;;  %v5365_v39 = vor.u32 %v6641_v21, %v5362_v22  ;;  %v6745_v21 = vld [vmem:[%s7173_s27 + $0xb44] sm:$0xf]  ;;  %v5778_v22 = vld [vmem:[%s7173_s27 + $0xb48] sm:$0xf0] }
 0x1ba   : > { %4007 = vmatpush.bf16.msrb.mxu3 %v5301_v51  ;;  %3969 = vmatmul.bf16.vlgmr.msrb.gmra.mxu0 %v7487_v46  ;;  %v5405_v46 = vor.u32 %v6651_v4, %v5402_v7  ;;  %v6645_v51 = vld [vmem:[%s7173_s27 + $0x824] sm:$0xf] }
 0x1bb   : > { %4013 = vmatpush.bf16.msra.mxu0 %v5421_v34  ;;  %3982 = vmatmul.bf16.vlgmr.msrb.gmra.mxu1 %v7491_v48  ;;  %v5597_v48 = vor.u32 %v6699_v19, %v5594_v20  ;;  %v5378_v34 = vld [vmem:[%s7173_s27 + $0x828] sm:$0xf0]  ;;  %v6675_v19 = vld [vmem:[%s7173_s27 + $0x914] sm:$0xf]  ;;  %v5498_v20 = vld [vmem:[%s7173_s27 + $0x918] sm:$0xf0] }
 0x1bc   : > { %4026 = vmatpush.bf16.msra.mxu1 %v5485_v52  ;;  %3995 = vmatmul.bf16.vlgmr.msrb.gmra.mxu2 %v7489_v47  ;;  %v6665_v47 = vld [vmem:[%s7173_s27 + $0x8c4] sm:$0xf] }
 0x1bd   : > { %4039 = vmatpush.bf16.msra.mxu2 %v5549_v53  ;;  %4008 = vmatmul.bf16.vlgmr.msrb.gmra.mxu3 %v7493_v49  ;;  %v3762_v49 = vpop.f32.mrf.mxu0  ;;  %v5461_v35 = vor.u32 %v6665_v47, %v5458_v23  ;;  %v6661_v52 = vld [vmem:[%s7173_s27 + $0x8a4] sm:$0xf]  ;;  %v5581_v53 = vor.u32 %v6695_v28, %v5578_v29  ;;  %v5437_v47 = vor.u32 %v6659_v8, %v5434_v17  ;;  %v5866_v28 = vld [vmem:[%s7173_s27 + $0xbf8] sm:$0xf0]  ;;  %v6763_v8 = vld [vmem:[%s7173_s27 + $0xbd4] sm:$0xf] }
 0x1be   : > { %4052 = vmatpush.bf16.msra.mxu3 %v5613_v57  ;;  %v3763_v6 = vadd.f32 %v3762_v49, %v8049_v31  ;;  %v5514_v31 = vld [vmem:[%s7173_s27 + $0x938] sm:$0xf0]  ;;  %v5506_v57 = vld [vmem:[%s7173_s27 + $0x928] sm:$0xf0]  ;;  %v5445_v4 = vor.u32 %v6661_v52, %v5442_v55  ;;  %v6657_v23 = vld [vmem:[%s7173_s27 + $0x884] sm:$0xf] }
 0x1bf   : > { %4014 = vmatpush.bf16.msra.mxu0 %v5413_v58  ;;  %v5517_v50 = vor.u32 %v6679_v56, %v5514_v31  ;;  %v3788_v54 = vpop.f32.mrf.mxu2  ;;  %v5381_v58 = vor.u32 %v6645_v51, %v5378_v34  ;;  %v5509_v7 = vor.u32 %v6677_v43, %v5506_v57  ;;  %v5429_v42 = vor.u32 %v6657_v23, %v5426_v15  ;;  %v6767_v31 = vld [vmem:[%s7173_s27 + $0xbf4] sm:$0xf]  ;;  %v6717_v51 = vld [vmem:[%s7173_s27 + $0xa64] sm:$0xf]  ;;  %v5666_v34 = vld [vmem:[%s7173_s27 + $0xa68] sm:$0xf0] }
 0x1c0   : > { %4027 = vmatpush.bf16.msra.mxu1 %v5477_v63  ;;  %v3776_v41 = vadd.f32 %v3775_v40, %v3763_v6  ;;  %v3801_v25 = vpop.f32.mrf.mxu3  ;;  %v3777_v63 = vpop.f32.mrf.mxu1  ;;  %v5554_v6 = vld [vmem:[%s7173_s27 + $0x988] sm:$0xf0]  ;;  %v6719_v40 = vld [vmem:[%s7173_s27 + $0xa74] sm:$0xf]  ;;  %v5493_v56 = vor.u32 %v6673_v24, %v5490_v26  ;;  %v6733_v52 = vld [vmem:[%s7173_s27 + $0xae4] sm:$0xf] }
 0x1c1   : > { %4040 = vmatpush.bf16.msra.mxu2 %v5541_v32  ;;  %v5557_v29 = vor.u32 %v6689_v30, %v5554_v6  ;;  %v6749_v55 = vld [vmem:[%s7173_s27 + $0xb64] sm:$0xf]  ;;  %v5794_v43 = vld [vmem:[%s7173_s27 + $0xb68] sm:$0xf0]  ;;  %v6731_v63 = vld [vmem:[%s7173_s27 + $0xad4] sm:$0xf] }
 0x1c2   : > { %4053 = vmatpush.bf16.msra.mxu3 %v5605_v16  ;;  %v3789_v59 = vadd.f32 %v3788_v54, %v3776_v41  ;;  %v5370_v16 = vld [vmem:[%s7173_s27 + $0x818] sm:$0xf0]  ;;  %v5730_v54 = vld [vmem:[%s7173_s27 + $0xae8] sm:$0xf0]  ;;  %v6765_v57 = vld [vmem:[%s7173_s27 + $0xbe4] sm:$0xf]  ;;  %v5797_v61 = vor.u32 %v6749_v55, %v5794_v43 }
 0x1c3   : > { %4015 = vmatpush.bf16.msra.mxu0 %v5405_v46  ;;  %v6691_v46 = vld [vmem:[%s7173_s27 + $0x994] sm:$0xf]  ;;  %v5802_v41 = vld [vmem:[%s7173_s27 + $0xb78] sm:$0xf0]  ;;  %v5733_v60 = vor.u32 %v6733_v52, %v5730_v54  ;;  %v6713_v17 = vld [vmem:[%s7173_s27 + $0xa44] sm:$0xf] }
 0x1c4   : > { %4028 = vmatpush.bf16.msra.mxu1 %v5469_v11  ;;  %v8120_v32 = vadd.f32 %v3801_v25, %v3789_v59  ;;  %v5562_v11 = vld [vmem:[%s7173_s27 + $0x998] sm:$0xf0]  ;;  %v5858_v59 = vld [vmem:[%s7173_s27 + $0xbe8] sm:$0xf0]  ;;  %v5669_v25 = vor.u32 %v6717_v51, %v5666_v34  ;;  %v6711_v26 = vld [vmem:[%s7173_s27 + $0xa34] sm:$0xf] }
 0x1c5   : > { %4041 = vmatpush.bf16.msra.mxu2 %v5533_v12  ;;  %v3764_v62 = vpop.f32.mrf.mxu0  ;;  %v5373_v12 = vor.u32 %v6643_v14, %v5370_v16  ;;  %v5565_v49 = vor.u32 %v6691_v46, %v5562_v11  ;;  %v6747_v14 = vld [vmem:[%s7173_s27 + $0xb54] sm:$0xf]  ;;  %v5786_v16 = vld [vmem:[%s7173_s27 + $0xb58] sm:$0xf0]  ;;  %v5650_v46 = vld [vmem:[%s7173_s27 + $0xa48] sm:$0xf0] }
 0x1c6   : > { %4054 = vmatpush.bf16.msra.mxu3 %v5597_v48  ;;  %v5501_v48 = vor.u32 %v6675_v19, %v5498_v20  ;;  %v6715_v62 = vld [vmem:[%s7173_s27 + $0xa54] sm:$0xf]  ;;  %v5789_v20 = vor.u32 %v6747_v14, %v5786_v16  ;;  %v6944_v11 = vld [vmem:[%s7179_s5] sm:$0x3]  ;;  %v5653_v23 = vor.u32 %v6713_v17, %v5650_v46  ;;  %v5642_v30 = vld [vmem:[%s7173_s27 + $0xa38] sm:$0xf0] }
 0x1c7   : > { %4016 = vmatpush.bf16.msra.mxu0 %v5397_v33  ;;  %v3790_v33 = vpop.f32.mrf.mxu2  ;;  %v6727_v6 = vld [vmem:[%s7173_s27 + $0xab4] sm:$0xf]  ;;  %v5698_v51 = vld [vmem:[%s7173_s27 + $0xaa8] sm:$0xf0]  ;;  %v6741_v34 = vld [vmem:[%s7173_s27 + $0xb24] sm:$0xf] }
 0x1c8   : > { %4029 = vmatpush.bf16.msra.mxu1 %v5461_v35  ;;  %v5674_v35 = vld [vmem:[%s7173_s27 + $0xa78] sm:$0xf0]  ;;  %v3803_v37 = vpop.f32.mrf.mxu3  ;;  %v5762_v52 = vld [vmem:[%s7173_s27 + $0xb28] sm:$0xf0]  ;;  %v6757_v55 = vld [vmem:[%s7173_s27 + $0xba4] sm:$0xf] }
 0x1c9   : > { %4042 = vmatpush.bf16.msra.mxu2 %v5525_v36  ;;  %v6735_v36 = vld [vmem:[%s7173_s27 + $0xaf4] sm:$0xf]  ;;  %v5826_v43 = vld [vmem:[%s7173_s27 + $0xba8] sm:$0xf0]  ;;  %v5690_v14 = vld [vmem:[%s7173_s27 + $0xa98] sm:$0xf0] }
 0x1ca   : > { %4055 = vmatpush.bf16.msra.mxu3 %v5589_v18  ;;  %v6751_v18 = vld [vmem:[%s7173_s27 + $0xb74] sm:$0xf] }
 0x1cb   : > { %4017 = vmatpush.bf16.msra.mxu0 %v5389_v44  ;;  %v5677_v44 = vor.u32 %v6719_v40, %v5674_v35  ;;  %v6743_v37 = vld [vmem:[%s7173_s27 + $0xb34] sm:$0xf] }
 0x1cc   : > { %4030 = vmatpush.bf16.msra.mxu1 %v5453_v45  ;;  %v5741_v45 = vor.u32 %v6735_v36, %v5738_v27  ;;  %v5706_v36 = vld [vmem:[%s7173_s27 + $0xab8] sm:$0xf0]  ;;  %v6759_v27 = vld [vmem:[%s7173_s27 + $0xbb4] sm:$0xf] }
 0x1cd   : > { %4043 = vmatpush.bf16.msra.mxu2 %v5517_v50  ;;  %v5805_v50 = vor.u32 %v6751_v18, %v5802_v41  ;;  %v5834_v18 = vld [vmem:[%s7173_s27 + $0xbb8] sm:$0xf0]  ;;  %v6739_v16 = vld [vmem:[%s7173_s27 + $0xb14] sm:$0xf] }
 0x1ce   : > { %4056 = vmatpush.bf16.msra.mxu3 %v5581_v53  ;;  %v5869_v53 = vor.u32 %v6767_v31, %v5866_v28  ;;  %v6709_v28 = vld [vmem:[%s7173_s27 + $0xa24] sm:$0xf] }
 0x1cf   : > { %4018 = vmatpush.bf16.msra.mxu0 %v5381_v58  ;;  %v5658_v58 = vld [vmem:[%s7173_s27 + $0xa58] sm:$0xf0] }
 0x1d0   : > { %4031 = vmatpush.bf16.msra.mxu1 %v5445_v4  ;;  %v5861_v4 = vor.u32 %v6765_v57, %v5858_v59 }
 0x1d1   : > { %4044 = vmatpush.bf16.msra.mxu2 %v5509_v7  ;;  %v5722_v7 = vld [vmem:[%s7173_s27 + $0xad8] sm:$0xf0] }
 0x1d2   : > { %4057 = vmatpush.bf16.msra.mxu3 %v5573_v38  ;;  %v5850_v38 = vld [vmem:[%s7173_s27 + $0xbd8] sm:$0xf0]  ;;  %v5725_v19 = vor.u32 %v6731_v63, %v5722_v7  ;;  %v6723_v63 = vld [vmem:[%s7173_s27 + $0xa94] sm:$0xf]  ;;  %v5829_v7 = vor.u32 %v6757_v55, %v5826_v43 }
 0x1d3   : > { %4019 = vmatpush.bf16.msra.mxu0 %v5373_v12  ;;  %v5853_v12 = vor.u32 %v6763_v8, %v5850_v38  ;;  %v5754_v8 = vld [vmem:[%s7173_s27 + $0xb18] sm:$0xf0]  ;;  %v6755_v38 = vld [vmem:[%s7173_s27 + $0xb94] sm:$0xf]  ;;  %v5693_v46 = vor.u32 %v6723_v63, %v5690_v14  ;;  %v5906_v14 = vld [vmem:[%s7173_s27 + $0xc48] sm:$0xf0] }
 0x1d4   : > { %4032 = vmatpush.bf16.msra.mxu1 %v5437_v47  ;;  %v6761_v47 = vld [vmem:[%s7173_s27 + $0xbc4] sm:$0xf]  ;;  %v5914_v55 = vld [vmem:[%s7173_s27 + $0xc58] sm:$0xf0]  ;;  %v6795_v43 = vld [vmem:[%s7173_s27 + $0xcd4] sm:$0xf] }
 0x1d5   : > { %4045 = vmatpush.bf16.msra.mxu2 %v5501_v48  ;;  %v5842_v48 = vld [vmem:[%s7173_s27 + $0xbc8] sm:$0xf0] }
 0x1d6   : > { %4058 = vmatpush.bf16.msra.mxu3 %v5565_v49  ;;  %v5781_v49 = vor.u32 %v6745_v21, %v5778_v22  ;;  %v5845_v35 = vor.u32 %v6761_v47, %v5842_v48  ;;  %v5746_v22 = vld [vmem:[%s7173_s27 + $0xb08] sm:$0xf0]  ;;  %v6753_v47 = vld [vmem:[%s7173_s27 + $0xb84] sm:$0xf] }
 0x1d7   : > { %4020 = vmatpush.bf16.msra.mxu0 %v5365_v39  ;;  %v3814_v15 = vpop.f32.mrf.mxu0  ;;  %v5770_v39 = vld [vmem:[%s7173_s27 + $0xb38] sm:$0xf0]  ;;  %v5810_v48 = vld [vmem:[%s7173_s27 + $0xb88] sm:$0xf0] }
 0x1d8   : > { %4033 = vmatpush.bf16.msra.mxu1 %v5429_v42  ;;  %v3827_v40 = vpop.f32.mrf.mxu1  ;;  %v5645_v42 = vor.u32 %v6711_v26, %v5642_v30  ;;  %v5773_v31 = vor.u32 %v6743_v37, %v5770_v39  ;;  %v5994_v30 = vld [vmem:[%s7173_s27 + $0xcf8] sm:$0xf0]  ;;  %v5813_v39 = vor.u32 %v6753_v47, %v5810_v48  ;;  %v6807_v47 = vld [vmem:[%s7173_s27 + $0xd34] sm:$0xf] }
 0x1d9   : > { %4046 = vmatpush.bf16.msra.mxu2 %v5493_v56  ;;  %v5709_v56 = vor.u32 %v6727_v6, %v5706_v36  ;;  %v6815_v6 = vld [vmem:[%s7173_s27 + $0xd74] sm:$0xf]  ;;  %v6122_v37 = vld [vmem:[%s7173_s27 + $0xdf8] sm:$0xf0] }
 0x1da   : > { %4059 = vmatpush.bf16.msra.mxu3 %v5557_v29  ;;  %4021 = vmatmul.bf16.vlgmr.msra.gmra.mxu0 %v7576_v5  ;;  %v5661_v5 = vor.u32 %v6715_v62, %v5658_v58  ;;  %v5634_v29 = vld [vmem:[%s7173_s27 + $0xa28] sm:$0xf0]  ;;  %v6707_v62 = vld [vmem:[%s7173_s27 + $0xa14] sm:$0xf]  ;;  %v5626_v58 = vld [vmem:[%s7173_s27 + $0xa18] sm:$0xf0] }
 0x1db   : > { %4065 = vmatpush.bf16.msrb.mxu0 %v5677_v44  ;;  %4034 = vmatmul.bf16.vlgmr.msra.gmra.mxu1 %v7582_v10  ;;  %v754_v10 = vperm.slane %v6944_v11, 1  ;;  %v6725_v44 = vld [vmem:[%s7173_s27 + $0xaa4] sm:$0xf]  ;;  %v5637_v57 = vor.u32 %v6709_v28, %v5634_v29  ;;  %v5629_v17 = vor.u32 %v6707_v62, %v5626_v58  ;;  %v6831_v36 = vld [vmem:[%s7173_s27 + $0xdf4] sm:$0xf] }
 0x1dc   : > { %4078 = vmatpush.bf16.msrb.mxu1 %v5741_v45  ;;  %4047 = vmatmul.bf16.vlgmr.msra.gmra.mxu2 %v7580_v9  ;;  %v6729_v9 = vld [vmem:[%s7173_s27 + $0xac4] sm:$0xf]  ;;  %v6125_v28 = vor.u32 %v6831_v36, %v6122_v37  ;;  %v5986_v29 = vld [vmem:[%s7173_s27 + $0xce8] sm:$0xf0]  ;;  %v6827_v62 = vld [vmem:[%s7173_s27 + $0xdd4] sm:$0xf] }
 0x1dd   : > { %4091 = vmatpush.bf16.msrb.mxu2 %v5805_v50  ;;  %4060 = vmatmul.bf16.vlgmr.msra.gmra.mxu3 %v7584_v13  ;;  %v5714_v13 = vld [vmem:[%s7173_s27 + $0xac8] sm:$0xf0]  ;;  %v3815_v33 = vadd.f32 %v3814_v15, %v754_v10  ;;  %v5837_v50 = vor.u32 %v6759_v27, %v5834_v18  ;;  %v6721_v11 = vld [vmem:[%s7173_s27 + $0xa84] sm:$0xf]  ;;  %v6783_v15 = vld [vmem:[%s7173_s27 + $0xc74] sm:$0xf] }
 0x1de   : > { %4104 = vmatpush.bf16.msrb.mxu3 %v5869_v53  ;;  %v5717_v24 = vor.u32 %v6729_v9, %v5714_v13  ;;  %v5757_v9 = vor.u32 %v6739_v16, %v5754_v8  ;;  %v5682_v10 = vld [vmem:[%s7173_s27 + $0xa88] sm:$0xf0]  ;;  %v6106_v58 = vld [vmem:[%s7173_s27 + $0xdd8] sm:$0xf0]  ;;  %v6809_v8 = vld [vmem:[%s7173_s27 + $0xd44] sm:$0xf] }
 0x1df   : > { %4066 = vmatpush.bf16.msrb.mxu0 %v5669_v25  ;;  %v3828_v41 = vadd.f32 %v3827_v40, %v3815_v33  ;;  %v3840_v45 = vpop.f32.mrf.mxu2  ;;  %v3816_v25 = vpop.f32.mrf.mxu0  ;;  %v6058_v33 = vld [vmem:[%s7173_s27 + $0xd78] sm:$0xf0]  ;;  %v5685_v40 = vor.u32 %v6721_v11, %v5682_v10  ;;  %v5970_v16 = vld [vmem:[%s7173_s27 + $0xcc8] sm:$0xf0]  ;;  %v6791_v10 = vld [vmem:[%s7173_s27 + $0xcb4] sm:$0xf] }
 0x1e0   : > { %4079 = vmatpush.bf16.msrb.mxu1 %v5733_v60  ;;  %v3853_v54 = vpop.f32.mrf.mxu3  ;;  %v5701_v60 = vor.u32 %v6725_v44, %v5698_v51  ;;  %v6813_v44 = vld [vmem:[%s7173_s27 + $0xd64] sm:$0xf]  ;;  %v6114_v51 = vld [vmem:[%s7173_s27 + $0xde8] sm:$0xf0]  ;;  %v5978_v25 = vld [vmem:[%s7173_s27 + $0xcd8] sm:$0xf0] }
 0x1e1   : > { %4092 = vmatpush.bf16.msrb.mxu2 %v5797_v61  ;;  %v3841_v53 = vadd.f32 %v3840_v45, %v3828_v41  ;;  %v5765_v61 = vor.u32 %v6741_v34, %v5762_v52  ;;  %v6061_v41 = vor.u32 %v6815_v6, %v6058_v33  ;;  %v6050_v45 = vld [vmem:[%s7173_s27 + $0xd68] sm:$0xf0]  ;;  %v5981_v63 = vor.u32 %v6795_v43, %v5978_v25  ;;  %v5898_v11 = vld [vmem:[%s7173_s27 + $0xc38] sm:$0xf0]  ;;  %v6789_v33 = vld [vmem:[%s7173_s27 + $0xca4] sm:$0xf] }
 0x1e2   : > { %4105 = vmatpush.bf16.msrb.mxu3 %v5861_v4  ;;  %v3829_v4 = vpop.f32.mrf.mxu1  ;;  %v6026_v48 = vld [vmem:[%s7173_s27 + $0xd38] sm:$0xf0]  ;;  %v5890_v6 = vld [vmem:[%s7173_s27 + $0xc28] sm:$0xf0]  ;;  %v6805_v37 = vld [vmem:[%s7173_s27 + $0xd24] sm:$0xf] }
 0x1e3   : > { %4067 = vmatpush.bf16.msrb.mxu0 %v5661_v5  ;;  %v8191_v59 = vadd.f32 %v3853_v54, %v3841_v53  ;;  %v5818_v5 = vld [vmem:[%s7173_s27 + $0xb98] sm:$0xf0]  ;;  %v6053_v53 = vor.u32 %v6813_v44, %v6050_v45  ;;  %v6779_v54 = vld [vmem:[%s7173_s27 + $0xc54] sm:$0xf]  ;;  %v5954_v36 = vld [vmem:[%s7173_s27 + $0xca8] sm:$0xf0] }
 0x1e4   : > { %4080 = vmatpush.bf16.msrb.mxu1 %v5725_v19  ;;  %v6705_v19 = vld [vmem:[%s7173_s27 + $0xa04] sm:$0xf]  ;;  %v5821_v21 = vor.u32 %v6755_v38, %v5818_v5  ;;  %v6034_v38 = vld [vmem:[%s7173_s27 + $0xd48] sm:$0xf0]  ;;  %v6771_v45 = vld [vmem:[%s7173_s27 + $0xc14] sm:$0xf] }
 0x1e5   : > { %4093 = vmatpush.bf16.msrb.mxu2 %v5789_v20  ;;  %v5618_v20 = vld [vmem:[%s7173_s27 + $0xa08] sm:$0xf0]  ;;  %v6825_v5 = vld [vmem:[%s7173_s27 + $0xdc4] sm:$0xf]  ;;  %v6819_v43 = vld [vmem:[%s7173_s27 + $0xd94] sm:$0xf] }
 0x1e6   : > { %4106 = vmatpush.bf16.msrb.mxu3 %v5853_v12  ;;  %v6737_v12 = vld [vmem:[%s7173_s27 + $0xb04] sm:$0xf]  ;;  %v5621_v26 = vor.u32 %v6705_v19, %v5618_v20 }
 0x1e7   : > { %4068 = vmatpush.bf16.msrb.mxu0 %v5653_v23  ;;  %v3842_v13 = vpop.f32.mrf.mxu2 }
 0x1e8   : > { %4081 = vmatpush.bf16.msrb.mxu1 %v5717_v24  ;;  %v3855_v23 = vpop.f32.mrf.mxu3  ;;  %v5930_v24 = vld [vmem:[%s7173_s27 + $0xc78] sm:$0xf0] }
 0x1e9   : > { %4094 = vmatpush.bf16.msrb.mxu2 %v5781_v49  ;;  %v6799_v49 = vld [vmem:[%s7173_s27 + $0xcf4] sm:$0xf]  ;;  %v5933_v27 = vor.u32 %v6783_v15, %v5930_v24  ;;  %v6090_v15 = vld [vmem:[%s7173_s27 + $0xdb8] sm:$0xf0] }
 0x1ea   : > { %4107 = vmatpush.bf16.msrb.mxu3 %v5845_v35  ;;  %v5749_v35 = vor.u32 %v6737_v12, %v5746_v22  ;;  %v5997_v18 = vor.u32 %v6799_v49, %v5994_v30  ;;  %v5962_v22 = vld [vmem:[%s7173_s27 + $0xcb8] sm:$0xf0]  ;;  %v6823_v23 = vld [vmem:[%s7173_s27 + $0xdb4] sm:$0xf]  ;;  %v6773_v30 = vld [vmem:[%s7173_s27 + $0xc24] sm:$0xf] }
 0x1eb   : > { %4069 = vmatpush.bf16.msrb.mxu0 %v5645_v42  ;;  %v6781_v42 = vld [vmem:[%s7173_s27 + $0xc64] sm:$0xf] }
 0x1ec   : > { %4082 = vmatpush.bf16.msrb.mxu1 %v5709_v56  ;;  %v5922_v56 = vld [vmem:[%s7173_s27 + $0xc68] sm:$0xf0] }
 0x1ed   : > { %4095 = vmatpush.bf16.msrb.mxu2 %v5773_v31  ;;  %v6797_v31 = vld [vmem:[%s7173_s27 + $0xce4] sm:$0xf]  ;;  %v5925_v34 = vor.u32 %v6781_v42, %v5922_v56  ;;  %v6082_v42 = vld [vmem:[%s7173_s27 + $0xda8] sm:$0xf0]  ;;  %v5893_v56 = vor.u32 %v6773_v30, %v5890_v6 }
 0x1ee   : > { %4108 = vmatpush.bf16.msrb.mxu3 %v5837_v50  ;;  %v6829_v50 = vld [vmem:[%s7173_s27 + $0xde4] sm:$0xf]  ;;  %v5989_v52 = vor.u32 %v6797_v31, %v5986_v29  ;;  %v5957_v29 = vor.u32 %v6789_v33, %v5954_v36  ;;  %v6370_v6 = vld [vmem:[%s7173_s27 + $0xfe8] sm:$0xf0]  ;;  %v6843_v36 = vld [vmem:[%s7173_s27 + $0xe54] sm:$0xf] }
 0x1ef   : > { %4070 = vmatpush.bf16.msrb.mxu0 %v5637_v57  ;;  %v6117_v57 = vor.u32 %v6829_v50, %v6114_v51  ;;  %v5882_v50 = vld [vmem:[%s7173_s27 + $0xc18] sm:$0xf0]  ;;  %v6787_v51 = vld [vmem:[%s7173_s27 + $0xc94] sm:$0xf]  ;;  %v6893_v30 = vld [vmem:[%s7173_s27 + $0xfe4] sm:$0xf] }
 0x1f0   : > { %4083 = vmatpush.bf16.msrb.mxu1 %v5701_v60  ;;  %v6811_v60 = vld [vmem:[%s7173_s27 + $0xd54] sm:$0xf]  ;;  %v5885_v25 = vor.u32 %v6771_v45, %v5882_v50  ;;  %v6362_v45 = vld [vmem:[%s7173_s27 + $0xfd8] sm:$0xf0] }
 0x1f1   : > { %4096 = vmatpush.bf16.msrb.mxu2 %v5765_v61  ;;  %v6042_v61 = vld [vmem:[%s7173_s27 + $0xd58] sm:$0xf0]  ;;  %v6948_v50 = vld [vmem:[#allocation1 + $0x1b] sm:$0xff] }
 0x1f2   : > { %4109 = vmatpush.bf16.msrb.mxu3 %v5829_v7  ;;  %v6045_v4 = vor.u32 %v6811_v60, %v6042_v61  ;;  %v6777_v7 = vld [vmem:[%s7173_s27 + $0xc44] sm:$0xf]  ;;  %v5874_v61 = vld [vmem:[%s7173_s27 + $0xc08] sm:$0xf0] }
 0x1f3   : > { %4071 = vmatpush.bf16.msrb.mxu0 %v5629_v17  ;;  %v5909_v17 = vor.u32 %v6777_v7, %v5906_v14  ;;  %v6769_v60 = vld [vmem:[%s7173_s27 + $0xc04] sm:$0xf] }
 0x1f4   : > { %4084 = vmatpush.bf16.msrb.mxu1 %v5693_v46  ;;  %v6037_v46 = vor.u32 %v6809_v8, %v6034_v38  ;;  %v6847_v38 = vld [vmem:[%s7173_s27 + $0xe74] sm:$0xf] }
 0x1f5   : > { %4097 = vmatpush.bf16.msrb.mxu2 %v5757_v9  ;;  %v6775_v9 = vld [vmem:[%s7173_s27 + $0xc34] sm:$0xf] }
 0x1f6   : > { %4110 = vmatpush.bf16.msrb.mxu3 %v5821_v21  ;;  %v5901_v49 = vor.u32 %v6775_v9, %v5898_v11 }
 0x1f7   : > { %4072 = vmatpush.bf16.msrb.mxu0 %v5621_v26  ;;  %v3866_v19 = vpop.f32.mrf.mxu0  ;;  %v6029_v26 = vor.u32 %v6807_v47, %v6026_v48  ;;  %v6845_v48 = vld [vmem:[%s7173_s27 + $0xe64] sm:$0xf] }
 0x1f8   : > { %4085 = vmatpush.bf16.msrb.mxu1 %v5685_v40  ;;  %v3867_v12 = vadd.f32 %v3866_v19, %v8191_v59  ;;  %v3879_v13 = vpop.f32.mrf.mxu1  ;;  %v5965_v59 = vor.u32 %v6791_v10, %v5962_v22  ;;  %v6250_v19 = vld [vmem:[%s7173_s27 + $0xef8] sm:$0xf0]  ;;  %v6895_v10 = vld [vmem:[%s7173_s27 + $0xff4] sm:$0xf] }
 0x1f9   : > { %4098 = vmatpush.bf16.msrb.mxu2 %v5749_v35  ;;  %v6093_v35 = vor.u32 %v6823_v23, %v6090_v15  ;;  %v6178_v23 = vld [vmem:[%s7173_s27 + $0xe68] sm:$0xf0]  ;;  %v6861_v15 = vld [vmem:[%s7173_s27 + $0xee4] sm:$0xf] }
 0x1fa   : > { %4111 = vmatpush.bf16.msrb.mxu3 %v5813_v39  ;;  %4073 = vmatmul.bf16.vlgmr.msrb.gmra.mxu0 %v7643_v0  ;;  %v5917_v0 = vor.u32 %v6779_v54, %v5914_v55  ;;  %v3880_v24 = vadd.f32 %v3879_v13, %v3867_v12  ;;  %v6018_v39 = vld [vmem:[%s7173_s27 + $0xd28] sm:$0xf0]  ;;  %v6803_v54 = vld [vmem:[%s7173_s27 + $0xd14] sm:$0xf]  ;;  %v6010_v55 = vld [vmem:[%s7173_s27 + $0xd18] sm:$0xf0]  ;;  %v6181_v33 = vor.u32 %v6845_v48, %v6178_v23 }
 0x1fb   : > { %4117 = vmatpush.bf16.msra.mxu0 %v5933_v27  ;;  %4086 = vmatmul.bf16.vlgmr.msrb.gmra.mxu1 %v7647_v2  ;;  %v6109_v2 = vor.u32 %v6827_v62, %v6106_v58  ;;  %v6021_v44 = vor.u32 %v6805_v37, %v6018_v39  ;;  %v6013_v58 = vor.u32 %v6803_v54, %v6010_v55  ;;  %v6378_v12 = vld [vmem:[%s7173_s27 + $0xff8] sm:$0xf0]  ;;  %v6859_v39 = vld [vmem:[%s7173_s27 + $0xed4] sm:$0xf]  ;;  %v6162_v54 = vld [vmem:[%s7173_s27 + $0xe48] sm:$0xf0] }
 0x1fc   : > { %4130 = vmatpush.bf16.msra.mxu1 %v5997_v18  ;;  %4099 = vmatmul.bf16.vlgmr.msrb.gmra.mxu2 %v7645_v1  ;;  %v6793_v1 = vld [vmem:[%s7173_s27 + $0xcc4] sm:$0xf]  ;;  %v6170_v37 = vld [vmem:[%s7173_s27 + $0xe58] sm:$0xf0]  ;;  %v6274_v48 = vld [vmem:[%s7173_s27 + $0xf28] sm:$0xf0] }
 0x1fd   : > { %4143 = vmatpush.bf16.msra.mxu2 %v6061_v41  ;;  %4112 = vmatmul.bf16.vlgmr.msrb.gmra.mxu3 %v7649_v3  ;;  %v6098_v3 = vld [vmem:[%s7173_s27 + $0xdc8] sm:$0xf0]  ;;  %v5973_v20 = vor.u32 %v6793_v1, %v5970_v16  ;;  %v6821_v41 = vld [vmem:[%s7173_s27 + $0xda4] sm:$0xf] }
 0x1fe   : > { %4156 = vmatpush.bf16.msra.mxu3 %v6125_v28  ;;  %v6101_v21 = vor.u32 %v6825_v5, %v6098_v3  ;;  %v6002_v1 = vld [vmem:[%s7173_s27 + $0xd08] sm:$0xf0]  ;;  %v6186_v5 = vld [vmem:[%s7173_s27 + $0xe78] sm:$0xf0]  ;;  %v6863_v3 = vld [vmem:[%s7173_s27 + $0xef4] sm:$0xf] }
 0x1ff   : > { %4118 = vmatpush.bf16.msra.mxu0 %v5925_v34  ;;  %v3892_v40 = vpop.f32.mrf.mxu2  ;;  %v3868_v28 = vpop.f32.mrf.mxu0  ;;  %v6066_v16 = vld [vmem:[%s7173_s27 + $0xd88] sm:$0xf0]  ;;  %v6253_v22 = vor.u32 %v6863_v3, %v6250_v19  ;;  %v6857_v55 = vld [vmem:[%s7173_s27 + $0xec4] sm:$0xf]  ;;  %v6871_v3 = vld [vmem:[%s7173_s27 + $0xf34] sm:$0xf] }
 0x200   : > { %4131 = vmatpush.bf16.msra.mxu1 %v5989_v52  ;;  %v3893_v27 = vadd.f32 %v3892_v40, %v3880_v24  ;;  %v3905_v18 = vpop.f32.mrf.mxu3  ;;  %v3881_v34 = vpop.f32.mrf.mxu1  ;;  %v6085_v52 = vor.u32 %v6821_v41, %v6082_v42  ;;  %v6381_v24 = vor.u32 %v6895_v10, %v6378_v12  ;;  %v6234_v41 = vld [vmem:[%s7173_s27 + $0xed8] sm:$0xf0]  ;;  %v6875_v42 = vld [vmem:[%s7173_s27 + $0xf54] sm:$0xf]  ;;  %v6946_v28 = vld [vmem:[#allocation1 + $0x12] sm:$0xff] }
 0x201   : > { %4144 = vmatpush.bf16.msra.mxu2 %v6053_v53  ;;  %v5946_v53 = vld [vmem:[%s7173_s27 + $0xc98] sm:$0xf0]  ;;  %v6237_v34 = vor.u32 %v6859_v39, %v6234_v41  ;;  %v6146_v10 = vld [vmem:[%s7173_s27 + $0xe28] sm:$0xf0]  ;;  %v6853_v12 = vld [vmem:[%s7173_s27 + $0xea4] sm:$0xf] }
 0x202   : > { %4157 = vmatpush.bf16.msra.mxu3 %v6117_v57  ;;  %v8262_v31 = vadd.f32 %v3905_v18, %v3893_v27  ;;  %v6074_v57 = vld [vmem:[%s7173_s27 + $0xd98] sm:$0xf0]  ;;  %v5949_v62 = vor.u32 %v6787_v51, %v5946_v53  ;;  %v6373_v18 = vor.u32 %v6893_v30, %v6370_v6  ;;  %v6173_v51 = vor.u32 %v6843_v36, %v6170_v37  ;;  %v6841_v53 = vld [vmem:[%s7173_s27 + $0xe44] sm:$0xf]  ;;  %v6851_v37 = vld [vmem:[%s7173_s27 + $0xe94] sm:$0xf] }
 0x203   : > { %4119 = vmatpush.bf16.msra.mxu0 %v5917_v0  ;;  %v6785_v0 = vld [vmem:[%s7173_s27 + $0xc84] sm:$0xf]  ;;  %v6077_v14 = vor.u32 %v6819_v43, %v6074_v57  ;;  %v6945_v27 = vld [vmem:[#allocation1] sm:$0xff]  ;;  %v6226_v57 = vld [vmem:[%s7173_s27 + $0xec8] sm:$0xf0] }
 0x204   : > { %4132 = vmatpush.bf16.msra.mxu1 %v5981_v63  ;;  %v5938_v63 = vld [vmem:[%s7173_s27 + $0xc88] sm:$0xf0]  ;;  %v6346_v19 = vld [vmem:[%s7173_s27 + $0xfb8] sm:$0xf0] }
 0x205   : > { %4145 = vmatpush.bf16.msra.mxu2 %v6045_v4  ;;  %v6801_v4 = vld [vmem:[%s7173_s27 + $0xd04] sm:$0xf]  ;;  %v5941_v9 = vor.u32 %v6785_v0, %v5938_v63  ;;  %v6165_v63 = vor.u32 %v6841_v53, %v6162_v54  ;;  %v6138_v36 = vld [vmem:[%s7173_s27 + $0xe18] sm:$0xf0]  ;;  %v6258_v54 = vld [vmem:[%s7173_s27 + $0xf08] sm:$0xf0] }
 0x206   : > { %4158 = vmatpush.bf16.msra.mxu3 %v6109_v2  ;;  %v6817_v2 = vld [vmem:[%s7173_s27 + $0xd84] sm:$0xf]  ;;  %v6005_v11 = vor.u32 %v6801_v4, %v6002_v1  ;;  %v6839_v1 = vld [vmem:[%s7173_s27 + $0xe34] sm:$0xf]  ;;  %v6266_v41 = vld [vmem:[%s7173_s27 + $0xf18] sm:$0xf0] }
 0x207   : > { %4120 = vmatpush.bf16.msra.mxu0 %v5909_v17  ;;  %v3894_v7 = vpop.f32.mrf.mxu2  ;;  %v5877_v17 = vor.u32 %v6769_v60, %v5874_v61  ;;  %v6069_v13 = vor.u32 %v6817_v2, %v6066_v16  ;;  %v6290_v60 = vld [vmem:[%s7173_s27 + $0xf48] sm:$0xf0]  ;;  %v6154_v2 = vld [vmem:[%s7173_s27 + $0xe38] sm:$0xf0]  ;;  %v6855_v16 = vld [vmem:[%s7173_s27 + $0xeb4] sm:$0xf] }
 0x208   : > { %4133 = vmatpush.bf16.msra.mxu1 %v5973_v20  ;;  %v3907_v8 = vpop.f32.mrf.mxu3  ;;  %v6879_v20 = vld [vmem:[%s7173_s27 + $0xf74] sm:$0xf]  ;;  %v6229_v7 = vor.u32 %v6857_v55, %v6226_v57  ;;  %v6865_v53 = vld [vmem:[%s7173_s27 + $0xf04] sm:$0xf]  ;;  %v6322_v57 = vld [vmem:[%s7173_s27 + $0xf88] sm:$0xf0] }
 0x209   : > { %4146 = vmatpush.bf16.msra.mxu2 %v6037_v46  ;;  %v6314_v46 = vld [vmem:[%s7173_s27 + $0xf78] sm:$0xf0] }
 0x20a   : > { %4159 = vmatpush.bf16.msra.mxu3 %v6101_v21  ;;  %v6189_v21 = vor.u32 %v6847_v38, %v6186_v5  ;;  %v6317_v47 = vor.u32 %v6879_v20, %v6314_v46  ;;  %v6218_v5 = vld [vmem:[%s7173_s27 + $0xeb8] sm:$0xf0]  ;;  %v6157_v20 = vor.u32 %v6839_v1, %v6154_v2 }
 0x20b   : > { %4121 = vmatpush.bf16.msra.mxu0 %v5901_v49  ;;  %v6242_v49 = vld [vmem:[%s7173_s27 + $0xee8] sm:$0xf0]  ;;  %v6221_v46 = vor.u32 %v6855_v16, %v6218_v5 }
 0x20c   : > { %4134 = vmatpush.bf16.msra.mxu1 %v5965_v59  ;;  %v6877_v59 = vld [vmem:[%s7173_s27 + $0xf64] sm:$0xf]  ;;  %v6245_v40 = vor.u32 %v6861_v15, %v6242_v49  ;;  %v6338_v49 = vld [vmem:[%s7173_s27 + $0xfa8] sm:$0xf0] }
 0x20d   : > { %4147 = vmatpush.bf16.msra.mxu2 %v6029_v26  ;;  %v6306_v26 = vld [vmem:[%s7173_s27 + $0xf68] sm:$0xf0] }
 0x20e   : > { %4160 = vmatpush.bf16.msra.mxu3 %v6093_v35  ;;  %v6309_v35 = vor.u32 %v6877_v59, %v6306_v26 }
 0x20f   : > { %4122 = vmatpush.bf16.msra.mxu0 %v5893_v56  ;;  %v6298_v56 = vld [vmem:[%s7173_s27 + $0xf58] sm:$0xf0] }
 0x210   : > { %4135 = vmatpush.bf16.msra.mxu1 %v5957_v29  ;;  %v6947_v29 = vld [vmem:[#allocation1 + $0x9] sm:$0xff] }
 0x211   : > { %4148 = vmatpush.bf16.msra.mxu2 %v6021_v44  ;;  %v6891_v44 = vld [vmem:[%s7173_s27 + $0xfd4] sm:$0xf] }
 0x212   : > { %4161 = vmatpush.bf16.msra.mxu3 %v6085_v52  ;;  %v6301_v52 = vor.u32 %v6875_v42, %v6298_v56  ;;  %v6365_v43 = vor.u32 %v6891_v44, %v6362_v45  ;;  %v6883_v42 = vld [vmem:[%s7173_s27 + $0xf94] sm:$0xf]  ;;  %v6330_v56 = vld [vmem:[%s7173_s27 + $0xf98] sm:$0xf0]  ;;  %v6833_v45 = vld [vmem:[%s7173_s27 + $0xe04] sm:$0xf] }
 0x213   : > { %4123 = vmatpush.bf16.msra.mxu0 %v5885_v25  ;;  %v6873_v25 = vld [vmem:[%s7173_s27 + $0xf44] sm:$0xf] }
 0x214   : > { %4136 = vmatpush.bf16.msra.mxu1 %v5949_v62  ;;  %v6889_v62 = vld [vmem:[%s7173_s27 + $0xfc4] sm:$0xf] }
 0x215   : > { %4149 = vmatpush.bf16.msra.mxu2 %v6013_v58  ;;  %v6354_v58 = vld [vmem:[%s7173_s27 + $0xfc8] sm:$0xf0] }
 0x216   : > { %4162 = vmatpush.bf16.msra.mxu3 %v6077_v14  ;;  %v6293_v14 = vor.u32 %v6873_v25, %v6290_v60  ;;  %v6357_v8 = vor.u32 %v6889_v62, %v6354_v58  ;;  %v6261_v62 = vor.u32 %v6865_v53, %v6258_v54 }
 0x217   : > { %4124 = vmatpush.bf16.msra.mxu0 %v5877_v17  ;;  %v3918_v61 = vpop.f32.mrf.mxu0  ;;  %v6887_v17 = vld [vmem:[%s7173_s27 + $0xfb4] sm:$0xf] }
 0x218   : > { %4137 = vmatpush.bf16.msra.mxu1 %v5941_v9  ;;  %v3919_v0 = vadd.f32 %v3918_v61, %v8262_v31  ;;  %v3931_v4 = vpop.f32.mrf.mxu1  ;;  %v6282_v31 = vld [vmem:[%s7173_s27 + $0xf38] sm:$0xf0] }
 0x219   : > { %4150 = vmatpush.bf16.msra.mxu2 %v6005_v11  ;;  %v6285_v9 = vor.u32 %v6871_v3, %v6282_v31  ;;  %v6837_v11 = vld [vmem:[%s7173_s27 + $0xe24] sm:$0xf] }
 0x21a   : > { %4163 = vmatpush.bf16.msra.mxu3 %v6069_v13  ;;  %4125 = vmatmul.bf16.vlgmr.msra.gmra.mxu0 %v6945_v27  ;;  %v3932_v38 = vadd.f32 %v3931_v4, %v3919_v0  ;;  %v6349_v13 = vor.u32 %v6887_v17, %v6346_v19  ;;  %v6149_v26 = vor.u32 %v6837_v11, %v6146_v10  ;;  %v6202_v27 = vld [vmem:[%s7173_s27 + $0xe98] sm:$0xf0]  ;;  %v6951_v4 = vld [vmem:[#allocation1 + $0x36] sm:$0xff] }
 0x21b   : > { %4169 = vmatpush.bf16.msrb.mxu0 %v6189_v21  ;;  %4138 = vmatmul.bf16.vlgmr.msra.gmra.mxu1 %v6947_v29  ;;  %v6205_v29 = vor.u32 %v6851_v37, %v6202_v27  ;;  %v6949_v0 = vld [vmem:[#allocation1 + $0x24] sm:$0xff] }
 0x21c   : > { %4182 = vmatpush.bf16.msrb.mxu1 %v6253_v22  ;;  %4151 = vmatmul.bf16.vlgmr.msra.gmra.mxu2 %v6946_v28  ;;  %v6210_v22 = vld [vmem:[%s7173_s27 + $0xea8] sm:$0xf0] }
 0x21d   : > { %4195 = vmatpush.bf16.msrb.mxu2 %v6317_v47  ;;  %4164 = vmatmul.bf16.vlgmr.msra.gmra.mxu3 %v6948_v50  ;;  %v6869_v47 = vld [vmem:[%s7173_s27 + $0xf24] sm:$0xf]  ;;  %v6130_v50 = vld [vmem:[%s7173_s27 + $0xe08] sm:$0xf0] }
 0x21e   : > { %4208 = vmatpush.bf16.msrb.mxu3 %v6381_v24  ;;  %v6885_v24 = vld [vmem:[%s7173_s27 + $0xfa4] sm:$0xf]  ;;  %v6133_v60 = vor.u32 %v6833_v45, %v6130_v50 }
 0x21f   : > { %4170 = vmatpush.bf16.msrb.mxu0 %v6181_v33  ;;  %v3944_v21 = vpop.f32.mrf.mxu2  ;;  %v3920_v59 = vpop.f32.mrf.mxu0  ;;  %v6213_v33 = vor.u32 %v6853_v12, %v6210_v22  ;;  %v6341_v39 = vor.u32 %v6885_v24, %v6338_v49 }
 0x220   : > { %4183 = vmatpush.bf16.msrb.mxu1 %v6245_v40  ;;  %v3945_v23 = vadd.f32 %v3944_v21, %v3932_v38  ;;  %v3957_v15 = vpop.f32.mrf.mxu3  ;;  %v3933_v30 = vpop.f32.mrf.mxu1  ;;  %v6277_v40 = vor.u32 %v6869_v47, %v6274_v48 }
 0x221   : > { %4196 = vmatpush.bf16.msrb.mxu2 %v6309_v35  ;;  %v6835_v35 = vld [vmem:[%s7173_s27 + $0xe14] sm:$0xf] }
 0x222   : > { %4209 = vmatpush.bf16.msrb.mxu3 %v6373_v18  ;;  %v3958_v6 = vadd.f32 %v3957_v15, %v3945_v23  ;;  %v6867_v18 = vld [vmem:[%s7173_s27 + $0xf14] sm:$0xf]  ;;  %v6141_v28 = vor.u32 %v6835_v35, %v6138_v36 }
 0x223   : > { %4171 = vmatpush.bf16.msrb.mxu0 %v6173_v51  ;;  %v6269_v44 = vor.u32 %v6867_v18, %v6266_v41  ;;  %v6849_v51 = vld [vmem:[%s7173_s27 + $0xe84] sm:$0xf] }
 0x224   : > { %4184 = vmatpush.bf16.msrb.mxu1 %v6237_v34  ;;  %v6333_v34 = vor.u32 %v6883_v42, %v6330_v56 }
 0x225   : > { %4197 = vmatpush.bf16.msrb.mxu2 %v6301_v52  ;;  %v6194_v52 = vld [vmem:[%s7173_s27 + $0xe88] sm:$0xf0] }
 0x226   : > { %4210 = vmatpush.bf16.msrb.mxu3 %v6365_v43  ;;  %v6881_v43 = vld [vmem:[%s7173_s27 + $0xf84] sm:$0xf]  ;;  %v6197_v61 = vor.u32 %v6849_v51, %v6194_v52 }
 0x227   : > { %4172 = vmatpush.bf16.msrb.mxu0 %v6165_v63  ;;  %v3946_v55 = vpop.f32.mrf.mxu2  ;;  %v6325_v58 = vor.u32 %v6881_v43, %v6322_v57  ;;  %v6950_v63 = vld [vmem:[#allocation1 + $0x2d] sm:$0xff] }
 0x228   : > { %4185 = vmatpush.bf16.msrb.mxu1 %v6229_v7  ;;  %v3959_v25 = vpop.f32.mrf.mxu3  ;;  %v6952_v7 = vld [vmem:[#allocation1 + $0x3f] sm:$0xff] }
 0x229   : > { %4198 = vmatpush.bf16.msrb.mxu2 %v6293_v14 }
 0x22a   : > { %4211 = vmatpush.bf16.msrb.mxu3 %v6357_v8 }
 0x22b   : > { %4173 = vmatpush.bf16.msrb.mxu0 %v6157_v20 }
 0x22c   : > { %4186 = vmatpush.bf16.msrb.mxu1 %v6221_v46 }
 0x22d   : > { %4199 = vmatpush.bf16.msrb.mxu2 %v6285_v9 }
 0x22e   : > { %4212 = vmatpush.bf16.msrb.mxu3 %v6349_v13 }
 0x22f   : > { %4174 = vmatpush.bf16.msrb.mxu0 %v6149_v26 }
 0x230   : > { %4187 = vmatpush.bf16.msrb.mxu1 %v6213_v33 }
 0x231   : > { %4200 = vmatpush.bf16.msrb.mxu2 %v6277_v40 }
 0x232   : > { %4213 = vmatpush.bf16.msrb.mxu3 %v6341_v39 }
 0x233   : > { %4175 = vmatpush.bf16.msrb.mxu0 %v6141_v28 }
 0x234   : > { %4188 = vmatpush.bf16.msrb.mxu1 %v6205_v29 }
 0x235   : > { %4201 = vmatpush.bf16.msrb.mxu2 %v6269_v44 }
 0x236   : > { %4214 = vmatpush.bf16.msrb.mxu3 %v6333_v34 }
 0x237   : > { %4176 = vmatpush.bf16.msrb.mxu0 %v6133_v60  ;;  %v3970_v14 = vpop.f32.mrf.mxu0 }
 0x238   : > { %4189 = vmatpush.bf16.msrb.mxu1 %v6197_v61  ;;  %v3971_v1 = vadd.f32 %v3970_v14, %v3958_v6  ;;  %v3983_v2 = vpop.f32.mrf.mxu1 }
 0x239   : > { %4202 = vmatpush.bf16.msrb.mxu2 %v6261_v62 }
 0x23a   : > { %4215 = vmatpush.bf16.msrb.mxu3 %v6325_v58  ;;  %4177 = vmatmul.bf16.vlgmr.msrb.gmra.mxu0 %v6949_v0  ;;  %v3984_v16 = vadd.f32 %v3983_v2, %v3971_v1  ;;  %v4221_v0 = vmax.f32 %v8120_v32, 0.0 }
 0x23b   : > { %4190 = vmatmul.bf16.vlgmr.msrb.gmra.mxu1 %v6950_v63 }
 0x23c   : > { %4203 = vmatmul.bf16.vlgmr.msrb.gmra.mxu2 %v6951_v4 }
 0x23d   : > { %4216 = vmatmul.bf16.vlgmr.msrb.gmra.mxu3 %v6952_v7 }
 0x23f   : > { %v3996_v8 = vpop.f32.mrf.mxu2  ;;  %v3972_v3 = vpop.f32.mrf.mxu0 }
 0x240   : > { %v3997_v38 = vadd.f32 %v3996_v8, %v3984_v16  ;;  %v4009_v5 = vpop.f32.mrf.mxu3  ;;  %v3985_v31 = vpop.f32.mrf.mxu1 }
 0x242   : > { %v4010_v17 = vadd.f32 %v4009_v5, %v3997_v38 }
 0x247   : > { %v3998_v19 = vpop.f32.mrf.mxu2 }
 0x248   : > { %v4011_v20 = vpop.f32.mrf.mxu3 }
 0x257   : > { %v4022_v46 = vpop.f32.mrf.mxu0 }
 0x258   : > { %v4023_v9 = vadd.f32 %v4022_v46, %v4010_v17  ;;  %v4035_v11 = vpop.f32.mrf.mxu1 }
 0x25a   : > { %v4036_v10 = vadd.f32 %v4035_v11, %v4023_v9 }
 0x25f   : > { %v4048_v12 = vpop.f32.mrf.mxu2  ;;  %v4024_v22 = vpop.f32.mrf.mxu0 }
 0x260   : > { %v4049_v13 = vadd.f32 %v4048_v12, %v4036_v10  ;;  %v4061_v21 = vpop.f32.mrf.mxu3  ;;  %v4037_v47 = vpop.f32.mrf.mxu1 }
 0x262   : > { %v4062_v48 = vadd.f32 %v4061_v21, %v4049_v13 }
 0x267   : > { %v4050_v23 = vpop.f32.mrf.mxu2 }
 0x268   : > { %v4063_v15 = vpop.f32.mrf.mxu3 }
 0x277   : > { %v4074_v24 = vpop.f32.mrf.mxu0 }
 0x278   : > { %v4087_v49 = vpop.f32.mrf.mxu1  ;;  %v4075_v37 = vadd.f32 %v4074_v24, %v4062_v48 }
 0x27a   : > { %v4088_v42 = vadd.f32 %v4087_v49, %v4075_v37 }
 0x27f   : > { %v4100_v59 = vpop.f32.mrf.mxu2  ;;  %v4076_v30 = vpop.f32.mrf.mxu0 }
 0x280   : > { %v4113_v26 = vpop.f32.mrf.mxu3  ;;  %v4089_v6 = vpop.f32.mrf.mxu1  ;;  %v4101_v56 = vadd.f32 %v4100_v59, %v4088_v42 }
 0x282   : > { %v4114_v44 = vadd.f32 %v4113_v26, %v4101_v56 }
 0x287   : > { %v4102_v33 = vpop.f32.mrf.mxu2 }
 0x288   : > { %v4115_v40 = vpop.f32.mrf.mxu3 }
 0x297   : > { %v4126_v35 = vpop.f32.mrf.mxu0 }
 0x298   : > { %v4139_v36 = vpop.f32.mrf.mxu1  ;;  %v4127_v45 = vadd.f32 %v4126_v35, %v4114_v44 }
 0x29a   : > { %v4140_v50 = vadd.f32 %v4139_v36, %v4127_v45 }
 0x29f   : > { %v4152_v39 = vpop.f32.mrf.mxu2  ;;  %v4128_v18 = vpop.f32.mrf.mxu0 }
 0x2a0   : > { %v4165_v27 = vpop.f32.mrf.mxu3  ;;  %v4141_v41 = vpop.f32.mrf.mxu1  ;;  %v4153_v51 = vadd.f32 %v4152_v39, %v4140_v50 }
 0x2a2   : > { %v4166_v34 = vadd.f32 %v4165_v27, %v4153_v51 }
 0x2a7   : > { %v4154_v28 = vpop.f32.mrf.mxu2 }
 0x2a8   : > { %v4167_v29 = vpop.f32.mrf.mxu3 }
 0x2b7   : > { %v4178_v52 = vpop.f32.mrf.mxu0 }
 0x2b8   : > { %v4191_v53 = vpop.f32.mrf.mxu1  ;;  %v4179_v54 = vadd.f32 %v4178_v52, %v4166_v34 }
 0x2ba   : > { %v4192_v55 = vadd.f32 %v4191_v53, %v4179_v54 }
 0x2bf   : > { %v4204_v43 = vpop.f32.mrf.mxu2  ;;  %v4180_v60 = vpop.f32.mrf.mxu0 }
 0x2c0   : > { %v4205_v57 = vadd.f32 %v4204_v43, %v4192_v55  ;;  %v4217_v25 = vpop.f32.mrf.mxu3  ;;  %v4193_v61 = vpop.f32.mrf.mxu1 }
 0x2c2   : > { %v4218_v62 = vadd.f32 %v4217_v25, %v4205_v57 }
 0x2c4   : > { %v4222_v58 = vmax.f32 %v4218_v62, 0.0 }
 0x2c6   : > { %v4225_v63 = vrot.slane %v4222_v58, 6 }
 0x2c7   : > { %v4206_v4 = vpop.f32.mrf.mxu2 }
 0x2c8   : > { %v4227_v7 = vsel %vm4226_vm0, %v4221_v0, %v4225_v63  ;;  %v4219_v14 = vpop.f32.mrf.mxu3 }
 0x2c9   : > { %4229 = vst [vmem:[%s233_s15] sm:$0xf] %v4227_v7 }
 0x2ca PF: > { %p16_p8 = scmp.ge.s32.totalorder %s7096_s17, 6   ;;  %s8372_s12 = smov %s7043_s13 }
 0x2cb   : > { %s8373_s13 = smov %s7047_s14  ;;  %s8374_s14 = smov %s7106_s20 }
 0x2cc   : > { %s8375_s15 = smov %s7096_s17  ;;  %18 = sbr.rel (!%p16_p8) target bundleno = 5 (0x5), region = 85 }
 0x2d1   :  { %4252 = vsyncpa [#allocation3], 1 }
 0x2d2   :  { %4254 = vsyncpa [#allocation3 + $0x1], 1 }
 0x2d3   :  { %4255 = vsyncpa [#allocation5], 1 }
 0x2d4   :  { %4257 = vsyncpa [#allocation5 + $0x1], 1 }

</bundles_post_ra>
